<compile_context>
chip_gen: v7x
topology: tpu7x:2x2x1
jax: 0.10.0
libtpu: 0.0.40
codegen_flags: <defaults>
</compile_context>

<pallas_src>
import functools

import jax
import jax.numpy as jnp
import numpy as np
from jax import lax
from jax.experimental import pallas as pl
from jax.experimental.pallas import tpu as pltpu


# ----------------------------------------------------------------------------- kernel body
def _resblock_body(x_ref, w1_ref, w2_ref, wsc_ref, b1_ref, b2_ref, bsc_ref,
                   o_ref, xpad, ypad, *, KH, KW, pad_h, pad_w,
                   use_im2col_1, use_im2col_2, has_projection):
    # x_ref  : (NB, H, W, Cin)        bf16 activation block (NB images per grid step)
    # w1_ref : (KH*KW*Cin,  Cout)     conv1 weights, BN1 scale pre-folded (bf16)
    # w2_ref : (KH*KW*Cout, Cout)     conv2 weights, BN2 scale pre-folded (bf16)
    # wsc_ref: (Cin, Cout) or None    1x1 projection-shortcut weights, BN folded
    # b*_ref : (1, Cout)              folded BN biases (f32); bsc_ref None for identity
    # o_ref  : (NB, H, W, Cout)       bf16 output block
    # xpad   : (H+KH-1, W+KW-1, Cin)  VMEM scratch with zero halo
    # ypad   : (H+KH-1, W+KW-1, Cout) VMEM scratch with zero halo
    NB, H, W, Cin = x_ref.shape
    Cout = o_ref.shape[-1]
    P = H * W
    cd = xpad.dtype

    def zero_halo(buf):
        # Zero only the thin halo strips (not the whole buffer).
        Hp, Wp, C = buf.shape
        if pad_h > 0:
            buf[0:pad_h, :, :] = jnp.zeros((pad_h, Wp, C), cd)
            buf[Hp - pad_h:Hp, :, :] = jnp.zeros((pad_h, Wp, C), cd)
        if pad_w > 0:
            buf[:, 0:pad_w, :] = jnp.zeros((Hp, pad_w, C), cd)
            buf[:, Wp - pad_w:Wp, :] = jnp.zeros((Hp, pad_w, C), cd)

    def conv_same(buf, w_ref, C, use_im2col):
        """KxK SAME conv of padded scratch `buf` against flat (KH*KW*C, Cout) weights."""
        if use_im2col:
            # C % 128 == 0: every tap lands lane-aligned -> fuse all taps into ONE MXU dot.
            taps = [buf[i:i + H, j:j + W, :] for i in range(KH) for j in range(KW)]
            patches = jnp.concatenate(taps, axis=-1).reshape(P, KH * KW * C)
            return jnp.dot(patches, w_ref[...], preferred_element_type=jnp.float32)
        # sub-128-channel layers: KH*KW accumulating dots into the f32 accumulator
        # (avoids the lane-misaligned concat copies / XLU relayouts of im2col).
        acc = None
        for t in range(KH * KW):
            i, j = divmod(t, KW)
            tap = buf[i:i + H, j:j + W, :].reshape(P, C)
            part = jnp.dot(tap, w_ref[t * C:(t + 1) * C, :],
                           preferred_element_type=jnp.float32)
            acc = part if acc is None else acc + part
        return acc

    # Halo strips stay zero across images (only the interior is rewritten), so zero them once
    # per grid step. Done every step (not program_id==0-gated) because scratch persists across
    # the megacore-sharded grid and each core starts at a different program_id.
    zero_halo(xpad)
    zero_halo(ypad)

    for nb in range(NB):                                  # static per-step image loop
        # ---- conv1 (KxK SAME, BN1 scale folded into w1) + bias + ReLU, f32 accumulation
        xpad[pad_h:pad_h + H, pad_w:pad_w + W, :] = x_ref[nb]
        out1 = jnp.maximum(conv_same(xpad, w1_ref, Cin, use_im2col_1) + b1_ref[...], 0.0)

        # ---- stage the ReLU output directly into conv2's padded scratch interior
        ypad[pad_h:pad_h + H, pad_w:pad_w + W, :] = out1.reshape(H, W, Cout).astype(cd)

        # ---- conv2 (KxK SAME, BN2 scale folded into w2) + bias
        acc2 = conv_same(ypad, w2_ref, Cout, use_im2col_2) + b2_ref[...]

        # ---- shortcut
        if has_projection:                                # 1x1 conv + BN (folded)
            sc = jnp.dot(x_ref[nb].reshape(P, Cin), wsc_ref[...],
                         preferred_element_type=jnp.float32) + bsc_ref[...]
        else:                                             # true identity: no MXU pass at all
            sc = x_ref[nb].reshape(P, Cout).astype(jnp.float32)

        # ---- residual add + final ReLU; cast to activation dtype only at the store
        o_ref[nb] = jnp.maximum(acc2 + sc, 0.0).reshape(H, W, Cout).astype(o_ref.dtype)


# ----------------------------------------------------------------------------- wrapper
def _fold_bn(gamma, beta, mean, var, eps=1e-5):
    scale = (gamma.astype(jnp.float32) / jnp.sqrt(var.astype(jnp.float32) + eps))   # (C,)
    bias = beta.astype(jnp.float32) - mean.astype(jnp.float32) * scale              # (C,)
    return scale, bias.reshape(1, -1)


def _images_per_step(N, H, W):
    # Pack several images per grid step when the spatial stage is small (7x7, 14x14) so the
    # matmul M dim (NB*H*W rows) is >= ~256 and per-step overhead (~0.35us) is amortized.
    target = max(1, -(-256 // (H * W)))                   # ceil(256 / (H*W))
    nb = 1
    for d in range(1, min(N, target) + 1):
        if N % d == 0:
            nb = d
    return nb


def res_basic_block(x_nhwc, params, *, eps=1e-5, compute_dtype=jnp.bfloat16,
                    images_per_step=None):
    """Fused ResBasicBlock forward (inference-mode BN). NHWC in / NHWC (bf16) out.

    Keep activations NHWC end-to-end across the network so no per-block layout transposes are
    paid; use `res_basic_block_nchw` only at a PyTorch-layout boundary.
    """
    # TODO(synk): only stride=1, groups=1 and odd kernel_size supported; training-mode BN
    #             (batch statistics) and H-tiled grids with halo exchange for ResNet-scale
    #             spatial dims are not implemented.
    N, H, W, Cin = x_nhwc.shape
    KH, KW, _, Cout = params["w1"].shape
    assert KH % 2 == 1 and KW % 2 == 1, "only odd kernel sizes (SAME, stride=1) supported"
    pad_h, pad_w = (KH - 1) // 2, (KW - 1) // 2
    has_projection = "wsc" in params
    if not has_projection:
        assert Cin == Cout, "identity shortcut requires in_channels == out_channels"

    # Fold BN into per-output-channel (scale, bias); fold the scale into the conv weights so
    # the kernel only does bias-add + ReLU on the f32 accumulator.
    s1, b1 = _fold_bn(params["g1"], params["be1"], params["m1"], params["v1"], eps)
    s2, b2 = _fold_bn(params["g2"], params["be2"], params["m2"], params["v2"], eps)
    w1 = (params["w1"].astype(jnp.float32) * s1).reshape(KH * KW * Cin, Cout).astype(compute_dtype)
    w2 = (params["w2"].astype(jnp.float32) * s2).reshape(KH * KW * Cout, Cout).astype(compute_dtype)

    NB = _images_per_step(N, H, W) if images_per_step is None else images_per_step
    assert N % NB == 0, "images_per_step must divide the batch"

    xk = x_nhwc.astype(compute_dtype)                     # bf16 MXU operands

    body = functools.partial(
        _resblock_body, KH=KH, KW=KW, pad_h=pad_h, pad_w=pad_w,
        use_im2col_1=(Cin % 128 == 0), use_im2col_2=(Cout % 128 == 0),
        has_projection=has_projection)

    # TODO(synk): add pipeline_mode=pl.Buffered(1) to the resident weight/bias specs once
    #             single-buffering constant-index blocks is supported in this JAX version
    #             (saves a duplicate weight copy out of v7x's 64 MiB VMEM).
    if has_projection:
        ssc, bsc = _fold_bn(params["gsc"], params["besc"], params["msc"], params["vsc"], eps)
        wsc = (params["wsc"].astype(jnp.float32) * ssc).astype(compute_dtype)
        inputs = (xk, w1, w2, wsc, b1, b2, bsc)
        const_specs = [
            pl.BlockSpec(w1.shape, lambda n: (0, 0)),     # resident across the grid
            pl.BlockSpec(w2.shape, lambda n: (0, 0)),
            pl.BlockSpec(wsc.shape, lambda n: (0, 0)),
            pl.BlockSpec((1, Cout), lambda n: (0, 0)),
            pl.BlockSpec((1, Cout), lambda n: (0, 0)),
            pl.BlockSpec((1, Cout), lambda n: (0, 0)),
        ]

        def kernel(x_ref, w1_ref, w2_ref, wsc_ref, b1_ref, b2_ref, bsc_ref, o_ref, xpad, ypad):
            body(x_ref, w1_ref, w2_ref, wsc_ref, b1_ref, b2_ref, bsc_ref, o_ref, xpad, ypad)
    else:
        inputs = (xk, w1, w2, b1, b2)
        const_specs = [
            pl.BlockSpec(w1.shape, lambda n: (0, 0)),
            pl.BlockSpec(w2.shape, lambda n: (0, 0)),
            pl.BlockSpec((1, Cout), lambda n: (0, 0)),
            pl.BlockSpec((1, Cout), lambda n: (0, 0)),
        ]

        def kernel(x_ref, w1_ref, w2_ref, b1_ref, b2_ref, o_ref, xpad, ypad):
            body(x_ref, w1_ref, w2_ref, None, b1_ref, b2_ref, None, o_ref, xpad, ypad)

    grid_spec = pltpu.PrefetchScalarGridSpec(
        num_scalar_prefetch=0,
        grid=(N // NB,),                                  # NB images per grid step, pipelined
        in_specs=[pl.BlockSpec((NB, H, W, Cin), lambda n: (n, 0, 0, 0))] + const_specs,
        out_specs=pl.BlockSpec((NB, H, W, Cout), lambda n: (n, 0, 0, 0)),
        scratch_shapes=[
            pltpu.VMEM((H + KH - 1, W + KW - 1, Cin), compute_dtype),
            pltpu.VMEM((H + KH - 1, W + KW - 1, Cout), compute_dtype),
        ],
    )

    return pl.pallas_call(
        kernel,
        out_shape=jax.ShapeDtypeStruct((N, H, W, Cout), compute_dtype),   # bf16 writeback
        grid_spec=grid_spec,
        compiler_params=pltpu.CompilerParams(
            dimension_semantics=("parallel",),            # batch axis shards over v7x's 2 TCs
            # x/out double-buffers + resident weights + xpad/ypad + f32 accumulators stay well
            # under this for stage-1/2 ResNet shapes; raise toward ~100 MiB on v5e/v6e for
            # bigger multi-image/spatial tiles, keep <= ~48 MiB on v7x (64 MiB physical).
            vmem_limit_bytes=32 * 1024 * 1024,
        ),
    )(*inputs)


def res_basic_block_nchw(x_nchw, params, **kwargs):
    """PyTorch-layout convenience wrapper (pays two transposes; avoid inside a network)."""
    out = res_basic_block(jnp.transpose(x_nchw, (0, 2, 3, 1)), params, **kwargs)
    return jnp.transpose(out, (0, 3, 1, 2))


# ----------------------------------------------------------------------------- reference (pure JAX, f32)
def _ref_forward_nhwc(x, params, eps=1e-5):
    x = x.astype(jnp.float32)
    dn = ("NHWC", "HWIO", "NHWC")

    def bn(y, g, be, m, v):
        return (y - m) / jnp.sqrt(v + eps) * g + be

    o = lax.conv_general_dilated(x, params["w1"], (1, 1), "SAME", dimension_numbers=dn)
    o = jnp.maximum(bn(o, params["g1"], params["be1"], params["m1"], params["v1"]), 0.0)
    o = lax.conv_general_dilated(o, params["w2"], (1, 1), "SAME", dimension_numbers=dn)
    o = bn(o, params["g2"], params["be2"], params["m2"], params["v2"])
    if "wsc" in params:
        sc = lax.conv_general_dilated(x, params["wsc"][None, None], (1, 1), "SAME",
                                      dimension_numbers=dn)
        sc = bn(sc, params["gsc"], params["besc"], params["msc"], params["vsc"])
    else:
        sc = x
    return jnp.maximum(o + sc, 0.0)


# ----------------------------------------------------------------------------- main
if __name__ == "__main__":
    key = jax.random.PRNGKey(0)
    ks = jax.random.split(key, 16)

    N, Cin, Cout, H, W, K = 2, 4, 8, 16, 16, 3

    def bn_params(k, C):
        k1, k2, k3, k4 = jax.random.split(k, 4)
        return (1.0 + 0.1 * jax.random.normal(k1, (C,)),          # gamma
                0.1 * jax.random.normal(k2, (C,)),                 # beta
                0.1 * jax.random.normal(k3, (C,)),                 # running mean
                0.5 + jax.random.uniform(k4, (C,)))                # running var

    g1, be1, m1, v1 = bn_params(ks[0], Cout)
    g2, be2, m2, v2 = bn_params(ks[1], Cout)
    gsc, besc, msc, vsc = bn_params(ks[2], Cout)

    # ---------- test 1: projection shortcut (Cin != Cout) ----------
    params_proj = dict(
        w1=0.2 * jax.random.normal(ks[3], (K, K, Cin, Cout), jnp.float32),
        w2=0.2 * jax.random.normal(ks[4], (K, K, Cout, Cout), jnp.float32),
        wsc=0.2 * jax.random.normal(ks[5], (Cin, Cout), jnp.float32),
        g1=g1, be1=be1, m1=m1, v1=v1,
        g2=g2, be2=be2, m2=m2, v2=v2,
        gsc=gsc, besc=besc, msc=msc, vsc=vsc,
    )
    x_nchw = jax.random.normal(ks[6], (N, Cin, H, W), jnp.float32)   # PyTorch-style NCHW input

    out = jax.block_until_ready(res_basic_block_nchw(x_nchw, params_proj))
    ref = jnp.transpose(_ref_forward_nhwc(jnp.transpose(x_nchw, (0, 2, 3, 1)), params_proj),
                        (0, 3, 1, 2))
    ref = jax.block_until_ready(ref)
    assert out.shape == (N, Cout, H, W), out.shape
    # Kernel uses bf16 MXU operands / bf16 output (f32 accumulation) -> loose comparison.
    np.testing.assert_allclose(np.asarray(out.astype(jnp.float32)), np.asarray(ref),
                               rtol=5e-2, atol=5e-2)

    # ---------- test 2: identity shortcut (Cin == Cout), exercises the no-projection path ----
    params_id = dict(
        w1=0.2 * jax.random.normal(ks[7], (K, K, Cout, Cout), jnp.float32),
        w2=0.2 * jax.random.normal(ks[8], (K, K, Cout, Cout), jnp.float32),
        g1=g1, be1=be1, m1=m1, v1=v1,
        g2=g2, be2=be2, m2=m2, v2=v2,
    )
    x2_nhwc = jax.random.normal(ks[9], (N, H, W, Cout), jnp.float32)  # NHWC end-to-end path

    out2 = jax.block_until_ready(res_basic_block(x2_nhwc, params_id))
    ref2 = jax.block_until_ready(_ref_forward_nhwc(x2_nhwc, params_id))
    assert out2.shape == (N, H, W, Cout), out2.shape
    np.testing.assert_allclose(np.asarray(out2.astype(jnp.float32)), np.asarray(ref2),
                               rtol=5e-2, atol=5e-2)

    print("KERNEL_OK")
</pallas_src>

<mosaic_0001>
module attributes {stable_mosaic.version = 11 : i64} {
  func.func @kernel(%arg0: i32, %arg1: memref<1x16x16x4xbf16, #tpu.memory_space<vmem>>, %arg2: memref<36x8xbf16, #tpu.memory_space<vmem>>, %arg3: memref<72x8xbf16, #tpu.memory_space<vmem>>, %arg4: memref<4x8xbf16, #tpu.memory_space<vmem>>, %arg5: memref<1x8xf32, #tpu.memory_space<vmem>>, %arg6: memref<1x8xf32, #tpu.memory_space<vmem>>, %arg7: memref<1x8xf32, #tpu.memory_space<vmem>>, %arg8: memref<1x16x16x8xbf16, #tpu.memory_space<vmem>>, %arg9: memref<18x18x4xbf16, #tpu.memory_space<vmem>>, %arg10: memref<18x18x8xbf16, #tpu.memory_space<vmem>>) attributes {dimension_semantics = [#tpu.dimension_semantics<parallel>], iteration_bounds = array<i64: 2>, scalar_prefetch = 0 : i64, scratch_operands = 2 : i64, tpu.core_type = #tpu.core_type<tc>, window_params = [{transform_indices = @transform_0, window_bounds = array<i64: 1, 16, 16, 4>}, {pipeline_mode = #tpu.pipeline_mode<synchronous>, transform_indices = @transform_1, window_bounds = array<i64: 36, 8>}, {pipeline_mode = #tpu.pipeline_mode<synchronous>, transform_indices = @transform_2, window_bounds = array<i64: 72, 8>}, {pipeline_mode = #tpu.pipeline_mode<synchronous>, transform_indices = @transform_3, window_bounds = array<i64: 4, 8>}, {pipeline_mode = #tpu.pipeline_mode<synchronous>, transform_indices = @transform_4, window_bounds = array<i64: 1, 8>}, {pipeline_mode = #tpu.pipeline_mode<synchronous>, transform_indices = @transform_5, window_bounds = array<i64: 1, 8>}, {pipeline_mode = #tpu.pipeline_mode<synchronous>, transform_indices = @transform_6, window_bounds = array<i64: 1, 8>}, {transform_indices = @transform_7, window_bounds = array<i64: 1, 16, 16, 8>}]} {
    %cst = arith.constant 0.000000e+00 : bf16
    %0 = vector.broadcast %cst : bf16 to vector<1x18x4xbf16>
    %c0 = arith.constant 0 : index
    %c0_0 = arith.constant 0 : index
    %c0_1 = arith.constant 0 : index
    %1 = vector.load %arg9[%c0, %c0_0, %c0_1] : memref<18x18x4xbf16, #tpu.memory_space<vmem>>, vector<1x18x4xbf16>
    tpu.vector_store %arg9[%c0, %c0_0, %c0_1], %0 {strides = array<i32>} : memref<18x18x4xbf16, #tpu.memory_space<vmem>>, vector<1x18x4xbf16>,
    %cst_2 = arith.constant 0.000000e+00 : bf16
    %2 = vector.broadcast %cst_2 : bf16 to vector<1x18x4xbf16>
    %c17 = arith.constant 17 : index
    %c0_3 = arith.constant 0 : index
    %c0_4 = arith.constant 0 : index
    %3 = vector.load %arg9[%c17, %c0_3, %c0_4] : memref<18x18x4xbf16, #tpu.memory_space<vmem>>, vector<1x18x4xbf16>
    tpu.vector_store %arg9[%c17, %c0_3, %c0_4], %2 {strides = array<i32>} : memref<18x18x4xbf16, #tpu.memory_space<vmem>>, vector<1x18x4xbf16>,
    %cst_5 = arith.constant 0.000000e+00 : bf16
    %4 = vector.broadcast %cst_5 : bf16 to vector<18x1x4xbf16>
    %c0_6 = arith.constant 0 : index
    %c0_7 = arith.constant 0 : index
    %c0_8 = arith.constant 0 : index
    %5 = vector.load %arg9[%c0_6, %c0_7, %c0_8] : memref<18x18x4xbf16, #tpu.memory_space<vmem>>, vector<18x1x4xbf16>
    tpu.vector_store %arg9[%c0_6, %c0_7, %c0_8], %4 {strides = array<i32>} : memref<18x18x4xbf16, #tpu.memory_space<vmem>>, vector<18x1x4xbf16>,
    %cst_9 = arith.constant 0.000000e+00 : bf16
    %6 = vector.broadcast %cst_9 : bf16 to vector<18x1x4xbf16>
    %c0_10 = arith.constant 0 : index
    %c17_11 = arith.constant 17 : index
    %c0_12 = arith.constant 0 : index
    %7 = vector.load %arg9[%c0_10, %c17_11, %c0_12] : memref<18x18x4xbf16, #tpu.memory_space<vmem>>, vector<18x1x4xbf16>
    tpu.vector_store %arg9[%c0_10, %c17_11, %c0_12], %6 {strides = array<i32>} : memref<18x18x4xbf16, #tpu.memory_space<vmem>>, vector<18x1x4xbf16>,
    %cst_13 = arith.constant 0.000000e+00 : bf16
    %8 = vector.broadcast %cst_13 : bf16 to vector<1x18x8xbf16>
    %c0_14 = arith.constant 0 : index
    %c0_15 = arith.constant 0 : index
    %c0_16 = arith.constant 0 : index
    %9 = vector.load %arg10[%c0_14, %c0_15, %c0_16] : memref<18x18x8xbf16, #tpu.memory_space<vmem>>, vector<1x18x8xbf16>
    tpu.vector_store %arg10[%c0_14, %c0_15, %c0_16], %8 {strides = array<i32>} : memref<18x18x8xbf16, #tpu.memory_space<vmem>>, vector<1x18x8xbf16>,
    %cst_17 = arith.constant 0.000000e+00 : bf16
    %10 = vector.broadcast %cst_17 : bf16 to vector<1x18x8xbf16>
    %c17_18 = arith.constant 17 : index
    %c0_19 = arith.constant 0 : index
    %c0_20 = arith.constant 0 : index
    %11 = vector.load %arg10[%c17_18, %c0_19, %c0_20] : memref<18x18x8xbf16, #tpu.memory_space<vmem>>, vector<1x18x8xbf16>
    tpu.vector_store %arg10[%c17_18, %c0_19, %c0_20], %10 {strides = array<i32>} : memref<18x18x8xbf16, #tpu.memory_space<vmem>>, vector<1x18x8xbf16>,
    %cst_21 = arith.constant 0.000000e+00 : bf16
    %12 = vector.broadcast %cst_21 : bf16 to vector<18x1x8xbf16>
    %c0_22 = arith.constant 0 : index
    %c0_23 = arith.constant 0 : index
    %c0_24 = arith.constant 0 : index
    %13 = vector.load %arg10[%c0_22, %c0_23, %c0_24] : memref<18x18x8xbf16, #tpu.memory_space<vmem>>, vector<18x1x8xbf16>
    tpu.vector_store %arg10[%c0_22, %c0_23, %c0_24], %12 {strides = array<i32>} : memref<18x18x8xbf16, #tpu.memory_space<vmem>>, vector<18x1x8xbf16>,
    %cst_25 = arith.constant 0.000000e+00 : bf16
    %14 = vector.broadcast %cst_25 : bf16 to vector<18x1x8xbf16>
    %c0_26 = arith.constant 0 : index
    %c17_27 = arith.constant 17 : index
    %c0_28 = arith.constant 0 : index
    %15 = vector.load %arg10[%c0_26, %c17_27, %c0_28] : memref<18x18x8xbf16, #tpu.memory_space<vmem>>, vector<18x1x8xbf16>
    tpu.vector_store %arg10[%c0_26, %c17_27, %c0_28], %14 {strides = array<i32>} : memref<18x18x8xbf16, #tpu.memory_space<vmem>>, vector<18x1x8xbf16>,
    %c0_29 = arith.constant 0 : index
    %c0_30 = arith.constant 0 : index
    %c0_31 = arith.constant 0 : index
    %c0_32 = arith.constant 0 : index
    %16 = vector.load %arg1[%c0_29, %c0_30, %c0_31, %c0_32] : memref<1x16x16x4xbf16, #tpu.memory_space<vmem>>, vector<1x16x16x4xbf16>
    %17 = vector.shape_cast %16 : vector<1x16x16x4xbf16> to vector<16x16x4xbf16>
    %c1 = arith.constant 1 : index
    %c1_33 = arith.constant 1 : index
    %c0_34 = arith.constant 0 : index
    %18 = vector.load %arg9[%c1, %c1_33, %c0_34] : memref<18x18x4xbf16, #tpu.memory_space<vmem>>, vector<16x16x4xbf16>
    tpu.vector_store %arg9[%c1, %c1_33, %c0_34], %17 {strides = array<i32>} : memref<18x18x4xbf16, #tpu.memory_space<vmem>>, vector<16x16x4xbf16>,
    %c0_35 = arith.constant 0 : index
    %c0_36 = arith.constant 0 : index
    %c0_37 = arith.constant 0 : index
    %19 = vector.load %arg9[%c0_35, %c0_36, %c0_37] : memref<18x18x4xbf16, #tpu.memory_space<vmem>>, vector<16x16x4xbf16>
    %20 = vector.shape_cast %19 : vector<16x16x4xbf16> to vector<256x4xbf16>
    %c0_38 = arith.constant 0 : index
    %c0_39 = arith.constant 0 : index
    %21 = vector.load %arg2[%c0_38, %c0_39] : memref<36x8xbf16, #tpu.memory_space<vmem>>, vector<4x8xbf16>
    %cst_40 = arith.constant dense<0.000000e+00> : vector<256x8xf32>
    %22 = tpu.matmul %20, %21, %cst_40 {dimension_numbers = #tpu.dot_dimension_numbers<[1], [0], [0], [1], [0, 0, 1, 1], [], []>} : vector<256x4xbf16>, vector<4x8xbf16>, vector<256x8xf32> -> vector<256x8xf32>
    %c0_41 = arith.constant 0 : index
    %c1_42 = arith.constant 1 : index
    %c0_43 = arith.constant 0 : index
    %23 = vector.load %arg9[%c0_41, %c1_42, %c0_43] : memref<18x18x4xbf16, #tpu.memory_space<vmem>>, vector<16x16x4xbf16>
    %24 = vector.shape_cast %23 : vector<16x16x4xbf16> to vector<256x4xbf16>
    %c4 = arith.constant 4 : index
    %c0_44 = arith.constant 0 : index
    %25 = vector.load %arg2[%c4, %c0_44] : memref<36x8xbf16, #tpu.memory_space<vmem>>, vector<4x8xbf16>
    %cst_45 = arith.constant dense<0.000000e+00> : vector<256x8xf32>
    %26 = tpu.matmul %24, %25, %cst_45 {dimension_numbers = #tpu.dot_dimension_numbers<[1], [0], [0], [1], [0, 0, 1, 1], [], []>} : vector<256x4xbf16>, vector<4x8xbf16>, vector<256x8xf32> -> vector<256x8xf32>
    %27 = arith.addf %22, %26 : vector<256x8xf32>
    %c0_46 = arith.constant 0 : index
    %c2 = arith.constant 2 : index
    %c0_47 = arith.constant 0 : index
    %28 = vector.load %arg9[%c0_46, %c2, %c0_47] : memref<18x18x4xbf16, #tpu.memory_space<vmem>>, vector<16x16x4xbf16>
    %29 = vector.shape_cast %28 : vector<16x16x4xbf16> to vector<256x4xbf16>
    %c8 = arith.constant 8 : index
    %c0_48 = arith.constant 0 : index
    %30 = vector.load %arg2[%c8, %c0_48] : memref<36x8xbf16, #tpu.memory_space<vmem>>, vector<4x8xbf16>
    %cst_49 = arith.constant dense<0.000000e+00> : vector<256x8xf32>
    %31 = tpu.matmul %29, %30, %cst_49 {dimension_numbers = #tpu.dot_dimension_numbers<[1], [0], [0], [1], [0, 0, 1, 1], [], []>} : vector<256x4xbf16>, vector<4x8xbf16>, vector<256x8xf32> -> vector<256x8xf32>
    %32 = arith.addf %27, %31 : vector<256x8xf32>
    %c1_50 = arith.constant 1 : index
    %c0_51 = arith.constant 0 : index
    %c0_52 = arith.constant 0 : index
    %33 = vector.load %arg9[%c1_50, %c0_51, %c0_52] : memref<18x18x4xbf16, #tpu.memory_space<vmem>>, vector<16x16x4xbf16>
    %34 = vector.shape_cast %33 : vector<16x16x4xbf16> to vector<256x4xbf16>
    %c12 = arith.constant 12 : index
    %c0_53 = arith.constant 0 : index
    %35 = vector.load %arg2[%c12, %c0_53] : memref<36x8xbf16, #tpu.memory_space<vmem>>, vector<4x8xbf16>
    %cst_54 = arith.constant dense<0.000000e+00> : vector<256x8xf32>
    %36 = tpu.matmul %34, %35, %cst_54 {dimension_numbers = #tpu.dot_dimension_numbers<[1], [0], [0], [1], [0, 0, 1, 1], [], []>} : vector<256x4xbf16>, vector<4x8xbf16>, vector<256x8xf32> -> vector<256x8xf32>
    %37 = arith.addf %32, %36 : vector<256x8xf32>
    %c1_55 = arith.constant 1 : index
    %c1_56 = arith.constant 1 : index
    %c0_57 = arith.constant 0 : index
    %38 = vector.load %arg9[%c1_55, %c1_56, %c0_57] : memref<18x18x4xbf16, #tpu.memory_space<vmem>>, vector<16x16x4xbf16>
    %39 = vector.shape_cast %38 : vector<16x16x4xbf16> to vector<256x4xbf16>
    %c16 = arith.constant 16 : index
    %c0_58 = arith.constant 0 : index
    %40 = vector.load %arg2[%c16, %c0_58] : memref<36x8xbf16, #tpu.memory_space<vmem>>, vector<4x8xbf16>
    %cst_59 = arith.constant dense<0.000000e+00> : vector<256x8xf32>
    %41 = tpu.matmul %39, %40, %cst_59 {dimension_numbers = #tpu.dot_dimension_numbers<[1], [0], [0], [1], [0, 0, 1, 1], [], []>} : vector<256x4xbf16>, vector<4x8xbf16>, vector<256x8xf32> -> vector<256x8xf32>
    %42 = arith.addf %37, %41 : vector<256x8xf32>
    %c1_60 = arith.constant 1 : index
    %c2_61 = arith.constant 2 : index
    %c0_62 = arith.constant 0 : index
    %43 = vector.load %arg9[%c1_60, %c2_61, %c0_62] : memref<18x18x4xbf16, #tpu.memory_space<vmem>>, vector<16x16x4xbf16>
    %44 = vector.shape_cast %43 : vector<16x16x4xbf16> to vector<256x4xbf16>
    %c20 = arith.constant 20 : index
    %c0_63 = arith.constant 0 : index
    %45 = vector.load %arg2[%c20, %c0_63] : memref<36x8xbf16, #tpu.memory_space<vmem>>, vector<4x8xbf16>
    %cst_64 = arith.constant dense<0.000000e+00> : vector<256x8xf32>
    %46 = tpu.matmul %44, %45, %cst_64 {dimension_numbers = #tpu.dot_dimension_numbers<[1], [0], [0], [1], [0, 0, 1, 1], [], []>} : vector<256x4xbf16>, vector<4x8xbf16>, vector<256x8xf32> -> vector<256x8xf32>
    %47 = arith.addf %42, %46 : vector<256x8xf32>
    %c2_65 = arith.constant 2 : index
    %c0_66 = arith.constant 0 : index
    %c0_67 = arith.constant 0 : index
    %48 = vector.load %arg9[%c2_65, %c0_66, %c0_67] : memref<18x18x4xbf16, #tpu.memory_space<vmem>>, vector<16x16x4xbf16>
    %49 = vector.shape_cast %48 : vector<16x16x4xbf16> to vector<256x4xbf16>
    %c24 = arith.constant 24 : index
    %c0_68 = arith.constant 0 : index
    %50 = vector.load %arg2[%c24, %c0_68] : memref<36x8xbf16, #tpu.memory_space<vmem>>, vector<4x8xbf16>
    %cst_69 = arith.constant dense<0.000000e+00> : vector<256x8xf32>
    %51 = tpu.matmul %49, %50, %cst_69 {dimension_numbers = #tpu.dot_dimension_numbers<[1], [0], [0], [1], [0, 0, 1, 1], [], []>} : vector<256x4xbf16>, vector<4x8xbf16>, vector<256x8xf32> -> vector<256x8xf32>
    %52 = arith.addf %47, %51 : vector<256x8xf32>
    %c2_70 = arith.constant 2 : index
    %c1_71 = arith.constant 1 : index
    %c0_72 = arith.constant 0 : index
    %53 = vector.load %arg9[%c2_70, %c1_71, %c0_72] : memref<18x18x4xbf16, #tpu.memory_space<vmem>>, vector<16x16x4xbf16>
    %54 = vector.shape_cast %53 : vector<16x16x4xbf16> to vector<256x4xbf16>
    %c28 = arith.constant 28 : index
    %c0_73 = arith.constant 0 : index
    %55 = vector.load %arg2[%c28, %c0_73] : memref<36x8xbf16, #tpu.memory_space<vmem>>, vector<4x8xbf16>
    %cst_74 = arith.constant dense<0.000000e+00> : vector<256x8xf32>
    %56 = tpu.matmul %54, %55, %cst_74 {dimension_numbers = #tpu.dot_dimension_numbers<[1], [0], [0], [1], [0, 0, 1, 1], [], []>} : vector<256x4xbf16>, vector<4x8xbf16>, vector<256x8xf32> -> vector<256x8xf32>
    %57 = arith.addf %52, %56 : vector<256x8xf32>
    %c2_75 = arith.constant 2 : index
    %c2_76 = arith.constant 2 : index
    %c0_77 = arith.constant 0 : index
    %58 = vector.load %arg9[%c2_75, %c2_76, %c0_77] : memref<18x18x4xbf16, #tpu.memory_space<vmem>>, vector<16x16x4xbf16>
    %59 = vector.shape_cast %58 : vector<16x16x4xbf16> to vector<256x4xbf16>
    %c32 = arith.constant 32 : index
    %c0_78 = arith.constant 0 : index
    %60 = vector.load %arg2[%c32, %c0_78] : memref<36x8xbf16, #tpu.memory_space<vmem>>, vector<4x8xbf16>
    %cst_79 = arith.constant dense<0.000000e+00> : vector<256x8xf32>
    %61 = tpu.matmul %59, %60, %cst_79 {dimension_numbers = #tpu.dot_dimension_numbers<[1], [0], [0], [1], [0, 0, 1, 1], [], []>} : vector<256x4xbf16>, vector<4x8xbf16>, vector<256x8xf32> -> vector<256x8xf32>
    %62 = arith.addf %57, %61 : vector<256x8xf32>
    %c0_80 = arith.constant 0 : index
    %c0_81 = arith.constant 0 : index
    %63 = vector.load %arg5[%c0_80, %c0_81] : memref<1x8xf32, #tpu.memory_space<vmem>>, vector<1x8xf32>
    %64 = vector.broadcast %63 : vector<1x8xf32> to vector<256x8xf32>
    %65 = arith.addf %62, %64 : vector<256x8xf32>
    %cst_82 = arith.constant 0.000000e+00 : f32
    %66 = vector.broadcast %cst_82 : f32 to vector<256x8xf32>
    %67 = arith.maximumf %65, %66 : vector<256x8xf32>
    %68 = vector.shape_cast %67 : vector<256x8xf32> to vector<16x16x8xf32>
    %69 = arith.truncf %68 : vector<16x16x8xf32> to vector<16x16x8xbf16>
    %c1_83 = arith.constant 1 : index
    %c1_84 = arith.constant 1 : index
    %c0_85 = arith.constant 0 : index
    %70 = vector.load %arg10[%c1_83, %c1_84, %c0_85] : memref<18x18x8xbf16, #tpu.memory_space<vmem>>, vector<16x16x8xbf16>
    tpu.vector_store %arg10[%c1_83, %c1_84, %c0_85], %69 {strides = array<i32>} : memref<18x18x8xbf16, #tpu.memory_space<vmem>>, vector<16x16x8xbf16>,
    %c0_86 = arith.constant 0 : index
    %c0_87 = arith.constant 0 : index
    %c0_88 = arith.constant 0 : index
    %71 = vector.load %arg10[%c0_86, %c0_87, %c0_88] : memref<18x18x8xbf16, #tpu.memory_space<vmem>>, vector<16x16x8xbf16>
    %72 = vector.shape_cast %71 : vector<16x16x8xbf16> to vector<256x8xbf16>
    %c0_89 = arith.constant 0 : index
    %c0_90 = arith.constant 0 : index
    %73 = vector.load %arg3[%c0_89, %c0_90] : memref<72x8xbf16, #tpu.memory_space<vmem>>, vector<8x8xbf16>
    %cst_91 = arith.constant dense<0.000000e+00> : vector<256x8xf32>
    %74 = tpu.matmul %72, %73, %cst_91 {dimension_numbers = #tpu.dot_dimension_numbers<[1], [0], [0], [1], [0, 0, 1, 1], [], []>} : vector<256x8xbf16>, vector<8x8xbf16>, vector<256x8xf32> -> vector<256x8xf32>
    %c0_92 = arith.constant 0 : index
    %c1_93 = arith.constant 1 : index
    %c0_94 = arith.constant 0 : index
    %75 = vector.load %arg10[%c0_92, %c1_93, %c0_94] : memref<18x18x8xbf16, #tpu.memory_space<vmem>>, vector<16x16x8xbf16>
    %76 = vector.shape_cast %75 : vector<16x16x8xbf16> to vector<256x8xbf16>
    %c8_95 = arith.constant 8 : index
    %c0_96 = arith.constant 0 : index
    %77 = vector.load %arg3[%c8_95, %c0_96] : memref<72x8xbf16, #tpu.memory_space<vmem>>, vector<8x8xbf16>
    %cst_97 = arith.constant dense<0.000000e+00> : vector<256x8xf32>
    %78 = tpu.matmul %76, %77, %cst_97 {dimension_numbers = #tpu.dot_dimension_numbers<[1], [0], [0], [1], [0, 0, 1, 1], [], []>} : vector<256x8xbf16>, vector<8x8xbf16>, vector<256x8xf32> -> vector<256x8xf32>
    %79 = arith.addf %74, %78 : vector<256x8xf32>
    %c0_98 = arith.constant 0 : index
    %c2_99 = arith.constant 2 : index
    %c0_100 = arith.constant 0 : index
    %80 = vector.load %arg10[%c0_98, %c2_99, %c0_100] : memref<18x18x8xbf16, #tpu.memory_space<vmem>>, vector<16x16x8xbf16>
    %81 = vector.shape_cast %80 : vector<16x16x8xbf16> to vector<256x8xbf16>
    %c16_101 = arith.constant 16 : index
    %c0_102 = arith.constant 0 : index
    %82 = vector.load %arg3[%c16_101, %c0_102] : memref<72x8xbf16, #tpu.memory_space<vmem>>, vector<8x8xbf16>
    %cst_103 = arith.constant dense<0.000000e+00> : vector<256x8xf32>
    %83 = tpu.matmul %81, %82, %cst_103 {dimension_numbers = #tpu.dot_dimension_numbers<[1], [0], [0], [1], [0, 0, 1, 1], [], []>} : vector<256x8xbf16>, vector<8x8xbf16>, vector<256x8xf32> -> vector<256x8xf32>
    %84 = arith.addf %79, %83 : vector<256x8xf32>
    %c1_104 = arith.constant 1 : index
    %c0_105 = arith.constant 0 : index
    %c0_106 = arith.constant 0 : index
    %85 = vector.load %arg10[%c1_104, %c0_105, %c0_106] : memref<18x18x8xbf16, #tpu.memory_space<vmem>>, vector<16x16x8xbf16>
    %86 = vector.shape_cast %85 : vector<16x16x8xbf16> to vector<256x8xbf16>
    %c24_107 = arith.constant 24 : index
    %c0_108 = arith.constant 0 : index
    %87 = vector.load %arg3[%c24_107, %c0_108] : memref<72x8xbf16, #tpu.memory_space<vmem>>, vector<8x8xbf16>
    %cst_109 = arith.constant dense<0.000000e+00> : vector<256x8xf32>
    %88 = tpu.matmul %86, %87, %cst_109 {dimension_numbers = #tpu.dot_dimension_numbers<[1], [0], [0], [1], [0, 0, 1, 1], [], []>} : vector<256x8xbf16>, vector<8x8xbf16>, vector<256x8xf32> -> vector<256x8xf32>
    %89 = arith.addf %84, %88 : vector<256x8xf32>
    %c1_110 = arith.constant 1 : index
    %c1_111 = arith.constant 1 : index
    %c0_112 = arith.constant 0 : index
    %90 = vector.load %arg10[%c1_110, %c1_111, %c0_112] : memref<18x18x8xbf16, #tpu.memory_space<vmem>>, vector<16x16x8xbf16>
    %91 = vector.shape_cast %90 : vector<16x16x8xbf16> to vector<256x8xbf16>
    %c32_113 = arith.constant 32 : index
    %c0_114 = arith.constant 0 : index
    %92 = vector.load %arg3[%c32_113, %c0_114] : memref<72x8xbf16, #tpu.memory_space<vmem>>, vector<8x8xbf16>
    %cst_115 = arith.constant dense<0.000000e+00> : vector<256x8xf32>
    %93 = tpu.matmul %91, %92, %cst_115 {dimension_numbers = #tpu.dot_dimension_numbers<[1], [0], [0], [1], [0, 0, 1, 1], [], []>} : vector<256x8xbf16>, vector<8x8xbf16>, vector<256x8xf32> -> vector<256x8xf32>
    %94 = arith.addf %89, %93 : vector<256x8xf32>
    %c1_116 = arith.constant 1 : index
    %c2_117 = arith.constant 2 : index
    %c0_118 = arith.constant 0 : index
    %95 = vector.load %arg10[%c1_116, %c2_117, %c0_118] : memref<18x18x8xbf16, #tpu.memory_space<vmem>>, vector<16x16x8xbf16>
    %96 = vector.shape_cast %95 : vector<16x16x8xbf16> to vector<256x8xbf16>
    %c40 = arith.constant 40 : index
    %c0_119 = arith.constant 0 : index
    %97 = vector.load %arg3[%c40, %c0_119] : memref<72x8xbf16, #tpu.memory_space<vmem>>, vector<8x8xbf16>
    %cst_120 = arith.constant dense<0.000000e+00> : vector<256x8xf32>
    %98 = tpu.matmul %96, %97, %cst_120 {dimension_numbers = #tpu.dot_dimension_numbers<[1], [0], [0], [1], [0, 0, 1, 1], [], []>} : vector<256x8xbf16>, vector<8x8xbf16>, vector<256x8xf32> -> vector<256x8xf32>
    %99 = arith.addf %94, %98 : vector<256x8xf32>
    %c2_121 = arith.constant 2 : index
    %c0_122 = arith.constant 0 : index
    %c0_123 = arith.constant 0 : index
    %100 = vector.load %arg10[%c2_121, %c0_122, %c0_123] : memref<18x18x8xbf16, #tpu.memory_space<vmem>>, vector<16x16x8xbf16>
    %101 = vector.shape_cast %100 : vector<16x16x8xbf16> to vector<256x8xbf16>
    %c48 = arith.constant 48 : index
    %c0_124 = arith.constant 0 : index
    %102 = vector.load %arg3[%c48, %c0_124] : memref<72x8xbf16, #tpu.memory_space<vmem>>, vector<8x8xbf16>
    %cst_125 = arith.constant dense<0.000000e+00> : vector<256x8xf32>
    %103 = tpu.matmul %101, %102, %cst_125 {dimension_numbers = #tpu.dot_dimension_numbers<[1], [0], [0], [1], [0, 0, 1, 1], [], []>} : vector<256x8xbf16>, vector<8x8xbf16>, vector<256x8xf32> -> vector<256x8xf32>
    %104 = arith.addf %99, %103 : vector<256x8xf32>
    %c2_126 = arith.constant 2 : index
    %c1_127 = arith.constant 1 : index
    %c0_128 = arith.constant 0 : index
    %105 = vector.load %arg10[%c2_126, %c1_127, %c0_128] : memref<18x18x8xbf16, #tpu.memory_space<vmem>>, vector<16x16x8xbf16>
    %106 = vector.shape_cast %105 : vector<16x16x8xbf16> to vector<256x8xbf16>
    %c56 = arith.constant 56 : index
    %c0_129 = arith.constant 0 : index
    %107 = vector.load %arg3[%c56, %c0_129] : memref<72x8xbf16, #tpu.memory_space<vmem>>, vector<8x8xbf16>
    %cst_130 = arith.constant dense<0.000000e+00> : vector<256x8xf32>
    %108 = tpu.matmul %106, %107, %cst_130 {dimension_numbers = #tpu.dot_dimension_numbers<[1], [0], [0], [1], [0, 0, 1, 1], [], []>} : vector<256x8xbf16>, vector<8x8xbf16>, vector<256x8xf32> -> vector<256x8xf32>
    %109 = arith.addf %104, %108 : vector<256x8xf32>
    %c2_131 = arith.constant 2 : index
    %c2_132 = arith.constant 2 : index
    %c0_133 = arith.constant 0 : index
    %110 = vector.load %arg10[%c2_131, %c2_132, %c0_133] : memref<18x18x8xbf16, #tpu.memory_space<vmem>>, vector<16x16x8xbf16>
    %111 = vector.shape_cast %110 : vector<16x16x8xbf16> to vector<256x8xbf16>
    %c64 = arith.constant 64 : index
    %c0_134 = arith.constant 0 : index
    %112 = vector.load %arg3[%c64, %c0_134] : memref<72x8xbf16, #tpu.memory_space<vmem>>, vector<8x8xbf16>
    %cst_135 = arith.constant dense<0.000000e+00> : vector<256x8xf32>
    %113 = tpu.matmul %111, %112, %cst_135 {dimension_numbers = #tpu.dot_dimension_numbers<[1], [0], [0], [1], [0, 0, 1, 1], [], []>} : vector<256x8xbf16>, vector<8x8xbf16>, vector<256x8xf32> -> vector<256x8xf32>
    %114 = arith.addf %109, %113 : vector<256x8xf32>
    %c0_136 = arith.constant 0 : index
    %c0_137 = arith.constant 0 : index
    %115 = vector.load %arg6[%c0_136, %c0_137] : memref<1x8xf32, #tpu.memory_space<vmem>>, vector<1x8xf32>
    %116 = vector.broadcast %115 : vector<1x8xf32> to vector<256x8xf32>
    %117 = arith.addf %114, %116 : vector<256x8xf32>
    %c0_138 = arith.constant 0 : index
    %c0_139 = arith.constant 0 : index
    %c0_140 = arith.constant 0 : index
    %c0_141 = arith.constant 0 : index
    %118 = vector.load %arg1[%c0_138, %c0_139, %c0_140, %c0_141] : memref<1x16x16x4xbf16, #tpu.memory_space<vmem>>, vector<1x16x16x4xbf16>
    %119 = vector.shape_cast %118 : vector<1x16x16x4xbf16> to vector<16x16x4xbf16>
    %120 = vector.shape_cast %119 : vector<16x16x4xbf16> to vector<256x4xbf16>
    %c0_142 = arith.constant 0 : index
    %c0_143 = arith.constant 0 : index
    %121 = vector.load %arg4[%c0_142, %c0_143] : memref<4x8xbf16, #tpu.memory_space<vmem>>, vector<4x8xbf16>
    %cst_144 = arith.constant dense<0.000000e+00> : vector<256x8xf32>
    %122 = tpu.matmul %120, %121, %cst_144 {dimension_numbers = #tpu.dot_dimension_numbers<[1], [0], [0], [1], [0, 0, 1, 1], [], []>} : vector<256x4xbf16>, vector<4x8xbf16>, vector<256x8xf32> -> vector<256x8xf32>
    %c0_145 = arith.constant 0 : index
    %c0_146 = arith.constant 0 : index
    %123 = vector.load %arg7[%c0_145, %c0_146] : memref<1x8xf32, #tpu.memory_space<vmem>>, vector<1x8xf32>
    %124 = vector.broadcast %123 : vector<1x8xf32> to vector<256x8xf32>
    %125 = arith.addf %122, %124 : vector<256x8xf32>
    %126 = arith.addf %117, %125 : vector<256x8xf32>
    %cst_147 = arith.constant 0.000000e+00 : f32
    %127 = vector.broadcast %cst_147 : f32 to vector<256x8xf32>
    %128 = arith.maximumf %126, %127 : vector<256x8xf32>
    %129 = vector.shape_cast %128 : vector<256x8xf32> to vector<16x16x8xf32>
    %130 = arith.truncf %129 : vector<16x16x8xf32> to vector<16x16x8xbf16>
    %c0_148 = arith.constant 0 : index
    %c0_149 = arith.constant 0 : index
    %c0_150 = arith.constant 0 : index
    %c0_151 = arith.constant 0 : index
    %131 = vector.load %arg8[%c0_148, %c0_149, %c0_150, %c0_151] : memref<1x16x16x8xbf16, #tpu.memory_space<vmem>>, vector<1x16x16x8xbf16>
    %132 = vector.shape_cast %131 : vector<1x16x16x8xbf16> to vector<16x16x8xbf16>
    %133 = vector.shape_cast %130 : vector<16x16x8xbf16> to vector<1x16x16x8xbf16>
    tpu.vector_store %arg8[%c0_148, %c0_149, %c0_150, %c0_151], %133 {strides = array<i32>} : memref<1x16x16x8xbf16, #tpu.memory_space<vmem>>, vector<1x16x16x8xbf16>,
    return
  }
  func.func @transform_0(%arg0: i32) -> (i32, i32, i32, i32) {
    %c0_i32 = arith.constant 0 : i32
    %c0_i32_0 = arith.constant 0 : i32
    %c0_i32_1 = arith.constant 0 : i32
    %c0_i32_2 = arith.constant 0 : i32
    return %arg0, %c0_i32, %c0_i32_0, %c0_i32_1 : i32, i32, i32, i32
  }
  func.func @transform_1(%arg0: i32) -> (i32, i32) {
    %c0_i32 = arith.constant 0 : i32
    %c0_i32_0 = arith.constant 0 : i32
    %c0_i32_1 = arith.constant 0 : i32
    return %c0_i32, %c0_i32_0 : i32, i32
  }
  func.func @transform_2(%arg0: i32) -> (i32, i32) {
    %c0_i32 = arith.constant 0 : i32
    %c0_i32_0 = arith.constant 0 : i32
    %c0_i32_1 = arith.constant 0 : i32
    return %c0_i32, %c0_i32_0 : i32, i32
  }
  func.func @transform_3(%arg0: i32) -> (i32, i32) {
    %c0_i32 = arith.constant 0 : i32
    %c0_i32_0 = arith.constant 0 : i32
    %c0_i32_1 = arith.constant 0 : i32
    return %c0_i32, %c0_i32_0 : i32, i32
  }
  func.func @transform_4(%arg0: i32) -> (i32, i32) {
    %c0_i32 = arith.constant 0 : i32
    %c0_i32_0 = arith.constant 0 : i32
    %c0_i32_1 = arith.constant 0 : i32
    return %c0_i32, %c0_i32_0 : i32, i32
  }
  func.func @transform_5(%arg0: i32) -> (i32, i32) {
    %c0_i32 = arith.constant 0 : i32
    %c0_i32_0 = arith.constant 0 : i32
    %c0_i32_1 = arith.constant 0 : i32
    return %c0_i32, %c0_i32_0 : i32, i32
  }
  func.func @transform_6(%arg0: i32) -> (i32, i32) {
    %c0_i32 = arith.constant 0 : i32
    %c0_i32_0 = arith.constant 0 : i32
    %c0_i32_1 = arith.constant 0 : i32
    return %c0_i32, %c0_i32_0 : i32, i32
  }
  func.func @transform_7(%arg0: i32) -> (i32, i32, i32, i32) {
    %c0_i32 = arith.constant 0 : i32
    %c0_i32_0 = arith.constant 0 : i32
    %c0_i32_1 = arith.constant 0 : i32
    %c0_i32_2 = arith.constant 0 : i32
    return %arg0, %c0_i32, %c0_i32_0, %c0_i32_1 : i32, i32, i32, i32
  }
}

</mosaic_0001>

<bundles_post_ra>
// kernel: tpu_custom_call.1
= control target key start
LH: loop header
LB: loop body
LE: loop exit
PB: predicated region body
PF: predicated region fallthrough
CT: control target
= control target key end

     0   :  { %s14001_s24 = smov 0   ;;  %s17883_s0 = inlined_call_operand.vmem [shape: bf16[2,16,16,4], index: 0, kind: input, shape index: {}]   ;;  %s17884_s1 = inlined_call_operand.vmem [shape: bf16[36,8], index: 1, kind: input, shape index: {}]   ;;  %s17885_s2 = inlined_call_operand.vmem [shape: bf16[72,8], index: 2, kind: input, shape index: {}]   ;;  %s17886_s3 = inlined_call_operand.vmem [shape: bf16[4,8], index: 3, kind: input, shape index: {}]   ;;  %s17887_s4 = inlined_call_operand.vmem [shape: f32[1,8], index: 4, kind: input, shape index: {}]   ;;  %s17888_s5 = inlined_call_operand.vmem [shape: f32[1,8], index: 5, kind: input, shape index: {}]   ;;  %s17889_s6 = inlined_call_operand.vmem [shape: f32[1,8], index: 6, kind: input, shape index: {}]   ;;  %s17890_s7 = inlined_call_operand.vmem [shape: bf16[2,16,16,8], index: 7, kind: output, shape index: {}]  }
   0x1 LB: > { %s11353_s25 = sadd.s32 4294967295, %s13958_s24   ;;  %p11357_p0 = scmp.ge.s32.totalorder %s13958_s24, 1  ;;  %s13958_s24 = sphi %s14001_s24, %s17_s24  }
   0x2   : > { %p237_p1 = scmp.lt.s32.totalorder %s13958_s24, 3 }
   0x4   : > { %p238_p2 = pnand %p11357_p0, %p237_p1 }
   0x6   : > { %241 = sbr.rel (%p238_p2) target bundleno = 1793 (0x701), region = 48 }
   0xd   : > { %v13813_v0 = vld [vmem:[%s17884_s1] ss:$0 sps:$4 sm:$0xcc]   ;;  %vm1529_vm0 = vcmask 1041408   ;;  %vm280_vm1 = vcmask 27648   ;;  %vm283_vm2 = vcmask 24576  }
   0xe   : > { %vm290_vm3 = vsmask.f32 256  ;;  %p14012_p3 = scmp.lt.s32.totalorder %s11353_s25, 1  ;;  %v1479_v1 = vrot.slane %v13813_v0, 2  ;;  %v17891_v2 = vmov 0   ;;  %vm402_vm6 = vcmask 60416  }
   0xf   : > { %281 = vst.msk [vmem:[#allocation2] sm:$0xf] %vm280_vm1, %v17891_v2  ;;  %282 = vst.msk [vmem:[#allocation2 + $0x4] sm:$0xf] %vm280_vm1, %v17891_v2  ;;  %vm346_vm5 = vsmask.f32 7938 }
  0x10   : > { %284 = vst.msk [vmem:[#allocation2 + $0x8] sm:$0x1] %vm283_vm2, %v17891_v2  ;;  %vm14022_vm4 = vmand %vm283_vm2, %vm290_vm3  ;;  %v18002_v4 = vmov 0  ;;  %v14047_v5 = vld [vmem:[%s17884_s1] sm:$0x3]  ;;  %s18301_s25 = smov (!%p14012_p3, %s11353_s25), 1  ;;  %13784 = vmatprep.subr.msk.bf16.mxu0 %vm1529_vm0, %v1479_v1 }
  0x11   : > { %286 = vst.msk [vmem:[#allocation2 + $0xcc] sm:$0xf] %vm280_vm1, %v17891_v2  ;;  %287 = vst.msk [vmem:[#allocation2 + $0xd0] sm:$0xf] %vm280_vm1, %v17891_v2  ;;  %v1531_v6 = vsel %vm1529_vm0, %v1479_v1, 0  ;;  %s12139_s8 = sshll.u32 %s18301_s25, 7 }
  0x12   : > { %288 = vst.msk [vmem:[#allocation2 + $0xd4] sm:$0x1] %vm283_vm2, %v17891_v2  ;;  %vm14032_vm7 = vmand %vm283_vm2, %vm346_vm5  ;;  %v295_v7 = vld [vmem:[#allocation2 + $0xc] sm:$0x1]  ;;  %v351_v8 = vld [vmem:[#allocation2 + $0x14] sm:$0x1]  ;;  %12529 = vmatpush3.bf16.msra.mxu0 %v1531_v6  ;;  %s14067_s11 = scalar_lea.vmem %s17883_s0, %s12139_s8  ;;  %s17766_s19 = scalar_lea.vmem %s17890_s7, %s12139_s8 }
  0x13   : > { %v18003_v4 = vsel %vm14032_vm7, 4294967295, %v18002_v4  ;;  %403 = vst.msk [vmem:[#allocation3] sm:$0xf] %vm402_vm6, %v17891_v2  ;;  %404 = vst.msk [vmem:[#allocation3 + $0x4] sm:$0xf] %vm402_vm6, %v17891_v2  ;;  %v296_v9 = vsel %vm14022_vm4, 0, %v295_v7  ;;  %13785 = vmatprep.subr.msk.bf16.mxu0 %vm1529_vm0, %v14047_v5 }
  0x14   : > { %18004 = vst [vmem:[#allocation4_spill] sm:$0xff] %v18003_v4  ;;  %408 = vst.msk [vmem:[#allocation3 + $0xcc] sm:$0xf] %vm402_vm6, %v17891_v2  ;;  %v352_v10 = vsel %vm14032_vm7, 0, %v351_v8  ;;  %vm554_vm8 = vsmask.f32 4368 }
  0x15   : > { %409 = vst.msk [vmem:[#allocation3 + $0xd0] sm:$0xf] %vm402_vm6, %v17891_v2  ;;  %297 = vst [vmem:[#allocation2 + $0xc] sm:$0x1] %v296_v9  ;;  %v298_v11 = vld [vmem:[#allocation2 + $0x18] sm:$0x1] }
  0x16   : > { %353 = vst [vmem:[#allocation2 + $0x14] sm:$0x1] %v352_v10  ;;  %v354_v12 = vld [vmem:[#allocation2 + $0x20] sm:$0x1]  ;;  %v523_v14 = vld [vmem:[%s14067_s11 + $0x4] sm:$0xf]  ;;  %vm14083_vm9 = vmand %vm280_vm1, %vm346_vm5 }
  0x17   : > { %v522_v13 = vld [vmem:[%s14067_s11] sm:$0xf]  ;;  %v299_v15 = vsel %vm14022_vm4, 0, %v298_v11  ;;  %v355_v16 = vsel %vm14032_vm7, 0, %v354_v12  ;;  %v565_v19 = vshrl.u32 %v523_v14, 16  ;;  %v568_v20 = vshll.u32 %v523_v14, 16  ;;  %vm14091_vm12 = vmor %vm290_vm3, %vm554_vm8 }
  0x18   : > { %v557_v17 = vshrl.u32 %v522_v13, 16  ;;  %v560_v18 = vshll.u32 %v522_v13, 16  ;;  %300 = vst [vmem:[#allocation2 + $0x18] sm:$0x1] %v299_v15  ;;  %356 = vst [vmem:[#allocation2 + $0x20] sm:$0x1] %v355_v16 }
  0x19   : > { %v524_v21 = vld [vmem:[%s14067_s11 + $0x8] sm:$0xf]  ;;  %v292_v22 = vld [vmem:[#allocation2] sm:$0x1]  ;;  %v992_v24 = vld [vmem:[#allocation2 + $0x4] sm:$0xf] }
  0x1a   : > { %v348_v23 = vld [vmem:[#allocation2 + $0x8] sm:$0x1]  ;;  %v293_v25 = vsel %vm14022_vm4, 0, %v292_v22  ;;  %v1053_v27 = vshll.u32 %v992_v24, 16  ;;  %v1057_v28 = vshrl.u32 %v992_v24, 16  ;;  %v559_v31 = vrot.slane %v557_v17, 7 }
  0x1b   : > { %v349_v26 = vsel %vm14032_vm7, 0, %v348_v23  ;;  %v525_v29 = vld [vmem:[%s14067_s11 + $0xc] sm:$0xf]  ;;  %294 = vst [vmem:[#allocation2] sm:$0x1] %v293_v25  ;;  %v567_v32 = vrot.slane %v565_v19, 7 }
  0x1c   : > { %350 = vst [vmem:[#allocation2 + $0x8] sm:$0x1] %v349_v26  ;;  %vm1040_vm10 = vsmask.f32 3328  ;;  %vm1041_vm11 = vsmask.f32 7440  ;;  %v562_v42 = vor.u32 %v560_v18, %v559_v31 }
  0x1d   : > { %v574_v33 = vshrl.u32 %v524_v21, 16  ;;  %v577_v34 = vshll.u32 %v524_v21, 16  ;;  %v301_v35 = vld [vmem:[#allocation2 + $0x24] sm:$0x1]  ;;  %v14087_v36 = vrot.slane %v1053_v27, 5  ;;  %v1059_v37 = vrot.slane %v1057_v28, 4  ;;  %vm14127_vm13 = vmor %vm1040_vm10, %vm1041_vm11 }
  0x1e   : > { %v18007_v38 = vmov 0  ;;  %v582_v39 = vshrl.u32 %v525_v29, 16  ;;  %v585_v40 = vshll.u32 %v525_v29, 16  ;;  %v357_v41 = vld [vmem:[#allocation2 + $0x2c] sm:$0x1]  ;;  %v563_v43 = vrot.slane %v559_v31, 4  ;;  %vm15867_vm10 = vmand %vm402_vm6, %vm346_vm5 }
  0x1f   : > { %v18008_v38 = vsel %vm14091_vm12, 4294967295, %v18007_v38  ;;  %v570_v44 = vor.u32 %v568_v20, %v567_v32  ;;  %v572_v45 = vrot.slane %v567_v32, 4  ;;  %v879_v46 = vld [vmem:[#allocation2 + $0xc] sm:$0xf]  ;;  %v883_v47 = vld [vmem:[#allocation2 + $0x14] sm:$0x1]  ;;  %v1060_v63 = vor.u32 %v1059_v37, %v14087_v36 }
  0x20   : > { %18009 = vst [vmem:[#allocation5_spill] sm:$0xff] %v18008_v38  ;;  %v576_v48 = vrot.slane %v574_v33, 7  ;;  %v584_v49 = vrot.slane %v582_v39, 7  ;;  %v302_v50 = vsel %vm14022_vm4, 0, %v301_v35  ;;  %v526_v51 = vld [vmem:[%s14067_s11 + $0x10] sm:$0xf]  ;;  %v880_v53 = vsel %vm14083_vm9, %v562_v42, %v879_v46 }
  0x21   : > { %v571_v52 = vsel %vm14091_vm12, %v563_v43, %v570_v44  ;;  %v884_v54 = vsel %vm14022_vm4, %v572_v45, %v883_v47  ;;  %v886_v55 = vld [vmem:[#allocation2 + $0x18] sm:$0xf]  ;;  %v890_v56 = vld [vmem:[#allocation2 + $0x20] sm:$0x1]  ;;  %303 = vst [vmem:[#allocation2 + $0x24] sm:$0x1] %v302_v50 }
  0x22   : > { %v358_v57 = vsel %vm14032_vm7, 0, %v357_v41  ;;  %881 = vst [vmem:[#allocation2 + $0xc] sm:$0xf] %v880_v53  ;;  %882 = vst.msk [vmem:[#allocation2 + $0x10] sm:$0xf] %vm280_vm1, %v571_v52  ;;  %v579_v58 = vor.u32 %v577_v34, %v576_v48  ;;  %v580_v59 = vrot.slane %v576_v48, 4  ;;  %v587_v60 = vor.u32 %v585_v40, %v584_v49 }
  0x23   : > { %885 = vst [vmem:[#allocation2 + $0x14] sm:$0x1] %v884_v54  ;;  %359 = vst [vmem:[#allocation2 + $0x2c] sm:$0x1] %v358_v57  ;;  %v527_v61 = vld [vmem:[%s14067_s11 + $0x14] sm:$0xf] }
  0x24   : > { %v304_v62 = vld [vmem:[#allocation2 + $0x30] sm:$0x1]  ;;  %v589_v0 = vrot.slane %v584_v49, 4  ;;  %v591_v1 = vshrl.u32 %v526_v51, 16  ;;  %v599_v6 = vshrl.u32 %v527_v61, 16  ;;  %v588_v10 = vsel %vm14091_vm12, %v580_v59, %v587_v60 }
  0x25   : > { %v360_v7 = vld [vmem:[#allocation2 + $0x38] sm:$0x1]  ;;  %v991_v8 = vld [vmem:[#allocation2] sm:$0xf]  ;;  %v1024_v9 = vld [vmem:[#allocation2 + $0x8] sm:$0x1]  ;;  %v887_v11 = vsel %vm14083_vm9, %v579_v58, %v886_v55 }
  0x26   : > { %v594_v12 = vshll.u32 %v526_v51, 16  ;;  %v305_v13 = vsel %vm14022_vm4, 0, %v304_v62  ;;  %v1044_v14 = vshrl.u32 %v991_v8, 16  ;;  %v1047_v15 = vshll.u32 %v991_v8, 16  ;;  %888 = vst [vmem:[#allocation2 + $0x18] sm:$0xf] %v887_v11 }
  0x27   : > { %v1063_v16 = vshll.u32 %v1024_v9, 16  ;;  %889 = vst.msk [vmem:[#allocation2 + $0x1c] sm:$0xf] %vm280_vm1, %v588_v10  ;;  %v602_v17 = vshll.u32 %v527_v61, 16  ;;  %306 = vst [vmem:[#allocation2 + $0x30] sm:$0x1] %v305_v13  ;;  %v891_v19 = vsel %vm14022_vm4, %v589_v0, %v890_v56 }
  0x28   : > { %v14117_v18 = vld [vmem:[%s14067_s11 + $0x18] sm:$0xf]  ;;  %v593_v20 = vrot.slane %v591_v1, 7  ;;  %v14121_v21 = vrot.slane %v599_v6, 7  ;;  %v361_v22 = vsel %vm14032_vm7, 0, %v360_v7  ;;  %v1046_v23 = vrot.slane %v1044_v14, 4 }
  0x29   : > { %v1049_v24 = vrot.slane %v1047_v15, 5  ;;  %v1061_v25 = vrot.slane %v1060_v63, 4  ;;  %v1065_v26 = vrot.slane %v1063_v16, 5  ;;  %892 = vst [vmem:[#allocation2 + $0x20] sm:$0x1] %v891_v19  ;;  %vm1480_vm14 = vcmask 31744  }
  0x2a   : > { %362 = vst [vmem:[#allocation2 + $0x38] sm:$0x1] %v361_v22  ;;  %v14133_v28 = vsel %vm1529_vm0, %v14047_v5, 0  ;;  %v597_v29 = vrot.slane %v593_v20, 4  ;;  %v608_v31 = vshrl.u32 %v14117_v18, 16  ;;  %v596_v37 = vor.u32 %v594_v12, %v593_v20 }
  0x2b   : > { %v1050_v32 = vor.u32 %v1049_v24, %v1046_v23  ;;  %v14136_v33 = vld [vmem:[#allocation2 + $0xc] sm:$0xf]  ;;  %v14138_v34 = vld [vmem:[#allocation2 + $0x10] sm:$0xf]  ;;  %v1025_v35 = vld [vmem:[#allocation2 + $0x14] sm:$0x1]  ;;  %v604_v39 = vor.u32 %v602_v17, %v14121_v21  ;;  %v1066_v44 = vsel %vm14127_vm13, %v1061_v25, %v1065_v26 }
  0x2c   : > { %v1068_v40 = vshrl.u32 %v14136_v33, 16  ;;  %v1071_v41 = vshll.u32 %v14136_v33, 16  ;;  %v1077_v42 = vshll.u32 %v14138_v34, 16  ;;  %v1081_v5 = vshrl.u32 %v14138_v34, 16  ;;  %v893_v62 = vld [vmem:[#allocation2 + $0x24] sm:$0xf] }
  0x2d   : > { %v1051_v43 = vrot.slane %v1050_v32, 4  ;;  %v1087_v45 = vshll.u32 %v1025_v35, 16  ;;  %v606_v46 = vrot.slane %v14121_v21, 4  ;;  %v995_v51 = vld [vmem:[#allocation2 + $0x18] sm:$0xf]  ;;  %v605_v10 = vsel %vm14091_vm12, %v597_v29, %v604_v39 }
  0x2e   : > { %v1070_v47 = vrot.slane %v1068_v40, 4  ;;  %v1073_v48 = vrot.slane %v1071_v41, 5  ;;  %v1079_v49 = vrot.slane %v1077_v42, 5  ;;  %v1083_v50 = vrot.slane %v1081_v5, 4  ;;  %v996_v54 = vld [vmem:[#allocation2 + $0x1c] sm:$0xf] }
  0x2f   : > { %v1056_v52 = vsel %vm14127_vm13, %v1051_v43, %v14087_v36  ;;  %v1089_v53 = vrot.slane %v1087_v45, 5  ;;  %v1092_v55 = vshrl.u32 %v995_v51, 16  ;;  %v1095_v56 = vshll.u32 %v995_v51, 16  ;;  %v897_v7 = vld [vmem:[#allocation2 + $0x2c] sm:$0x1] }
  0x30   : > { %v11362_v57 = vcombine.low %v1056_v52, %v1066_v44  ;;  %v1074_v58 = vor.u32 %v1073_v48, %v1070_v47  ;;  %v1084_v59 = vor.u32 %v1083_v50, %v1079_v49  ;;  %v1026_v60 = vld [vmem:[#allocation2 + $0x20] sm:$0x1]  ;;  %v1101_v61 = vshll.u32 %v996_v54, 16  ;;  %896 = vst.msk [vmem:[#allocation2 + $0x28] sm:$0xf] %vm280_vm1, %v605_v10 }
  0x31   : > { %v1094_v63 = vrot.slane %v1092_v55, 4  ;;  %v1097_v0 = vrot.slane %v1095_v56, 5  ;;  %v1105_v1 = vshrl.u32 %v996_v54, 16  ;;  %v1111_v6 = vshll.u32 %v1026_v60, 16  ;;  %v529_v15 = vld [vmem:[%s14067_s11 + $0x1c] sm:$0xf] }
  0x32   : > { %12530 = vmatprep.mubr.msk.bf16.mxu0 %vm1480_vm14, %v11362_v57  ;;  %v1075_v8 = vrot.slane %v1074_v58, 4  ;;  %v1085_v36 = vrot.slane %v1084_v59, 4  ;;  %v1103_v9 = vrot.slane %v1101_v61, 5  ;;  %v894_v14 = vsel %vm14083_vm9, %v596_v37, %v893_v62  ;;  %v307_v16 = vld [vmem:[#allocation2 + $0x3c] sm:$0x1] }
  0x33   : > { %v1098_v11 = vor.u32 %v1097_v0, %v1094_v63  ;;  %v1107_v12 = vrot.slane %v1105_v1, 4  ;;  %v1113_v13 = vrot.slane %v1111_v6, 5  ;;  %895 = vst [vmem:[#allocation2 + $0x24] sm:$0xf] %v894_v14  ;;  %v898_v20 = vsel %vm14022_vm4, %v606_v46, %v897_v7  ;;  %v363_v22 = vld [vmem:[#allocation2 + $0x44] sm:$0x1] }
  0x34   : > { %v1080_v17 = vsel %vm14127_vm13, %v1075_v8, %v1079_v49  ;;  %v1090_v19 = vsel %vm14127_vm13, %v1085_v36, %v1089_v53  ;;  %v610_v21 = vrot.slane %v608_v31, 7  ;;  %v530_v23 = vld [vmem:[%s14067_s11 + $0x20] sm:$0xf]  ;;  %899 = vst [vmem:[#allocation2 + $0x2c] sm:$0x1] %v898_v20  ;;  %v611_v29 = vshll.u32 %v14117_v18, 16 }
  0x35   : > { %v11363_v24 = vcombine.low %v1080_v17, %v1090_v19  ;;  %v1099_v25 = vrot.slane %v1098_v11, 4  ;;  %v1108_v26 = vor.u32 %v1107_v12, %v1103_v9  ;;  %v900_v32 = vld [vmem:[#allocation2 + $0x30] sm:$0xf]  ;;  %v531_v35 = vld [vmem:[%s14067_s11 + $0x24] sm:$0xf]  ;;  %v616_v39 = vshrl.u32 %v529_v15, 16 }
  0x36   : > { %v614_v37 = vrot.slane %v610_v21, 4  ;;  %v619_v40 = vshll.u32 %v529_v15, 16  ;;  %v308_v41 = vsel %vm14022_vm4, 0, %v307_v16  ;;  %v310_v42 = vld [vmem:[#allocation2 + $0x48] sm:$0x1]  ;;  %v613_v43 = vor.u32 %v611_v29, %v610_v21 }
  0x37   : > { %12531 = vmatmul.mubr.msk.bf16.vlgmr.msra.gmra.mrb[0].mxu0 %vm1480_vm14, %v11363_v24  ;;  %v1104_v31 = vsel %vm14127_vm13, %v1099_v25, %v1103_v9  ;;  %v1109_v5 = vrot.slane %v1108_v26, 4  ;;  %309 = vst [vmem:[#allocation2 + $0x3c] sm:$0x1] %v308_v41  ;;  %v364_v18 = vsel %vm14032_vm7, 0, %v363_v22  ;;  %v618_v44 = vrot.slane %v616_v39, 7 }
  0x38   : > { %12563 = vmatpush3.bf16.msra.mxu0 %v14133_v28  ;;  %365 = vst [vmem:[#allocation2 + $0x44] sm:$0x1] %v364_v18  ;;  %v625_v45 = vshrl.u32 %v530_v23, 16  ;;  %v628_v46 = vshll.u32 %v530_v23, 16  ;;  %v633_v47 = vshrl.u32 %v531_v35, 16  ;;  %v901_v50 = vsel %vm14083_vm9, %v613_v43, %v900_v32 }
  0x39   : > { %v366_v48 = vld [vmem:[#allocation2 + $0x50] sm:$0x1]  ;;  %v1114_v49 = vsel %vm14127_vm13, %v1109_v5, %v1113_v13  ;;  %v904_v51 = vld [vmem:[#allocation2 + $0x38] sm:$0x1]  ;;  %v636_v52 = vshll.u32 %v531_v35, 16  ;;  %v311_v53 = vsel %vm14022_vm4, 0, %v310_v42  ;;  %v621_v28 = vor.u32 %v619_v40, %v618_v44 }
  0x3a   : > { %v11364_v54 = vcombine.low %v1104_v31, %v1114_v49  ;;  %v998_v55 = vld [vmem:[#allocation2 + $0x28] sm:$0xf]  ;;  %v623_v56 = vrot.slane %v618_v44, 4  ;;  %902 = vst [vmem:[#allocation2 + $0x30] sm:$0xf] %v901_v50  ;;  %v627_v57 = vrot.slane %v625_v45, 7 }
  0x3b   : > { %312 = vst [vmem:[#allocation2 + $0x48] sm:$0x1] %v311_v53  ;;  %v997_v58 = vld [vmem:[#allocation2 + $0x24] sm:$0xf]  ;;  %v1125_v59 = vshll.u32 %v998_v55, 16  ;;  %v1129_v60 = vshrl.u32 %v998_v55, 16  ;;  %v622_v6 = vsel %vm14091_vm12, %v614_v37, %v621_v28 }
  0x3c   : > { %v635_v61 = vrot.slane %v633_v47, 7  ;;  %v367_v62 = vsel %vm14032_vm7, 0, %v366_v48  ;;  %12534 = vmatprep.mubr.msk.bf16.mxu0 %vm1480_vm14, %v11364_v54  ;;  %v1027_v63 = vld [vmem:[#allocation2 + $0x2c] sm:$0x1]  ;;  %v1116_v0 = vshrl.u32 %v997_v58, 16  ;;  %v1119_v1 = vshll.u32 %v997_v58, 16 }
  0x3d   : > { %v905_v7 = vsel %vm14022_vm4, %v623_v56, %v904_v51  ;;  %368 = vst [vmem:[#allocation2 + $0x50] sm:$0x1] %v367_v62  ;;  %v532_v8 = vld [vmem:[%s14067_s11 + $0x28] sm:$0xf]  ;;  %v1127_v36 = vrot.slane %v1125_v59, 5  ;;  %v1131_v9 = vrot.slane %v1129_v60, 4  ;;  %v630_v11 = vor.u32 %v628_v46, %v627_v57 }
  0x3e   : > { %v1135_v10 = vshll.u32 %v1027_v63, 16  ;;  %903 = vst.msk [vmem:[#allocation2 + $0x34] sm:$0xf] %vm280_vm1, %v622_v6  ;;  %906 = vst [vmem:[#allocation2 + $0x38] sm:$0x1] %v905_v7  ;;  %v1118_v13 = vrot.slane %v1116_v0, 4  ;;  %v638_v16 = vor.u32 %v636_v52, %v635_v61 }
  0x3f   : > { %v533_v12 = vld [vmem:[%s14067_s11 + $0x2c] sm:$0xf]  ;;  %v1121_v14 = vrot.slane %v1119_v1, 5  ;;  %v631_v15 = vrot.slane %v627_v57, 4  ;;  %v907_v17 = vld [vmem:[#allocation2 + $0x3c] sm:$0xf]  ;;  %v1132_v19 = vor.u32 %v1131_v9, %v1127_v36 }
  0x40   : > { %v1137_v20 = vrot.slane %v1135_v10, 5  ;;  %v640_v21 = vrot.slane %v635_v61, 4  ;;  %v908_v22 = vsel %vm14083_vm9, %v630_v11, %v907_v17  ;;  %v911_v23 = vld [vmem:[#allocation2 + $0x44] sm:$0x1]  ;;  %v642_v26 = vshrl.u32 %v532_v8, 16 }
  0x41   : > { %v1122_v24 = vor.u32 %v1121_v14, %v1118_v13  ;;  %v639_v25 = vsel %vm14091_vm12, %v631_v15, %v638_v16  ;;  %909 = vst [vmem:[#allocation2 + $0x3c] sm:$0xf] %v908_v22  ;;  %v645_v29 = vshll.u32 %v532_v8, 16  ;;  %v313_v32 = vld [vmem:[#allocation2 + $0x54] sm:$0x1]  ;;  %v1133_v37 = vrot.slane %v1132_v19, 4 }
  0x42   : > { %v369_v35 = vld [vmem:[#allocation2 + $0x5c] sm:$0x1]  ;;  %v999_v39 = vld [vmem:[#allocation2 + $0x30] sm:$0xf]  ;;  %910 = vst.msk [vmem:[#allocation2 + $0x40] sm:$0xf] %vm280_vm1, %v639_v25  ;;  %v912_v40 = vsel %vm14022_vm4, %v640_v21, %v911_v23 }
  0x43   : > { %v650_v41 = vshrl.u32 %v533_v12, 16  ;;  %v653_v42 = vshll.u32 %v533_v12, 16  ;;  %v1123_v31 = vrot.slane %v1122_v24, 4  ;;  %v1140_v5 = vshrl.u32 %v999_v39, 16  ;;  %913 = vst [vmem:[#allocation2 + $0x44] sm:$0x1] %v912_v40 }
  0x44   : > { %v1143_v43 = vshll.u32 %v999_v39, 16  ;;  %v644_v18 = vrot.slane %v642_v26, 7  ;;  %v1138_v44 = vsel %vm14127_vm13, %v1133_v37, %v1137_v20  ;;  %v914_v46 = vld [vmem:[#allocation2 + $0x48] sm:$0xf]  ;;  %v314_v47 = vsel %vm14022_vm4, 0, %v313_v32 }
  0x45   : > { %v652_v45 = vrot.slane %v650_v41, 7  ;;  %v370_v48 = vsel %vm14032_vm7, 0, %v369_v35  ;;  %v1128_v49 = vsel %vm14127_vm13, %v1123_v31, %v1127_v36  ;;  %v1000_v50 = vld [vmem:[#allocation2 + $0x34] sm:$0xf]  ;;  %v1028_v51 = vld [vmem:[#allocation2 + $0x38] sm:$0x1] }
  0x46   : > { %v1142_v52 = vrot.slane %v1140_v5, 4  ;;  %v1145_v53 = vrot.slane %v1143_v43, 5  ;;  %v647_v54 = vor.u32 %v645_v29, %v644_v18  ;;  %315 = vst [vmem:[#allocation2 + $0x54] sm:$0x1] %v314_v47  ;;  %371 = vst [vmem:[#allocation2 + $0x5c] sm:$0x1] %v370_v48  ;;  %v11365_v55 = vcombine.low %v1128_v49, %v1138_v44 }
  0x47   : > { %v1149_v28 = vshll.u32 %v1000_v50, 16  ;;  %v1153_v56 = vshrl.u32 %v1000_v50, 16  ;;  %v1159_v57 = vshll.u32 %v1028_v51, 16  ;;  %v648_v59 = vrot.slane %v644_v18, 4  ;;  %v918_v62 = vld [vmem:[#allocation2 + $0x50] sm:$0x1] }
  0x48   : > { %v1146_v58 = vor.u32 %v1145_v53, %v1142_v52  ;;  %v655_v60 = vor.u32 %v653_v42, %v652_v45  ;;  %v657_v61 = vrot.slane %v652_v45, 4  ;;  %v534_v63 = vld [vmem:[%s14067_s11 + $0x30] sm:$0xf]  ;;  %12535 = vmatmul.mubr.msk.bf16.gmra.mrb[4].mxu0 %vm1480_vm14, %v11365_v55  ;;  %v1001_v7 = vld [vmem:[#allocation2 + $0x3c] sm:$0xf]  ;;  %v915_v8 = vsel %vm14083_vm9, %v647_v54, %v914_v46 }
  0x49   : > { %v1151_v0 = vrot.slane %v1149_v28, 5  ;;  %v1155_v1 = vrot.slane %v1153_v56, 4  ;;  %v1161_v6 = vrot.slane %v1159_v57, 5  ;;  %v1002_v9 = vld [vmem:[#allocation2 + $0x40] sm:$0xf]  ;;  %v1164_v10 = vshrl.u32 %v1001_v7, 16 }
  0x4a   : > { %v1147_v36 = vrot.slane %v1146_v58, 4  ;;  %v1167_v11 = vshll.u32 %v1001_v7, 16  ;;  %v656_v12 = vsel %vm14091_vm12, %v648_v59, %v655_v60  ;;  %916 = vst [vmem:[#allocation2 + $0x48] sm:$0xf] %v915_v8  ;;  %v1029_v14 = vld [vmem:[#allocation2 + $0x44] sm:$0x1]  ;;  %v919_v17 = vsel %vm14022_vm4, %v657_v61, %v918_v62 }
  0x4b   : > { %v1156_v13 = vor.u32 %v1155_v1, %v1151_v0  ;;  %v1173_v15 = vshll.u32 %v1002_v9, 16  ;;  %v1177_v16 = vshrl.u32 %v1002_v9, 16  ;;  %917 = vst.msk [vmem:[#allocation2 + $0x4c] sm:$0xf] %vm280_vm1, %v656_v12  ;;  %v535_v19 = vld [vmem:[%s14067_s11 + $0x34] sm:$0xf] }
  0x4c   : > { %v1152_v20 = vsel %vm14127_vm13, %v1147_v36, %v1151_v0  ;;  %v1166_v21 = vrot.slane %v1164_v10, 4  ;;  %v1169_v22 = vrot.slane %v1167_v11, 5  ;;  %v1183_v23 = vshll.u32 %v1029_v14, 16  ;;  %920 = vst [vmem:[#allocation2 + $0x50] sm:$0x1] %v919_v17 }
  0x4d   : > { %v1157_v24 = vrot.slane %v1156_v13, 4  ;;  %v1175_v25 = vrot.slane %v1173_v15, 5  ;;  %v1179_v26 = vrot.slane %v1177_v16, 4  ;;  %v659_v29 = vshrl.u32 %v534_v63, 16  ;;  %v316_v32 = vld [vmem:[#allocation2 + $0x60] sm:$0x1] }
  0x4e   : > { %v1170_v35 = vor.u32 %v1169_v22, %v1166_v21  ;;  %v1185_v37 = vrot.slane %v1183_v23, 5  ;;  %v662_v39 = vshll.u32 %v534_v63, 16  ;;  %v667_v40 = vshrl.u32 %v535_v19, 16  ;;  %v372_v41 = vld [vmem:[#allocation2 + $0x68] sm:$0x1] }
  0x4f   : > { %v1162_v42 = vsel %vm14127_vm13, %v1157_v24, %v1161_v6  ;;  %v1180_v31 = vor.u32 %v1179_v26, %v1175_v25  ;;  %v661_v5 = vrot.slane %v659_v29, 7  ;;  %v670_v43 = vshll.u32 %v535_v19, 16  ;;  %v921_v46 = vld [vmem:[#allocation2 + $0x54] sm:$0xf]  ;;  %v536_v53 = vld [vmem:[%s14067_s11 + $0x38] sm:$0xf] }
  0x50   : > { %v11366_v18 = vcombine.low %v1152_v20, %v1162_v42  ;;  %v1171_v44 = vrot.slane %v1170_v35, 4  ;;  %v669_v45 = vrot.slane %v667_v40, 7  ;;  %v317_v47 = vsel %vm14022_vm4, 0, %v316_v32  ;;  %v925_v58 = vld [vmem:[#allocation2 + $0x5c] sm:$0x1] }
  0x51   : > { %v1181_v48 = vrot.slane %v1180_v31, 4  ;;  %v1003_v49 = vld [vmem:[#allocation2 + $0x48] sm:$0xf]  ;;  %v664_v50 = vor.u32 %v662_v39, %v661_v5  ;;  %v665_v51 = vrot.slane %v661_v5, 4  ;;  %318 = vst [vmem:[#allocation2 + $0x60] sm:$0x1] %v317_v47 }
  0x52   : > { %v373_v52 = vsel %vm14032_vm7, 0, %v372_v41  ;;  %12538 = vmatprep.mubr.msk.bf16.mxu0 %vm1480_vm14, %v11366_v18  ;;  %v1176_v54 = vsel %vm14127_vm13, %v1171_v44, %v1175_v25  ;;  %v1004_v55 = vld [vmem:[#allocation2 + $0x4c] sm:$0xf]  ;;  %v1188_v28 = vshrl.u32 %v1003_v49, 16  ;;  %v1191_v56 = vshll.u32 %v1003_v49, 16 }
  0x53   : > { %v672_v57 = vor.u32 %v670_v43, %v669_v45  ;;  %374 = vst [vmem:[#allocation2 + $0x68] sm:$0x1] %v373_v52  ;;  %v1186_v59 = vsel %vm14127_vm13, %v1181_v48, %v1185_v37  ;;  %v1030_v60 = vld [vmem:[#allocation2 + $0x50] sm:$0x1]  ;;  %v1197_v61 = vshll.u32 %v1004_v55, 16  ;;  %v1201_v62 = vshrl.u32 %v1004_v55, 16 }
  0x54   : > { %v674_v63 = vrot.slane %v669_v45, 4  ;;  %v11367_v0 = vcombine.low %v1176_v54, %v1186_v59  ;;  %v1190_v1 = vrot.slane %v1188_v28, 4  ;;  %v1193_v6 = vrot.slane %v1191_v56, 5  ;;  %v537_v8 = vld [vmem:[%s14067_s11 + $0x3c] sm:$0xf] }
  0x55   : > { %v1207_v7 = vshll.u32 %v1030_v60, 16  ;;  %v1199_v36 = vrot.slane %v1197_v61, 5  ;;  %v1203_v9 = vrot.slane %v1201_v62, 4  ;;  %v673_v10 = vsel %vm14091_vm12, %v665_v51, %v672_v57  ;;  %v319_v12 = vld [vmem:[#allocation2 + $0x6c] sm:$0x1] }
  0x56   : > { %v922_v11 = vsel %vm14083_vm9, %v664_v50, %v921_v46  ;;  %v375_v13 = vld [vmem:[#allocation2 + $0x74] sm:$0x1]  ;;  %12539 = vmatmul.mubr.msk.bf16.gmra.mrb[8].mxu0 %vm1480_vm14, %v11367_v0  ;;  %v1194_v14 = vor.u32 %v1193_v6, %v1190_v1  ;;  %924 = vst.msk [vmem:[#allocation2 + $0x58] sm:$0xf] %vm280_vm1, %v673_v10  ;;  %v926_v16 = vsel %vm14022_vm4, %v674_v63, %v925_v58  ;;  %v676_v17 = vshrl.u32 %v536_v53, 16 }
  0x57   : > { %v1209_v15 = vrot.slane %v1207_v7, 5  ;;  %923 = vst [vmem:[#allocation2 + $0x54] sm:$0xf] %v922_v11  ;;  %v538_v19 = vld [vmem:[%s14067_s11 + $0x40] sm:$0xf]  ;;  %v1204_v20 = vor.u32 %v1203_v9, %v1199_v36  ;;  %v679_v21 = vshll.u32 %v536_v53, 16 }
  0x58   : > { %927 = vst [vmem:[#allocation2 + $0x5c] sm:$0x1] %v926_v16  ;;  %v684_v22 = vshrl.u32 %v537_v8, 16  ;;  %v687_v23 = vshll.u32 %v537_v8, 16  ;;  %v539_v24 = vld [vmem:[%s14067_s11 + $0x44] sm:$0xf] }
  0x59   : > { %v1195_v25 = vrot.slane %v1194_v14, 4  ;;  %v678_v26 = vrot.slane %v676_v17, 7  ;;  %v320_v29 = vsel %vm14022_vm4, 0, %v319_v12  ;;  %v376_v32 = vsel %vm14032_vm7, 0, %v375_v13  ;;  %v928_v39 = vld [vmem:[#allocation2 + $0x60] sm:$0xf] }
  0x5a   : > { %v1205_v35 = vrot.slane %v1204_v20, 4  ;;  %v686_v37 = vrot.slane %v684_v22, 7  ;;  %321 = vst [vmem:[#allocation2 + $0x6c] sm:$0x1] %v320_v29  ;;  %377 = vst [vmem:[#allocation2 + $0x74] sm:$0x1] %v376_v32 }
  0x5b   : > { %v693_v40 = vshrl.u32 %v538_v19, 16  ;;  %v696_v41 = vshll.u32 %v538_v19, 16  ;;  %v1200_v42 = vsel %vm14127_vm13, %v1195_v25, %v1199_v36  ;;  %v681_v31 = vor.u32 %v679_v21, %v678_v26  ;;  %v932_v43 = vld [vmem:[#allocation2 + $0x68] sm:$0x1]  ;;  %v322_v52 = vld [vmem:[#allocation2 + $0x78] sm:$0x1] }
  0x5c   : > { %v682_v5 = vrot.slane %v678_v26, 4  ;;  %v701_v18 = vshrl.u32 %v539_v24, 16  ;;  %v1210_v44 = vsel %vm14127_vm13, %v1205_v35, %v1209_v15  ;;  %v689_v45 = vor.u32 %v687_v23, %v686_v37  ;;  %v378_v53 = vld [vmem:[#allocation2 + $0x80] sm:$0x1]  ;;  %v14256_v59 = vld [vmem:[%s14067_s11 + $0x48] sm:$0xf] }
  0x5d   : > { %v691_v46 = vrot.slane %v686_v37, 4  ;;  %v695_v47 = vrot.slane %v693_v40, 7  ;;  %v11368_v48 = vcombine.low %v1200_v42, %v1210_v44  ;;  %v929_v49 = vsel %vm14083_vm9, %v681_v31, %v928_v39  ;;  %v1006_v55 = vld [vmem:[#allocation2 + $0x58] sm:$0xf]  ;;  %v14261_v1 = vld [vmem:[%s14067_s11 + $0x4c] sm:$0xf] }
  0x5e   : > { %v703_v50 = vrot.slane %v701_v18, 7  ;;  %v704_v51 = vshll.u32 %v539_v24, 16  ;;  %v1005_v54 = vld [vmem:[#allocation2 + $0x54] sm:$0xf]  ;;  %v690_v28 = vsel %vm14091_vm12, %v682_v5, %v689_v45  ;;  %930 = vst [vmem:[#allocation2 + $0x60] sm:$0xf] %v929_v49  ;;  %v11396_v45 = vcombine.low %v14136_v33, %v14138_v34 }
  0x5f   : > { %v933_v56 = vsel %vm14022_vm4, %v691_v46, %v932_v43  ;;  %v698_v57 = vor.u32 %v696_v41, %v695_v47  ;;  %v699_v58 = vrot.slane %v695_v47, 4  ;;  %12542 = vmatprep.mubr.msk.bf16.mxu0 %vm1480_vm14, %v11368_v48  ;;  %v1031_v60 = vld [vmem:[#allocation2 + $0x5c] sm:$0x1]  ;;  %v1212_v61 = vshrl.u32 %v1005_v54, 16  ;;  %931 = vst.msk [vmem:[#allocation2 + $0x64] sm:$0xf] %vm280_vm1, %v690_v28 }
  0x60   : > { %v1215_v62 = vshll.u32 %v1005_v54, 16  ;;  %v1221_v63 = vshll.u32 %v1006_v55, 16  ;;  %v1225_v0 = vshrl.u32 %v1006_v55, 16  ;;  %934 = vst [vmem:[#allocation2 + $0x68] sm:$0x1] %v933_v56  ;;  %v1231_v7 = vshll.u32 %v1031_v60, 16 }
  0x61   : > { %v325_v6 = vld [vmem:[#allocation2 + $0x84] sm:$0x1]  ;;  %v706_v8 = vor.u32 %v704_v51, %v703_v50  ;;  %v708_v36 = vrot.slane %v703_v50, 4  ;;  %v323_v9 = vsel %vm14022_vm4, 0, %v322_v52  ;;  %v381_v10 = vld [vmem:[#allocation2 + $0x8c] sm:$0x1] }
  0x62   : > { %v1214_v11 = vrot.slane %v1212_v61, 4  ;;  %v1217_v12 = vrot.slane %v1215_v62, 5  ;;  %v1223_v13 = vrot.slane %v1221_v63, 5  ;;  %v1227_v14 = vrot.slane %v1225_v0, 4  ;;  %v935_v15 = vld [vmem:[#allocation2 + $0x6c] sm:$0xf] }
  0x63   : > { %324 = vst [vmem:[#allocation2 + $0x78] sm:$0x1] %v323_v9  ;;  %v1233_v16 = vrot.slane %v1231_v7, 5  ;;  %v707_v17 = vsel %vm14091_vm12, %v699_v58, %v706_v8  ;;  %v936_v19 = vsel %vm14083_vm9, %v698_v57, %v935_v15  ;;  %v939_v20 = vld [vmem:[#allocation2 + $0x74] sm:$0x1]  ;;  %v379_v21 = vsel %vm14032_vm7, 0, %v378_v53 }
  0x64   : > { %v14274_v22 = vld [vmem:[%s17884_s1 + $0x4] sm:$0x3]  ;;  %v1218_v23 = vor.u32 %v1217_v12, %v1214_v11  ;;  %v1228_v24 = vor.u32 %v1227_v14, %v1223_v13  ;;  %937 = vst [vmem:[#allocation2 + $0x6c] sm:$0xf] %v936_v19  ;;  %938 = vst.msk [vmem:[#allocation2 + $0x70] sm:$0xf] %vm280_vm1, %v707_v17  ;;  %v940_v25 = vsel %vm14022_vm4, %v708_v36, %v939_v20 }
  0x65   : > { %380 = vst [vmem:[#allocation2 + $0x80] sm:$0x1] %v379_v21  ;;  %v710_v26 = vshrl.u32 %v14256_v59, 16  ;;  %13786 = vmatprep.subr.msk.bf16.mxu0 %vm1529_vm0, %v14274_v22  ;;  %941 = vst [vmem:[#allocation2 + $0x74] sm:$0x1] %v940_v25  ;;  %v713_v29 = vshll.u32 %v14256_v59, 16 }
  0x66   : > { %v718_v32 = vshrl.u32 %v14261_v1, 16  ;;  %v721_v35 = vshll.u32 %v14261_v1, 16  ;;  %v326_v37 = vsel %vm14022_vm4, 0, %v325_v6  ;;  %v1219_v39 = vrot.slane %v1218_v23, 4  ;;  %v14287_v41 = vld [vmem:[#allocation2 + $0x60] sm:$0xf] }
  0x67   : > { %v1229_v40 = vrot.slane %v1228_v24, 4  ;;  %v712_v42 = vrot.slane %v710_v26, 7  ;;  %327 = vst [vmem:[#allocation2 + $0x84] sm:$0x1] %v326_v37  ;;  %v382_v31 = vsel %vm14032_vm7, 0, %v381_v10  ;;  %v1236_v18 = vshrl.u32 %v14287_v41, 16 }
  0x68   : > { %v14291_v5 = vld [vmem:[#allocation2 + $0x64] sm:$0xf]  ;;  %v1032_v43 = vld [vmem:[#allocation2 + $0x68] sm:$0x1]  ;;  %v1239_v44 = vshll.u32 %v14287_v41, 16  ;;  %v1224_v46 = vsel %vm14127_vm13, %v1219_v39, %v1223_v13  ;;  %v720_v61 = vrot.slane %v718_v32, 7 }
  0x69   : > { %383 = vst [vmem:[#allocation2 + $0x8c] sm:$0x1] %v382_v31  ;;  %v1234_v47 = vsel %vm14127_vm13, %v1229_v40, %v1233_v16  ;;  %v1245_v48 = vshll.u32 %v14291_v5, 16  ;;  %v1249_v49 = vshrl.u32 %v14291_v5, 16  ;;  %v1238_v51 = vrot.slane %v1236_v18, 4 }
  0x6a   : > { %v11369_v50 = vcombine.low %v1224_v46, %v1234_v47  ;;  %v1241_v52 = vrot.slane %v1239_v44, 5  ;;  %v1255_v53 = vshll.u32 %v1032_v43, 16  ;;  %v716_v28 = vrot.slane %v712_v42, 4  ;;  %v542_v7 = vld [vmem:[%s14067_s11 + $0x50] sm:$0xf] }
  0x6b   : > { %v1247_v54 = vrot.slane %v1245_v48, 5  ;;  %v1251_v55 = vrot.slane %v1249_v49, 4  ;;  %v14304_v58 = vld [vmem:[#allocation2 + $0x6c] sm:$0xf]  ;;  %v14306_v59 = vld [vmem:[#allocation2 + $0x70] sm:$0xf]  ;;  %v715_v60 = vor.u32 %v713_v29, %v712_v42  ;;  %v723_v10 = vor.u32 %v721_v35, %v720_v61 }
  0x6c   : > { %12543 = vmatmul.mubr.msk.bf16.gmra.mrb[12].mxu0 %vm1480_vm14, %v11369_v50  ;;  %v1242_v56 = vor.u32 %v1241_v52, %v1238_v51  ;;  %v1257_v57 = vrot.slane %v1255_v53, 5  ;;  %v1033_v63 = vld [vmem:[#allocation2 + $0x74] sm:$0x1]  ;;  %v1260_v0 = vshrl.u32 %v14304_v58, 16  ;;  %v1263_v1 = vshll.u32 %v14304_v58, 16 }
  0x6d   : > { %v1252_v62 = vor.u32 %v1251_v55, %v1247_v54  ;;  %v1269_v6 = vshll.u32 %v14306_v59, 16  ;;  %v1273_v36 = vshrl.u32 %v14306_v59, 16  ;;  %v1279_v9 = vshll.u32 %v1033_v63, 16  ;;  %v942_v11 = vld [vmem:[#allocation2 + $0x78] sm:$0xf] }
  0x6e   : > { %v1243_v8 = vrot.slane %v1242_v56, 4  ;;  %v543_v12 = vld [vmem:[%s14067_s11 + $0x54] sm:$0xf]  ;;  %v1262_v14 = vrot.slane %v1260_v0, 4  ;;  %v1265_v15 = vrot.slane %v1263_v1, 5  ;;  %v724_v23 = vsel %vm14091_vm12, %v716_v28, %v723_v10 }
  0x6f   : > { %v1253_v13 = vrot.slane %v1252_v62, 4  ;;  %v1271_v16 = vrot.slane %v1269_v6, 5  ;;  %v328_v17 = vld [vmem:[#allocation2 + $0x90] sm:$0x1]  ;;  %v1275_v20 = vrot.slane %v1273_v36, 4  ;;  %v1281_v21 = vrot.slane %v1279_v9, 5 }
  0x70   : > { %v1248_v19 = vsel %vm14127_vm13, %v1243_v8, %v1247_v54  ;;  %v946_v24 = vld [vmem:[#allocation2 + $0x80] sm:$0x1]  ;;  %v384_v25 = vld [vmem:[#allocation2 + $0x98] sm:$0x1]  ;;  %v1266_v29 = vor.u32 %v1265_v15, %v1262_v14  ;;  %v725_v32 = vrot.slane %v720_v61, 4  ;;  %v943_v35 = vsel %vm14083_vm9, %v715_v60, %v942_v11 }
  0x71   : > { %v1258_v26 = vsel %vm14127_vm13, %v1253_v13, %v1257_v57  ;;  %945 = vst.msk [vmem:[#allocation2 + $0x7c] sm:$0xf] %vm280_vm1, %v724_v23  ;;  %v544_v37 = vld [vmem:[%s14067_s11 + $0x58] sm:$0xf]  ;;  %v545_v39 = vld [vmem:[%s14067_s11 + $0x5c] sm:$0xf]  ;;  %v1276_v42 = vor.u32 %v1275_v20, %v1271_v16 }
  0x72   : > { %v11370_v40 = vcombine.low %v1248_v19, %v1258_v26  ;;  %944 = vst [vmem:[#allocation2 + $0x78] sm:$0xf] %v943_v35  ;;  %v727_v31 = vshrl.u32 %v542_v7, 16  ;;  %v730_v43 = vshll.u32 %v542_v7, 16  ;;  %v1267_v18 = vrot.slane %v1266_v29, 4 }
  0x73   : > { %v947_v44 = vsel %vm14022_vm4, %v725_v32, %v946_v24  ;;  %v735_v46 = vshrl.u32 %v543_v12, 16  ;;  %v738_v47 = vshll.u32 %v543_v12, 16  ;;  %v331_v48 = vld [vmem:[#allocation2 + $0x9c] sm:$0x1]  ;;  %v1277_v49 = vrot.slane %v1276_v42, 4 }
  0x74   : > { %12546 = vmatprep.mubr.msk.bf16.mxu0 %vm1480_vm14, %v11370_v40  ;;  %948 = vst [vmem:[#allocation2 + $0x80] sm:$0x1] %v947_v44  ;;  %v729_v50 = vrot.slane %v727_v31, 7  ;;  %v329_v51 = vsel %vm14022_vm4, 0, %v328_v17  ;;  %v385_v52 = vsel %vm14032_vm7, 0, %v384_v25  ;;  %v1272_v53 = vsel %vm14127_vm13, %v1267_v18, %v1271_v16 }
  0x75   : > { %v737_v54 = vrot.slane %v735_v46, 7  ;;  %v949_v55 = vld [vmem:[#allocation2 + $0x84] sm:$0xf]  ;;  %330 = vst [vmem:[#allocation2 + $0x90] sm:$0x1] %v329_v51  ;;  %v744_v28 = vshrl.u32 %v544_v37, 16  ;;  %v1282_v57 = vsel %vm14127_vm13, %v1277_v49, %v1281_v21 }
  0x76   : > { %386 = vst [vmem:[#allocation2 + $0x98] sm:$0x1] %v385_v52  ;;  %v747_v56 = vshll.u32 %v544_v37, 16  ;;  %v732_v60 = vor.u32 %v730_v43, %v729_v50  ;;  %v733_v61 = vrot.slane %v729_v50, 4  ;;  %v953_v62 = vld [vmem:[#allocation2 + $0x8c] sm:$0x1]  ;;  %v11371_v0 = vcombine.low %v1272_v53, %v1282_v57 }
  0x77   : > { %v752_v63 = vshrl.u32 %v545_v39, 16  ;;  %v740_v1 = vor.u32 %v738_v47, %v737_v54  ;;  %v742_v6 = vrot.slane %v737_v54, 4  ;;  %v746_v7 = vrot.slane %v744_v28, 7  ;;  %v387_v8 = vld [vmem:[#allocation2 + $0xa4] sm:$0x1] }
  0x78   : > { %v14336_v36 = vld [vmem:[#allocation2 + $0x7c] sm:$0xf]  ;;  %v950_v9 = vsel %vm14083_vm9, %v732_v60, %v949_v55  ;;  %v755_v11 = vshll.u32 %v545_v39, 16  ;;  %v332_v12 = vsel %vm14022_vm4, 0, %v331_v48  ;;  %v546_v13 = vld [vmem:[%s14067_s11 + $0x60] sm:$0xf]  ;;  %12547 = vmatmul.mubr.msk.bf16.gmra.mrb[16].mxu0 %vm1480_vm14, %v11371_v0 }
  0x79   : > { %v754_v10 = vrot.slane %v752_v63, 7  ;;  %v14344_v14 = vld [vmem:[#allocation2 + $0x78] sm:$0xf]  ;;  %v1293_v15 = vshll.u32 %v14336_v36, 16  ;;  %v1297_v16 = vshrl.u32 %v14336_v36, 16  ;;  %v741_v17 = vsel %vm14091_vm12, %v733_v61, %v740_v1 }
  0x7a   : > { %951 = vst [vmem:[#allocation2 + $0x84] sm:$0xf] %v950_v9  ;;  %v954_v19 = vsel %vm14022_vm4, %v742_v6, %v953_v62  ;;  %333 = vst [vmem:[#allocation2 + $0x9c] sm:$0x1] %v332_v12  ;;  %v1284_v20 = vshrl.u32 %v14344_v14, 16  ;;  %v1287_v21 = vshll.u32 %v14344_v14, 16  ;;  %v749_v23 = vor.u32 %v747_v56, %v746_v7 }
  0x7b   : > { %952 = vst.msk [vmem:[#allocation2 + $0x88] sm:$0xf] %vm280_vm1, %v741_v17  ;;  %955 = vst [vmem:[#allocation2 + $0x8c] sm:$0x1] %v954_v19  ;;  %v750_v24 = vrot.slane %v746_v7, 4  ;;  %v1295_v29 = vrot.slane %v1293_v15, 5  ;;  %v757_v35 = vor.u32 %v755_v11, %v754_v10 }
  0x7c   : > { %v14356_v25 = vld [vmem:[%s14067_s11 + $0x64] sm:$0xf]  ;;  %v14358_v26 = vld [vmem:[#allocation2 + $0x80] sm:$0x1]  ;;  %v1299_v32 = vrot.slane %v1297_v16, 4  ;;  %v759_v37 = vrot.slane %v754_v10, 4 }
  0x7d   : > { %v1286_v39 = vrot.slane %v1284_v20, 4  ;;  %v1289_v40 = vrot.slane %v1287_v21, 5  ;;  %v1303_v42 = vshll.u32 %v14358_v26, 16  ;;  %v956_v31 = vld [vmem:[#allocation2 + $0x90] sm:$0xf]  ;;  %v388_v43 = vsel %vm14032_vm7, 0, %v387_v8 }
  0x7e   : > { %v1300_v18 = vor.u32 %v1299_v32, %v1295_v29  ;;  %v758_v44 = vsel %vm14091_vm12, %v750_v24, %v757_v35  ;;  %v957_v46 = vsel %vm14083_vm9, %v749_v23, %v956_v31  ;;  %v960_v47 = vld [vmem:[#allocation2 + $0x98] sm:$0x1]  ;;  %389 = vst [vmem:[#allocation2 + $0xa4] sm:$0x1] %v388_v43  ;;  %v761_v48 = vshrl.u32 %v546_v13, 16 }
  0x7f   : > { %v334_v49 = vld [vmem:[#allocation2 + $0xa8] sm:$0x1]  ;;  %v1290_v50 = vor.u32 %v1289_v40, %v1286_v39  ;;  %v1305_v51 = vrot.slane %v1303_v42, 5  ;;  %958 = vst [vmem:[#allocation2 + $0x90] sm:$0xf] %v957_v46  ;;  %v961_v52 = vsel %vm14022_vm4, %v759_v37, %v960_v47  ;;  %v764_v53 = vshll.u32 %v546_v13, 16 }
  0x80   : > { %959 = vst.msk [vmem:[#allocation2 + $0x94] sm:$0xf] %vm280_vm1, %v758_v44  ;;  %v1301_v54 = vrot.slane %v1300_v18, 4  ;;  %962 = vst [vmem:[#allocation2 + $0x98] sm:$0x1] %v961_v52  ;;  %v763_v55 = vrot.slane %v761_v48, 7 }
  0x81   : > { %v769_v28 = vshrl.u32 %v14356_v25, 16  ;;  %v772_v56 = vshll.u32 %v14356_v25, 16  ;;  %v1291_v57 = vrot.slane %v1290_v50, 4  ;;  %v14372_v60 = vld [vmem:[#allocation2 + $0x84] sm:$0xf]  ;;  %v335_v62 = vsel %vm14022_vm4, 0, %v334_v49 }
  0x82   : > { %v963_v61 = vld [vmem:[#allocation2 + $0x9c] sm:$0xf]  ;;  %v390_v63 = vld [vmem:[#allocation2 + $0xb0] sm:$0x1]  ;;  %v14377_v0 = vld [vmem:[%s14067_s11 + $0x68] sm:$0xf]  ;;  %v1306_v1 = vsel %vm14127_vm13, %v1301_v54, %v1305_v51  ;;  %v766_v10 = vor.u32 %v764_v53, %v763_v55 }
  0x83   : > { %v14381_v6 = vld [vmem:[#allocation2 + $0x88] sm:$0xf]  ;;  %v14383_v7 = vld [vmem:[#allocation2 + $0x8c] sm:$0x1]  ;;  %v1308_v8 = vshrl.u32 %v14372_v60, 16  ;;  %v1311_v9 = vshll.u32 %v14372_v60, 16  ;;  %v1296_v11 = vsel %vm14127_vm13, %v1291_v57, %v1295_v29 }
  0x84   : > { %336 = vst [vmem:[#allocation2 + $0xa8] sm:$0x1] %v335_v62  ;;  %v1317_v12 = vshll.u32 %v14381_v6, 16  ;;  %v1321_v13 = vshrl.u32 %v14381_v6, 16  ;;  %v1327_v15 = vshll.u32 %v14383_v7, 16  ;;  %v11372_v16 = vcombine.low %v1296_v11, %v1306_v1 }
  0x85   : > { %v1310_v17 = vrot.slane %v1308_v8, 4  ;;  %v1313_v19 = vrot.slane %v1311_v9, 5  ;;  %v767_v20 = vrot.slane %v763_v55, 4  ;;  %v771_v25 = vrot.slane %v769_v28, 7  ;;  %v549_v54 = vld [vmem:[%s14067_s11 + $0x6c] sm:$0xf] }
  0x86   : > { %v1319_v21 = vrot.slane %v1317_v12, 5  ;;  %v1323_v23 = vrot.slane %v1321_v13, 4  ;;  %v1329_v24 = vrot.slane %v1327_v15, 5  ;;  %12550 = vmatprep.mubr.msk.bf16.mxu0 %vm1480_vm14, %v11372_v16  ;;  %v14393_v35 = vld [vmem:[#allocation2 + $0x90] sm:$0xf]  ;;  %v964_v37 = vsel %vm14083_vm9, %v766_v10, %v963_v61 }
  0x87   : > { %v1314_v32 = vor.u32 %v1313_v19, %v1310_v17  ;;  %v14395_v29 = vld [vmem:[#allocation2 + $0x94] sm:$0xf]  ;;  %v391_v39 = vsel %vm14032_vm7, 0, %v390_v63  ;;  %v778_v40 = vshrl.u32 %v14377_v0, 16  ;;  %v14402_v31 = vld [vmem:[#allocation2 + $0x98] sm:$0x1]  ;;  %v774_v49 = vor.u32 %v772_v56, %v771_v25 }
  0x88   : > { %v1324_v42 = vor.u32 %v1323_v23, %v1319_v21  ;;  %v1332_v43 = vshrl.u32 %v14393_v35, 16  ;;  %v1335_v18 = vshll.u32 %v14393_v35, 16  ;;  %v1341_v44 = vshll.u32 %v14395_v29, 16  ;;  %965 = vst [vmem:[#allocation2 + $0x9c] sm:$0xf] %v964_v37 }
  0x89   : > { %392 = vst [vmem:[#allocation2 + $0xb0] sm:$0x1] %v391_v39  ;;  %v1315_v46 = vrot.slane %v1314_v32, 4  ;;  %v1345_v47 = vshrl.u32 %v14395_v29, 16  ;;  %v1351_v48 = vshll.u32 %v14402_v31, 16  ;;  %v775_v61 = vsel %vm14091_vm12, %v767_v20, %v774_v49 }
  0x8a   : > { %v1325_v50 = vrot.slane %v1324_v42, 4  ;;  %v1334_v51 = vrot.slane %v1332_v43, 4  ;;  %v1337_v52 = vrot.slane %v1335_v18, 5  ;;  %v1343_v53 = vrot.slane %v1341_v44, 5  ;;  %v967_v62 = vld [vmem:[#allocation2 + $0xa4] sm:$0x1] }
  0x8b   : > { %v1320_v55 = vsel %vm14127_vm13, %v1315_v46, %v1319_v21  ;;  %v1347_v28 = vrot.slane %v1345_v47, 4  ;;  %v1353_v57 = vrot.slane %v1351_v48, 5  ;;  %v337_v63 = vld [vmem:[#allocation2 + $0xb4] sm:$0x1]  ;;  %v776_v8 = vrot.slane %v771_v25, 4 }
  0x8c   : > { %v1330_v1 = vsel %vm14127_vm13, %v1325_v50, %v1329_v24  ;;  %v1338_v56 = vor.u32 %v1337_v52, %v1334_v51  ;;  %966 = vst.msk [vmem:[#allocation2 + $0xa0] sm:$0xf] %vm280_vm1, %v775_v61  ;;  %v780_v9 = vrot.slane %v778_v40, 7  ;;  %v781_v12 = vshll.u32 %v14377_v0, 16  ;;  %v393_v15 = vld [vmem:[#allocation2 + $0xbc] sm:$0x1] }
  0x8d   : > { %v11373_v10 = vcombine.low %v1320_v55, %v1330_v1  ;;  %v1348_v11 = vor.u32 %v1347_v28, %v1343_v53  ;;  %v786_v13 = vshrl.u32 %v549_v54, 16  ;;  %v968_v17 = vsel %vm14022_vm4, %v776_v8, %v967_v62  ;;  %v970_v20 = vld [vmem:[#allocation2 + $0xa8] sm:$0xf]  ;;  %v550_v21 = vld [vmem:[%s14067_s11 + $0x70] sm:$0xf] }
  0x8e   : > { %v1339_v16 = vrot.slane %v1338_v56, 4  ;;  %v789_v19 = vshll.u32 %v549_v54, 16  ;;  %969 = vst [vmem:[#allocation2 + $0xa4] sm:$0x1] %v968_v17  ;;  %v783_v25 = vor.u32 %v781_v12, %v780_v9  ;;  %v784_v32 = vrot.slane %v780_v9, 4 }
  0x8f   : > { %12551 = vmatmul.mubr.msk.bf16.gmra.mrb[20].mxu0 %vm1480_vm14, %v11373_v10  ;;  %v1349_v23 = vrot.slane %v1348_v11, 4  ;;  %v14422_v24 = vld [vmem:[#allocation2 + $0x9c] sm:$0xf]  ;;  %v788_v37 = vrot.slane %v786_v13, 7  ;;  %v551_v39 = vld [vmem:[%s14067_s11 + $0x74] sm:$0xf] }
  0x90   : > { %v1344_v0 = vsel %vm14127_vm13, %v1339_v16, %v1343_v53  ;;  %v1356_v40 = vshrl.u32 %v14422_v24, 16  ;;  %v1359_v42 = vshll.u32 %v14422_v24, 16  ;;  %v974_v43 = vld [vmem:[#allocation2 + $0xb0] sm:$0x1]  ;;  %v338_v18 = vsel %vm14022_vm4, 0, %v337_v63 }
  0x91   : > { %v1354_v44 = vsel %vm14127_vm13, %v1349_v23, %v1353_v57  ;;  %v791_v46 = vor.u32 %v789_v19, %v788_v37  ;;  %v793_v47 = vrot.slane %v788_v37, 4  ;;  %v971_v48 = vsel %vm14083_vm9, %v783_v25, %v970_v20  ;;  %339 = vst [vmem:[#allocation2 + $0xb4] sm:$0x1] %v338_v18  ;;  %v14450_v19 = vld [vmem:[#allocation2 + $0x10] sm:$0xf] }
  0x92   : > { %v11374_v49 = vcombine.low %v1344_v0, %v1354_v44  ;;  %v1358_v50 = vrot.slane %v1356_v40, 4  ;;  %v1361_v51 = vrot.slane %v1359_v42, 5  ;;  %972 = vst [vmem:[#allocation2 + $0xa8] sm:$0xf] %v971_v48  ;;  %v394_v52 = vsel %vm14032_vm7, 0, %v393_v15 }
  0x93   : > { %v14437_v53 = vld [vmem:[#allocation2 + $0xa0] sm:$0xf]  ;;  %v792_v54 = vsel %vm14091_vm12, %v784_v32, %v791_v46  ;;  %v975_v55 = vsel %vm14022_vm4, %v793_v47, %v974_v43  ;;  %395 = vst [vmem:[#allocation2 + $0xbc] sm:$0x1] %v394_v52  ;;  %v795_v28 = vshrl.u32 %v550_v21, 16  ;;  %v798_v57 = vshll.u32 %v550_v21, 16 }
  0x94   : > { %12554 = vmatprep.mubr.msk.bf16.mxu0 %vm1480_vm14, %v11374_v49  ;;  %v1362_v61 = vor.u32 %v1361_v51, %v1358_v50  ;;  %v1365_v62 = vshll.u32 %v14437_v53, 16  ;;  %v1369_v63 = vshrl.u32 %v14437_v53, 16  ;;  %973 = vst.msk [vmem:[#allocation2 + $0xac] sm:$0xf] %vm280_vm1, %v792_v54  ;;  %976 = vst [vmem:[#allocation2 + $0xb0] sm:$0x1] %v975_v55  ;;  %v11405_v42 = vcombine.low %v14344_v14, %v14336_v36 }
  0x95   : > { %v803_v1 = vshrl.u32 %v551_v39, 16  ;;  %v797_v56 = vrot.slane %v795_v28, 7  ;;  %v806_v8 = vshll.u32 %v551_v39, 16  ;;  %v14447_v9 = vld [vmem:[#allocation2 + $0xa4] sm:$0x1]  ;;  %v2046_v20 = vrot.slane %v14450_v19, 5 }
  0x96   : > { %v1363_v10 = vrot.slane %v1362_v61, 4  ;;  %v1367_v11 = vrot.slane %v1365_v62, 5  ;;  %v1371_v12 = vrot.slane %v1369_v63, 4  ;;  %v1375_v15 = vshll.u32 %v14447_v9, 16  ;;  %v1987_v55 = vld [vmem:[#allocation2 + $0xc] sm:$0xe] }
  0x97   : > { %v805_v13 = vrot.slane %v803_v1, 7  ;;  %v800_v16 = vor.u32 %v798_v57, %v797_v56  ;;  %v801_v17 = vrot.slane %v797_v56, 4  ;;  %v11406_v51 = vcombine.low %v14372_v60, %v14381_v6  ;;  %v13914_v33 = vld [vmem:[#allocation2 + $0x24] sm:$0xf] }
  0x98   : > { %v1372_v21 = vor.u32 %v1371_v12, %v1367_v11  ;;  %v977_v32 = vld [vmem:[#allocation2 + $0xb4] sm:$0xf]  ;;  %v1368_v37 = vsel %vm14127_vm13, %v1363_v10, %v1367_v11  ;;  %v1377_v39 = vrot.slane %v1375_v15, 5  ;;  %v11407_v52 = vcombine.low %v14393_v35, %v14395_v29 }
  0x99   : > { %v808_v23 = vor.u32 %v806_v8, %v805_v13  ;;  %v810_v25 = vrot.slane %v805_v13, 4  ;;  %v14455_v0 = vld [vmem:[#allocation2 + $0xa8] sm:$0xf]  ;;  %v978_v40 = vsel %vm14083_vm9, %v800_v16, %v977_v32  ;;  %v11408_v54 = vcombine.low %v14422_v24, %v14437_v53  ;;  %v13908_v13 = vld [vmem:[#allocation2 + $0x14] sm:$0x1] }
  0x9a   : > { %v1373_v43 = vrot.slane %v1372_v21, 4  ;;  %v1380_v18 = vshrl.u32 %v14455_v0, 16  ;;  %v1383_v44 = vshll.u32 %v14455_v0, 16  ;;  %979 = vst [vmem:[#allocation2 + $0xb4] sm:$0xf] %v978_v40  ;;  %vm2034_vm15 = vcmask 1042432  }
  0x9b   : > { %v809_v46 = vsel %vm14091_vm12, %v801_v17, %v808_v23  ;;  %v981_v47 = vld [vmem:[#allocation2 + $0xbc] sm:$0x1]  ;;  %v14465_v48 = vld [vmem:[#allocation2 + $0xac] sm:$0xf]  ;;  %v14467_v49 = vld [vmem:[#allocation2 + $0xb0] sm:$0x1] }
  0x9c   : > { %980 = vst.msk [vmem:[#allocation2 + $0xb8] sm:$0xf] %vm280_vm1, %v809_v46  ;;  %v982_v50 = vsel %vm14022_vm4, %v810_v25, %v981_v47  ;;  %v1378_v28 = vsel %vm14127_vm13, %v1373_v43, %v1377_v39  ;;  %v1382_v57 = vrot.slane %v1380_v18, 4  ;;  %v1385_v61 = vrot.slane %v1383_v44, 5  ;;  %v13924_v24 = vld [vmem:[#allocation2 + $0x20] sm:$0x1] }
  0x9d   : > { %v1389_v62 = vshll.u32 %v14465_v48, 16  ;;  %983 = vst [vmem:[#allocation2 + $0xbc] sm:$0x1] %v982_v50  ;;  %v11375_v63 = vcombine.low %v1368_v37, %v1378_v28  ;;  %v1393_v1 = vshrl.u32 %v14465_v48, 16  ;;  %v1399_v56 = vshll.u32 %v14467_v49, 16  ;;  %v13829_v4 = vld [vmem:[#allocation2 + $0xa8] sm:$0xff]  }
  0x9e   : > { %v11409_v8 = vcombine.low %v14455_v0, %v14465_v48  ;;  %v1386_v10 = vor.u32 %v1385_v61, %v1382_v57  ;;  %vm2035_vm2 = vcmask 1046532   ;;  %v2049_v15 = vrot.slane %v13908_v13, 5 }
  0x9f   : > { %v1391_v11 = vrot.slane %v1389_v62, 5  ;;  %12555 = vmatmul.mubr.msk.bf16.gmra.mrb[24].mxu0 %vm1480_vm14, %v11375_v63  ;;  %v1395_v12 = vrot.slane %v1393_v1, 4  ;;  %v11428_v17 = vrot.slane %v1987_v55, 9  ;;  %v1401_v21 = vrot.slane %v1399_v56, 5  ;;  %vm14488_vm8 = vmor %vm2034_vm15, %vm2035_vm2 }
  0xa0   : > { %v1387_v16 = vrot.slane %v1386_v10, 4  ;;  %v2048_v32 = vrot.slane %v2046_v20, 4 }
  0xa1   : > { %v1396_v19 = vor.u32 %v1395_v12, %v1391_v11  ;;  %v14486_v23 = vld [vmem:[#allocation2 + $0xb4] sm:$0xf]  ;;  %v14507_v61 = vsel %vm14488_vm8, %v11428_v17, %v2046_v20 }
  0xa2   : > { %v1392_v37 = vsel %vm14127_vm13, %v1387_v16, %v1391_v11  ;;  %v1404_v40 = vshrl.u32 %v14486_v23, 16  ;;  %v1407_v43 = vshll.u32 %v14486_v23, 16  ;;  %v14513_v11 = vsel %vm14488_vm8, %v2048_v32, %v2049_v15 }
  0xa3   : > { %v14494_v39 = vld [vmem:[#allocation2 + $0xb8] sm:$0xf]  ;;  %v1397_v18 = vrot.slane %v1396_v19, 4  ;;  %v11444_v16 = vcombine.low %v14507_v61, %v14513_v11  ;;  %v1991_v61 = vld [vmem:[#allocation2 + $0x3c] sm:$0xe] }
  0xa4   : > { %v14498_v44 = vld [vmem:[#allocation2 + $0xbc] sm:$0x1]  ;;  %v1413_v46 = vshll.u32 %v14494_v39, 16  ;;  %v1417_v47 = vshrl.u32 %v14494_v39, 16  ;;  %v11410_v50 = vcombine.low %v14486_v23, %v14494_v39  ;;  %v1406_v55 = vrot.slane %v1404_v40, 4 }
  0xa5   : > { %v1409_v28 = vrot.slane %v1407_v43, 5  ;;  %v1423_v57 = vshll.u32 %v14498_v44, 16  ;;  %v1402_v62 = vsel %vm14127_vm13, %v1397_v18, %v1401_v21  ;;  %v13910_v40 = vld [vmem:[#allocation2] sm:$0xf]  ;;  %v1996_v18 = vld [vmem:[#allocation2 + $0x78] sm:$0xe] }
  0xa6   : > { %v1415_v63 = vrot.slane %v1413_v46, 5  ;;  %v1419_v1 = vrot.slane %v1417_v47, 4  ;;  %v11376_v56 = vcombine.low %v1392_v37, %v1402_v62  ;;  %v14522_v37 = vld [vmem:[#allocation2 + $0x4] sm:$0xf]  ;;  %v13911_v46 = vld [vmem:[#allocation2 + $0x18] sm:$0xf] }
  0xa7   : > { %v1410_v10 = vor.u32 %v1409_v28, %v1406_v55  ;;  %v1425_v13 = vrot.slane %v1423_v57, 5  ;;  %v11395_v15 = vcombine.low %v13910_v40, %v14522_v37  ;;  %v14530_v43 = vld [vmem:[%s17884_s1 + $0x4] ss:$0 sps:$4 sm:$0xcc]   ;;  %v14532_v47 = vld [vmem:[#allocation2 + $0x1c] sm:$0xf] }
  0xa8   : > { %v1420_v12 = vor.u32 %v1419_v1, %v1415_v63  ;;  %12558 = vmatprep.mubr.msk.bf16.mxu0 %vm1480_vm14, %v11376_v56  ;;  %v11397_v55 = vcombine.low %v13911_v46, %v14532_v47  ;;  %v1997_v28 = vld [vmem:[#allocation2 + $0x84] sm:$0xe]  ;;  %v2247_v57 = vsel %vm1529_vm0, %v14274_v22, 0  ;;  %v2558_v62 = vrot.slane %v14530_v43, 2  ;;  %v13925_v23 = vld [vmem:[#allocation2 + $0x2c] sm:$0x1] }
  0xa9   : > { %v1411_v20 = vrot.slane %v1410_v10, 4  ;;  %v11437_v1 = vrot.slane %v1996_v18, 9  ;;  %v2109_v56 = vrot.slane %v14336_v36, 5  ;;  %v2112_v10 = vrot.slane %v14358_v26, 5 }
  0xaa   : > { %v1421_v17 = vrot.slane %v1420_v12, 4  ;;  %v1999_v12 = vld [vmem:[#allocation2 + $0x9c] sm:$0xe]  ;;  %v2123_v40 = vrot.slane %v14395_v29, 5  ;;  %v2039_v36 = vrot.slane %v14522_v37, 5 }
  0xab   : > { %v1416_v19 = vsel %vm14127_vm13, %v1411_v20, %v1415_v63  ;;  %v1998_v63 = vld [vmem:[#allocation2 + $0x90] sm:$0xe]  ;;  %v14547_v22 = vsel %vm14488_vm8, %v11437_v1, %v2109_v56  ;;  %v11438_v20 = vrot.slane %v1997_v28, 9  ;;  %v1988_v37 = vld [vmem:[#allocation2 + $0x18] sm:$0xe] }
  0xac   : > { %v1426_v21 = vsel %vm14127_vm13, %v1421_v17, %v1425_v13  ;;  %v2111_v13 = vrot.slane %v2109_v56, 4  ;;  %v2116_v17 = vrot.slane %v14381_v6, 5  ;;  %v11439_v26 = vrot.slane %v1998_v63, 9  ;;  %v13923_v6 = vld [vmem:[#allocation2 + $0x8] sm:$0x1] }
  0xad   : > { %v11377_v32 = vcombine.low %v1416_v19, %v1426_v21  ;;  %v2000_v19 = vld [vmem:[#allocation2 + $0xa8] sm:$0xe]  ;;  %v2125_v1 = vrot.slane %v2123_v40, 4  ;;  %v2126_v56 = vrot.slane %v14402_v31, 5 }
  0xae   : > { %v14550_v21 = vld [vmem:[#allocation2 + $0x28] sm:$0xf]  ;;  %v14563_v46 = vsel %vm14488_vm8, %v2111_v13, %v2112_v10  ;;  %v2118_v28 = vrot.slane %v2116_v17, 4  ;;  %v14573_v63 = vsel %vm14488_vm8, %v11439_v26, %v2123_v40  ;;  %v11440_v13 = vrot.slane %v1999_v12, 9 }
  0xaf   : > { %12559 = vmatmul.mubr.msk.bf16.gmra.mrb[28].mxu0 %vm1480_vm14, %v11377_v32  ;;  %v11398_v34 = vcombine.low %v13914_v33, %v14550_v21  ;;  %v14558_v32 = vld [vmem:[#allocation2 + $0x34] sm:$0xf]  ;;  %v11441_v26 = vrot.slane %v2000_v19, 9  ;;  %v2137_v40 = vrot.slane %v14465_v48, 5  ;;  %v2060_v0 = vrot.slane %v14550_v21, 5 }
  0xb0   : > { %12564 = vmatprep.mubr.msk.bf16.mxu0 %vm1480_vm14, %v11395_v15  ;;  %v13915_v15 = vld [vmem:[#allocation2 + $0x30] sm:$0xf] }
  0xb1   : > { %v11399_v18 = vcombine.low %v13915_v15, %v14558_v32  ;;  %v14586_v15 = vsel %vm14488_vm8, %v2125_v1, %v2126_v56  ;;  %v2139_v1 = vrot.slane %v2137_v40, 4  ;;  %v2144_v56 = vrot.slane %v14494_v39, 5 }
  0xb2   : > { %v11455_v31 = vcombine.low %v14573_v63, %v14586_v15  ;;  %v2063_v39 = vrot.slane %v13925_v23, 5  ;;  %v14777_v63 = vld [vmem:[%s17884_s1 + $0x8] ss:$0 sps:$4 sm:$0xcc]  }
  0xb7   : > { %12565 = vmatmul.mubr.msk.bf16.vlgmr.msra.gmra.mrb[0].mxu0 %vm1480_vm14, %v11396_v45  ;;  %v2119_v45 = vrot.slane %v14383_v7, 5  ;;  %v11453_v7 = vcombine.low %v14547_v22, %v14563_v46 }
  0xb8   : > { %12597 = vmatpush3.bf16.msra.mxu0 %v2247_v57  ;;  %12568 = vmatprep.mubr.msk.bf16.mxu0 %vm1480_vm14, %v11397_v55  ;;  %v14567_v55 = vsel %vm14488_vm8, %v11438_v20, %v2116_v17  ;;  %v2001_v57 = vld [vmem:[#allocation2 + $0xb4] sm:$0xe]  ;;  %v2130_v20 = vrot.slane %v14437_v53, 5  ;;  %v2133_v17 = vrot.slane %v14447_v9, 5  ;;  %v2140_v9 = vrot.slane %v14467_v49, 5 }
  0xb9   : > { %13787 = vmatprep.subr.msk.bf16.mxu0 %vm1529_vm0, %v2558_v62  ;;  %v14578_v10 = vsel %vm14488_vm8, %v2118_v28, %v2119_v45  ;;  %v14599_v28 = vsel %vm14488_vm8, %v11441_v26, %v2137_v40  ;;  %v11442_v19 = vrot.slane %v2001_v57, 9  ;;  %v13917_v26 = vld [vmem:[#allocation2 + $0x3c] sm:$0xf]  ;;  %v2056_v53 = vrot.slane %v13924_v24, 5 }
  0xba   : > { %v11454_v33 = vcombine.low %v14567_v55, %v14578_v10  ;;  %v14593_v12 = vsel %vm14488_vm8, %v11440_v13, %v2130_v20  ;;  %v2132_v45 = vrot.slane %v2130_v20, 4  ;;  %v2147_v13 = vrot.slane %v14498_v44, 5  ;;  %v13816_v55 = vld [vmem:[#allocation2 + $0xc] sm:$0xff]  }
  0xbb   : > { %v14616_v57 = vsel %vm14488_vm8, %v11442_v19, %v2144_v56  ;;  %v2146_v20 = vrot.slane %v2144_v56, 4  ;;  %v13921_v56 = vld [vmem:[#allocation2 + $0x54] sm:$0xf] }
  0xbc   : > { %v14605_v2 = vsel %vm14488_vm8, %v2132_v45, %v2133_v17  ;;  %v14620_v17 = vld [vmem:[#allocation2 + $0x40] sm:$0xf]  ;;  %v13919_v45 = vld [vmem:[#allocation2 + $0x48] sm:$0xf] }
  0xbd   : > { %v11456_v49 = vcombine.low %v14593_v12, %v14605_v2  ;;  %v11400_v44 = vcombine.low %v13917_v26, %v14620_v17  ;;  %v14625_v40 = vsel %vm14488_vm8, %v2146_v20, %v2147_v13  ;;  %v14634_v26 = vld [vmem:[#allocation2 + $0x58] sm:$0xf]  ;;  %v11403_v20 = vcombine.low %v14287_v41, %v14291_v5  ;;  %v553_v5 = vld [vmem:[%s14067_s11 + $0x7c] sm:$0xf] }
  0xbe   : > { %v11402_v13 = vcombine.low %v13921_v56, %v14634_v26  ;;  %v552_v41 = vld [vmem:[%s14067_s11 + $0x78] sm:$0xf] }
  0xbf   : > { %12569 = vmatmul.mubr.msk.bf16.gmra.mrb[4].mxu0 %vm1480_vm14, %v11398_v34  ;;  %v14612_v34 = vsel %vm14488_vm8, %v2139_v1, %v2140_v9  ;;  %v14627_v9 = vld [vmem:[#allocation2 + $0x4c] sm:$0xf] }
  0xc0   : > { %12572 = vmatprep.mubr.msk.bf16.mxu0 %vm1480_vm14, %v11399_v18  ;;  %v11401_v1 = vcombine.low %v13919_v45, %v14627_v9  ;;  %v11404_v45 = vcombine.low %v14304_v58, %v14306_v59  ;;  %v812_v58 = vshrl.u32 %v552_v41, 16  ;;  %v820_v59 = vshrl.u32 %v553_v5, 16 }
  0xc1   : > { %v2041_v18 = vrot.slane %v2039_v36, 4  ;;  %v2081_v11 = vrot.slane %v14627_v9, 5  ;;  %v18014_v22 = vcombine.low %v14599_v28, %v14612_v34  ;;  %v17893_v28 = vrot.slane %v14777_v63, 2  ;;  %v14788_v34 = vld [vmem:[#allocation2 + $0x38] sm:$0x1] }
  0xc2   : > { %v814_v14 = vrot.slane %v812_v58, 7  ;;  %v14661_v56 = vrot.slane %v820_v59, 7  ;;  %v11429_v58 = vrot.slane %v1988_v37, 9  ;;  %v13928_v37 = vld [vmem:[#allocation2 + $0x50] sm:$0x1] }
  0xc4   : > { %v827_v2 = vrot.slane %v14661_v56, 4 }
  0xc7   : > { %12573 = vmatmul.mubr.msk.bf16.gmra.mrb[8].mxu0 %vm1480_vm14, %v11400_v44  ;;  %v340_v44 = vld [vmem:[#allocation2 + $0xc0] sm:$0x1] }
  0xc8   : > { %12576 = vmatprep.mubr.msk.bf16.mxu0 %vm1480_vm14, %v11401_v1  ;;  %v341_v1 = vsel %vm14022_vm4, 0, %v340_v44  ;;  %v818_v44 = vrot.slane %v814_v14, 4 }
  0xc9   : > { %342 = vst [vmem:[#allocation2 + $0xc0] sm:$0x1] %v341_v1 }
  0xcf   : > { %12577 = vmatmul.mubr.msk.bf16.gmra.mrb[12].mxu0 %vm1480_vm14, %v11402_v13  ;;  %v823_v13 = vshll.u32 %v553_v5, 16 }
  0xd0   : > { %12580 = vmatprep.mubr.msk.bf16.mxu0 %vm1480_vm14, %v11403_v20  ;;  %v1986_v20 = vld [vmem:[#allocation2] sm:$0xe] }
  0xd1   : > { %v825_v60 = vor.u32 %v823_v13, %v14661_v56  ;;  %v984_v1 = vld [vmem:[#allocation2 + $0xc0] sm:$0xf]  ;;  %v11427_v19 = vrot.slane %v1986_v20, 9  ;;  %v13926_v13 = vld [vmem:[#allocation2 + $0x38] sm:$0x1] }
  0xd2   : > { %v2070_v20 = vrot.slane %v13926_v13, 5  ;;  %v13932_v13 = vld [vmem:[#allocation2 + $0x70] sm:$0xf] }
  0xd3   : > { %v826_v35 = vsel %vm14091_vm12, %v818_v44, %v825_v60 }
  0xd4   : > { %987 = vst.msk [vmem:[#allocation2 + $0xc4] sm:$0xf] %vm280_vm1, %v826_v35  ;;  %vm405_vm1 = vcmask 57344  }
  0xd7   : > { %12581 = vmatmul.mubr.msk.bf16.gmra.mrb[16].mxu0 %vm1480_vm14, %v11404_v45 }
  0xd8   : > { %12584 = vmatprep.mubr.msk.bf16.mxu0 %vm1480_vm14, %v11405_v42  ;;  %v815_v42 = vshll.u32 %v552_v41, 16  ;;  %v2053_v41 = vrot.slane %v14532_v47, 5  ;;  %v2067_v47 = vrot.slane %v14558_v32, 5  ;;  %v2074_v32 = vrot.slane %v14620_v17, 5 }
  0xda   : > { %v817_v45 = vor.u32 %v815_v42, %v814_v14  ;;  %v2055_v59 = vrot.slane %v2053_v41, 4  ;;  %v2054_v48 = vsel %vm14488_vm8, %v11429_v58, %v2053_v41  ;;  %v2062_v14 = vrot.slane %v2060_v0, 4 }
  0xdb   : > { %v2069_v42 = vrot.slane %v2067_v47, 4  ;;  %v2076_v35 = vrot.slane %v2074_v32, 4  ;;  %v2084_v41 = vrot.slane %v13928_v37, 5  ;;  %v2088_v58 = vrot.slane %v14634_v26, 5  ;;  %v13820_v37 = vld [vmem:[#allocation2 + $0x3c] sm:$0xff]  }
  0xdc   : > { %v985_v29 = vsel %vm14083_vm9, %v817_v45, %v984_v1  ;;  %v14699_v45 = vld [vmem:[%s17884_s1 + $0x8] sm:$0x3]  ;;  %v11432_v1 = vrot.slane %v1991_v61, 9  ;;  %vm6641_vm9 = vcmask 64512  }
  0xdd   : > { %986 = vst [vmem:[#allocation2 + $0xc0] sm:$0xf] %v985_v29  ;;  %v2071_v60 = vsel %vm14488_vm8, %v2069_v42, %v2070_v20  ;;  %v13927_v29 = vld [vmem:[#allocation2 + $0x44] sm:$0x1]  ;;  %v2102_v20 = vrot.slane %v13932_v13, 5  ;;  %v3333_v12 = vsel %vm1529_vm0, %v14699_v45, 0 }
  0xde   : > { %v2075_v9 = vsel %vm14488_vm8, %v11432_v1, %v2074_v32  ;;  %v1995_v32 = vld [vmem:[#allocation2 + $0x6c] sm:$0xe]  ;;  %v3535_v13 = vld [vmem:[#allocation2 + $0x60] sm:$0xe] }
  0xdf   : > { %12585 = vmatmul.mubr.msk.bf16.gmra.mrb[20].mxu0 %vm1480_vm14, %v11406_v51  ;;  %v2042_v51 = vrot.slane %v13923_v6, 5  ;;  %v11436_v61 = vrot.slane %v1995_v32, 9 }
  0xe0   : > { %12588 = vmatprep.mubr.msk.bf16.mxu0 %vm1480_vm14, %v11407_v52  ;;  %v2040_v52 = vsel %vm14488_vm8, %v11427_v19, %v2039_v36 }
  0xe1   : > { %v2043_v30 = vsel %vm14488_vm8, %v2041_v18, %v2042_v51  ;;  %v1990_v18 = vld [vmem:[#allocation2 + $0x30] sm:$0xe] }
  0xe2   : > { %v11443_v5 = vcombine.low %v2040_v52, %v2043_v30  ;;  %v11431_v21 = vrot.slane %v1990_v18, 9  ;;  %v2077_v52 = vrot.slane %v13927_v29, 5  ;;  %v2083_v30 = vrot.slane %v2081_v11, 4  ;;  %v396_v29 = vld [vmem:[#allocation2 + $0xc8] sm:$0x1] }
  0xe3   : > { %v397_v46 = vsel %vm14032_vm7, 0, %v396_v29  ;;  %v13824_v29 = vld [vmem:[#allocation2 + $0x6c] sm:$0xff]  }
  0xe4   : > { %v2068_v44 = vsel %vm14488_vm8, %v11431_v21, %v2067_v47  ;;  %v2085_v24 = vsel %vm14488_vm8, %v2083_v30, %v2084_v41  ;;  %398 = vst [vmem:[#allocation2 + $0xc8] sm:$0x1] %v397_v46 }
  0xe5   : > { %v11447_v51 = vcombine.low %v2068_v44, %v2071_v60 }
  0xe7   : > { %12589 = vmatmul.mubr.msk.bf16.gmra.mrb[24].mxu0 %vm1480_vm14, %v11408_v54  ;;  %v2057_v54 = vsel %vm14488_vm8, %v2055_v59, %v2056_v53  ;;  %v1993_v53 = vld [vmem:[#allocation2 + $0x54] sm:$0xe] }
  0xe8   : > { %12592 = vmatprep.mubr.msk.bf16.mxu0 %vm1480_vm14, %v11409_v8  ;;  %v1989_v8 = vld [vmem:[#allocation2 + $0x24] sm:$0xe]  ;;  %v11445_v19 = vcombine.low %v2054_v48, %v2057_v54  ;;  %v1994_v54 = vld [vmem:[#allocation2 + $0x60] sm:$0xe]  ;;  %v11434_v18 = vrot.slane %v1993_v53, 9 }
  0xe9   : > { %v11430_v36 = vrot.slane %v1989_v8, 9  ;;  %v11435_v23 = vrot.slane %v1994_v54, 9  ;;  %v13821_v54 = vld [vmem:[#allocation2 + $0x48] sm:$0xff]  }
  0xea   : > { %v2089_v21 = vsel %vm14488_vm8, %v11434_v18, %v2088_v58  ;;  %v13822_v18 = vld [vmem:[#allocation2 + $0x54] sm:$0xff]  }
  0xeb   : > { %v2061_v43 = vsel %vm14488_vm8, %v11430_v36, %v2060_v0  ;;  %v13929_v0 = vld [vmem:[#allocation2 + $0x64] sm:$0xf]  ;;  %v13930_v36 = vld [vmem:[#allocation2 + $0x5c] sm:$0x1]  ;;  %v988_v10 = vld [vmem:[#allocation2 + $0xc8] sm:$0x1] }
  0xec   : > { %v2095_v48 = vrot.slane %v13929_v0, 5  ;;  %v989_v15 = vsel %vm14022_vm4, %v827_v2, %v988_v10  ;;  %v14852_v10 = vld [vmem:[#allocation2 + $0x20] sm:$0x1] }
  0xed   : > { %990 = vst [vmem:[#allocation2 + $0xc8] sm:$0x1] %v989_v15  ;;  %v2809_v15 = vld [vmem:[#allocation2 + $0x24] sm:$0xf] }
  0xef   : > { %12593 = vmatmul.mubr.msk.bf16.gmra.mrb[28].mxu0 %vm1480_vm14, %v11410_v50  ;;  %v2608_v50 = vsel %vm1529_vm0, %v2558_v62, 0  ;;  %v2064_v62 = vsel %vm14488_vm8, %v2062_v14, %v2063_v39  ;;  %v2091_v14 = vrot.slane %v13930_v36, 5  ;;  %v2097_v39 = vrot.slane %v2095_v48, 4 }
  0xf0   : > { %12598 = vmatprep.mubr.msk.bf16.mxu0 %vm1480_vm14, %v11443_v5  ;;  %v11446_v6 = vcombine.low %v2061_v43, %v2064_v62  ;;  %v2078_v5 = vsel %vm14488_vm8, %v2076_v35, %v2077_v52  ;;  %v2096_v43 = vsel %vm14488_vm8, %v11435_v23, %v2095_v48 }
  0xf1   : > { %v11448_v8 = vcombine.low %v2075_v9, %v2078_v5  ;;  %v14806_v5 = vld [vmem:[#allocation2 + $0x4c] sm:$0xf] }
  0xf7   : > { %12599 = vmatmul.mubr.msk.bf16.vlgmr.msra.gmra.mrb[0].mxu0 %vm1480_vm14, %v11444_v16  ;;  %v1992_v16 = vld [vmem:[#allocation2 + $0x48] sm:$0xe] }
  0xf8   : > { %12631 = vmatpush3.bf16.msra.mxu0 %v2608_v50  ;;  %12602 = vmatprep.mubr.msk.bf16.mxu0 %vm1480_vm14, %v11445_v19  ;;  %v11433_v17 = vrot.slane %v1992_v16, 9  ;;  %v2090_v19 = vrot.slane %v2088_v58, 4  ;;  %v13931_v50 = vld [vmem:[#allocation2 + $0x68] sm:$0x1]  ;;  %v13933_v16 = vld [vmem:[#allocation2 + $0x74] sm:$0x1] }
  0xf9   : > { %13788 = vmatprep.subr.msk.bf16.mxu0 %vm1529_vm0, %v14699_v45  ;;  %v2098_v26 = vrot.slane %v13931_v50, 5  ;;  %v3618_v45 = vrot.slane %v14788_v34, 5  ;;  %v14808_v58 = vld [vmem:[#allocation2 + $0x50] sm:$0x1] }
  0xfa   : > { %v2082_v59 = vsel %vm14488_vm8, %v11433_v17, %v2081_v11  ;;  %v2092_v42 = vsel %vm14488_vm8, %v2090_v19, %v2091_v14  ;;  %v2104_v11 = vrot.slane %v2102_v20, 4  ;;  %v13819_v17 = vld [vmem:[#allocation2 + $0x30] sm:$0xff]   ;;  %v3632_v53 = vrot.slane %v14808_v58, 5 }
  0xfb   : > { %v11449_v47 = vcombine.low %v2082_v59, %v2085_v24  ;;  %v2099_v62 = vsel %vm14488_vm8, %v2097_v39, %v2098_v26  ;;  %v11450_v44 = vcombine.low %v2089_v21, %v2092_v42  ;;  %v3533_v59 = vld [vmem:[#allocation2 + $0x48] sm:$0xe]  ;;  %v3629_v24 = vrot.slane %v14806_v5, 5  ;;  %v14817_v19 = vld [vmem:[#allocation2 + $0x10] sm:$0xf] }
  0xfc   : > { %v11451_v60 = vcombine.low %v2096_v43, %v2099_v62  ;;  %v11545_v0 = vrot.slane %v3533_v59, 9  ;;  %v2861_v50 = vshll.u32 %v14817_v19, 16  ;;  %v2865_v26 = vshrl.u32 %v14817_v19, 16  ;;  %v14828_v21 = vld [vmem:[#allocation2 + $0x64] sm:$0xf] }
  0xfd   : > { %v3631_v48 = vrot.slane %v3629_v24, 4  ;;  %v14830_v42 = vld [vmem:[#allocation2 + $0x68] sm:$0x1]  ;;  %v11547_v62 = vrot.slane %v3535_v13, 9 }
  0xfe   : > { %v3646_v43 = vrot.slane %v14830_v42, 5 }
  0xff   : > { %12603 = vmatmul.mubr.msk.bf16.gmra.mrb[4].mxu0 %vm1480_vm14, %v11446_v6  ;;  %v2105_v6 = vrot.slane %v13933_v16, 5  ;;  %v14821_v36 = vsel %vm14488_vm8, %v3631_v48, %v3632_v53  ;;  %v14837_v16 = vld [vmem:[#allocation2 + $0x14] sm:$0x1]  ;;  %v2900_v53 = vshrl.u32 %v2809_v15, 16 }
 0x100   : > { %12606 = vmatprep.mubr.msk.bf16.mxu0 %vm1480_vm14, %v11447_v51  ;;  %v2103_v51 = vsel %vm14488_vm8, %v11436_v61, %v2102_v20  ;;  %18019 = vst [vmem:[#allocation9_spill] sm:$0xff] %v14821_v36  ;;  %v3643_v20 = vrot.slane %v14828_v21, 5  ;;  %v2871_v2 = vshll.u32 %v14837_v16, 16 }
 0x101   : > { %v2106_v1 = vsel %vm14488_vm8, %v2104_v11, %v2105_v6  ;;  %v13823_v11 = vld [vmem:[#allocation2 + $0x60] sm:$0xff]  }
 0x102   : > { %v11452_v35 = vcombine.low %v2103_v51, %v2106_v1  ;;  %v3645_v61 = vrot.slane %v3643_v20, 4  ;;  %v14839_v51 = vrot.slane %v2861_v50, 5  ;;  %v2867_v1 = vrot.slane %v2865_v26, 4 }
 0x103   : > { %v14867_v48 = vrot.slane %v2871_v2, 5  ;;  %v14896_v2 = vld [vmem:[#allocation2 + $0x94] sm:$0xf] }
 0x107   : > { %12607 = vmatmul.mubr.msk.bf16.gmra.mrb[8].mxu0 %vm1480_vm14, %v11448_v8  ;;  %v2803_v8 = vld [vmem:[#allocation2 + $0xc] sm:$0xf] }
 0x108   : > { %12610 = vmatprep.mubr.msk.bf16.mxu0 %vm1480_vm14, %v11449_v47  ;;  %v14815_v47 = vsel %vm14488_vm8, %v11545_v0, %v3629_v24  ;;  %v2852_v23 = vshrl.u32 %v2803_v8, 16  ;;  %v2855_v39 = vshll.u32 %v2803_v8, 16  ;;  %v14865_v24 = vld [vmem:[#allocation2 + $0x28] sm:$0xf]  ;;  %v2895_v8 = vshll.u32 %v14852_v10, 16 }
 0x109   : > { %18018 = vst [vmem:[#allocation8_spill] sm:$0xff] %v14815_v47 }
 0x10a   : > { %v2854_v32 = vrot.slane %v2852_v23, 4  ;;  %v2857_v6 = vrot.slane %v2855_v39, 5  ;;  %v13825_v39 = vld [vmem:[#allocation2 + $0x78] sm:$0xff]  }
 0x10f   : > { %12611 = vmatmul.mubr.msk.bf16.gmra.mrb[12].mxu0 %vm1480_vm14, %v11450_v44  ;;  %v2806_v44 = vld [vmem:[#allocation2 + $0x18] sm:$0xf] }
 0x110   : > { %12614 = vmatprep.mubr.msk.bf16.mxu0 %vm1480_vm14, %v11451_v60  ;;  %v14835_v60 = vld [vmem:[#allocation2 + $0x1c] sm:$0xf]  ;;  %v2876_v46 = vshrl.u32 %v2806_v44, 16 }
 0x117   : > { %12615 = vmatmul.mubr.msk.bf16.gmra.mrb[16].mxu0 %vm1480_vm14, %v11452_v35  ;;  %v14843_v35 = vsel %vm14488_vm8, %v11547_v62, %v3643_v20  ;;  %v2903_v62 = vshll.u32 %v2809_v15, 16  ;;  %v14899_v15 = vld [vmem:[#allocation2 + $0x98] sm:$0x1] }
 0x118   : > { %12618 = vmatprep.mubr.msk.bf16.mxu0 %vm1480_vm14, %v11453_v7  ;;  %v18015_v7 = vcombine.low %v14616_v57, %v14625_v40  ;;  %v3531_v57 = vld [vmem:[#allocation2 + $0x30] sm:$0xe]  ;;  %18020 = vst [vmem:[#allocation10_spill] sm:$0xff] %v14843_v35 }
 0x119   : > { %v11543_v56 = vrot.slane %v3531_v57, 9  ;;  %v2889_v57 = vshrl.u32 %v14835_v60, 16 }
 0x11b   : > { %v14876_v13 = vrot.slane %v2889_v57, 4 }
 0x11f   : > { %12619 = vmatmul.mubr.msk.bf16.gmra.mrb[20].mxu0 %vm1480_vm14, %v11454_v33  ;;  %v13817_v33 = vld [vmem:[#allocation2 + $0x18] sm:$0xff]  }
 0x120   : > { %12622 = vmatprep.mubr.msk.bf16.mxu0 %vm1480_vm14, %v11455_v31  ;;  %v13818_v31 = vld [vmem:[#allocation2 + $0x24] sm:$0xff]  }
 0x127   : > { %12623 = vmatmul.mubr.msk.bf16.gmra.mrb[24].mxu0 %vm1480_vm14, %v11456_v49  ;;  %v14785_v49 = vld [vmem:[#allocation2 + $0x34] sm:$0xf] }
 0x128   : > { %12626 = vmatprep.mubr.msk.bf16.mxu0 %vm1480_vm14, %v18014_v22  ;;  %v3615_v40 = vrot.slane %v14785_v49, 5  ;;  %v14847_v22 = vsel %vm14488_vm8, %v3645_v61, %v3646_v43  ;;  %v13826_v43 = vld [vmem:[#allocation2 + $0x84] sm:$0xff]   ;;  %v2937_v9 = vshrl.u32 %v14785_v49, 16 }
 0x129   : > { %18021 = vst [vmem:[#allocation11_spill] sm:$0xff] %v14847_v22  ;;  %v14991_v22 = vld [vmem:[#allocation2 + $0xb8] sm:$0xf] }
 0x12a   : > { %v3617_v52 = vrot.slane %v3615_v40, 4  ;;  %v14797_v30 = vsel %vm14488_vm8, %v11543_v56, %v3615_v40  ;;  %v14858_v40 = vld [vmem:[#allocation2 + $0x7c] sm:$0xf]  ;;  %v14860_v56 = vld [vmem:[#allocation2 + $0x80] sm:$0x1] }
 0x12b   : > { %18016 = vst [vmem:[#allocation6_spill] sm:$0xff] %v14797_v30 }
 0x12c   : > { %v14801_v41 = vsel %vm14488_vm8, %v3617_v52, %v3618_v45  ;;  %v3537_v45 = vld [vmem:[#allocation2 + $0x78] sm:$0xe]  ;;  %v3657_v52 = vrot.slane %v14858_v40, 5 }
 0x12d   : > { %18017 = vst [vmem:[#allocation7_spill] sm:$0xff] %v14801_v41  ;;  %v11549_v0 = vrot.slane %v3537_v45, 9  ;;  %v2905_v45 = vrot.slane %v2903_v62, 5  ;;  %v14912_v62 = vld [vmem:[#allocation2 + $0x2c] sm:$0x1] }
 0x12e   : > { %v3659_v23 = vrot.slane %v3657_v52, 4  ;;  %v15010_v41 = vld [vmem:[#allocation2 + $0x58] sm:$0xf] }
 0x12f   : > { %12627 = vmatmul.mubr.msk.bf16.gmra.mrb[28].mxu0 %vm1480_vm14, %v18015_v7  ;;  %v14880_v20 = vsel %vm14488_vm8, %v11549_v0, %v3657_v52  ;;  %v3674_v0 = vrot.slane %v14899_v15, 5 }
 0x130   : > { %12632 = vmatprep.mubr.msk.bf16.mxu0 %vm1480_vm14, %v13816_v55  ;;  %v2879_v55 = vshll.u32 %v2806_v44, 16  ;;  %18022 = vst [vmem:[#allocation12_spill] sm:$0xff] %v14880_v20  ;;  %v2913_v44 = vshrl.u32 %v14865_v24, 16 }
 0x132   : > { %v2881_v59 = vrot.slane %v2879_v55, 5  ;;  %v14894_v55 = vld [vmem:[#allocation2 + $0x8c] sm:$0x1] }
 0x133   : > { %v3667_v57 = vrot.slane %v14894_v55, 5 }
 0x137   : > { %12633 = vmatmul.mubr.msk.bf16.vlgmr.msra.gmra.mrb[0].mxu0 %vm1480_vm14, %v13817_v33  ;;  %v2885_v33 = vshll.u32 %v14835_v60, 16 }
 0x138   : > { %12665 = vmatpush3.bf16.msra.mxu0 %v3333_v12  ;;  %12636 = vmatprep.mubr.msk.bf16.mxu0 %vm1480_vm14, %v13818_v31  ;;  %v2858_v31 = vor.u32 %v2857_v6, %v2854_v32  ;;  %v2868_v12 = vor.u32 %v2867_v1, %v14839_v51  ;;  %v2909_v32 = vshll.u32 %v14865_v24, 16 }
 0x139   : > { %13789 = vmatprep.subr.msk.bf16.mxu0 %vm1529_vm0, %v17893_v28 }
 0x13a   : > { %v14872_v50 = vrot.slane %v2858_v31, 4  ;;  %v14874_v26 = vrot.slane %v2868_v12, 4  ;;  %v3538_v31 = vld [vmem:[#allocation2 + $0x84] sm:$0xe] }
 0x13b   : > { %v11550_v52 = vrot.slane %v3538_v31, 9  ;;  %v2933_v31 = vshll.u32 %v14785_v49, 16 }
 0x13c   : > { %v2864_v49 = vsel %vm14127_vm13, %v14872_v50, %v14839_v51  ;;  %v2874_v51 = vsel %vm14127_vm13, %v14874_v26, %v14867_v48 }
 0x13f   : > { %12637 = vmatmul.mubr.msk.bf16.gmra.mrb[4].mxu0 %vm1480_vm14, %v13819_v17  ;;  %v3660_v17 = vrot.slane %v14860_v56, 5 }
 0x140   : > { %12640 = vmatprep.mubr.msk.bf16.mxu0 %vm1480_vm14, %v13820_v37  ;;  %v2878_v37 = vrot.slane %v2876_v46, 4  ;;  %v14892_v46 = vld [vmem:[#allocation2 + $0x88] sm:$0xf] }
 0x141   : > { %v14886_v61 = vsel %vm14488_vm8, %v3659_v23, %v3660_v17  ;;  %v3664_v12 = vrot.slane %v14892_v46, 5  ;;  %v3539_v17 = vld [vmem:[#allocation2 + $0x90] sm:$0xe]  ;;  %v2915_v23 = vrot.slane %v2913_v44, 4 }
 0x142   : > { %18023 = vst [vmem:[#allocation13_spill] sm:$0xff] %v14886_v61 }
 0x143   : > { %v14910_v7 = vsel %vm14488_vm8, %v11550_v52, %v3664_v12 }
 0x144   : > { %18024 = vst [vmem:[#allocation14_spill] sm:$0xff] %v14910_v7  ;;  %v13830_v7 = vld [vmem:[#allocation2 + $0xb4] sm:$0xff]  }
 0x147   : > { %12641 = vmatmul.mubr.msk.bf16.gmra.mrb[8].mxu0 %vm1480_vm14, %v13821_v54  ;;  %v14869_v54 = vrot.slane %v2885_v33, 5  ;;  %v2882_v33 = vor.u32 %v2881_v59, %v2878_v37  ;;  %v3666_v37 = vrot.slane %v3664_v12, 4  ;;  %v11551_v59 = vrot.slane %v3539_v17, 9  ;;  %v14946_v12 = vld [vmem:[#allocation2 + $0x40] sm:$0xf] }
 0x148   : > { %12644 = vmatprep.mubr.msk.bf16.mxu0 %vm1480_vm14, %v13822_v18  ;;  %v2812_v18 = vld [vmem:[#allocation2 + $0x30] sm:$0xf]  ;;  %18028 = vst [vmem:[#allocation18_spill] sm:$0xff] %v14946_v12  ;;  %v2957_v48 = vshll.u32 %v14946_v12, 16  ;;  %v2961_v26 = vshrl.u32 %v14946_v12, 16  ;;  %v2981_v12 = vshll.u32 %v14806_v5, 16 }
 0x149   : > { %v2924_v6 = vshrl.u32 %v2812_v18, 16  ;;  %v2927_v1 = vshll.u32 %v2812_v18, 16  ;;  %v14906_v18 = vrot.slane %v2909_v32, 5  ;;  %v14918_v32 = vsel %vm14488_vm8, %v3666_v37, %v3667_v57 }
 0x14a   : > { %18025 = vst [vmem:[#allocation15_spill] sm:$0xff] %v14918_v32  ;;  %v14936_v57 = vrot.slane %v2882_v33, 4  ;;  %v2892_v17 = vor.u32 %v14876_v13, %v14869_v54  ;;  %v14953_v13 = vrot.slane %v2933_v31, 5  ;;  %v2939_v33 = vrot.slane %v2937_v9, 4  ;;  %v2818_v9 = vld [vmem:[#allocation2 + $0x48] sm:$0xf] }
 0x14b   : > { %v2972_v61 = vshrl.u32 %v2818_v9, 16  ;;  %v2963_v20 = vrot.slane %v2961_v26, 4  ;;  %v3542_v26 = vld [vmem:[#allocation2 + $0xb4] sm:$0xe] }
 0x14c   : > { %v14962_v38 = vrot.slane %v2892_v17, 4 }
 0x14d   : > { %v2974_v36 = vrot.slane %v2972_v61, 4 }
 0x14f   : > { %12645 = vmatmul.mubr.msk.bf16.gmra.mrb[12].mxu0 %vm1480_vm14, %v13823_v11  ;;  %v14888_v11 = vrot.slane %v2900_v53, 4  ;;  %v3671_v53 = vrot.slane %v14896_v2, 5 }
 0x150   : > { %12648 = vmatprep.mubr.msk.bf16.mxu0 %vm1480_vm14, %v13824_v29  ;;  %v2929_v29 = vrot.slane %v2927_v1, 5  ;;  %v14924_v1 = vrot.slane %v2895_v8, 5  ;;  %v3541_v8 = vld [vmem:[#allocation2 + $0xa8] sm:$0xe] }
 0x151   : > { %v3673_v14 = vrot.slane %v3671_v53, 4  ;;  %v14922_v44 = vsel %vm14488_vm8, %v11551_v59, %v3671_v53  ;;  %v2815_v53 = vld [vmem:[#allocation2 + $0x3c] sm:$0xf]  ;;  %v2906_v37 = vor.u32 %v2905_v45, %v14888_v11  ;;  %v2916_v59 = vor.u32 %v2915_v23, %v14906_v18  ;;  %v14955_v11 = vld [vmem:[#allocation2 + $0xac] sm:$0xf] }
 0x152   : > { %18026 = vst [vmem:[#allocation16_spill] sm:$0xff] %v14922_v44  ;;  %v14957_v45 = vld [vmem:[#allocation2 + $0xb0] sm:$0x1]  ;;  %v2951_v23 = vshll.u32 %v2815_v53, 16  ;;  %v2940_v44 = vor.u32 %v2939_v33, %v14953_v13  ;;  %v2975_v33 = vshll.u32 %v2818_v9, 16  ;;  %v3692_v9 = vrot.slane %v14991_v22, 5 }
 0x153   : > { %v14930_v52 = vsel %vm14488_vm8, %v3673_v14, %v3674_v0  ;;  %v2919_v14 = vshll.u32 %v14912_v62, 16  ;;  %v2943_v0 = vshll.u32 %v14788_v34, 16  ;;  %v2948_v34 = vshrl.u32 %v2815_v53, 16 }
 0x154   : > { %18027 = vst [vmem:[#allocation17_spill] sm:$0xff] %v14930_v52  ;;  %v3688_v28 = vrot.slane %v14957_v45, 5  ;;  %v14968_v31 = vrot.slane %v2916_v59, 4  ;;  %v2977_v47 = vrot.slane %v2975_v33, 5 }
 0x155   : > { %v14975_v17 = vrot.slane %v2943_v0, 5  ;;  %v11554_v0 = vrot.slane %v3542_v26, 9  ;;  %v13831_v26 = vld [vmem:[#allocation2 + $0xc0] sm:$0xff]  }
 0x157   : > { %12649 = vmatmul.mubr.msk.bf16.gmra.mrb[16].mxu0 %vm1480_vm14, %v13825_v39  ;;  %v2926_v39 = vrot.slane %v2924_v6, 4  ;;  %v13828_v6 = vld [vmem:[#allocation2 + $0x9c] sm:$0xff]  }
 0x158   : > { %12652 = vmatprep.mubr.msk.bf16.mxu0 %vm1480_vm14, %v13826_v43  ;;  %v13827_v43 = vld [vmem:[#allocation2 + $0x90] sm:$0xff]  }
 0x159   : > { %v2930_v50 = vor.u32 %v2929_v29, %v2926_v39  ;;  %v11553_v29 = vrot.slane %v3541_v8, 9  ;;  %v14966_v39 = vrot.slane %v2906_v37, 4  ;;  %v2950_v8 = vrot.slane %v2948_v34, 4  ;;  %v14995_v34 = vld [vmem:[#allocation2 + $0xc4] sm:$0xf] }
 0x15a   : > { %v2953_v37 = vrot.slane %v2951_v23, 5  ;;  %v11508_v23 = vcombine.low %v2864_v49, %v2874_v51 }
 0x15b   : > { %v14972_v52 = vrot.slane %v2930_v50, 4  ;;  %v14987_v50 = vrot.slane %v2957_v48, 5  ;;  %v15002_v48 = vld [vmem:[#allocation2 + $0xc8] sm:$0x1] }
 0x15c   : > { %v3702_v49 = vrot.slane %v15002_v48, 5  ;;  %v2954_v51 = vor.u32 %v2953_v37, %v2950_v8  ;;  %v2985_v37 = vshrl.u32 %v14806_v5, 16  ;;  %v2898_v5 = vsel %vm14127_vm13, %v14962_v38, %v14924_v1 }
 0x15d   : > { %v2964_v30 = vor.u32 %v2963_v20, %v14987_v50 }
 0x15e   : > { %v2955_v1 = vrot.slane %v2954_v51, 4 }
 0x15f   : > { %12653 = vmatmul.mubr.msk.bf16.gmra.mrb[20].mxu0 %vm1480_vm14, %v13827_v43  ;;  %v3685_v43 = vrot.slane %v14955_v11, 5 }
 0x160   : > { %12656 = vmatprep.mubr.msk.bf16.mxu0 %vm1480_vm14, %v13828_v6  ;;  %v14970_v6 = vrot.slane %v2919_v14, 5  ;;  %v14985_v14 = vld [vmem:[#allocation2 + $0x44] sm:$0x1]  ;;  %v2960_v51 = vsel %vm14127_vm13, %v2955_v1, %v14987_v50  ;;  %v15089_v1 = vld [vmem:[%s17884_s1 + $0xc] sm:$0x3] }
 0x161   : > { %v3687_v53 = vrot.slane %v3685_v43, 4  ;;  %v14979_v32 = vsel %vm14488_vm8, %v11553_v29, %v3685_v43  ;;  %v14993_v43 = vld [vmem:[#allocation2 + $0xbc] sm:$0x1] }
 0x162   : > { %18029 = vst [vmem:[#allocation19_spill] sm:$0xff] %v14979_v32  ;;  %v3695_v29 = vrot.slane %v14993_v43, 5  ;;  %v2967_v32 = vshll.u32 %v14985_v14, 16 }
 0x163   : > { %v14983_v59 = vsel %vm14488_vm8, %v3687_v53, %v3688_v28  ;;  %v2888_v28 = vsel %vm14127_vm13, %v14936_v57, %v14869_v54  ;;  %v2941_v53 = vrot.slane %v2940_v44, 4  ;;  %v2821_v54 = vld [vmem:[#allocation2 + $0x54] sm:$0xf]  ;;  %v3694_v57 = vrot.slane %v3692_v9, 4 }
 0x164   : > { %18030 = vst [vmem:[#allocation20_spill] sm:$0xff] %v14983_v59  ;;  %v3543_v59 = vld [vmem:[#allocation2 + $0xc0] sm:$0xe]  ;;  %v2999_v20 = vshll.u32 %v2821_v54, 16 }
 0x165   : > { %v11555_v35 = vrot.slane %v3543_v59, 9  ;;  %v15020_v8 = vsel %vm14488_vm8, %v3694_v57, %v3695_v29  ;;  %v2996_v59 = vshrl.u32 %v2821_v54, 16  ;;  %v3009_v29 = vshrl.u32 %v15010_v41, 16 }
 0x166   : > { %v2946_v38 = vsel %vm14127_vm13, %v2941_v53, %v14975_v17  ;;  %v2969_v54 = vrot.slane %v2967_v32, 5  ;;  %v15058_v57 = vrot.slane %v2981_v12, 5  ;;  %v11509_v32 = vcombine.low %v2888_v28, %v2898_v5 }
 0x167   : > { %12657 = vmatmul.mubr.msk.bf16.gmra.mrb[24].mxu0 %vm1480_vm14, %v13829_v4  ;;  %v3699_v4 = vrot.slane %v14995_v34, 5  ;;  %v2998_v33 = vrot.slane %v2996_v59, 4 }
 0x168   : > { %12660 = vmatprep.mubr.msk.bf16.mxu0 %vm1480_vm14, %v13830_v7  ;;  %v15014_v7 = vsel %vm14488_vm8, %v11554_v0, %v3692_v9  ;;  %v3005_v9 = vshll.u32 %v15010_v41, 16 }
 0x169   : > { %v3701_v44 = vrot.slane %v3699_v4, 4  ;;  %v15024_v61 = vsel %vm14488_vm8, %v11555_v35, %v3699_v4  ;;  %v2912_v35 = vsel %vm14127_vm13, %v14966_v39, %v14906_v18  ;;  %v2922_v4 = vsel %vm14127_vm13, %v14968_v31, %v14970_v6  ;;  %v2824_v18 = vld [vmem:[#allocation2 + $0x60] sm:$0xf] }
 0x16a   : > { %v2965_v39 = vrot.slane %v2964_v30, 4  ;;  %v2987_v31 = vrot.slane %v2985_v37, 4  ;;  %v2991_v6 = vshll.u32 %v14808_v58, 16  ;;  %v3020_v17 = vshrl.u32 %v2824_v18, 16 }
 0x16b   : > { %v15031_v0 = vsel %vm14488_vm8, %v3701_v44, %v3702_v49  ;;  %v2936_v49 = vsel %vm14127_vm13, %v14972_v52, %v14953_v13  ;;  %v2978_v44 = vor.u32 %v2977_v47, %v2974_v36  ;;  %v3001_v52 = vrot.slane %v2999_v20, 5 }
 0x16c   : > { %18031 = vst [vmem:[#allocation21_spill] sm:$0xff] %v15031_v0  ;;  %v15061_v13 = vrot.slane %v3005_v9, 5  ;;  %v15063_v0 = vld [vmem:[#allocation2 + $0x5c] sm:$0x1]  ;;  %v3023_v53 = vshll.u32 %v2824_v18, 16  ;;  %v3029_v47 = vshll.u32 %v14828_v21, 16  ;;  %v11511_v58 = vcombine.low %v2936_v49, %v2946_v38 }
 0x16d   : > { %v3033_v36 = vshrl.u32 %v14828_v21, 16  ;;  %v18032_v30 = vrot.slane %v14777_v63, 2  ;;  %v15073_v37 = vrot.slane %v2978_v44, 4  ;;  %v2988_v59 = vor.u32 %v2987_v31, %v15058_v57  ;;  %v2827_v9 = vld [vmem:[#allocation2 + $0x6c] sm:$0xf] }
 0x16e   : > { %v15076_v20 = vrot.slane %v2991_v6, 5  ;;  %v2970_v63 = vsel %vm14127_vm13, %v2965_v39, %v2969_v54  ;;  %v3002_v21 = vor.u32 %v3001_v52, %v2998_v33  ;;  %v3015_v5 = vshll.u32 %v15063_v0, 16 }
 0x16f   : > { %12661 = vmatmul.mubr.msk.bf16.gmra.mrb[28].mxu0 %vm1480_vm14, %v13831_v26  ;;  %v3011_v26 = vrot.slane %v3009_v29, 4  ;;  %v3806_v12 = vsel %vm1529_vm0, %v18032_v30, 0  ;;  %v15078_v29 = vld [vmem:[#allocation2 + $0x70] sm:$0xf]  ;;  %v3025_v50 = vrot.slane %v3023_v53, 5  ;;  %v15084_v49 = vrot.slane %v3029_v47, 5 }
 0x170   : > { %12666 = vmatprep.mubr.msk.bf16.mxu0 %vm1480_vm14, %v11508_v23  ;;  %v11510_v23 = vcombine.low %v2912_v35, %v2922_v4  ;;  %v2830_v35 = vld [vmem:[#allocation2 + $0x78] sm:$0xf]  ;;  %v3022_v4 = vrot.slane %v3020_v17, 4  ;;  %v3035_v38 = vrot.slane %v3033_v36, 4  ;;  %v3044_v44 = vshrl.u32 %v2827_v9, 16 }
 0x171   : > { %v3012_v28 = vor.u32 %v3011_v26, %v15061_v13  ;;  %v3047_v54 = vshll.u32 %v2827_v9, 16  ;;  %v3053_v33 = vshll.u32 %v15078_v29, 16  ;;  %v3057_v18 = vshrl.u32 %v15078_v29, 16 }
 0x172   : > { %v11512_v39 = vcombine.low %v2960_v51, %v2970_v63  ;;  %v2989_v31 = vrot.slane %v2988_v59, 4  ;;  %v3068_v6 = vshrl.u32 %v2830_v35, 16  ;;  %v3071_v52 = vshll.u32 %v2830_v35, 16 }
 0x173   : > { %v3003_v26 = vrot.slane %v3002_v21, 4  ;;  %v3017_v17 = vrot.slane %v3015_v5, 5  ;;  %v3077_v53 = vshll.u32 %v14858_v40, 16  ;;  %v3081_v47 = vshrl.u32 %v14858_v40, 16 }
 0x174   : > { %v3013_v36 = vrot.slane %v3012_v28, 4  ;;  %v3036_v30 = vor.u32 %v3035_v38, %v15084_v49  ;;  %v3046_v51 = vrot.slane %v3044_v44, 4  ;;  %v3049_v59 = vrot.slane %v3047_v54, 5  ;;  %v15110_v28 = vld [vmem:[#allocation2 + $0x74] sm:$0x1] }
 0x175   : > { %v15101_v9 = vrot.slane %v3053_v33, 5  ;;  %v3059_v63 = vrot.slane %v3057_v18, 4  ;;  %v2984_v40 = vsel %vm14127_vm13, %v15073_v37, %v15058_v57  ;;  %v2994_v21 = vsel %vm14127_vm13, %v2989_v31, %v15076_v20 }
 0x176   : > { %v3070_v5 = vrot.slane %v3068_v6, 4  ;;  %v3073_v35 = vrot.slane %v3071_v52, 5  ;;  %v3008_v44 = vsel %vm14127_vm13, %v3003_v26, %v15061_v13  ;;  %v3018_v57 = vsel %vm14127_vm13, %v3013_v36, %v3017_v17 }
 0x177   : > { %12667 = vmatmul.mubr.msk.bf16.vlgmr.msra.gmra.mrb[0].mxu0 %vm1480_vm14, %v11509_v32  ;;  %v3026_v32 = vor.u32 %v3025_v50, %v3022_v4  ;;  %v3083_v4 = vrot.slane %v3081_v47, 4  ;;  %v3037_v20 = vrot.slane %v3036_v30, 4  ;;  %v3050_v33 = vor.u32 %v3049_v59, %v3046_v51  ;;  %v2839_v51 = vld [vmem:[#allocation2 + $0x9c] sm:$0xf] }
 0x178   : > { %12699 = vmatpush3.bf16.msra.mxu0 %v3806_v12  ;;  %12670 = vmatprep.mubr.msk.bf16.mxu0 %vm1480_vm14, %v11510_v23  ;;  %v3039_v12 = vshll.u32 %v14830_v42, 16  ;;  %v2833_v23 = vld [vmem:[#allocation2 + $0x84] sm:$0xf]  ;;  %v15112_v42 = vrot.slane %v3077_v53, 5  ;;  %v3060_v18 = vor.u32 %v3059_v63, %v15101_v9  ;;  %v3063_v31 = vshll.u32 %v15110_v28, 16 }
 0x179   : > { %13790 = vmatprep.subr.msk.bf16.mxu0 %vm1529_vm0, %v15089_v1  ;;  %v3092_v50 = vshrl.u32 %v2833_v23, 16  ;;  %v3095_v38 = vshll.u32 %v2833_v23, 16  ;;  %v3027_v37 = vrot.slane %v3026_v32, 4  ;;  %v3087_v6 = vshll.u32 %v14860_v56, 16 }
 0x17a   : > { %v3041_v54 = vrot.slane %v3039_v12, 5  ;;  %v3101_v52 = vshll.u32 %v14892_v46, 16  ;;  %v3105_v13 = vshrl.u32 %v14892_v46, 16  ;;  %v3074_v26 = vor.u32 %v3073_v35, %v3070_v5  ;;  %v15134_v35 = vld [vmem:[#allocation2 + $0xa0] sm:$0xf] }
 0x17b   : > { %v3084_v17 = vor.u32 %v3083_v4, %v15112_v42  ;;  %v3094_v53 = vrot.slane %v3092_v50, 4  ;;  %v3097_v47 = vrot.slane %v3095_v38, 5  ;;  %v11513_v36 = vcombine.low %v2984_v40, %v2994_v21 }
 0x17c   : > { %v11514_v32 = vcombine.low %v3008_v44, %v3018_v57  ;;  %v3032_v30 = vsel %vm14127_vm13, %v3027_v37, %v15084_v49  ;;  %v3051_v56 = vrot.slane %v3050_v33, 4  ;;  %v3061_v12 = vrot.slane %v3060_v18, 4 }
 0x17d   : > { %v3065_v23 = vrot.slane %v3063_v31, 5  ;;  %v15132_v46 = vrot.slane %v3101_v52, 5  ;;  %v3107_v59 = vrot.slane %v3105_v13, 4  ;;  %v3075_v40 = vrot.slane %v3074_v26, 4 }
 0x17e   : > { %v3085_v21 = vrot.slane %v3084_v17, 4  ;;  %v3089_v4 = vrot.slane %v3087_v6, 5  ;;  %v3098_v50 = vor.u32 %v3097_v47, %v3094_v53  ;;  %v3125_v49 = vshll.u32 %v14896_v2, 16 }
 0x17f   : > { %12671 = vmatmul.mubr.msk.bf16.gmra.mrb[4].mxu0 %vm1480_vm14, %v11511_v58  ;;  %v2836_v58 = vld [vmem:[#allocation2 + $0x90] sm:$0xf]  ;;  %v3129_v38 = vshrl.u32 %v14896_v2, 16  ;;  %v3140_v44 = vshrl.u32 %v2839_v51, 16  ;;  %v3143_v57 = vshll.u32 %v2839_v51, 16  ;;  %v3056_v37 = vsel %vm14127_vm13, %v3051_v56, %v15101_v9 }
 0x180   : > { %12674 = vmatprep.mubr.msk.bf16.mxu0 %vm1480_vm14, %v11512_v39  ;;  %v3042_v39 = vsel %vm14127_vm13, %v3037_v20, %v3041_v54  ;;  %v3116_v63 = vshrl.u32 %v2836_v58, 16  ;;  %v3119_v5 = vshll.u32 %v2836_v58, 16  ;;  %v3066_v54 = vsel %vm14127_vm13, %v3061_v12, %v3065_v23  ;;  %v2842_v12 = vld [vmem:[#allocation2 + $0xa8] sm:$0xf] }
 0x181   : > { %v3149_v20 = vshll.u32 %v15134_v35, 16  ;;  %v3153_v33 = vshrl.u32 %v15134_v35, 16  ;;  %v3108_v18 = vor.u32 %v3107_v59, %v15132_v46  ;;  %v3111_v2 = vshll.u32 %v14894_v55, 16 }
 0x182   : > { %v3118_v31 = vrot.slane %v3116_v63, 4  ;;  %v3121_v6 = vrot.slane %v3119_v5, 5  ;;  %v3080_v52 = vsel %vm14127_vm13, %v3075_v40, %v15112_v42  ;;  %v3090_v9 = vsel %vm14127_vm13, %v3085_v21, %v3089_v4 }
 0x183   : > { %v3099_v13 = vrot.slane %v3098_v50, 4  ;;  %v15154_v26 = vrot.slane %v3125_v49, 5  ;;  %v3131_v17 = vrot.slane %v3129_v38, 4  ;;  %v3142_v53 = vrot.slane %v3140_v44, 4  ;;  %v2845_v50 = vld [vmem:[#allocation2 + $0xb4] sm:$0xf] }
 0x184   : > { %v3145_v47 = vrot.slane %v3143_v57, 5  ;;  %v11515_v58 = vcombine.low %v3032_v30, %v3042_v39  ;;  %v3151_v55 = vrot.slane %v3149_v20, 5  ;;  %v3155_v56 = vrot.slane %v3153_v33, 4 }
 0x185   : > { %v3109_v23 = vrot.slane %v3108_v18, 4  ;;  %v3113_v51 = vrot.slane %v3111_v2, 5  ;;  %v3122_v59 = vor.u32 %v3121_v6, %v3118_v31  ;;  %v3135_v42 = vshll.u32 %v14899_v15, 16 }
 0x186   : > { %v11517_v63 = vcombine.low %v3080_v52, %v3090_v9  ;;  %v3132_v5 = vor.u32 %v3131_v17, %v15154_v26  ;;  %v3146_v40 = vor.u32 %v3145_v47, %v3142_v53  ;;  %v3164_v4 = vshrl.u32 %v2842_v12, 16 }
 0x187   : > { %12675 = vmatmul.mubr.msk.bf16.gmra.mrb[8].mxu0 %vm1480_vm14, %v11513_v36  ;;  %v11516_v36 = vcombine.low %v3056_v37, %v3066_v54  ;;  %v3156_v30 = vor.u32 %v3155_v56, %v3151_v55  ;;  %v3167_v39 = vshll.u32 %v2842_v12, 16  ;;  %v3173_v49 = vshll.u32 %v14955_v11, 16  ;;  %v2848_v56 = vld [vmem:[#allocation2 + $0xc0] sm:$0xf] }
 0x188   : > { %12678 = vmatprep.mubr.msk.bf16.mxu0 %vm1480_vm14, %v11514_v32  ;;  %v15156_v32 = vld [vmem:[#allocation2 + $0xa4] sm:$0x1]  ;;  %v3177_v38 = vshrl.u32 %v14955_v11, 16  ;;  %v3104_v15 = vsel %vm14127_vm13, %v3099_v13, %v15132_v46  ;;  %v3114_v44 = vsel %vm14127_vm13, %v3109_v23, %v3113_v51  ;;  %v3123_v57 = vrot.slane %v3122_v59, 4 }
 0x189   : > { %v3159_v21 = vshll.u32 %v15156_v32, 16  ;;  %v3137_v37 = vrot.slane %v3135_v42, 5  ;;  %v3188_v54 = vshrl.u32 %v2845_v50, 16  ;;  %v3191_v20 = vshll.u32 %v2845_v50, 16 }
 0x18a   : > { %v3197_v33 = vshll.u32 %v14991_v22, 16  ;;  %v3201_v18 = vshrl.u32 %v14991_v22, 16  ;;  %v3133_v2 = vrot.slane %v3132_v5, 4  ;;  %v3147_v31 = vrot.slane %v3146_v40, 4 }
 0x18b   : > { %v3161_v11 = vrot.slane %v3159_v21, 5  ;;  %v3166_v6 = vrot.slane %v3164_v4, 4  ;;  %v3157_v52 = vrot.slane %v3156_v30, 4  ;;  %v3169_v9 = vrot.slane %v3167_v39, 5 }
 0x18c   : > { %v3175_v17 = vrot.slane %v3173_v49, 5  ;;  %v3179_v53 = vrot.slane %v3177_v38, 4  ;;  %v11518_v46 = vcombine.low %v3104_v15, %v3114_v44  ;;  %v3190_v13 = vrot.slane %v3188_v54, 4 }
 0x18d   : > { %v3193_v47 = vrot.slane %v3191_v20, 5  ;;  %v3128_v12 = vsel %vm14127_vm13, %v3123_v57, %v15154_v26  ;;  %v3138_v22 = vsel %vm14127_vm13, %v3133_v2, %v3137_v37  ;;  %v3183_v23 = vshll.u32 %v14957_v45, 16 }
 0x18e   : > { %v3152_v51 = vsel %vm14127_vm13, %v3147_v31, %v3151_v55  ;;  %v3162_v59 = vsel %vm14127_vm13, %v3157_v52, %v3161_v11  ;;  %v3170_v42 = vor.u32 %v3169_v9, %v3166_v6  ;;  %v3180_v5 = vor.u32 %v3179_v53, %v3175_v17  ;;  %v3528_v9 = vld [vmem:[#allocation2 + $0xc] sm:$0xe] }
 0x18f   : > { %12679 = vmatmul.mubr.msk.bf16.gmra.mrb[12].mxu0 %vm1480_vm14, %v11515_v58  ;;  %v3199_v58 = vrot.slane %v3197_v33, 5  ;;  %v3212_v40 = vshrl.u32 %v2848_v56, 16  ;;  %v3215_v21 = vshll.u32 %v2848_v56, 16  ;;  %v3221_v26 = vshll.u32 %v14995_v34, 16 }
 0x190   : > { %12682 = vmatprep.mubr.msk.bf16.mxu0 %vm1480_vm14, %v11516_v36  ;;  %v3203_v36 = vrot.slane %v3201_v18, 4  ;;  %v3225_v4 = vshrl.u32 %v14995_v34, 16  ;;  %v3194_v50 = vor.u32 %v3193_v47, %v3190_v13  ;;  %v11519_v30 = vcombine.low %v3128_v12, %v3138_v22 }
 0x191   : > { %v11520_v39 = vcombine.low %v3152_v51, %v3162_v59  ;;  %v3171_v55 = vrot.slane %v3170_v42, 4  ;;  %v3181_v49 = vrot.slane %v3180_v5, 4  ;;  %v3185_v38 = vrot.slane %v3183_v23, 5  ;;  %v3530_v42 = vld [vmem:[#allocation2 + $0x24] sm:$0xe] }
 0x192   : > { %v3204_v45 = vor.u32 %v3203_v36, %v3199_v58  ;;  %v3214_v15 = vrot.slane %v3212_v40, 4  ;;  %v3217_v44 = vrot.slane %v3215_v21, 5  ;;  %v3223_v57 = vrot.slane %v3221_v26, 5  ;;  %v343_v36 = vld [vmem:[#allocation2 + $0xcc] sm:$0x1] }
 0x193   : > { %v3227_v37 = vrot.slane %v3225_v4, 4  ;;  %v3195_v54 = vrot.slane %v3194_v50, 4  ;;  %v3176_v34 = vsel %vm14127_vm13, %v3171_v55, %v3175_v17  ;;  %v3231_v31 = vshll.u32 %v15002_v48, 16 }
 0x194   : > { %v3205_v20 = vrot.slane %v3204_v45, 4  ;;  %v3218_v18 = vor.u32 %v3217_v44, %v3214_v15  ;;  %v3594_v52 = vrot.slane %v14817_v19, 5  ;;  %v11540_v56 = vrot.slane %v3528_v9, 9 }
 0x195   : > { %v3228_v2 = vor.u32 %v3227_v37, %v3223_v57  ;;  %v3200_v11 = vsel %vm14127_vm13, %v3195_v54, %v3199_v58  ;;  %v3233_v47 = vrot.slane %v3231_v31, 5  ;;  %v3597_v22 = vrot.slane %v14837_v16, 5  ;;  %v3529_v16 = vld [vmem:[#allocation2 + $0x18] sm:$0xe] }
 0x196   : > { %v3596_v12 = vrot.slane %v3594_v52, 4  ;;  %v344_v48 = vsel %vm14022_vm4, 0, %v343_v36  ;;  %v3601_v23 = vrot.slane %v14835_v60, 5  ;;  %v3595_v51 = vsel %vm14488_vm8, %v11540_v56, %v3594_v52  ;;  %v18037_v36 = vld [vmem:[#allocation8_spill] sm:$0xff]  ;;  %v18038_v56 = vld [vmem:[#allocation9_spill] sm:$0xff]  ;;  %vm15530_vm4 = vmand %vm405_vm1, %vm290_vm3 }
 0x197   : > { %12683 = vmatmul.mubr.msk.bf16.gmra.mrb[16].mxu0 %vm1480_vm14, %v11517_v63  ;;  %v3207_v63 = vshll.u32 %v14993_v43, 16  ;;  %v3186_v43 = vsel %vm14127_vm13, %v3181_v49, %v3185_v38  ;;  %v3229_v13 = vrot.slane %v3228_v2, 4  ;;  %345 = vst [vmem:[#allocation2 + $0xcc] sm:$0x1] %v344_v48  ;;  %v3608_v59 = vrot.slane %v14865_v24, 5  ;;  %vm15772_vm3 = vmand %vm405_vm1, %vm346_vm5 }
 0x198   : > { %12686 = vmatprep.mubr.msk.bf16.mxu0 %vm1480_vm14, %v11518_v46  ;;  %v11521_v53 = vcombine.low %v3176_v34, %v3186_v43  ;;  %v3219_v46 = vrot.slane %v3218_v18, 4  ;;  %v3598_v3 = vsel %vm14488_vm8, %v3596_v12, %v3597_v22  ;;  %v11541_v21 = vrot.slane %v3529_v16, 9  ;;  %v3532_v49 = vld [vmem:[#allocation2 + $0x3c] sm:$0xe] }
 0x199   : > { %v3209_v33 = vrot.slane %v3207_v63, 5  ;;  %v3234_v58 = vsel %vm14127_vm13, %v3229_v13, %v3233_v47  ;;  %v11556_v40 = vcombine.low %v3595_v51, %v3598_v3  ;;  %v3603_v26 = vrot.slane %v3601_v23, 4  ;;  %v3540_v51 = vld [vmem:[#allocation2 + $0x9c] sm:$0xe] }
 0x19a   : > { %v3224_v19 = vsel %vm14127_vm13, %v3219_v46, %v3223_v57  ;;  %v3604_v4 = vrot.slane %v14852_v10, 5  ;;  %v11542_v50 = vrot.slane %v3530_v42, 9  ;;  %v3610_v45 = vrot.slane %v3608_v59, 4  ;;  %v18043_v42 = vld [vmem:[#allocation12_spill] sm:$0xff] }
 0x19b   : > { %v3210_v6 = vsel %vm14127_vm13, %v3205_v20, %v3209_v33  ;;  %v11523_v5 = vcombine.low %v3224_v19, %v3234_v58  ;;  %v3611_v60 = vrot.slane %v14912_v62, 5  ;;  %v3602_v63 = vsel %vm14488_vm8, %v11541_v21, %v3601_v23  ;;  %v13834_v62 = vld [vmem:[%s17884_s1 + $0xc] ss:$0 sps:$4 sm:$0xcc]   ;;  %v18040_v19 = vld [vmem:[#allocation10_spill] sm:$0xff] }
 0x19c   : > { %v11522_v17 = vcombine.low %v3200_v11, %v3210_v6  ;;  %v3605_v24 = vsel %vm14488_vm8, %v3603_v26, %v3604_v4  ;;  %v4164_v15 = vsel %vm1529_vm0, %v15089_v1, 0  ;;  %v11544_v57 = vrot.slane %v3532_v49, 9  ;;  %v3534_v1 = vld [vmem:[#allocation2 + $0x54] sm:$0xe]  ;;  %v18034_v11 = vld [vmem:[#allocation6_spill] sm:$0xff]  ;;  %v18035_v6 = vld [vmem:[#allocation7_spill] sm:$0xff] }
 0x19d   : > { %v3612_v10 = vsel %vm14488_vm8, %v3610_v45, %v3611_v60  ;;  %v11557_v38 = vcombine.low %v3602_v63, %v3605_v24  ;;  %v3625_v54 = vrot.slane %v14985_v14, 5  ;;  %v4843_v20 = vrot.slane %v13834_v62, 2  ;;  %v18041_v58 = vld [vmem:[#allocation11_spill] sm:$0xff]  ;;  %v18046_v21 = vld [vmem:[#allocation14_spill] sm:$0xff]  ;;  %v18049_v60 = vld [vmem:[#allocation16_spill] sm:$0xff] }
 0x19e   : > { %v3636_v43 = vrot.slane %v15010_v41, 5  ;;  %v11546_v2 = vrot.slane %v3534_v1, 9  ;;  %v3639_v31 = vrot.slane %v15063_v0, 5  ;;  %v18036_v52 = vcombine.low %v18034_v11, %v18035_v6  ;;  %v18047_v26 = vld [vmem:[#allocation15_spill] sm:$0xff]  ;;  %v18050_v63 = vld [vmem:[#allocation17_spill] sm:$0xff] }
 0x19f   : > { %12687 = vmatmul.mubr.msk.bf16.gmra.mrb[20].mxu0 %vm1480_vm14, %v11519_v30  ;;  %v3609_v30 = vsel %vm14488_vm8, %v11542_v50, %v3608_v59  ;;  %v3653_v0 = vrot.slane %v15110_v28, 5  ;;  %v18039_v12 = vcombine.low %v18037_v36, %v18038_v56  ;;  %v18042_v23 = vcombine.low %v18040_v19, %v18041_v58  ;;  %v18052_v24 = vld [vmem:[#allocation19_spill] sm:$0xff]  ;;  %v15328_v6 = vld [vmem:[#allocation2 + $0x58] sm:$0xf] }
 0x1a0   : > { %12690 = vmatprep.mubr.msk.bf16.mxu0 %vm1480_vm14, %v11520_v39  ;;  %v18033_v39 = vld [vmem:[#allocation18_spill] sm:$0xff]  ;;  %v11558_v44 = vcombine.low %v3609_v30, %v3612_v10  ;;  %v3638_v14 = vrot.slane %v3636_v43, 4  ;;  %v3637_v9 = vsel %vm14488_vm8, %v11546_v2, %v3636_v43  ;;  %v3678_v28 = vrot.slane %v15134_v35, 5  ;;  %v18053_v30 = vld [vmem:[#allocation20_spill] sm:$0xff] }
 0x1a1   : > { %v3622_v55 = vrot.slane %v18033_v39, 5  ;;  %v11552_v3 = vrot.slane %v3540_v51, 9  ;;  %v3681_v59 = vrot.slane %v15156_v32, 5  ;;  %v18048_v4 = vcombine.low %v18046_v21, %v18047_v26  ;;  %v399_v39 = vld [vmem:[#allocation2 + $0xd4] sm:$0x1] }
 0x1a2   : > { %v3640_v41 = vsel %vm14488_vm8, %v3638_v14, %v3639_v31  ;;  %v3680_v16 = vrot.slane %v3678_v28, 4  ;;  %v18051_v32 = vcombine.low %v18049_v60, %v18050_v63  ;;  %v18054_v10 = vcombine.low %v18052_v24, %v18053_v30  ;;  %v13838_v14 = vld [vmem:[#allocation2 + $0x48] sm:$0xff]   ;;  %v4359_v51 = vld [vmem:[#allocation2 + $0x18] sm:$0xf]  ;;  %v5097_v24 = vld [vmem:[#allocation2 + $0x84] sm:$0xe] }
 0x1a3   : > { %v3624_v37 = vrot.slane %v3622_v55, 4  ;;  %v3623_v33 = vsel %vm14488_vm8, %v11544_v57, %v3622_v55  ;;  %v11562_v46 = vcombine.low %v3637_v9, %v3640_v41  ;;  %v3679_v50 = vsel %vm14488_vm8, %v11552_v3, %v3678_v28  ;;  %v13835_v57 = vld [vmem:[#allocation2 + $0x24] sm:$0xff]   ;;  %v5093_v9 = vld [vmem:[#allocation2 + $0x54] sm:$0xe]  ;;  %v13841_v28 = vld [vmem:[#allocation2 + $0x6c] sm:$0xff]  }
 0x1a4   : > { %v3682_v35 = vsel %vm14488_vm8, %v3680_v16, %v3681_v59  ;;  %v18055_v55 = vcombine.low %v15014_v7, %v15020_v8  ;;  %v400_v49 = vsel %vm14032_vm7, 0, %v399_v39  ;;  %v15305_v7 = vld [vmem:[%s17884_s1 + $0x10] sm:$0x3]  ;;  %v15308_v8 = vld [vmem:[#allocation2 + $0x40] sm:$0xf]  ;;  %v5189_v41 = vrot.slane %v15328_v6, 5 }
 0x1a5   : > { %v3626_v34 = vsel %vm14488_vm8, %v3624_v37, %v3625_v54  ;;  %v11568_v45 = vcombine.low %v3679_v50, %v3682_v35  ;;  %401 = vst [vmem:[#allocation2 + $0xd4] sm:$0x1] %v400_v49  ;;  %v13836_v37 = vld [vmem:[#allocation2 + $0x30] sm:$0xff]   ;;  %v4893_v54 = vsel %vm1529_vm0, %v4843_v20, 0  ;;  %v13842_v16 = vld [vmem:[#allocation2 + $0x78] sm:$0xff]   ;;  %v4408_v21 = vshrl.u32 %v4359_v51, 16 }
 0x1a6   : > { %v11560_v18 = vcombine.low %v3623_v33, %v3626_v34  ;;  %v15310_v33 = vld [vmem:[#allocation2 + $0x44] sm:$0x1]  ;;  %v5175_v34 = vrot.slane %v15308_v8, 5  ;;  %v15357_v59 = vld [vmem:[#allocation2 + $0x1c] sm:$0xf]  ;;  %v4411_v26 = vshll.u32 %v4359_v51, 16 }
 0x1a7   : > { %12691 = vmatmul.mubr.msk.bf16.gmra.mrb[24].mxu0 %vm1480_vm14, %v11521_v53  ;;  %v3650_v53 = vrot.slane %v15078_v29, 5  ;;  %v5178_v43 = vrot.slane %v15310_v33, 5  ;;  %v4417_v50 = vshll.u32 %v15357_v59, 16  ;;  %v4421_v35 = vshrl.u32 %v15357_v59, 16  ;;  %v15372_v60 = vld [vmem:[#allocation2 + $0x8c] sm:$0x1] }
 0x1a8   : > { %12694 = vmatprep.mubr.msk.bf16.mxu0 %vm1480_vm14, %v11522_v17  ;;  %v3536_v17 = vld [vmem:[#allocation2 + $0x6c] sm:$0xe]  ;;  %v5177_v1 = vrot.slane %v5175_v34, 4  ;;  %v11663_v62 = vrot.slane %v5097_v24, 9  ;;  %v4410_v49 = vrot.slane %v4408_v21, 4  ;;  %vm6690_vm7 = vcmask 1043456  }
 0x1a9   : > { %v11548_v13 = vrot.slane %v3536_v17, 9  ;;  %v3652_v47 = vrot.slane %v3650_v53, 4  ;;  %v11659_v17 = vrot.slane %v5093_v9, 9 }
 0x1aa   : > { %v15323_v31 = vsel %vm14488_vm8, %v5177_v1, %v5178_v43 }
 0x1ab   : > { %v3651_v22 = vsel %vm14488_vm8, %v11548_v13, %v3650_v53  ;;  %v3654_v48 = vsel %vm14488_vm8, %v3652_v47, %v3653_v0  ;;  %v13839_v13 = vld [vmem:[#allocation2 + $0x54] sm:$0xff]   ;;  %v15337_v47 = vsel %vm14488_vm8, %v11659_v17, %v5189_v41  ;;  %v13840_v0 = vld [vmem:[#allocation2 + $0x60] sm:$0xff]   ;;  %v4365_v17 = vld [vmem:[#allocation2 + $0x30] sm:$0xf] }
 0x1ac   : > { %v11564_v29 = vcombine.low %v3651_v22, %v3654_v48  ;;  %v15348_v22 = vld [vmem:[#allocation2 + $0x74] sm:$0x1]  ;;  %v5095_v48 = vld [vmem:[#allocation2 + $0x6c] sm:$0xe]  ;;  %v4459_v21 = vshll.u32 %v4365_v17, 16 }
 0x1ad   : > { %v5206_v19 = vrot.slane %v15348_v22, 5  ;;  %v11661_v58 = vrot.slane %v5095_v48, 9  ;;  %v15402_v48 = vld [vmem:[#allocation2 + $0xa0] sm:$0xf] }
 0x1af   : > { %12695 = vmatmul.mubr.msk.bf16.gmra.mrb[28].mxu0 %vm1480_vm14, %v11523_v5  ;;  %v18044_v5 = vld [vmem:[#allocation13_spill] sm:$0xff] }
 0x1b0   : > { %12700 = vmatprep.mubr.msk.bf16.mxu0 %vm1480_vm14, %v11556_v40  ;;  %v18045_v40 = vcombine.low %v18043_v42, %v18044_v5  ;;  %v4362_v5 = vld [vmem:[#allocation2 + $0x24] sm:$0xf] }
 0x1b1   : > { %v4432_v63 = vshrl.u32 %v4362_v5, 16 }
 0x1b3   : > { %v4434_v43 = vrot.slane %v4432_v63, 4 }
 0x1b7   : > { %12701 = vmatmul.mubr.msk.bf16.vlgmr.msra.gmra.mrb[0].mxu0 %vm1480_vm14, %v11557_v38  ;;  %v13833_v38 = vld [vmem:[#allocation2 + $0x18] sm:$0xff]  }
 0x1b8   : > { %12733 = vmatpush3.bf16.msra.mxu0 %v4164_v15  ;;  %12704 = vmatprep.mubr.msk.bf16.mxu0 %vm1480_vm14, %v11558_v44  ;;  %v18057_v15 = vld [vmem:[#allocation21_spill] sm:$0xff] }
 0x1b9   : > { %13791 = vmatprep.subr.msk.bf16.mxu0 %vm1529_vm0, %v4843_v20  ;;  %v18058_v44 = vcombine.low %v15024_v61, %v18057_v15  ;;  %v5091_v61 = vld [vmem:[#allocation2 + $0x3c] sm:$0xe]  ;;  %v13843_v15 = vld [vmem:[#allocation2 + $0x84] sm:$0xff]  }
 0x1ba   : > { %v11657_v20 = vrot.slane %v5091_v61, 9 }
 0x1bc   : > { %v15319_v2 = vsel %vm14488_vm8, %v11657_v20, %v5175_v34  ;;  %v13844_v34 = vld [vmem:[#allocation2 + $0x90] sm:$0xff]  }
 0x1bf   : > { %12705 = vmatmul.mubr.msk.bf16.gmra.mrb[4].mxu0 %vm1480_vm14, %v18036_v52  ;;  %v15330_v52 = vld [vmem:[#allocation2 + $0x5c] sm:$0x1] }
 0x1c0   : > { %12708 = vmatprep.mubr.msk.bf16.mxu0 %vm1480_vm14, %v11560_v18  ;;  %v13837_v18 = vld [vmem:[#allocation2 + $0x3c] sm:$0xff]   ;;  %v5192_v53 = vrot.slane %v15330_v52, 5 }
 0x1c7   : > { %12709 = vmatmul.mubr.msk.bf16.gmra.mrb[8].mxu0 %vm1480_vm14, %v18039_v12  ;;  %v15346_v12 = vld [vmem:[#allocation2 + $0x70] sm:$0xf] }
 0x1c8   : > { %12712 = vmatprep.mubr.msk.bf16.mxu0 %vm1480_vm14, %v11562_v46  ;;  %v5191_v46 = vrot.slane %v5189_v41, 4 }
 0x1ca   : > { %v15341_v36 = vsel %vm14488_vm8, %v5191_v46, %v5192_v53 }
 0x1cf   : > { %12713 = vmatmul.mubr.msk.bf16.gmra.mrb[12].mxu0 %vm1480_vm14, %v18042_v23 }
 0x1d0   : > { %12716 = vmatprep.mubr.msk.bf16.mxu0 %vm1480_vm14, %v11564_v29  ;;  %v5203_v29 = vrot.slane %v15346_v12, 5 }
 0x1d2   : > { %v5205_v23 = vrot.slane %v5203_v29, 4  ;;  %v15355_v3 = vsel %vm14488_vm8, %v11661_v58, %v5203_v29  ;;  %v15404_v29 = vld [vmem:[#allocation2 + $0xa4] sm:$0x1] }
 0x1d3   : > { %v5234_v51 = vrot.slane %v15404_v29, 5 }
 0x1d4   : > { %v15361_v42 = vsel %vm14488_vm8, %v5205_v23, %v5206_v19  ;;  %v5099_v23 = vld [vmem:[#allocation2 + $0x9c] sm:$0xe] }
 0x1d5   : > { %18059 = vst [vmem:[#allocation18_spill] sm:$0xff] %v15361_v42 }
 0x1d7   : > { %12717 = vmatmul.mubr.msk.bf16.gmra.mrb[16].mxu0 %vm1480_vm14, %v18045_v40 }
 0x1d8   : > { %12720 = vmatprep.mubr.msk.bf16.mxu0 %vm1480_vm14, %v18048_v4  ;;  %v15365_v4 = vld [vmem:[#allocation2 + $0x28] sm:$0xf] }
 0x1d9   : > { %v4441_v39 = vshll.u32 %v15365_v4, 16 }
 0x1df   : > { %12721 = vmatmul.mubr.msk.bf16.gmra.mrb[20].mxu0 %vm1480_vm14, %v18051_v32  ;;  %v4435_v32 = vshll.u32 %v4362_v5, 16  ;;  %v4456_v5 = vshrl.u32 %v4365_v17, 16 }
 0x1e0   : > { %12724 = vmatprep.mubr.msk.bf16.mxu0 %vm1480_vm14, %v11568_v45  ;;  %v15370_v45 = vld [vmem:[#allocation2 + $0x88] sm:$0xf] }
 0x1e1   : > { %v5217_v30 = vrot.slane %v15370_v45, 5  ;;  %v4437_v20 = vrot.slane %v4435_v32, 5  ;;  %v13845_v32 = vld [vmem:[#allocation2 + $0x9c] sm:$0xff]  }
 0x1e3   : > { %v15385_v61 = vsel %vm14488_vm8, %v11663_v62, %v5217_v30  ;;  %v4438_v19 = vor.u32 %v4437_v20, %v4434_v43  ;;  %v15423_v20 = vld [vmem:[#allocation2 + $0x38] sm:$0x1] }
 0x1e4   : > { %18060 = vst [vmem:[#allocation6_spill] sm:$0xff] %v15385_v61 }
 0x1e7   : > { %12725 = vmatmul.mubr.msk.bf16.gmra.mrb[24].mxu0 %vm1480_vm14, %v18054_v10  ;;  %v5220_v10 = vrot.slane %v15372_v60, 5 }
 0x1e8   : > { %12728 = vmatprep.mubr.msk.bf16.mxu0 %vm1480_vm14, %v18055_v55  ;;  %v4445_v55 = vshrl.u32 %v15365_v4, 16 }
 0x1ea   : > { %v4447_v9 = vrot.slane %v4445_v55, 4  ;;  %v13846_v55 = vld [vmem:[#allocation2 + $0xa8] sm:$0xff]  }
 0x1ef   : > { %12729 = vmatmul.mubr.msk.bf16.gmra.mrb[28].mxu0 %vm1480_vm14, %v18058_v44  ;;  %v15379_v44 = vld [vmem:[#allocation2 + $0x20] sm:$0x1] }
 0x1f0   : > { %12734 = vmatprep.mubr.msk.bf16.mxu0 %vm1480_vm14, %v13833_v38  ;;  %v5219_v38 = vrot.slane %v5217_v30, 4  ;;  %v4427_v53 = vshll.u32 %v15379_v44, 16 }
 0x1f2   : > { %v15389_v1 = vsel %vm14488_vm8, %v5219_v38, %v5220_v10  ;;  %v4429_v30 = vrot.slane %v4427_v53, 5  ;;  %v4368_v10 = vld [vmem:[#allocation2 + $0x3c] sm:$0xf] }
 0x1f3   : > { %18061 = vst [vmem:[#allocation7_spill] sm:$0xff] %v15389_v1  ;;  %v4480_v17 = vshrl.u32 %v4368_v10, 16  ;;  %v4386_v1 = vld [vmem:[#allocation2 + $0x84] sm:$0xf] }
 0x1f7   : > { %12735 = vmatmul.mubr.msk.bf16.vlgmr.msra.gmra.mrb[0].mxu0 %vm1480_vm14, %v13835_v57  ;;  %v4413_v57 = vrot.slane %v4411_v26, 5  ;;  %v11665_v26 = vrot.slane %v5099_v23, 9  ;;  %v15432_v23 = vld [vmem:[#allocation2 + $0xbc] sm:$0x1] }
 0x1f8   : > { %12767 = vmatpush3.bf16.msra.mxu0 %v4893_v54  ;;  %12738 = vmatprep.mubr.msk.bf16.mxu0 %vm1480_vm14, %v13836_v37  ;;  %v15381_v37 = vrot.slane %v4417_v50, 5  ;;  %v4423_v54 = vrot.slane %v4421_v35, 4 }
 0x1f9   : > { %13792 = vmatprep.subr.msk.bf16.mxu0 %vm1529_vm0, %v15305_v7  ;;  %v4414_v46 = vor.u32 %v4413_v57, %v4410_v49  ;;  %v4439_v49 = vrot.slane %v4438_v19, 4  ;;  %v4493_v19 = vshrl.u32 %v15308_v8, 16 }
 0x1fb   : > { %v4415_v24 = vrot.slane %v4414_v46, 4  ;;  %v4483_v46 = vshll.u32 %v4368_v10, 16  ;;  %v15447_v10 = vld [vmem:[#allocation2 + $0x4c] sm:$0xf]  ;;  %v4495_v43 = vrot.slane %v4493_v19, 4 }
 0x1fc   : > { %v4374_v19 = vld [vmem:[#allocation2 + $0x54] sm:$0xf] }
 0x1ff   : > { %12739 = vmatmul.mubr.msk.bf16.gmra.mrb[4].mxu0 %vm1480_vm14, %v13837_v18  ;;  %v15391_v18 = vld [vmem:[#allocation2 + $0x2c] sm:$0x1] }
 0x200   : > { %12742 = vmatprep.mubr.msk.bf16.mxu0 %vm1480_vm14, %v13838_v14  ;;  %v15393_v14 = vrot.slane %v4441_v39, 5  ;;  %v4451_v58 = vshll.u32 %v15391_v18, 16 }
 0x202   : > { %v4453_v38 = vrot.slane %v4451_v58, 5  ;;  %v15430_v58 = vld [vmem:[#allocation2 + $0xb8] sm:$0xf] }
 0x207   : > { %12743 = vmatmul.mubr.msk.bf16.gmra.mrb[8].mxu0 %vm1480_vm14, %v13839_v13  ;;  %v4424_v13 = vor.u32 %v4423_v54, %v15381_v37  ;;  %v4458_v54 = vrot.slane %v4456_v5, 4  ;;  %v5101_v5 = vld [vmem:[#allocation2 + $0xb4] sm:$0xe] }
 0x208   : > { %12746 = vmatprep.mubr.msk.bf16.mxu0 %vm1480_vm14, %v13840_v0  ;;  %v15400_v0 = vld [vmem:[#allocation2 + $0x34] sm:$0xf] }
 0x209   : > { %v4465_v50 = vshll.u32 %v15400_v0, 16  ;;  %v4469_v35 = vshrl.u32 %v15400_v0, 16  ;;  %v4425_v62 = vrot.slane %v4424_v13, 4  ;;  %v4489_v13 = vshll.u32 %v15308_v8, 16 }
 0x20a   : > { %v4444_v8 = vsel %vm14127_vm13, %v4439_v49, %v15393_v14 }
 0x20b   : > { %v4471_v53 = vrot.slane %v4469_v35, 4  ;;  %v4475_v35 = vshll.u32 %v15423_v20, 16 }
 0x20f   : > { %12747 = vmatmul.mubr.msk.bf16.gmra.mrb[12].mxu0 %vm1480_vm14, %v13841_v28  ;;  %v5231_v28 = vrot.slane %v15402_v48, 5 }
 0x210   : > { %12750 = vmatprep.mubr.msk.bf16.mxu0 %vm1480_vm14, %v13842_v16  ;;  %v4448_v16 = vor.u32 %v4447_v9, %v15393_v14  ;;  %v15425_v9 = vrot.slane %v4465_v50, 5  ;;  %v13848_v14 = vld [vmem:[#allocation2 + $0xc0] sm:$0xff]  }
 0x211   : > { %v5233_v63 = vrot.slane %v5231_v28, 4  ;;  %v15415_v39 = vsel %vm14488_vm8, %v11665_v26, %v5231_v28  ;;  %v4420_v28 = vsel %vm14127_vm13, %v4415_v24, %v15381_v37  ;;  %v5248_v26 = vrot.slane %v15432_v23, 5 }
 0x212   : > { %18062 = vst [vmem:[#allocation8_spill] sm:$0xff] %v15415_v39  ;;  %v4449_v57 = vrot.slane %v4448_v16, 4  ;;  %v4371_v16 = vld [vmem:[#allocation2 + $0x48] sm:$0xf]  ;;  %v4482_v37 = vrot.slane %v4480_v17, 4  ;;  %v4485_v24 = vrot.slane %v4483_v46, 5 }
 0x213   : > { %v4504_v41 = vshrl.u32 %v4371_v16, 16  ;;  %v15463_v17 = vsel %vm1529_vm0, %v15305_v7, 0  ;;  %v4513_v46 = vshll.u32 %v15447_v10, 16 }
 0x217   : > { %12751 = vmatmul.mubr.msk.bf16.gmra.mrb[16].mxu0 %vm1480_vm14, %v13843_v15  ;;  %v15419_v15 = vsel %vm14488_vm8, %v5233_v63, %v5234_v51  ;;  %v4430_v51 = vsel %vm14127_vm13, %v4425_v62, %v4429_v30  ;;  %v11667_v63 = vrot.slane %v5101_v5, 9  ;;  %v15449_v62 = vrot.slane %v4489_v13, 5 }
 0x218   : > { %12754 = vmatprep.mubr.msk.bf16.mxu0 %vm1480_vm14, %v13844_v34  ;;  %18063 = vst [vmem:[#allocation9_spill] sm:$0xff] %v15419_v15  ;;  %v4461_v34 = vrot.slane %v4459_v21, 5  ;;  %v5245_v21 = vrot.slane %v15430_v58, 5  ;;  %v11621_v49 = vcombine.low %v4420_v28, %v4430_v51  ;;  %v4517_v13 = vshrl.u32 %v15447_v10, 16 }
 0x219   : > { %v4477_v5 = vrot.slane %v4475_v35, 5  ;;  %v4496_v7 = vor.u32 %v4495_v43, %v15449_v62  ;;  %v5103_v35 = vld [vmem:[#allocation2 + $0xcc] sm:$0xe]  ;;  %v4531_v43 = vshll.u32 %v4374_v19, 16 }
 0x21a   : > { %v4462_v50 = vor.u32 %v4461_v34, %v4458_v54  ;;  %v5247_v30 = vrot.slane %v5245_v21, 4  ;;  %v15453_v40 = vsel %vm14488_vm8, %v11667_v63, %v5245_v21  ;;  %v4454_v54 = vsel %vm14127_vm13, %v4449_v57, %v4453_v38  ;;  %v15474_v63 = vld [vmem:[#allocation2 + $0xd0] sm:$0xf] }
 0x21b   : > { %18064 = vst [vmem:[#allocation10_spill] sm:$0xff] %v15453_v40  ;;  %v4507_v34 = vshll.u32 %v4371_v16, 16  ;;  %v4486_v38 = vor.u32 %v4485_v24, %v4482_v37  ;;  %v4499_v57 = vshll.u32 %v15310_v33, 16  ;;  %v15471_v16 = vcombine.low %v4444_v8, %v4454_v54  ;;  %v15481_v24 = vld [vmem:[#allocation2 + $0x50] sm:$0x1] }
 0x21c   : > { %v4463_v51 = vrot.slane %v4462_v50, 4  ;;  %v4528_v50 = vshrl.u32 %v4374_v19, 16  ;;  %v5259_v37 = vrot.slane %v15474_v63, 5  ;;  %v15483_v8 = vrot.slane %v4513_v46, 5  ;;  %v15496_v19 = vld [vmem:[#allocation2 + $0x64] sm:$0xf] }
 0x21d   : > { %v4509_v28 = vrot.slane %v4507_v34, 5  ;;  %v15490_v34 = vrot.slane %v4499_v57, 5  ;;  %v4541_v46 = vshrl.u32 %v15328_v6, 16  ;;  %v15543_v40 = vld [vmem:[#allocation2 + $0x7c] sm:$0xf] }
 0x21e   : > { %v4468_v54 = vsel %vm14127_vm13, %v4463_v51, %v15425_v9  ;;  %v5261_v56 = vrot.slane %v5259_v37, 4 }
 0x21f   : > { %12755 = vmatmul.mubr.msk.bf16.gmra.mrb[20].mxu0 %vm1480_vm14, %v13845_v32  ;;  %v4472_v32 = vor.u32 %v4471_v53, %v15425_v9  ;;  %v15459_v53 = vsel %vm14488_vm8, %v5247_v30, %v5248_v26  ;;  %v4506_v26 = vrot.slane %v4504_v41, 4  ;;  %v15476_v30 = vld [vmem:[#allocation2 + $0xd4] sm:$0x1]  ;;  %v11669_v41 = vrot.slane %v5103_v35, 9 }
 0x220   : > { %12758 = vmatprep.mubr.msk.bf16.mxu0 %vm1480_vm14, %v13846_v55  ;;  %v13847_v55 = vld [vmem:[#allocation2 + $0xb4] sm:$0xff]   ;;  %18065 = vst [vmem:[#allocation11_spill] sm:$0xff] %v15459_v53  ;;  %v5262_v33 = vrot.slane %v15476_v30, 5  ;;  %v4537_v53 = vshll.u32 %v15328_v6, 16  ;;  %v15502_v9 = vrot.slane %v4496_v7, 4  ;;  %v4533_v6 = vrot.slane %v4531_v43, 5 }
 0x221   : > { %v4473_v21 = vrot.slane %v4472_v32, 4  ;;  %v4519_v32 = vrot.slane %v4517_v13, 4  ;;  %v4377_v13 = vld [vmem:[#allocation2 + $0x60] sm:$0xf]  ;;  %v15500_v35 = vsel %vm14488_vm8, %v11669_v41, %v5259_v37  ;;  %v4510_v51 = vor.u32 %v4509_v28, %v4506_v26 }
 0x222   : > { %18066 = vst [vmem:[#allocation12_spill] sm:$0xff] %v15500_v35  ;;  %v15507_v57 = vsel %vm14488_vm8, %v5261_v56, %v5262_v33  ;;  %v4552_v15 = vshrl.u32 %v4377_v13, 16  ;;  %v4555_v39 = vshll.u32 %v4377_v13, 16  ;;  %v4561_v37 = vshll.u32 %v15496_v19, 16  ;;  %v419_v33 = vld [vmem:[#allocation3 + $0x18] sm:$0x1] }
 0x223   : > { %v4478_v11 = vsel %vm14127_vm13, %v4473_v21, %v4477_v5  ;;  %18067 = vst [vmem:[#allocation13_spill] sm:$0xff] %v15507_v57  ;;  %v4520_v5 = vor.u32 %v4519_v32, %v15483_v8  ;;  %v4530_v21 = vrot.slane %v4528_v50, 4  ;;  %v4565_v7 = vshrl.u32 %v15496_v19, 16 }
 0x224   : > { %v11623_v28 = vcombine.low %v4468_v54, %v4478_v11  ;;  %v15515_v26 = vrot.slane %v4537_v53, 5  ;;  %v4543_v56 = vrot.slane %v4541_v46, 4  ;;  %v4502_v32 = vsel %vm14127_vm13, %v15502_v9, %v15490_v34  ;;  %v15526_v11 = vld [vmem:[#allocation2 + $0x68] sm:$0x1]  ;;  %v4380_v53 = vld [vmem:[#allocation2 + $0x6c] sm:$0xf] }
 0x225   : > { %v4511_v43 = vrot.slane %v4510_v51, 4  ;;  %v4534_v54 = vor.u32 %v4533_v6, %v4530_v21  ;;  %v4383_v34 = vld [vmem:[#allocation2 + $0x78] sm:$0xf]  ;;  %v420_v46 = vsel %vm15530_vm4, 0, %v419_v33  ;;  %v4554_v13 = vrot.slane %v4552_v15, 4 }
 0x226   : > { %v4557_v9 = vrot.slane %v4555_v39, 5  ;;  %v15541_v51 = vrot.slane %v4561_v37, 5  ;;  %421 = vst [vmem:[#allocation3 + $0x18] sm:$0x1] %v420_v46  ;;  %v4544_v57 = vor.u32 %v4543_v56, %v15515_v26  ;;  %v4579_v21 = vshll.u32 %v4380_v53, 16 }
 0x227   : > { %12759 = vmatmul.mubr.msk.bf16.gmra.mrb[24].mxu0 %vm1480_vm14, %v13847_v55  ;;  %v13849_v55 = vld [vmem:[#allocation2 + $0xcc] sm:$0xff]   ;;  %v4589_v6 = vshrl.u32 %v15346_v12, 16  ;;  %v4603_v33 = vshll.u32 %v4383_v34, 16  ;;  %v4516_v39 = vsel %vm14127_vm13, %v4511_v43, %v15483_v8  ;;  %v4535_v15 = vrot.slane %v4534_v54, 4 }
 0x228   : > { %12762 = vmatprep.mubr.msk.bf16.mxu0 %vm1480_vm14, %v13848_v14  ;;  %v15488_v14 = vrot.slane %v4486_v38, 4  ;;  %v4523_v38 = vshll.u32 %v15481_v24, 16  ;;  %v4609_v37 = vshll.u32 %v15543_v40, 16  ;;  %v4581_v8 = vrot.slane %v4579_v21, 5 }
 0x229   : > { %v4591_v54 = vrot.slane %v4589_v6, 4 }
 0x22a   : > { %v4492_v50 = vsel %vm14127_vm13, %v15488_v14, %v15449_v62  ;;  %v4525_v41 = vrot.slane %v4523_v38, 5  ;;  %v4521_v62 = vrot.slane %v4520_v5, 4  ;;  %v4547_v14 = vshll.u32 %v15330_v52, 16 }
 0x22b   : > { %v4567_v38 = vrot.slane %v4565_v7, 4  ;;  %v4576_v5 = vshrl.u32 %v4380_v53, 16  ;;  %v4585_v52 = vshll.u32 %v15346_v12, 16  ;;  %v4613_v7 = vshrl.u32 %v15543_v40, 16 }
 0x22c   : > { %v4526_v56 = vsel %vm14127_vm13, %v4521_v62, %v4525_v41  ;;  %v4549_v46 = vrot.slane %v4547_v14, 5  ;;  %v4558_v53 = vor.u32 %v4557_v9, %v4554_v13  ;;  %v4545_v12 = vrot.slane %v4544_v57, 4  ;;  %v15565_v57 = vld [vmem:[#allocation2 + $0x80] sm:$0x1] }
 0x22d   : > { %v4568_v35 = vor.u32 %v4567_v38, %v15541_v51  ;;  %v4578_v61 = vrot.slane %v4576_v5, 4  ;;  %v15561_v43 = vrot.slane %v4585_v52, 5  ;;  %v4605_v62 = vrot.slane %v4603_v33, 5  ;;  %v4389_v33 = vld [vmem:[#allocation2 + $0x90] sm:$0xf] }
 0x22e   : > { %v15563_v14 = vrot.slane %v4609_v37, 5  ;;  %v4615_v13 = vrot.slane %v4613_v7, 4  ;;  %v4624_v9 = vshrl.u32 %v4386_v1, 16  ;;  %v4627_v38 = vshll.u32 %v4386_v1, 16  ;;  %v15576_v37 = vld [vmem:[#allocation2 + $0x94] sm:$0xf] }
 0x22f   : > { %12763 = vmatmul.mubr.msk.bf16.gmra.mrb[28].mxu0 %vm1480_vm14, %v13849_v55  ;;  %v18068_v55 = vmov 0  ;;  %v4559_v42 = vrot.slane %v4558_v53, 4  ;;  %v11624_v5 = vcombine.low %v4492_v50, %v4502_v32  ;;  %v4550_v21 = vsel %vm14127_vm13, %v4545_v12, %v4549_v46 }
 0x230   : > { %12768 = vmatprep.mubr.msk.bf16.mxu0 %vm1480_vm14, %v11621_v49  ;;  %v18069_v55 = vsel %vm15530_vm4, 4294967295, %v18068_v55  ;;  %v18071_v49 = vmov 0   ;;  %v4582_v52 = vor.u32 %v4581_v8, %v4578_v61  ;;  %v4592_v1 = vor.u32 %v4591_v54, %v15561_v43 }
 0x231   : > { %18070 = vst [vmem:[#allocation14_spill] sm:$0xff] %v18069_v55  ;;  %406 = vst.msk [vmem:[#allocation3 + $0x8] sm:$0x1] %vm405_vm1, %v18071_v49  ;;  %v4600_v55 = vshrl.u32 %v4383_v34, 16  ;;  %v4619_v50 = vshll.u32 %v15565_v57, 16  ;;  %v4626_v32 = vrot.slane %v4624_v9, 4 }
 0x232   : > { %410 = vst.msk [vmem:[#allocation3 + $0xd4] sm:$0x1] %vm405_vm1, %v18071_v49  ;;  %v4571_v49 = vshll.u32 %v15526_v11, 16  ;;  %v4648_v7 = vshrl.u32 %v4389_v33, 16  ;;  %v4657_v46 = vshll.u32 %v15576_v37, 16  ;;  %v4661_v53 = vshrl.u32 %v15576_v37, 16 }
 0x233   : > { %v4602_v41 = vrot.slane %v4600_v55, 4  ;;  %v4540_v55 = vsel %vm14127_vm13, %v4535_v15, %v15515_v26  ;;  %v4564_v26 = vsel %vm14127_vm13, %v4559_v42, %v15541_v51  ;;  %v4583_v12 = vrot.slane %v4582_v52, 4 }
 0x234   : > { %v4573_v34 = vrot.slane %v4571_v49, 5  ;;  %v4633_v49 = vshll.u32 %v15370_v45, 16  ;;  %v4593_v8 = vrot.slane %v4592_v1, 4  ;;  %v11626_v9 = vcombine.low %v4540_v55, %v4550_v21  ;;  %v4395_v55 = vld [vmem:[#allocation2 + $0xa8] sm:$0xf] }
 0x235   : > { %v4606_v6 = vor.u32 %v4605_v62, %v4602_v41  ;;  %v4621_v41 = vrot.slane %v4619_v50, 5  ;;  %v4643_v62 = vshll.u32 %v15372_v60, 16  ;;  %v4588_v52 = vsel %vm14127_vm13, %v4583_v12, %v15561_v43  ;;  %v15602_v21 = vld [vmem:[#allocation2 + $0xac] sm:$0xf] }
 0x236   : > { %v15585_v15 = vrot.slane %v4633_v49, 5  ;;  %v15593_v49 = vld [vmem:[#allocation2 + $0x98] sm:$0x1] }
 0x237   : > { %12769 = vmatmul.mubr.msk.bf16.vlgmr.msra.gmra.mrb[0].mxu0 %vm1480_vm14, %v15471_v16  ;;  %v4569_v16 = vrot.slane %v4568_v35, 4  ;;  %v4595_v35 = vshll.u32 %v15348_v22, 16  ;;  %v4607_v42 = vrot.slane %v4606_v6, 4  ;;  %v4667_v43 = vshll.u32 %v15593_v49, 16 }
 0x238   : > { %12801 = vmatpush3.bf16.msra.mxu0 %v15463_v17  ;;  %12772 = vmatprep.mubr.msk.bf16.mxu0 %vm1480_vm14, %v11623_v28  ;;  %v4637_v17 = vshrl.u32 %v15370_v45, 16  ;;  %v11625_v28 = vcombine.low %v4516_v39, %v4526_v56  ;;  %v4616_v45 = vor.u32 %v4615_v13, %v15563_v14  ;;  %v4629_v39 = vrot.slane %v4627_v38, 5  ;;  %v4392_v13 = vld [vmem:[#allocation2 + $0x9c] sm:$0xf] }
 0x239   : > { %v4574_v61 = vsel %vm14127_vm13, %v4569_v16, %v4573_v34  ;;  %v4651_v56 = vshll.u32 %v4389_v33, 16  ;;  %v4597_v54 = vrot.slane %v4595_v35, 5  ;;  %v15595_v33 = vrot.slane %v4657_v46, 5 }
 0x23a   : > { %v4639_v22 = vrot.slane %v4637_v17, 4  ;;  %v4617_v51 = vrot.slane %v4616_v45, 4  ;;  %v4630_v34 = vor.u32 %v4629_v39, %v4626_v32  ;;  %v11627_v38 = vcombine.low %v4564_v26, %v4574_v61 }
 0x23b   : > { %v4650_v17 = vrot.slane %v4648_v7, 4  ;;  %v4598_v1 = vsel %vm14127_vm13, %v4593_v8, %v4597_v54  ;;  %v4672_v60 = vshrl.u32 %v4392_v13, 16  ;;  %v4675_v35 = vshll.u32 %v4392_v13, 16  ;;  %v15624_v13 = vld [vmem:[#allocation2 + $0xb0] sm:$0x1] }
 0x23c   : > { %v4640_v16 = vor.u32 %v4639_v22, %v15585_v15  ;;  %v4612_v6 = vsel %vm14127_vm13, %v4607_v42, %v15563_v14  ;;  %v4622_v45 = vsel %vm14127_vm13, %v4617_v51, %v4621_v41  ;;  %v4631_v50 = vrot.slane %v4630_v34, 4 }
 0x23d   : > { %v4645_v32 = vrot.slane %v4643_v62, 5  ;;  %v4681_v26 = vshll.u32 %v15402_v48, 16  ;;  %v4685_v61 = vshrl.u32 %v15402_v48, 16  ;;  %v4696_v22 = vshrl.u32 %v4395_v55, 16 }
 0x23e   : > { %v4641_v39 = vrot.slane %v4640_v16, 4  ;;  %v4699_v7 = vshll.u32 %v4395_v55, 16  ;;  %v4709_v14 = vshrl.u32 %v15602_v21, 16  ;;  %v4674_v12 = vrot.slane %v4672_v60, 4 }
 0x23f   : > { %12773 = vmatmul.mubr.msk.bf16.gmra.mrb[4].mxu0 %vm1480_vm14, %v11624_v5  ;;  %v4653_v5 = vrot.slane %v4651_v56, 5  ;;  %v4705_v56 = vshll.u32 %v15602_v21, 16  ;;  %v4677_v8 = vrot.slane %v4675_v35, 5  ;;  %v11628_v54 = vcombine.low %v4588_v52, %v4598_v1 }
 0x240   : > { %12776 = vmatprep.mubr.msk.bf16.mxu0 %vm1480_vm14, %v11625_v28  ;;  %v4663_v28 = vrot.slane %v4661_v53, 4  ;;  %v11629_v42 = vcombine.low %v4612_v6, %v4622_v45  ;;  %v4636_v48 = vsel %vm14127_vm13, %v4631_v50, %v15585_v15  ;;  %v4646_v51 = vsel %vm14127_vm13, %v4641_v39, %v4645_v32  ;;  %v4401_v50 = vld [vmem:[#allocation2 + $0xc0] sm:$0xf]  ;;  %v15629_v32 = vld [vmem:[#allocation2 + $0xc4] sm:$0xf] }
 0x241   : > { %v4654_v46 = vor.u32 %v4653_v5, %v4650_v17  ;;  %v4669_v41 = vrot.slane %v4667_v43, 5  ;;  %v15622_v34 = vrot.slane %v4681_v26, 5  ;;  %v4687_v62 = vrot.slane %v4685_v61, 4  ;;  %v4398_v5 = vld [vmem:[#allocation2 + $0xb4] sm:$0xf] }
 0x242   : > { %v4664_v53 = vor.u32 %v4663_v28, %v15595_v33  ;;  %v4707_v16 = vrot.slane %v4705_v56, 5  ;;  %v4711_v17 = vrot.slane %v4709_v14, 4  ;;  %v4678_v1 = vor.u32 %v4677_v8, %v4674_v12 }
 0x243   : > { %v4655_v28 = vrot.slane %v4654_v46, 4  ;;  %v4691_v60 = vshll.u32 %v15404_v29, 16  ;;  %v4715_v15 = vshll.u32 %v15624_v13, 16  ;;  %v11630_v35 = vcombine.low %v4636_v48, %v4646_v51 }
 0x244   : > { %v4665_v52 = vrot.slane %v4664_v53, 4  ;;  %v4688_v55 = vor.u32 %v4687_v62, %v15622_v34  ;;  %v4720_v6 = vshrl.u32 %v4398_v5, 16  ;;  %v4723_v45 = vshll.u32 %v4398_v5, 16 }
 0x245   : > { %v4712_v43 = vor.u32 %v4711_v17, %v4707_v16  ;;  %v4729_v26 = vshll.u32 %v15430_v58, 16  ;;  %v4733_v61 = vshrl.u32 %v15430_v58, 16  ;;  %v4660_v29 = vsel %vm14127_vm13, %v4655_v28, %v15595_v33  ;;  %v4404_v28 = vld [vmem:[#allocation2 + $0xcc] sm:$0xf] }
 0x246   : > { %v4693_v56 = vrot.slane %v4691_v60, 5  ;;  %v4744_v14 = vshrl.u32 %v4401_v50, 16  ;;  %v4747_v46 = vshll.u32 %v4401_v50, 16  ;;  %v4753_v53 = vshll.u32 %v15629_v32, 16 }
 0x247   : > { %12777 = vmatmul.mubr.msk.bf16.gmra.mrb[8].mxu0 %vm1480_vm14, %v11626_v9  ;;  %v4698_v9 = vrot.slane %v4696_v22, 4  ;;  %v4670_v22 = vsel %vm14127_vm13, %v4665_v52, %v4669_v41  ;;  %v4757_v12 = vshrl.u32 %v15629_v32, 16  ;;  %v4689_v8 = vrot.slane %v4688_v55, 4 }
 0x248   : > { %12780 = vmatprep.mubr.msk.bf16.mxu0 %vm1480_vm14, %v11627_v38  ;;  %v4701_v38 = vrot.slane %v4699_v7, 5  ;;  %v4679_v7 = vrot.slane %v4678_v1, 4  ;;  %v4722_v58 = vrot.slane %v4720_v6, 4  ;;  %v4725_v48 = vrot.slane %v4723_v45, 5 }
 0x249   : > { %v4713_v51 = vrot.slane %v4712_v43, 4  ;;  %v4731_v62 = vrot.slane %v4729_v26, 5  ;;  %v11631_v33 = vcombine.low %v4660_v29, %v4670_v22  ;;  %v4749_v17 = vrot.slane %v4747_v46, 5 }
 0x24a   : > { %v4702_v39 = vor.u32 %v4701_v38, %v4698_v9  ;;  %v4735_v9 = vrot.slane %v4733_v61, 4  ;;  %v4746_v38 = vrot.slane %v4744_v14, 4  ;;  %v4755_v41 = vrot.slane %v4753_v53, 5 }
 0x24b   : > { %v4759_v5 = vrot.slane %v4757_v12, 4  ;;  %v4684_v52 = vsel %vm14127_vm13, %v4679_v7, %v15622_v34  ;;  %v4694_v1 = vsel %vm14127_vm13, %v4689_v8, %v4693_v56  ;;  %v4726_v60 = vor.u32 %v4725_v48, %v4722_v58 }
 0x24c   : > { %v4736_v45 = vor.u32 %v4735_v9, %v4731_v62  ;;  %v4739_v50 = vshll.u32 %v15432_v23, 16  ;;  %v4768_v34 = vshrl.u32 %v4404_v28, 16  ;;  %v4777_v43 = vshll.u32 %v15474_v63, 16 }
 0x24d   : > { %v4781_v26 = vshrl.u32 %v15474_v63, 16  ;;  %v4750_v61 = vor.u32 %v4749_v17, %v4746_v38  ;;  %v4760_v29 = vor.u32 %v4759_v5, %v4755_v41  ;;  %v11632_v22 = vcombine.low %v4684_v52, %v4694_v1  ;;  %v5088_v5 = vld [vmem:[#allocation2 + $0x18] sm:$0xe] }
 0x24e   : > { %v4727_v7 = vrot.slane %v4726_v60, 4  ;;  %v4737_v56 = vrot.slane %v4736_v45, 4  ;;  %v4741_v14 = vrot.slane %v4739_v50, 5  ;;  %v4770_v46 = vrot.slane %v4768_v34, 4 }
 0x24f   : > { %12781 = vmatmul.mubr.msk.bf16.gmra.mrb[12].mxu0 %vm1480_vm14, %v11628_v54  ;;  %v4717_v54 = vrot.slane %v4715_v15, 5  ;;  %v15647_v15 = vld [vmem:[#allocation2 + $0xc8] sm:$0x1]  ;;  %v4779_v23 = vrot.slane %v4777_v43, 5  ;;  %v4783_v12 = vrot.slane %v4781_v26, 4  ;;  %v4751_v8 = vrot.slane %v4750_v61, 4 }
 0x250   : > { %12784 = vmatprep.mubr.msk.bf16.mxu0 %vm1480_vm14, %v11629_v42  ;;  %v4703_v42 = vrot.slane %v4702_v39, 4  ;;  %v4771_v39 = vshll.u32 %v4404_v28, 16  ;;  %v4732_v63 = vsel %vm14127_vm13, %v4727_v7, %v4731_v62  ;;  %v4742_v48 = vsel %vm14127_vm13, %v4737_v56, %v4741_v14  ;;  %v5090_v43 = vld [vmem:[#allocation2 + $0x30] sm:$0xe] }
 0x251   : > { %v4718_v6 = vsel %vm14127_vm13, %v4713_v51, %v4717_v54  ;;  %v4761_v54 = vrot.slane %v4760_v29, 4  ;;  %v4784_v51 = vor.u32 %v4783_v12, %v4779_v23  ;;  %v4787_v9 = vshll.u32 %v15476_v30, 16 }
 0x252   : > { %v4708_v55 = vsel %vm14127_vm13, %v4703_v42, %v4707_v16  ;;  %v4773_v53 = vrot.slane %v4771_v39, 5  ;;  %v5154_v17 = vrot.slane %v15357_v59, 5  ;;  %v11634_v28 = vcombine.low %v4732_v63, %v4742_v48  ;;  %v5089_v39 = vld [vmem:[#allocation2 + $0x24] sm:$0xe] }
 0x253   : > { %v11633_v16 = vcombine.low %v4708_v55, %v4718_v6  ;;  %v4785_v1 = vrot.slane %v4784_v51, 4  ;;  %v4789_v60 = vrot.slane %v4787_v9, 5  ;;  %v11654_v55 = vrot.slane %v5088_v5, 9  ;;  %v5096_v5 = vld [vmem:[#allocation2 + $0x78] sm:$0xe] }
 0x254   : > { %v4774_v42 = vor.u32 %v4773_v53, %v4770_v46  ;;  %v5156_v6 = vrot.slane %v5154_v17, 4  ;;  %v5157_v45 = vrot.slane %v15379_v44, 5  ;;  %v5168_v44 = vrot.slane %v15400_v0, 5  ;;  %v5092_v53 = vld [vmem:[#allocation2 + $0x48] sm:$0xe] }
 0x255   : > { %v4790_v59 = vsel %vm14127_vm13, %v4785_v1, %v4789_v60  ;;  %v5155_v50 = vsel %vm14488_vm8, %v11654_v55, %v5154_v17  ;;  %v11655_v29 = vrot.slane %v5089_v39, 9  ;;  %v5182_v46 = vrot.slane %v15447_v10, 5  ;;  %v5094_v10 = vld [vmem:[#allocation2 + $0x60] sm:$0xe]  ;;  %v5098_v60 = vld [vmem:[#allocation2 + $0x90] sm:$0xe] }
 0x256   : > { %v4775_v52 = vrot.slane %v4774_v42, 4  ;;  %v5158_v34 = vsel %vm14488_vm8, %v5156_v6, %v5157_v45  ;;  %v5170_v7 = vrot.slane %v5168_v44, 4  ;;  %v11658_v12 = vrot.slane %v5092_v53, 9 }
 0x257   : > { %12785 = vmatmul.mubr.msk.bf16.gmra.mrb[16].mxu0 %vm1480_vm14, %v11630_v35  ;;  %v4763_v35 = vshll.u32 %v15647_v15, 16  ;;  %v11670_v61 = vcombine.low %v5155_v50, %v5158_v34  ;;  %v5196_v48 = vrot.slane %v15496_v19, 5  ;;  %v11660_v51 = vrot.slane %v5094_v10, 9  ;;  %v471_v10 = vld [vmem:[#allocation3 + $0x14] sm:$0x1] }
 0x258   : > { %12788 = vmatprep.mubr.msk.bf16.mxu0 %vm1480_vm14, %v11631_v33  ;;  %v4756_v33 = vsel %vm14127_vm13, %v4751_v8, %v4755_v41  ;;  %v4780_v30 = vsel %vm14127_vm13, %v4775_v52, %v4779_v23  ;;  %v5161_v41 = vrot.slane %v15365_v4, 5  ;;  %v5171_v4 = vrot.slane %v15423_v20, 5 }
 0x259   : > { %v4765_v58 = vrot.slane %v4763_v35, 5  ;;  %v11636_v26 = vcombine.low %v4780_v30, %v4790_v59  ;;  %v5184_v8 = vrot.slane %v5182_v46, 4  ;;  %v5198_v9 = vrot.slane %v5196_v48, 4 }
 0x25a   : > { %v5163_v35 = vrot.slane %v5161_v41, 4  ;;  %v5162_v56 = vsel %vm14488_vm8, %v11655_v29, %v5161_v41  ;;  %v5210_v19 = vrot.slane %v15543_v40, 5  ;;  %v5224_v40 = vrot.slane %v15576_v37, 5  ;;  %v5100_v41 = vld [vmem:[#allocation2 + $0xa8] sm:$0xe] }
 0x25b   : > { %v4766_v38 = vsel %vm14127_vm13, %v4761_v54, %v4765_v58  ;;  %v5185_v54 = vrot.slane %v15481_v24, 5  ;;  %v5183_v58 = vsel %vm14488_vm8, %v11658_v12, %v5182_v46  ;;  %v18072_v24 = vcombine.low %v15319_v2, %v15323_v31  ;;  %v5102_v29 = vld [vmem:[#allocation2 + $0xc0] sm:$0xe]  ;;  %v18083_v46 = vld [vmem:[#allocation11_spill] sm:$0xff]  ;;  %v416_v12 = vld [vmem:[#allocation3 + $0xc] sm:$0x1] }
 0x25c   : > { %v11635_v62 = vcombine.low %v4756_v33, %v4766_v38  ;;  %v5199_v33 = vrot.slane %v15526_v11, 5  ;;  %v5197_v38 = vsel %vm14488_vm8, %v11660_v51, %v5196_v48  ;;  %v5212_v52 = vrot.slane %v5210_v19, 4  ;;  %v425_v51 = vld [vmem:[#allocation3 + $0x30] sm:$0x1] }
 0x25d   : > { %v5186_v63 = vsel %vm14488_vm8, %v5184_v8, %v5185_v54  ;;  %v5213_v11 = vrot.slane %v15565_v57, 5  ;;  %v18073_v2 = vcombine.low %v15337_v47, %v15341_v36  ;;  %v11664_v6 = vrot.slane %v5098_v60, 9  ;;  %v18074_v47 = vld [vmem:[#allocation18_spill] sm:$0xff]  ;;  %v483_v60 = vld [vmem:[#allocation3 + $0x44] sm:$0x1] }
 0x25e   : > { %v11674_v42 = vcombine.low %v5183_v58, %v5186_v63  ;;  %v5200_v17 = vsel %vm14488_vm8, %v5198_v9, %v5199_v33  ;;  %v5226_v45 = vrot.slane %v5224_v40, 4  ;;  %v5227_v57 = vrot.slane %v15593_v49, 5  ;;  %v474_v63 = vld [vmem:[#allocation3 + $0x20] sm:$0x1]  ;;  %v422_v33 = vld [vmem:[#allocation3 + $0x24] sm:$0x1] }
 0x25f   : > { %12789 = vmatmul.mubr.msk.bf16.gmra.mrb[20].mxu0 %vm1480_vm14, %v11632_v22  ;;  %v5164_v22 = vrot.slane %v15391_v18, 5  ;;  %v5172_v18 = vsel %vm14488_vm8, %v5170_v7, %v5171_v4  ;;  %v5214_v1 = vsel %vm14488_vm8, %v5212_v52, %v5213_v11  ;;  %v18075_v36 = vcombine.low %v15355_v3, %v18074_v47  ;;  %v18077_v3 = vld [vmem:[#allocation7_spill] sm:$0xff]  ;;  %v18079_v7 = vld [vmem:[#allocation8_spill] sm:$0xff]  ;;  %v18080_v4 = vld [vmem:[#allocation9_spill] sm:$0xff] }
 0x260   : > { %12792 = vmatprep.mubr.msk.bf16.mxu0 %vm1480_vm14, %v11633_v16  ;;  %v11656_v16 = vrot.slane %v5090_v43, 9  ;;  %v5225_v30 = vsel %vm14488_vm8, %v11664_v6, %v5224_v40  ;;  %v5228_v59 = vsel %vm14488_vm8, %v5226_v45, %v5227_v57  ;;  %v5238_v37 = vrot.slane %v15602_v21, 5  ;;  %v428_v11 = vld [vmem:[#allocation3 + $0x3c] sm:$0x1]  ;;  %v437_v57 = vld [vmem:[#allocation3 + $0x60] sm:$0x1] }
 0x261   : > { %v5165_v0 = vsel %vm14488_vm8, %v5163_v35, %v5164_v22  ;;  %v11680_v50 = vcombine.low %v5225_v30, %v5228_v59  ;;  %v11666_v34 = vrot.slane %v5100_v41, 9  ;;  %v5241_v49 = vrot.slane %v15624_v13, 5  ;;  %v434_v30 = vld [vmem:[#allocation3 + $0x54] sm:$0x1]  ;;  %v492_v41 = vld [vmem:[#allocation3 + $0x68] sm:$0x1] }
 0x262   : > { %v5169_v14 = vsel %vm14488_vm8, %v11656_v16, %v5168_v44  ;;  %v11671_v20 = vcombine.low %v5162_v56, %v5165_v0  ;;  %v5240_v39 = vrot.slane %v5238_v37, 4  ;;  %v18076_v44 = vld [vmem:[#allocation6_spill] sm:$0xff]  ;;  %v5252_v21 = vrot.slane %v15629_v32, 5 }
 0x263   : > { %v11672_v23 = vcombine.low %v5169_v14, %v5172_v18  ;;  %v18078_v43 = vcombine.low %v18076_v44, %v18077_v3  ;;  %v11668_v22 = vrot.slane %v5102_v29, 9  ;;  %v5255_v13 = vrot.slane %v15647_v15, 5  ;;  %v18082_v18 = vld [vmem:[#allocation10_spill] sm:$0xff]  ;;  %v18085_v15 = vld [vmem:[#allocation12_spill] sm:$0xff] }
 0x264   : > { %v5254_v16 = vrot.slane %v5252_v21, 4  ;;  %v18081_v56 = vcombine.low %v18079_v7, %v18080_v4  ;;  %v18084_v53 = vcombine.low %v18082_v18, %v18083_v46  ;;  %v417_v54 = vsel %vm15530_vm4, 0, %v416_v12  ;;  %v443_v4 = vld [vmem:[#allocation3 + $0x78] sm:$0x1] }
 0x265   : > { %v5253_v0 = vsel %vm14488_vm8, %v11668_v22, %v5252_v21  ;;  %v18089_v58 = vmov 0  ;;  %418 = vst [vmem:[#allocation3 + $0xc] sm:$0x1] %v417_v54  ;;  %v475_v48 = vsel %vm15772_vm3, 0, %v474_v63  ;;  %v426_v9 = vsel %vm15530_vm4, 0, %v425_v51 }
 0x266   : > { %v5256_v14 = vsel %vm14488_vm8, %v5254_v16, %v5255_v13  ;;  %v18090_v58 = vsel %vm15772_vm3, 4294967295, %v18089_v58  ;;  %476 = vst [vmem:[#allocation3 + $0x20] sm:$0x1] %v475_v48  ;;  %427 = vst [vmem:[#allocation3 + $0x30] sm:$0x1] %v426_v9  ;;  %v484_v6 = vsel %vm15772_vm3, 0, %v483_v60 }
 0x267   : > { %12793 = vmatmul.mubr.msk.bf16.gmra.mrb[24].mxu0 %vm1480_vm14, %v11634_v28  ;;  %v11676_v28 = vcombine.low %v5197_v38, %v5200_v17  ;;  %v11684_v32 = vcombine.low %v5253_v0, %v5256_v14  ;;  %18091 = vst [vmem:[#allocation15_spill] sm:$0xff] %v18090_v58  ;;  %v480_v38 = vld [vmem:[#allocation3 + $0x38] sm:$0x1]  ;;  %485 = vst [vmem:[#allocation3 + $0x44] sm:$0x1] %v484_v6 }
 0x268   : > { %12796 = vmatprep.mubr.msk.bf16.mxu0 %vm1480_vm14, %v11635_v62  ;;  %v11662_v62 = vrot.slane %v5096_v5, 9  ;;  %v481_v17 = vsel %vm15772_vm3, 0, %v480_v38  ;;  %v440_v0 = vld [vmem:[#allocation3 + $0x6c] sm:$0x1]  ;;  %v495_v63 = vld [vmem:[#allocation3 + $0x74] sm:$0x1] }
 0x269   : > { %482 = vst [vmem:[#allocation3 + $0x38] sm:$0x1] %v481_v17  ;;  %v441_v46 = vsel %vm15530_vm4, 0, %v440_v0  ;;  %v496_v48 = vsel %vm15772_vm3, 0, %v495_v63  ;;  %v446_v51 = vld [vmem:[#allocation3 + $0x84] sm:$0x1] }
 0x26a   : > { %v5211_v31 = vsel %vm14488_vm8, %v11662_v62, %v5210_v19  ;;  %v477_v19 = vld [vmem:[#allocation3 + $0x2c] sm:$0x1]  ;;  %v413_v62 = vld [vmem:[#allocation3] sm:$0x1]  ;;  %442 = vst [vmem:[#allocation3 + $0x6c] sm:$0x1] %v441_v46 }
 0x26b   : > { %v11678_v55 = vcombine.low %v5211_v31, %v5214_v1  ;;  %v478_v5 = vsel %vm15772_vm3, 0, %v477_v19  ;;  %v429_v31 = vsel %vm15530_vm4, 0, %v428_v11  ;;  %v486_v1 = vld [vmem:[#allocation3 + $0x50] sm:$0x1]  ;;  %497 = vst [vmem:[#allocation3 + $0x74] sm:$0x1] %v496_v48 }
 0x26c   : > { %479 = vst [vmem:[#allocation3 + $0x2c] sm:$0x1] %v478_v5  ;;  %430 = vst [vmem:[#allocation3 + $0x3c] sm:$0x1] %v429_v31  ;;  %v487_v40 = vsel %vm15772_vm3, 0, %v486_v1 }
 0x26d   : > { %488 = vst [vmem:[#allocation3 + $0x50] sm:$0x1] %v487_v40  ;;  %v504_v9 = vld [vmem:[#allocation3 + $0x98] sm:$0x1]  ;;  %v501_v38 = vld [vmem:[#allocation3 + $0x8c] sm:$0x1] }
 0x26e   : > { %v502_v17 = vsel %vm15772_vm3, 0, %v501_v38  ;;  %v455_v19 = vld [vmem:[#allocation3 + $0xa8] sm:$0x1]  ;;  %v461_v1 = vld [vmem:[#allocation3 + $0xc0] sm:$0x1] }
 0x26f   : > { %12797 = vmatmul.mubr.msk.bf16.gmra.mrb[28].mxu0 %vm1480_vm14, %v11636_v26  ;;  %v5239_v26 = vsel %vm14488_vm8, %v11666_v34, %v5238_v37  ;;  %v435_v37 = vsel %vm15530_vm4, 0, %v434_v30  ;;  %503 = vst [vmem:[#allocation3 + $0x8c] sm:$0x1] %v502_v17  ;;  %v456_v5 = vsel %vm15530_vm4, 0, %v455_v19  ;;  %v462_v40 = vsel %vm15530_vm4, 0, %v461_v1 }
 0x270   : > { %12802 = vmatprep.mubr.msk.bf16.mxu0 %vm1480_vm14, %v11670_v61  ;;  %v5242_v61 = vsel %vm14488_vm8, %v5240_v39, %v5241_v49  ;;  %436 = vst [vmem:[#allocation3 + $0x54] sm:$0x1] %v435_v37  ;;  %v493_v39 = vsel %vm15772_vm3, 0, %v492_v41  ;;  %v489_v49 = vld [vmem:[#allocation3 + $0x5c] sm:$0x1] }
 0x271   : > { %v11682_v35 = vcombine.low %v5239_v26, %v5242_v61  ;;  %494 = vst [vmem:[#allocation3 + $0x68] sm:$0x1] %v493_v39  ;;  %v490_v3 = vsel %vm15772_vm3, 0, %v489_v49  ;;  %457 = vst [vmem:[#allocation3 + $0xa8] sm:$0x1] %v456_v5 }
 0x272   : > { %491 = vst [vmem:[#allocation3 + $0x5c] sm:$0x1] %v490_v3  ;;  %463 = vst [vmem:[#allocation3 + $0xc0] sm:$0x1] %v462_v40  ;;  %v458_v60 = vld [vmem:[#allocation3 + $0xb4] sm:$0x1] }
 0x273   : > { %v516_v6 = vld [vmem:[#allocation3 + $0xc8] sm:$0x1]  ;;  %v6058_v17 = vld [vmem:[#allocation3 + $0x20] sm:$0x1] }
 0x274   : > { %v15858_v30 = vld [vmem:[%s17887_s4] ss:$0 sm:$0xff] }
 0x277   : > { %12803 = vmatmul.mubr.msk.bf16.vlgmr.msra.gmra.mrb[0].mxu0 %vm1480_vm14, %v11671_v20  ;;  %v18086_v20 = vld [vmem:[#allocation13_spill] sm:$0xff] }
 0x278   : > { %12806 = vmatprep.mubr.msk.bf16.mxu0 %vm1480_vm14, %v11672_v23  ;;  %v18087_v23 = vcombine.low %v18085_v15, %v18086_v20 }
 0x27f   : > { %12807 = vmatmul.mubr.msk.bf16.gmra.mrb[4].mxu0 %vm1480_vm14, %v18072_v24  ;;  %v423_v24 = vsel %vm15530_vm4, 0, %v422_v33  ;;  %v447_v33 = vsel %vm15530_vm4, 0, %v446_v51 }
 0x280   : > { %12810 = vmatprep.mubr.msk.bf16.mxu0 %vm1480_vm14, %v11674_v42  ;;  %v472_v42 = vsel %vm15772_vm3, 0, %v471_v10  ;;  %424 = vst [vmem:[#allocation3 + $0x24] sm:$0x1] %v423_v24  ;;  %v449_v10 = vld [vmem:[#allocation3 + $0x90] sm:$0x1]  ;;  %v505_v24 = vsel %vm15772_vm3, 0, %v504_v9 }
 0x281   : > { %473 = vst [vmem:[#allocation3 + $0x14] sm:$0x1] %v472_v42  ;;  %v450_v42 = vsel %vm15530_vm4, 0, %v449_v10  ;;  %448 = vst [vmem:[#allocation3 + $0x84] sm:$0x1] %v447_v33 }
 0x282   : > { %451 = vst [vmem:[#allocation3 + $0x90] sm:$0x1] %v450_v42  ;;  %506 = vst [vmem:[#allocation3 + $0x98] sm:$0x1] %v505_v24  ;;  %v6047_v42 = vld [vmem:[#allocation3 + $0xc] sm:$0xf] }
 0x287   : > { %12811 = vmatmul.mubr.msk.bf16.gmra.mrb[8].mxu0 %vm1480_vm14, %v18073_v2  ;;  %v414_v2 = vsel %vm15530_vm4, 0, %v413_v62  ;;  %v510_v62 = vld [vmem:[#allocation3 + $0xb0] sm:$0x1] }
 0x288   : > { %12814 = vmatprep.mubr.msk.bf16.mxu0 %vm1480_vm14, %v11676_v28  ;;  %v431_v28 = vld [vmem:[#allocation3 + $0x48] sm:$0x1]  ;;  %415 = vst [vmem:[#allocation3] sm:$0x1] %v414_v2  ;;  %v511_v11 = vsel %vm15772_vm3, 0, %v510_v62 }
 0x289   : > { %v432_v52 = vsel %vm15530_vm4, 0, %v431_v28  ;;  %v452_v28 = vld [vmem:[#allocation3 + $0x9c] sm:$0x1]  ;;  %512 = vst [vmem:[#allocation3 + $0xb0] sm:$0x1] %v511_v11 }
 0x28a   : > { %433 = vst [vmem:[#allocation3 + $0x48] sm:$0x1] %v432_v52  ;;  %v453_v52 = vsel %vm15530_vm4, 0, %v452_v28  ;;  %v507_v2 = vld [vmem:[#allocation3 + $0xa4] sm:$0x1] }
 0x28b   : > { %454 = vst [vmem:[#allocation3 + $0x9c] sm:$0x1] %v453_v52  ;;  %v508_v31 = vsel %vm15772_vm3, 0, %v507_v2  ;;  %v6051_v11 = vld [vmem:[#allocation3 + $0x14] sm:$0x1] }
 0x28c   : > { %509 = vst [vmem:[#allocation3 + $0xa4] sm:$0x1] %v508_v31 }
 0x28f   : > { %12815 = vmatmul.mubr.msk.bf16.gmra.mrb[12].mxu0 %vm1480_vm14, %v18075_v36  ;;  %v6159_v47 = vld [vmem:[#allocation3] sm:$0xf]  ;;  %v438_v36 = vsel %vm15530_vm4, 0, %v437_v57  ;;  %v513_v57 = vld [vmem:[#allocation3 + $0xbc] sm:$0x1] }
 0x290   : > { %12818 = vmatprep.mubr.msk.bf16.mxu0 %vm1480_vm14, %v11678_v55  ;;  %v468_v55 = vld [vmem:[#allocation3 + $0x8] sm:$0x1]  ;;  %v6209_v59 = vshrl.u32 %v6159_v47, 16  ;;  %439 = vst [vmem:[#allocation3 + $0x60] sm:$0x1] %v438_v36  ;;  %v6212_v34 = vshll.u32 %v6159_v47, 16 }
 0x291   : > { %v469_v45 = vsel %vm15772_vm3, 0, %v468_v55  ;;  %v459_v55 = vsel %vm15530_vm4, 0, %v458_v60  ;;  %v514_v47 = vsel %vm15772_vm3, 0, %v513_v57  ;;  %v6191_v36 = vld [vmem:[%s17885_s2] sm:$0xf] }
 0x292   : > { %470 = vst [vmem:[#allocation3 + $0x8] sm:$0x1] %v469_v45  ;;  %v6211_v44 = vrot.slane %v6209_v59, 4  ;;  %v6214_v21 = vrot.slane %v6212_v34, 5  ;;  %460 = vst [vmem:[#allocation3 + $0xb4] sm:$0x1] %v459_v55 }
 0x293   : > { %v517_v45 = vsel %vm15772_vm3, 0, %v516_v6  ;;  %515 = vst [vmem:[#allocation3 + $0xbc] sm:$0x1] %v514_v47 }
 0x294   : > { %v6215_v16 = vor.u32 %v6214_v21, %v6211_v44  ;;  %518 = vst [vmem:[#allocation3 + $0xc8] sm:$0x1] %v517_v45 }
 0x296   : > { %v6216_v14 = vrot.slane %v6215_v16, 4 }
 0x297   : > { %12819 = vmatmul.mubr.msk.bf16.gmra.mrb[16].mxu0 %vm1480_vm14, %v18078_v43  ;;  %v6592_v43 = vld [vmem:[%s17885_s2 + $0x4] sm:$0xf] }
 0x298   : > { %12822 = vmatprep.mubr.msk.bf16.mxu0 %vm1480_vm14, %v11680_v50  ;;  %v6160_v50 = vld [vmem:[#allocation3 + $0x4] sm:$0xf]  ;;  %13793 = vmatprep.subr.msk.bf16.mxu0 %vm6690_vm7, %v6592_v43  ;;  %v6692_v26 = vsel %vm6690_vm7, %v6592_v43, 0 }
 0x299   : > { %v6192_v61 = vld [vmem:[#allocation3 + $0x8] sm:$0x1]  ;;  %v6218_v29 = vshll.u32 %v6160_v50, 16  ;;  %13794 = vmatprep.subr.msk.bf16.mxu1 %vm6690_vm7, %v6592_v43  ;;  %12835 = vmatpush3.bf16.msra.mxu0 %v6692_v26 }
 0x29a   : > { %v6228_v22 = vshll.u32 %v6192_v61, 16  ;;  %13175 = vmatpush3.bf16.msra.mxu1 %v6692_v26 }
 0x29b   : > { %v6220_v13 = vrot.slane %v6218_v29, 5  ;;  %13795 = vmatprep.subr.msk.bf16.mxu1 %vm6690_vm7, %v6191_v36 }
 0x29c   : > { %v6230_v18 = vrot.slane %v6228_v22, 5 }
 0x29d   : > { %v6221_v20 = vsel %vm14127_vm13, %v6216_v14, %v6220_v13 }
 0x29f   : > { %12823 = vmatmul.mubr.msk.bf16.gmra.mrb[20].mxu0 %vm1480_vm14, %v18081_v56  ;;  %v444_v56 = vsel %vm15530_vm4, 0, %v443_v4 }
 0x2a0   : > { %12826 = vmatprep.mubr.msk.bf16.mxu0 %vm1480_vm14, %v11682_v35  ;;  %v6222_v35 = vshrl.u32 %v6160_v50, 16  ;;  %445 = vst [vmem:[#allocation3 + $0x78] sm:$0x1] %v444_v56 }
 0x2a2   : > { %v6224_v7 = vrot.slane %v6222_v35, 4 }
 0x2a7   : > { %12827 = vmatmul.mubr.msk.bf16.gmra.mrb[24].mxu0 %vm1480_vm14, %v18084_v53  ;;  %v498_v53 = vld [vmem:[#allocation3 + $0x80] sm:$0x1] }
 0x2a8   : > { %12830 = vmatprep.mubr.msk.bf16.mxu0 %vm1480_vm14, %v11684_v32  ;;  %v6225_v32 = vor.u32 %v6224_v7, %v6220_v13  ;;  %v499_v15 = vsel %vm15772_vm3, 0, %v498_v53 }
 0x2a9   : > { %500 = vst [vmem:[#allocation3 + $0x80] sm:$0x1] %v499_v15  ;;  %v6054_v15 = vld [vmem:[#allocation3 + $0x18] sm:$0xf] }
 0x2af   : > { %12831 = vmatmul.mubr.msk.bf16.gmra.mrb[28].mxu0 %vm1480_vm14, %v18087_v23  ;;  %v6226_v23 = vrot.slane %v6225_v32, 4 }
 0x2b1   : > { %v6231_v12 = vsel %vm14127_vm13, %v6226_v23, %v6230_v18 }
 0x2b2   : > { %v11735_v54 = vcombine.low %v6221_v20, %v6231_v12 }
 0x2b4   : > { %12836 = vmatprep.mubr.msk.bf16.mxu0 %vm6641_vm9, %v11735_v54 }
 0x34a   : > { %v12804_v59 = vpop.f32.mrb[0].mxu0 }
 0x34b   : > { %v5566_v37 = vadd.f32 %v12804_v59, %v15858_v30  ;;  %v5398_v41 = vpop.f32.mrb[1].mxu0 }
 0x34c   : > { %v5564_v50 = vadd.f32 %v15858_v30, %v5398_v41  ;;  %v12805_v34 = vpop.f32.mrb[2].mxu0 }
 0x34d   : > { %v5598_v39 = vmax.f32 %v5566_v37, 0.0  ;;  %v5567_v49 = vadd.f32 %v12805_v34, %v15858_v30  ;;  %v5401_v44 = vpop.f32.mrb[3].mxu0 }
 0x34e   : > { %v5596_v3 = vmax.f32 %v5564_v50, 0.0  ;;  %v5565_v43 = vadd.f32 %v15858_v30, %v5401_v44 }
 0x34f   : > { %v12143_v26 = vpack.c.bf16 %v5598_v39, %v5598_v39  ;;  %v5599_v61 = vmax.f32 %v5567_v49, 0.0 }
 0x350   : > { %v12141_v21 = vpack.c.bf16 %v5596_v3, %v5596_v3  ;;  %v5597_v29 = vmax.f32 %v5565_v43, 0.0  ;;  %v6068_v3 = vld [vmem:[#allocation3 + $0x30] sm:$0xf] }
 0x351   : > { %v5742_v35 = vshrl.u32 %v12143_v26, 16  ;;  %v12144_v22 = vpack.c.bf16 %v5599_v61, %v5599_v61  ;;  %v5745_v16 = vshll.u32 %v12143_v26, 16 }
 0x352   : > { %v5725_v13 = vshrl.u32 %v12141_v21, 16  ;;  %v5728_v7 = vshll.u32 %v12141_v21, 16  ;;  %v12142_v4 = vpack.c.bf16 %v5597_v29, %v5597_v29  ;;  %v12808_v56 = vpop.f32.mrb[4].mxu0 }
 0x353   : > { %v5744_v0 = vrot.slane %v5742_v35, 7  ;;  %v5750_v14 = vshrl.u32 %v12144_v22, 16  ;;  %v5753_v32 = vshll.u32 %v12144_v22, 16  ;;  %v5570_v18 = vadd.f32 %v12808_v56, %v15858_v30  ;;  %v5414_v46 = vpop.f32.mrb[5].mxu0  ;;  %v6061_v22 = vld [vmem:[#allocation3 + $0x24] sm:$0xf] }
 0x354   : > { %v5727_v20 = vrot.slane %v5725_v13, 7  ;;  %v5733_v23 = vshrl.u32 %v12142_v4, 16  ;;  %v5736_v12 = vshll.u32 %v12142_v4, 16  ;;  %v5568_v54 = vadd.f32 %v15858_v30, %v5414_v46  ;;  %v12809_v63 = vpop.f32.mrb[6].mxu0 }
 0x355   : > { %v5747_v48 = vor.u32 %v5745_v16, %v5744_v0  ;;  %v5748_v10 = vrot.slane %v5744_v0, 4  ;;  %v5752_v51 = vrot.slane %v5750_v14, 7  ;;  %v5602_v9 = vmax.f32 %v5570_v18, 0.0  ;;  %v5417_v33 = vpop.f32.mrb[7].mxu0 }
 0x356   : > { %v5730_v24 = vor.u32 %v5728_v7, %v5727_v20  ;;  %v5731_v38 = vrot.slane %v5727_v20, 4  ;;  %v5735_v19 = vrot.slane %v5733_v23, 7  ;;  %v5600_v5 = vmax.f32 %v5568_v54, 0.0 }
 0x357   : > { %v6055_v28 = vsel %vm15867_vm10, %v5747_v48, %v6054_v15  ;;  %v5755_v62 = vor.u32 %v5753_v32, %v5752_v51  ;;  %v5757_v52 = vrot.slane %v5752_v51, 4  ;;  %v12147_v2 = vpack.c.bf16 %v5602_v9, %v5602_v9  ;;  %v6072_v51 = vld [vmem:[#allocation3 + $0x38] sm:$0x1]  ;;  %v6065_v9 = vld [vmem:[#allocation3 + $0x2c] sm:$0x1] }
 0x358   : > { %6056 = vst [vmem:[#allocation3 + $0x18] sm:$0xf] %v6055_v28  ;;  %v6048_v31 = vsel %vm15867_vm10, %v5730_v24, %v6047_v42  ;;  %v5738_v1 = vor.u32 %v5736_v12, %v5735_v19  ;;  %v5740_v40 = vrot.slane %v5735_v19, 4  ;;  %v12145_v60 = vpack.c.bf16 %v5600_v5, %v5600_v5 }
 0x359   : > { %6049 = vst [vmem:[#allocation3 + $0xc] sm:$0xf] %v6048_v31  ;;  %v5756_v6 = vsel %vm14091_vm12, %v5748_v10, %v5755_v62  ;;  %v6059_v45 = vsel %vm15530_vm4, %v5757_v52, %v6058_v17  ;;  %v5776_v57 = vshrl.u32 %v12147_v2, 16  ;;  %v5779_v59 = vshll.u32 %v12147_v2, 16  ;;  %v6082_v31 = vld [vmem:[#allocation3 + $0x48] sm:$0xf] }
 0x35a   : > { %6057 = vst.msk [vmem:[#allocation3 + $0x1c] sm:$0xf] %vm402_vm6, %v5756_v6  ;;  %6060 = vst [vmem:[#allocation3 + $0x20] sm:$0x1] %v6059_v45  ;;  %v5739_v47 = vsel %vm14091_vm12, %v5731_v38, %v5738_v1  ;;  %v6052_v36 = vsel %vm15530_vm4, %v5740_v40, %v6051_v11  ;;  %v5759_v37 = vshrl.u32 %v12145_v60, 16  ;;  %v12812_v41 = vpop.f32.mrb[8].mxu0  ;;  %v5571_v34 = vadd.f32 %v12809_v63, %v15858_v30 }
 0x35b   : > { %6050 = vst.msk [vmem:[#allocation3 + $0x10] sm:$0xf] %vm402_vm6, %v5739_v47  ;;  %6053 = vst [vmem:[#allocation3 + $0x14] sm:$0x1] %v6052_v36  ;;  %v15886_v50 = vrot.slane %v5776_v57, 7  ;;  %v5569_v39 = vadd.f32 %v15858_v30, %v5417_v33  ;;  %v5574_v49 = vadd.f32 %v12812_v41, %v15858_v30  ;;  %v5430_v44 = vpop.f32.mrb[9].mxu0 }
 0x35c   : > { %v5761_v43 = vrot.slane %v5759_v37, 7  ;;  %v5762_v26 = vshll.u32 %v12145_v60, 16  ;;  %v5572_v61 = vadd.f32 %v15858_v30, %v5430_v44  ;;  %v12813_v21 = vpop.f32.mrb[10].mxu0  ;;  %v5603_v16 = vmax.f32 %v5571_v34, 0.0 }
 0x35d   : > { %v5781_v29 = vor.u32 %v5779_v59, %v15886_v50  ;;  %v5782_v35 = vrot.slane %v15886_v50, 4  ;;  %v5601_v13 = vmax.f32 %v5569_v39, 0.0  ;;  %v5433_v7 = vpop.f32.mrb[11].mxu0  ;;  %v5606_v0 = vmax.f32 %v5574_v49, 0.0  ;;  %v6075_v59 = vld [vmem:[#allocation3 + $0x3c] sm:$0xf] }
 0x35e   : > { %v5764_v4 = vor.u32 %v5762_v26, %v5761_v43  ;;  %v5765_v56 = vrot.slane %v5761_v43, 4  ;;  %v5604_v14 = vmax.f32 %v5572_v61, 0.0  ;;  %v12148_v18 = vpack.c.bf16 %v5603_v16, %v5603_v16 }
 0x35f   : > { %v6069_v32 = vsel %vm15867_vm10, %v5781_v29, %v6068_v3  ;;  %v12146_v46 = vpack.c.bf16 %v5601_v13, %v5601_v13  ;;  %v5575_v15 = vadd.f32 %v12813_v21, %v15858_v30  ;;  %v12151_v23 = vpack.c.bf16 %v5606_v0, %v5606_v0 }
 0x360   : > { %6070 = vst [vmem:[#allocation3 + $0x30] sm:$0xf] %v6069_v32  ;;  %v6062_v20 = vsel %vm15867_vm10, %v5764_v4, %v6061_v22  ;;  %v12149_v12 = vpack.c.bf16 %v5604_v14, %v5604_v14  ;;  %v5573_v54 = vadd.f32 %v15858_v30, %v5433_v7  ;;  %v5784_v63 = vshrl.u32 %v12148_v18, 16  ;;  %v6086_v32 = vld [vmem:[#allocation3 + $0x50] sm:$0x1] }
 0x361   : > { %6063 = vst [vmem:[#allocation3 + $0x24] sm:$0xf] %v6062_v20  ;;  %v5787_v48 = vshll.u32 %v12148_v18, 16  ;;  %v5767_v10 = vshrl.u32 %v12146_v46, 16  ;;  %v5770_v42 = vshll.u32 %v12146_v46, 16  ;;  %v5810_v33 = vshrl.u32 %v12151_v23, 16 }
 0x362   : > { %v5813_v24 = vshll.u32 %v12151_v23, 16  ;;  %v5793_v38 = vshrl.u32 %v12149_v12, 16  ;;  %v5796_v17 = vshll.u32 %v12149_v12, 16  ;;  %v12816_v19 = vpop.f32.mrb[12].mxu0  ;;  %v5786_v5 = vrot.slane %v5784_v63, 7 }
 0x363   : > { %v5769_v28 = vrot.slane %v5767_v10, 7  ;;  %v5607_v62 = vmax.f32 %v5575_v15, 0.0  ;;  %v5605_v52 = vmax.f32 %v5573_v54, 0.0  ;;  %v5446_v11 = vpop.f32.mrb[13].mxu0  ;;  %v15900_v2 = vrot.slane %v5810_v33, 7 }
 0x364   : > { %v15902_v1 = vrot.slane %v5793_v38, 7  ;;  %v5578_v40 = vadd.f32 %v12816_v19, %v15858_v30  ;;  %v5576_v60 = vadd.f32 %v15858_v30, %v5446_v11  ;;  %v12817_v6 = vpop.f32.mrb[14].mxu0  ;;  %v5789_v45 = vor.u32 %v5787_v48, %v5786_v5  ;;  %v6079_v63 = vld [vmem:[#allocation3 + $0x44] sm:$0x1] }
 0x365   : > { %v5791_v57 = vrot.slane %v5786_v5, 4  ;;  %v5772_v47 = vor.u32 %v5770_v42, %v5769_v28  ;;  %v5774_v36 = vrot.slane %v5769_v28, 4  ;;  %v5449_v37 = vpop.f32.mrb[15].mxu0  ;;  %v5815_v41 = vor.u32 %v5813_v24, %v15900_v2 }
 0x366   : > { %v5816_v50 = vrot.slane %v15900_v2, 4  ;;  %v5798_v34 = vor.u32 %v5796_v17, %v15902_v1  ;;  %v5799_v39 = vrot.slane %v15902_v1, 4  ;;  %v5790_v49 = vsel %vm14091_vm12, %v5782_v35, %v5789_v45  ;;  %v6089_v45 = vld [vmem:[#allocation3 + $0x54] sm:$0xf] }
 0x367   : > { %v6073_v44 = vsel %vm15530_vm4, %v5791_v57, %v6072_v51  ;;  %v5773_v3 = vsel %vm14091_vm12, %v5765_v56, %v5772_v47  ;;  %v6066_v43 = vsel %vm15530_vm4, %v5774_v36, %v6065_v9  ;;  %6071 = vst.msk [vmem:[#allocation3 + $0x34] sm:$0xf] %vm402_vm6, %v5790_v49  ;;  %v6083_v26 = vsel %vm15867_vm10, %v5815_v41, %v6082_v31 }
 0x368   : > { %6074 = vst [vmem:[#allocation3 + $0x38] sm:$0x1] %v6073_v44  ;;  %6064 = vst.msk [vmem:[#allocation3 + $0x28] sm:$0xf] %vm402_vm6, %v5773_v3  ;;  %v6076_v61 = vsel %vm15867_vm10, %v5798_v34, %v6075_v59  ;;  %v12152_v21 = vpack.c.bf16 %v5607_v62, %v5607_v62  ;;  %v12150_v29 = vpack.c.bf16 %v5605_v52, %v5605_v52  ;;  %v5610_v35 = vmax.f32 %v5578_v40, 0.0 }
 0x369   : > { %6067 = vst [vmem:[#allocation3 + $0x2c] sm:$0x1] %v6066_v43  ;;  %6084 = vst [vmem:[#allocation3 + $0x48] sm:$0xf] %v6083_v26  ;;  %v5608_v22 = vmax.f32 %v5576_v60, 0.0  ;;  %v5579_v16 = vadd.f32 %v12817_v6, %v15858_v30  ;;  %v5577_v13 = vadd.f32 %v15858_v30, %v5449_v37 }
 0x36a   : > { %6077 = vst [vmem:[#allocation3 + $0x3c] sm:$0xf] %v6076_v61  ;;  %v5818_v7 = vshrl.u32 %v12152_v21, 16  ;;  %v5821_v4 = vshll.u32 %v12152_v21, 16  ;;  %v5801_v56 = vshrl.u32 %v12150_v29, 16  ;;  %v5804_v0 = vshll.u32 %v12150_v29, 16 }
 0x36b   : > { %v12820_v14 = vpop.f32.mrb[16].mxu0  ;;  %v12155_v18 = vpack.c.bf16 %v5610_v35, %v5610_v35  ;;  %v12153_v46 = vpack.c.bf16 %v5608_v22, %v5608_v22  ;;  %v5611_v15 = vmax.f32 %v5579_v16, 0.0  ;;  %v5609_v20 = vmax.f32 %v5577_v13, 0.0  ;;  %v6096_v6 = vld [vmem:[#allocation3 + $0x60] sm:$0xf] }
 0x36c   : > { %v5462_v23 = vpop.f32.mrb[17].mxu0  ;;  %v5820_v12 = vrot.slane %v5818_v7, 7  ;;  %v5803_v54 = vrot.slane %v5801_v56, 7  ;;  %v5582_v48 = vadd.f32 %v12820_v14, %v15858_v30  ;;  %v6161_v37 = vld [vmem:[#allocation3 + $0xc] sm:$0xf] }
 0x36d   : > { %v5580_v10 = vadd.f32 %v15858_v30, %v5462_v23  ;;  %v12821_v42 = vpop.f32.mrb[18].mxu0  ;;  %v5844_v51 = vshrl.u32 %v12155_v18, 16  ;;  %v5847_v9 = vshll.u32 %v12155_v18, 16  ;;  %v5827_v33 = vshrl.u32 %v12153_v46, 16  ;;  %v6100_v43 = vld [vmem:[#allocation3 + $0x68] sm:$0x1] }
 0x36e   : > { %v5830_v24 = vshll.u32 %v12153_v46, 16  ;;  %v5465_v38 = vpop.f32.mrb[19].mxu0  ;;  %v5823_v17 = vor.u32 %v5821_v4, %v5820_v12  ;;  %v5825_v19 = vrot.slane %v5820_v12, 4  ;;  %v5806_v5 = vor.u32 %v5804_v0, %v5803_v54  ;;  %v6093_v26 = vld [vmem:[#allocation3 + $0x5c] sm:$0x1] }
 0x36f   : > { %v5808_v28 = vrot.slane %v5803_v54, 4  ;;  %v5846_v62 = vrot.slane %v5844_v51, 7  ;;  %v5829_v52 = vrot.slane %v5827_v33, 7  ;;  %v12156_v11 = vpack.c.bf16 %v5611_v15, %v5611_v15  ;;  %v6162_v0 = vld [vmem:[#allocation3 + $0x10] sm:$0xf] }
 0x370   : > { %v12154_v2 = vpack.c.bf16 %v5609_v20, %v5609_v20  ;;  %v5824_v31 = vsel %vm14091_vm12, %v5816_v50, %v5823_v17  ;;  %v6087_v1 = vsel %vm15530_vm4, %v5825_v19, %v6086_v32  ;;  %v5807_v40 = vsel %vm14091_vm12, %v5799_v39, %v5806_v5  ;;  %v6110_v33 = vld [vmem:[#allocation3 + $0x78] sm:$0xf] }
 0x371   : > { %v6080_v60 = vsel %vm15530_vm4, %v5808_v28, %v6079_v63  ;;  %6085 = vst.msk [vmem:[#allocation3 + $0x4c] sm:$0xf] %vm402_vm6, %v5824_v31  ;;  %6088 = vst [vmem:[#allocation3 + $0x50] sm:$0x1] %v6087_v1  ;;  %v5849_v57 = vor.u32 %v5847_v9, %v5846_v62  ;;  %v5850_v47 = vrot.slane %v5846_v62, 4  ;;  %v5832_v36 = vor.u32 %v5830_v24, %v5829_v52 }
 0x372   : > { %6078 = vst.msk [vmem:[#allocation3 + $0x40] sm:$0xf] %vm402_vm6, %v5807_v40  ;;  %6081 = vst [vmem:[#allocation3 + $0x44] sm:$0x1] %v6080_v60  ;;  %v5833_v59 = vrot.slane %v5829_v52, 4  ;;  %v5852_v41 = vshrl.u32 %v12156_v11, 16  ;;  %v5583_v16 = vadd.f32 %v12821_v42, %v15858_v30  ;;  %v5581_v13 = vadd.f32 %v15858_v30, %v5465_v38 }
 0x373   : > { %v5855_v50 = vshll.u32 %v12156_v11, 16  ;;  %v5835_v34 = vshrl.u32 %v12154_v2, 16  ;;  %v5838_v39 = vshll.u32 %v12154_v2, 16  ;;  %v15938_v49 = vpop.f32.mrb[20].mxu0  ;;  %v6097_v44 = vsel %vm15867_vm10, %v5849_v57, %v6096_v6  ;;  %v6103_v24 = vld [vmem:[#allocation3 + $0x6c] sm:$0xf] }
 0x374   : > { %v6090_v3 = vsel %vm15867_vm10, %v5832_v36, %v6089_v45  ;;  %v5614_v61 = vmax.f32 %v5582_v48, 0.0  ;;  %v5612_v21 = vmax.f32 %v5580_v10, 0.0  ;;  %v15944_v29 = vpop.f32.mrb[21].mxu0  ;;  %6098 = vst [vmem:[#allocation3 + $0x60] sm:$0xf] %v6097_v44  ;;  %v5854_v35 = vrot.slane %v5852_v41, 7 }
 0x375   : > { %6091 = vst [vmem:[#allocation3 + $0x54] sm:$0xf] %v6090_v3  ;;  %v5837_v22 = vrot.slane %v5835_v34, 7  ;;  %v15948_v7 = vpop.f32.mrb[22].mxu0  ;;  %v6233_v14 = vshrl.u32 %v6161_v37, 16  ;;  %v6236_v32 = vshll.u32 %v6161_v37, 16 }
 0x376   : > { %v12159_v4 = vpack.c.bf16 %v5614_v61, %v5614_v61  ;;  %v12157_v56 = vpack.c.bf16 %v5612_v21, %v5612_v21  ;;  %v15950_v18 = vpop.f32.mrb[23].mxu0  ;;  %v5857_v46 = vor.u32 %v5855_v50, %v5854_v35  ;;  %v5859_v15 = vrot.slane %v5854_v35, 4  ;;  %v6193_v28 = vld [vmem:[#allocation3 + $0x14] sm:$0x1]  ;;  %v6163_v37 = vld [vmem:[#allocation3 + $0x18] sm:$0xf] }
 0x377   : > { %v5840_v20 = vor.u32 %v5838_v39, %v5837_v22  ;;  %v5842_v23 = vrot.slane %v5837_v22, 4  ;;  %v5615_v19 = vmax.f32 %v5583_v16, 0.0  ;;  %v5613_v5 = vmax.f32 %v5581_v13, 0.0  ;;  %v6164_v3 = vld [vmem:[#allocation3 + $0x1c] sm:$0xf] }
 0x378   : > { %v5878_v12 = vshrl.u32 %v12159_v4, 16  ;;  %v5881_v54 = vshll.u32 %v12159_v4, 16  ;;  %v5861_v63 = vshrl.u32 %v12157_v56, 16  ;;  %v5864_v48 = vshll.u32 %v12157_v56, 16 }
 0x379   : > { %v5858_v10 = vsel %vm14091_vm12, %v5850_v47, %v5857_v46  ;;  %v6101_v42 = vsel %vm15530_vm4, %v5859_v15, %v6100_v43  ;;  %v5841_v51 = vsel %vm14091_vm12, %v5833_v59, %v5840_v20  ;;  %v6094_v9 = vsel %vm15530_vm4, %v5842_v23, %v6093_v26  ;;  %v6107_v15 = vld [vmem:[#allocation3 + $0x74] sm:$0x1] }
 0x37a   : > { %6099 = vst.msk [vmem:[#allocation3 + $0x64] sm:$0xf] %vm402_vm6, %v5858_v10  ;;  %6102 = vst [vmem:[#allocation3 + $0x68] sm:$0x1] %v6101_v42  ;;  %v5880_v38 = vrot.slane %v5878_v12, 7  ;;  %v5863_v17 = vrot.slane %v5861_v63, 7  ;;  %v12160_v57 = vpack.c.bf16 %v5615_v19, %v5615_v19  ;;  %v12158_v47 = vpack.c.bf16 %v5613_v5, %v5613_v5 }
 0x37b   : > { %6092 = vst.msk [vmem:[#allocation3 + $0x58] sm:$0xf] %vm402_vm6, %v5841_v51  ;;  %6095 = vst [vmem:[#allocation3 + $0x5c] sm:$0x1] %v6094_v9  ;;  %v6235_v62 = vrot.slane %v6233_v14, 4  ;;  %v6238_v52 = vrot.slane %v6236_v32, 5 }
 0x37c   : > { %v6242_v11 = vshll.u32 %v6162_v0, 16  ;;  %v6246_v2 = vshrl.u32 %v6162_v0, 16  ;;  %v15962_v31 = vpop.f32.mrb[24].mxu0  ;;  %v5883_v1 = vor.u32 %v5881_v54, %v5880_v38  ;;  %v5884_v40 = vrot.slane %v5880_v38, 4  ;;  %v6114_v0 = vld [vmem:[#allocation3 + $0x80] sm:$0x1] }
 0x37d   : > { %v5866_v60 = vor.u32 %v5864_v48, %v5863_v17  ;;  %v5867_v6 = vrot.slane %v5863_v17, 4  ;;  %v15964_v45 = vpop.f32.mrb[25].mxu0  ;;  %v6239_v36 = vor.u32 %v6238_v52, %v6235_v62  ;;  %v6252_v44 = vshll.u32 %v6193_v28, 16  ;;  %v6194_v51 = vld [vmem:[#allocation3 + $0x20] sm:$0x1] }
 0x37e   : > { %v6244_v59 = vrot.slane %v6242_v11, 5  ;;  %v15966_v41 = vpop.f32.mrb[26].mxu0  ;;  %v6111_v50 = vsel %vm15867_vm10, %v5883_v1, %v6110_v33  ;;  %v6248_v39 = vrot.slane %v6246_v2, 4  ;;  %v5886_v26 = vshrl.u32 %v12160_v57, 16  ;;  %v6165_v19 = vld [vmem:[#allocation3 + $0x24] sm:$0xf] }
 0x37f   : > { %v6104_v34 = vsel %vm15867_vm10, %v5866_v60, %v6103_v24  ;;  %v15972_v43 = vpop.f32.mrb[27].mxu0  ;;  %6112 = vst [vmem:[#allocation3 + $0x78] sm:$0xf] %v6111_v50  ;;  %v5889_v61 = vshll.u32 %v12160_v57, 16  ;;  %v5869_v21 = vshrl.u32 %v12158_v47, 16  ;;  %v5872_v35 = vshll.u32 %v12158_v47, 16 }
 0x380   : > { %6105 = vst [vmem:[#allocation3 + $0x6c] sm:$0xf] %v6104_v34  ;;  %v6240_v22 = vrot.slane %v6239_v36, 4  ;;  %v6249_v16 = vor.u32 %v6248_v39, %v6244_v59  ;;  %v6254_v13 = vrot.slane %v6252_v44, 5  ;;  %v6257_v4 = vshrl.u32 %v6163_v37, 16 }
 0x381   : > { %v5888_v56 = vrot.slane %v5886_v26, 7  ;;  %v5871_v14 = vrot.slane %v5869_v21, 7  ;;  %v6260_v32 = vshll.u32 %v6163_v37, 16  ;;  %v6266_v46 = vshll.u32 %v6164_v3, 16  ;;  %v16004_v50 = vld [vmem:[#allocation3 + $0x28] sm:$0xf] }
 0x382   : > { %v6245_v20 = vsel %vm14127_vm13, %v6240_v22, %v6244_v59  ;;  %v6250_v23 = vrot.slane %v6249_v16, 4  ;;  %v6259_v12 = vrot.slane %v6257_v4, 4  ;;  %v6270_v54 = vshrl.u32 %v6164_v3, 16  ;;  %v15976_v9 = vpop.f32.mrb[28].mxu0 }
 0x383   : > { %v5891_v63 = vor.u32 %v5889_v61, %v5888_v56  ;;  %v5893_v48 = vrot.slane %v5888_v56, 4  ;;  %v5874_v10 = vor.u32 %v5872_v35, %v5871_v14  ;;  %v5876_v42 = vrot.slane %v5871_v14, 4  ;;  %v15980_v5 = vpop.f32.mrb[29].mxu0 }
 0x384   : > { %v6255_v33 = vsel %vm14127_vm13, %v6250_v23, %v6254_v13  ;;  %v6262_v24 = vrot.slane %v6260_v32, 5  ;;  %v6268_v38 = vrot.slane %v6266_v46, 5  ;;  %v6272_v17 = vrot.slane %v6270_v54, 4  ;;  %v15990_v2 = vpop.f32.mrb[30].mxu0  ;;  %v6124_v54 = vld [vmem:[#allocation3 + $0x90] sm:$0xf] }
 0x385   : > { %v5892_v28 = vsel %vm14091_vm12, %v5884_v40, %v5891_v63  ;;  %v6115_v62 = vsel %vm15530_vm4, %v5893_v48, %v6114_v0  ;;  %v5875_v52 = vsel %vm14091_vm12, %v5867_v6, %v5874_v10  ;;  %v6108_v11 = vsel %vm15530_vm4, %v5876_v42, %v6107_v15  ;;  %v15994_v47 = vpop.f32.mrb[31].mxu0  ;;  %v6117_v63 = vld [vmem:[#allocation3 + $0x84] sm:$0xf] }
 0x386   : > { %6113 = vst.msk [vmem:[#allocation3 + $0x7c] sm:$0xf] %vm402_vm6, %v5892_v28  ;;  %6116 = vst [vmem:[#allocation3 + $0x80] sm:$0x1] %v6115_v62  ;;  %v11736_v1 = vcombine.low %v6245_v20, %v6255_v33  ;;  %v6263_v60 = vor.u32 %v6262_v24, %v6259_v12  ;;  %v6273_v40 = vor.u32 %v6272_v17, %v6268_v38  ;;  %v6276_v57 = vshll.u32 %v6194_v51, 16 }
 0x387   : > { %6106 = vst.msk [vmem:[#allocation3 + $0x70] sm:$0xf] %vm402_vm6, %v5875_v52  ;;  %6109 = vst [vmem:[#allocation3 + $0x74] sm:$0x1] %v6108_v11  ;;  %v5586_v6 = vadd.f32 %v15938_v49, %v15858_v30  ;;  %v5584_v36 = vadd.f32 %v15858_v30, %v15944_v29  ;;  %v5587_v59 = vadd.f32 %v15948_v7, %v15858_v30  ;;  %v6281_v3 = vshrl.u32 %v6165_v19, 16 }
 0x388   : > { %v5585_v37 = vadd.f32 %v15858_v30, %v15950_v18  ;;  %12837 = vmatmul.mubr.msk.bf16.vlgmr.msra.gmra.mrb[32].mxu0 %vm6641_vm9, %v11736_v1  ;;  %v6264_v34 = vrot.slane %v6263_v60, 4  ;;  %v6274_v39 = vrot.slane %v6273_v40, 4  ;;  %v6278_v44 = vrot.slane %v6276_v57, 5  ;;  %v6195_v12 = vld [vmem:[#allocation3 + $0x2c] sm:$0x1] }
 0x389   : > { %v5618_v26 = vmax.f32 %v5586_v6, 0.0  ;;  %v5616_v61 = vmax.f32 %v5584_v36, 0.0  ;;  %v5619_v49 = vmax.f32 %v5587_v59, 0.0  ;;  %v6283_v35 = vrot.slane %v6281_v3, 4  ;;  %v6121_v52 = vld [vmem:[#allocation3 + $0x8c] sm:$0x1] }
 0x38a   : > { %v5617_v21 = vmax.f32 %v5585_v37, 0.0  ;;  %v6269_v29 = vsel %vm14127_vm13, %v6264_v34, %v6268_v38  ;;  %v6279_v7 = vsel %vm14127_vm13, %v6274_v39, %v6278_v44  ;;  %v6284_v18 = vshll.u32 %v6165_v19, 16  ;;  %v6128_v38 = vld [vmem:[#allocation3 + $0x98] sm:$0x1]  ;;  %v16014_v39 = vld [vmem:[#allocation3 + $0x30] sm:$0xf] }
 0x38b   : > { %v11737_v22 = vcombine.low %v6269_v29, %v6279_v7  ;;  %v12163_v16 = vpack.c.bf16 %v5618_v26, %v5618_v26  ;;  %v12161_v13 = vpack.c.bf16 %v5616_v61, %v5616_v61  ;;  %v12164_v4 = vpack.c.bf16 %v5619_v49, %v5619_v49  ;;  %v16020_v49 = vld [vmem:[#allocation3 + $0x34] sm:$0xf] }
 0x38c   : > { %v12162_v56 = vpack.c.bf16 %v5617_v21, %v5617_v21  ;;  %v6286_v0 = vrot.slane %v6284_v18, 5  ;;  %v6290_v14 = vshll.u32 %v16004_v50, 16  ;;  %v6294_v32 = vshrl.u32 %v16004_v50, 16  ;;  %v6196_v21 = vld [vmem:[#allocation3 + $0x38] sm:$0x1] }
 0x38d   : > { %12840 = vmatprep.mubr.msk.bf16.mxu0 %vm6641_vm9, %v11737_v22  ;;  %v5912_v46 = vshrl.u32 %v12163_v16, 16  ;;  %v5915_v15 = vshll.u32 %v12163_v16, 16  ;;  %v5895_v20 = vshrl.u32 %v12161_v13, 16  ;;  %v5898_v23 = vshll.u32 %v12161_v13, 16 }
 0x38e   : > { %v5920_v48 = vshrl.u32 %v12164_v4, 16  ;;  %v5923_v10 = vshll.u32 %v12164_v4, 16  ;;  %v5903_v42 = vshrl.u32 %v12162_v56, 16  ;;  %v5906_v51 = vshll.u32 %v12162_v56, 16 }
 0x38f   : > { %v5914_v33 = vrot.slane %v5912_v46, 7  ;;  %v5897_v24 = vrot.slane %v5895_v20, 7  ;;  %v6287_v17 = vor.u32 %v6286_v0, %v6283_v35  ;;  %v6292_v19 = vrot.slane %v6290_v14, 5 }
 0x390   : > { %v5922_v28 = vrot.slane %v5920_v48, 7  ;;  %v5905_v62 = vrot.slane %v5903_v42, 7  ;;  %v6296_v11 = vrot.slane %v6294_v32, 4  ;;  %v6300_v1 = vshll.u32 %v6195_v12, 16  ;;  %v16044_v12 = vld [vmem:[#allocation3 + $0x3c] sm:$0xf] }
 0x391   : > { %v5917_v60 = vor.u32 %v5915_v15, %v5914_v33  ;;  %v5918_v40 = vrot.slane %v5914_v33, 4  ;;  %v5900_v57 = vor.u32 %v5898_v23, %v5897_v24  ;;  %v5901_v6 = vrot.slane %v5897_v24, 4 }
 0x392   : > { %v5925_v36 = vor.u32 %v5923_v10, %v5922_v28  ;;  %v5927_v59 = vrot.slane %v5922_v28, 4  ;;  %v5908_v37 = vor.u32 %v5906_v51, %v5905_v62  ;;  %v5910_v34 = vrot.slane %v5905_v62, 4 }
 0x393   : > { %v6125_v44 = vsel %vm15867_vm10, %v5917_v60, %v6124_v54  ;;  %v6118_v3 = vsel %vm15867_vm10, %v5900_v57, %v6117_v63  ;;  %v6288_v26 = vrot.slane %v6287_v17, 4  ;;  %v6297_v61 = vor.u32 %v6296_v11, %v6292_v19 }
 0x394   : > { %6126 = vst [vmem:[#allocation3 + $0x90] sm:$0xf] %v6125_v44  ;;  %6119 = vst [vmem:[#allocation3 + $0x84] sm:$0xf] %v6118_v3  ;;  %v5926_v29 = vsel %vm14091_vm12, %v5918_v40, %v5925_v36  ;;  %v6129_v7 = vsel %vm15530_vm4, %v5927_v59, %v6128_v38  ;;  %v5909_v35 = vsel %vm14091_vm12, %v5901_v6, %v5908_v37  ;;  %v6302_v13 = vrot.slane %v6300_v1, 5 }
 0x395   : > { %v6122_v18 = vsel %vm15530_vm4, %v5910_v34, %v6121_v52  ;;  %6127 = vst.msk [vmem:[#allocation3 + $0x94] sm:$0xf] %vm402_vm6, %v5926_v29  ;;  %6130 = vst [vmem:[#allocation3 + $0x98] sm:$0x1] %v6129_v7  ;;  %v6293_v22 = vsel %vm14127_vm13, %v6288_v26, %v6292_v19  ;;  %v6298_v16 = vrot.slane %v6297_v61, 4  ;;  %v6305_v4 = vshrl.u32 %v16014_v39, 16 }
 0x396   : > { %6120 = vst.msk [vmem:[#allocation3 + $0x88] sm:$0xf] %vm402_vm6, %v5909_v35  ;;  %6123 = vst [vmem:[#allocation3 + $0x8c] sm:$0x1] %v6122_v18  ;;  %v6308_v56 = vshll.u32 %v16014_v39, 16  ;;  %v6314_v0 = vshll.u32 %v16020_v49, 16  ;;  %v5590_v20 = vadd.f32 %v15962_v31, %v15858_v30  ;;  %v5588_v23 = vadd.f32 %v15858_v30, %v15964_v45 }
 0x397   : > { %v6318_v14 = vshrl.u32 %v16020_v49, 16  ;;  %v6324_v32 = vshll.u32 %v6196_v21, 16  ;;  %v6303_v46 = vsel %vm14127_vm13, %v6298_v16, %v6302_v13  ;;  %v6307_v15 = vrot.slane %v6305_v4, 4  ;;  %v6138_v37 = vld [vmem:[#allocation3 + $0xa8] sm:$0xf] }
 0x398   : > { %v11738_v54 = vcombine.low %v6293_v22, %v6303_v46  ;;  %v6310_v63 = vrot.slane %v6308_v56, 5  ;;  %v6316_v48 = vrot.slane %v6314_v0, 5  ;;  %v5622_v51 = vmax.f32 %v5590_v20, 0.0  ;;  %v6131_v34 = vld [vmem:[#allocation3 + $0x9c] sm:$0xf] }
 0x399   : > { %v6320_v10 = vrot.slane %v6318_v14, 4  ;;  %v6326_v42 = vrot.slane %v6324_v32, 5  ;;  %v5620_v33 = vmax.f32 %v5588_v23, 0.0  ;;  %v5591_v24 = vadd.f32 %v15966_v41, %v15858_v30  ;;  %v16057_v26 = vld [vmem:[#allocation3 + $0x40] sm:$0xf] }
 0x39a   : > { %12841 = vmatmul.mubr.msk.bf16.gmra.mrb[36].mxu0 %vm6641_vm9, %v11738_v54  ;;  %v6311_v38 = vor.u32 %v6310_v63, %v6307_v15  ;;  %v5589_v31 = vadd.f32 %v15858_v30, %v15972_v43  ;;  %v6329_v45 = vshrl.u32 %v16044_v12, 16  ;;  %v12167_v19 = vpack.c.bf16 %v5622_v51, %v5622_v51  ;;  %v16059_v7 = vld [vmem:[#allocation3 + $0x44] sm:$0x1]  ;;  %v6142_v46 = vld [vmem:[#allocation3 + $0xb0] sm:$0x1] }
 0x39b   : > { %v6321_v17 = vor.u32 %v6320_v10, %v6316_v48  ;;  %v12165_v28 = vpack.c.bf16 %v5620_v33, %v5620_v33  ;;  %v5623_v62 = vmax.f32 %v5591_v24, 0.0  ;;  %v6332_v52 = vshll.u32 %v16044_v12, 16 }
 0x39c   : > { %v6312_v11 = vrot.slane %v6311_v38, 4  ;;  %v5621_v60 = vmax.f32 %v5589_v31, 0.0  ;;  %v6331_v40 = vrot.slane %v6329_v45, 4  ;;  %v5946_v57 = vshrl.u32 %v12167_v19, 16  ;;  %v16071_v31 = vld [vmem:[#allocation3 + $0x4c] sm:$0xf] }
 0x39d   : > { %v6322_v1 = vrot.slane %v6321_v17, 4  ;;  %v5949_v41 = vshll.u32 %v12167_v19, 16  ;;  %v5929_v6 = vshrl.u32 %v12165_v28, 16  ;;  %v5932_v36 = vshll.u32 %v12165_v28, 16  ;;  %v16069_v17 = vld [vmem:[#allocation3 + $0x48] sm:$0xf] }
 0x39e   : > { %v6317_v59 = vsel %vm14127_vm13, %v6312_v11, %v6316_v48  ;;  %v12168_v44 = vpack.c.bf16 %v5623_v62, %v5623_v62  ;;  %v12166_v3 = vpack.c.bf16 %v5621_v60, %v5621_v60  ;;  %v5948_v21 = vrot.slane %v5946_v57, 7  ;;  %v6135_v48 = vld [vmem:[#allocation3 + $0xa4] sm:$0x1] }
 0x39f   : > { %v6327_v43 = vsel %vm14127_vm13, %v6322_v1, %v6326_v42  ;;  %v5931_v29 = vrot.slane %v5929_v6, 7  ;;  %v6334_v35 = vrot.slane %v6332_v52, 5  ;;  %v6338_v23 = vshll.u32 %v16057_v26, 16  ;;  %v16073_v52 = vld [vmem:[#allocation3 + $0x50] sm:$0x1] }
 0x3a0   : > { %v11739_v61 = vcombine.low %v6317_v59, %v6327_v43  ;;  %v5954_v18 = vshrl.u32 %v12168_v44, 16  ;;  %v5957_v22 = vshll.u32 %v12168_v44, 16  ;;  %v5937_v16 = vshrl.u32 %v12166_v3, 16 }
 0x3a1   : > { %v5940_v13 = vshll.u32 %v12166_v3, 16  ;;  %v5951_v4 = vor.u32 %v5949_v41, %v5948_v21  ;;  %v5952_v56 = vrot.slane %v5948_v21, 4  ;;  %v5934_v0 = vor.u32 %v5932_v36, %v5931_v29 }
 0x3a2   : > { %12844 = vmatprep.mubr.msk.bf16.mxu0 %vm6641_vm9, %v11739_v61  ;;  %v5935_v14 = vrot.slane %v5931_v29, 4  ;;  %v5956_v32 = vrot.slane %v5954_v18, 7  ;;  %v5939_v15 = vrot.slane %v5937_v16, 7  ;;  %v6335_v20 = vor.u32 %v6334_v35, %v6331_v40  ;;  %v16096_v16 = vld [vmem:[#allocation3 + $0x60] sm:$0xf] }
 0x3a3   : > { %v6139_v54 = vsel %vm15867_vm10, %v5951_v4, %v6138_v37  ;;  %v6132_v63 = vsel %vm15867_vm10, %v5934_v0, %v6131_v34  ;;  %v6342_v10 = vshrl.u32 %v16057_v26, 16  ;;  %v6348_v42 = vshll.u32 %v16059_v7, 16 }
 0x3a4   : > { %6140 = vst [vmem:[#allocation3 + $0xa8] sm:$0xf] %v6139_v54  ;;  %6133 = vst [vmem:[#allocation3 + $0x9c] sm:$0xf] %v6132_v63  ;;  %v5959_v51 = vor.u32 %v5957_v22, %v5956_v32  ;;  %v5961_v33 = vrot.slane %v5956_v32, 4  ;;  %v5942_v24 = vor.u32 %v5940_v13, %v5939_v15  ;;  %v5944_v38 = vrot.slane %v5939_v15, 4 }
 0x3a5   : > { %v6336_v45 = vrot.slane %v6335_v20, 4  ;;  %v6340_v19 = vrot.slane %v6338_v23, 5  ;;  %v6344_v28 = vrot.slane %v6342_v10, 4  ;;  %v6350_v62 = vrot.slane %v6348_v42, 5 }
 0x3a6   : > { %v5960_v11 = vsel %vm14091_vm12, %v5952_v56, %v5959_v51  ;;  %v6143_v1 = vsel %vm15530_vm4, %v5961_v33, %v6142_v46  ;;  %v5943_v60 = vsel %vm14091_vm12, %v5935_v14, %v5942_v24  ;;  %v6136_v40 = vsel %vm15530_vm4, %v5944_v38, %v6135_v48 }
 0x3a7   : > { %6141 = vst.msk [vmem:[#allocation3 + $0xac] sm:$0xf] %vm402_vm6, %v5960_v11  ;;  %6144 = vst [vmem:[#allocation3 + $0xb0] sm:$0x1] %v6143_v1  ;;  %v6341_v57 = vsel %vm14127_vm13, %v6336_v45, %v6340_v19  ;;  %v6345_v41 = vor.u32 %v6344_v28, %v6340_v19  ;;  %v6353_v6 = vshrl.u32 %v16069_v17, 16  ;;  %v6356_v36 = vshll.u32 %v16069_v17, 16 }
 0x3a8   : > { %6134 = vst.msk [vmem:[#allocation3 + $0xa0] sm:$0xf] %vm402_vm6, %v5943_v60  ;;  %6137 = vst [vmem:[#allocation3 + $0xa4] sm:$0x1] %v6136_v40  ;;  %v6362_v59 = vshll.u32 %v16071_v31, 16  ;;  %v6366_v43 = vshrl.u32 %v16071_v31, 16  ;;  %v5594_v34 = vadd.f32 %v15976_v9, %v15858_v30  ;;  %v5592_v21 = vadd.f32 %v15858_v30, %v15980_v5 }
 0x3a9   : > { %v6372_v37 = vshll.u32 %v16073_v52, 16  ;;  %v6346_v44 = vrot.slane %v6345_v41, 4  ;;  %v6355_v3 = vrot.slane %v6353_v6, 4  ;;  %v6358_v61 = vrot.slane %v6356_v36, 5  ;;  %v13934_v9 = vld [vmem:[%s17887_s4] ss:$0 sm:$0xff] }
 0x3aa   : > { %v6364_v29 = vrot.slane %v6362_v59, 5  ;;  %v6368_v35 = vrot.slane %v6366_v43, 4  ;;  %v5626_v22 = vmax.f32 %v5594_v34, 0.0  ;;  %v5624_v56 = vmax.f32 %v5592_v21, 0.0  ;;  %v16111_v19 = vld [vmem:[#allocation3 + $0x64] sm:$0xf] }
 0x3ab   : > { %v6374_v18 = vrot.slane %v6372_v37, 5  ;;  %v6351_v13 = vsel %vm14127_vm13, %v6346_v44, %v6350_v62  ;;  %v6359_v4 = vor.u32 %v6358_v61, %v6355_v3  ;;  %v5595_v0 = vadd.f32 %v13934_v9, %v15990_v2  ;;  %v6152_v2 = vld [vmem:[#allocation3 + $0xc0] sm:$0xf]  ;;  %v6145_v41 = vld [vmem:[#allocation3 + $0xb4] sm:$0xf] }
 0x3ac   : > { %v11740_v14 = vcombine.low %v6341_v57, %v6351_v13  ;;  %v6369_v32 = vor.u32 %v6368_v35, %v6364_v29  ;;  %v12171_v30 = vpack.c.bf16 %v5626_v22, %v5626_v22  ;;  %v5593_v5 = vadd.f32 %v13934_v9, %v15994_v47  ;;  %v6156_v34 = vld [vmem:[#allocation3 + $0xc8] sm:$0x1] }
 0x3ad   : > { %v6360_v46 = vrot.slane %v6359_v4, 4  ;;  %v12169_v15 = vpack.c.bf16 %v5624_v56, %v5624_v56  ;;  %v5627_v20 = vmax.f32 %v5595_v0, 0.0  ;;  %v6401_v23 = vshrl.u32 %v16096_v16, 16  ;;  %v16117_v21 = vld [vmem:[#allocation3 + $0x68] sm:$0x1] }
 0x3ae   : > { %12845 = vmatmul.mubr.msk.bf16.gmra.mrb[40].mxu0 %vm6641_vm9, %v11740_v14  ;;  %v6370_v54 = vrot.slane %v6369_v32, 4  ;;  %v5980_v63 = vshrl.u32 %v12171_v30, 16  ;;  %v5983_v48 = vshll.u32 %v12171_v30, 16  ;;  %v5625_v10 = vmax.f32 %v5593_v5, 0.0  ;;  %v6149_v4 = vld [vmem:[#allocation3 + $0xbc] sm:$0x1] }
 0x3af   : > { %v6365_v42 = vsel %vm14127_vm13, %v6360_v46, %v6364_v29  ;;  %v5963_v51 = vshrl.u32 %v12169_v15, 16  ;;  %v5966_v33 = vshll.u32 %v12169_v15, 16  ;;  %v12172_v24 = vpack.c.bf16 %v5627_v20, %v5627_v20  ;;  %v16123_v30 = vld [vmem:[#allocation3 + $0x54] sm:$0xf]  ;;  %v16130_v20 = vld [vmem:[#allocation3 + $0x58] sm:$0xf] }
 0x3b0   : > { %v6375_v47 = vsel %vm14127_vm13, %v6370_v54, %v6374_v18  ;;  %v5982_v38 = vrot.slane %v5980_v63, 7  ;;  %v12170_v45 = vpack.c.bf16 %v5625_v10, %v5625_v10  ;;  %v6403_v28 = vrot.slane %v6401_v23, 4  ;;  %v16132_v23 = vld [vmem:[#allocation3 + $0x5c] sm:$0x1]  ;;  %v16139_v10 = vld [vmem:[#allocation3 + $0x6c] sm:$0xf] }
 0x3b1   : > { %v11741_v62 = vcombine.low %v6365_v42, %v6375_v47  ;;  %v5965_v11 = vrot.slane %v5963_v51, 7  ;;  %v5988_v1 = vshrl.u32 %v12172_v24, 16  ;;  %v5991_v60 = vshll.u32 %v12172_v24, 16  ;;  %v13935_v42 = vld [vmem:[%s17885_s2] sm:$0xf] }
 0x3b2   : > { %v5985_v40 = vor.u32 %v5983_v48, %v5982_v38  ;;  %v5986_v57 = vrot.slane %v5982_v38, 4  ;;  %v5971_v6 = vshrl.u32 %v12170_v45, 16  ;;  %v5974_v36 = vshll.u32 %v12170_v45, 16  ;;  %v16150_v47 = vld [vmem:[#allocation3 + $0x70] sm:$0xf] }
 0x3b3   : > { %12848 = vmatprep.mubr.msk.bf16.mxu0 %vm6641_vm9, %v11741_v62  ;;  %v5968_v59 = vor.u32 %v5966_v33, %v5965_v11  ;;  %v5969_v43 = vrot.slane %v5965_v11, 4  ;;  %v5990_v37 = vrot.slane %v5988_v1, 7  ;;  %v6404_v44 = vshll.u32 %v16096_v16, 16  ;;  %v16152_v38 = vld [vmem:[#allocation3 + $0x74] sm:$0x1] }
 0x3b4   : > { %v6153_v3 = vsel %vm15867_vm10, %v5985_v40, %v6152_v2  ;;  %v5973_v61 = vrot.slane %v5971_v6, 7  ;;  %v6410_v29 = vshll.u32 %v16111_v19, 16  ;;  %v6414_v35 = vshrl.u32 %v16111_v19, 16  ;;  %v16157_v1 = vld [vmem:[#allocation3 + $0x78] sm:$0xf] }
 0x3b5   : > { %6154 = vst [vmem:[#allocation3 + $0xc0] sm:$0xf] %v6153_v3  ;;  %v6146_v18 = vsel %vm15867_vm10, %v5968_v59, %v6145_v41  ;;  %v5993_v22 = vor.u32 %v5991_v60, %v5990_v37  ;;  %v5995_v13 = vrot.slane %v5990_v37, 4  ;;  %v6406_v56 = vrot.slane %v6404_v44, 5 }
 0x3b6   : > { %6147 = vst [vmem:[#allocation3 + $0xb4] sm:$0xf] %v6146_v18  ;;  %v5976_v9 = vor.u32 %v5974_v36, %v5973_v61  ;;  %v5978_v0 = vrot.slane %v5973_v61, 4  ;;  %v6412_v14 = vrot.slane %v6410_v29, 5  ;;  %v6416_v32 = vrot.slane %v6414_v35, 4 }
 0x3b7   : > { %v5994_v5 = vsel %vm14091_vm12, %v5986_v57, %v5993_v22  ;;  %v6157_v46 = vsel %vm15530_vm4, %v5995_v13, %v6156_v34  ;;  %v6407_v15 = vor.u32 %v6406_v56, %v6403_v28  ;;  %v6420_v53 = vshll.u32 %v16117_v21, 16  ;;  %v16165_v61 = vld [vmem:[#allocation3 + $0x7c] sm:$0xf] }
 0x3b8   : > { %6155 = vst.msk [vmem:[#allocation3 + $0xc4] sm:$0xf] %vm402_vm6, %v5994_v5  ;;  %6158 = vst [vmem:[#allocation3 + $0xc8] sm:$0x1] %v6157_v46  ;;  %v5977_v54 = vsel %vm14091_vm12, %v5969_v43, %v5976_v9  ;;  %v6150_v63 = vsel %vm15530_vm4, %v5978_v0, %v6149_v4  ;;  %v6417_v48 = vor.u32 %v6416_v32, %v6412_v14  ;;  %v16145_v2 = vsel %vm6690_vm7, %v13935_v42, 0 }
 0x3b9   : > { %6148 = vst.msk [vmem:[#allocation3 + $0xb8] sm:$0xf] %vm402_vm6, %v5977_v54  ;;  %6151 = vst [vmem:[#allocation3 + $0xbc] sm:$0x1] %v6150_v63  ;;  %v6408_v51 = vrot.slane %v6407_v15, 4  ;;  %v6422_v33 = vrot.slane %v6420_v53, 5 }
 0x3ba   : > { %v6377_v55 = vshrl.u32 %v16123_v30, 16  ;;  %v6380_v24 = vshll.u32 %v16123_v30, 16  ;;  %v6418_v45 = vrot.slane %v6417_v48, 4  ;;  %v6386_v28 = vshll.u32 %v16130_v20, 16  ;;  %v16173_v46 = vld [vmem:[#allocation3 + $0x80] sm:$0x1] }
 0x3bb   : > { %v6390_v62 = vshrl.u32 %v16130_v20, 16  ;;  %v6396_v11 = vshll.u32 %v16132_v23, 16  ;;  %v6413_v60 = vsel %vm14127_vm13, %v6408_v51, %v6412_v14  ;;  %v6425_v41 = vshrl.u32 %v16139_v10, 16  ;;  %v16177_v48 = vld [vmem:[#allocation3 + $0x84] sm:$0xf] }
 0x3bc   : > { %v6379_v40 = vrot.slane %v6377_v55, 4  ;;  %v6382_v57 = vrot.slane %v6380_v24, 5  ;;  %v6423_v6 = vsel %vm14127_vm13, %v6418_v45, %v6422_v33  ;;  %v6388_v36 = vrot.slane %v6386_v28, 5 }
 0x3bd   : > { %v6392_v59 = vrot.slane %v6390_v62, 4  ;;  %v6398_v43 = vrot.slane %v6396_v11, 5  ;;  %v11743_v37 = vcombine.low %v6413_v60, %v6423_v6  ;;  %v6427_v44 = vrot.slane %v6425_v41, 4  ;;  %v16184_v11 = vld [vmem:[#allocation3 + $0x88] sm:$0xf] }
 0x3be   : > { %v6383_v34 = vor.u32 %v6382_v57, %v6379_v40  ;;  %v6428_v3 = vshll.u32 %v16139_v10, 16  ;;  %v6434_v35 = vshll.u32 %v16150_v47, 16  ;;  %v6438_v18 = vshrl.u32 %v16150_v47, 16  ;;  %v16187_v6 = vld [vmem:[#allocation3 + $0x90] sm:$0xf] }
 0x3bf   : > { %v6393_v29 = vor.u32 %v6392_v59, %v6388_v36  ;;  %v6444_v22 = vshll.u32 %v16152_v38, 16  ;;  %12852 = vmatprep.mubr.msk.bf16.mxu1 %vm6641_vm9, %v11743_v37  ;;  %v6449_v56 = vshrl.u32 %v16157_v1, 16  ;;  %v6452_v9 = vshll.u32 %v16157_v1, 16  ;;  %v16192_v37 = vld [vmem:[#allocation3 + $0x8c] sm:$0x1] }
 0x3c0   : > { %v6384_v13 = vrot.slane %v6383_v34, 4  ;;  %v6430_v4 = vrot.slane %v6428_v3, 5  ;;  %v6436_v14 = vrot.slane %v6434_v35, 5  ;;  %v6440_v32 = vrot.slane %v6438_v18, 4  ;;  %v16198_v18 = vld [vmem:[#allocation3 + $0x94] sm:$0xf] }
 0x3c1   : > { %v6394_v0 = vrot.slane %v6393_v29, 4  ;;  %v6446_v5 = vrot.slane %v6444_v22, 5  ;;  %v6451_v54 = vrot.slane %v6449_v56, 4  ;;  %v6454_v63 = vrot.slane %v6452_v9, 5  ;;  %v16203_v22 = vld [vmem:[%s17885_s2 + $0x8] sm:$0xf] }
 0x3c2   : > { %v6389_v15 = vsel %vm14127_vm13, %v6384_v13, %v6388_v36  ;;  %v6431_v53 = vor.u32 %v6430_v4, %v6427_v44  ;;  %v6441_v51 = vor.u32 %v6440_v32, %v6436_v14  ;;  %v6458_v33 = vshll.u32 %v16165_v61, 16 }
 0x3c3   : > { %v6399_v42 = vsel %vm14127_vm13, %v6394_v0, %v6398_v43  ;;  %v6462_v55 = vshrl.u32 %v16165_v61, 16  ;;  %v6455_v28 = vor.u32 %v6454_v63, %v6451_v54  ;;  %v6468_v62 = vshll.u32 %v16173_v46, 16  ;;  %v16208_v0 = vld [vmem:[#allocation3 + $0x98] sm:$0x1] }
 0x3c4   : > { %v11742_v24 = vcombine.low %v6389_v15, %v6399_v42  ;;  %v6432_v45 = vrot.slane %v6431_v53, 4  ;;  %v6442_v60 = vrot.slane %v6441_v51, 4  ;;  %v6460_v40 = vrot.slane %v6458_v33, 5  ;;  %v16212_v53 = vld [vmem:[#allocation3 + $0x9c] sm:$0xf] }
 0x3c5   : > { %v6464_v57 = vrot.slane %v6462_v55, 4  ;;  %v6473_v41 = vshrl.u32 %v16177_v48, 16  ;;  %v6456_v59 = vrot.slane %v6455_v28, 4  ;;  %v6470_v43 = vrot.slane %v6468_v62, 5  ;;  %v16217_v33 = vld [vmem:[#allocation3 + $0xa0] sm:$0xf] }
 0x3c6   : > { %12849 = vmatmul.mubr.msk.bf16.gmra.mrb[44].mxu0 %vm6641_vm9, %v11742_v24  ;;  %v6437_v36 = vsel %vm14127_vm13, %v6432_v45, %v6436_v14  ;;  %v6476_v34 = vshll.u32 %v16177_v48, 16  ;;  %v6447_v44 = vsel %vm14127_vm13, %v6442_v60, %v6446_v5  ;;  %v6482_v35 = vshll.u32 %v16184_v11, 16 }
 0x3c7   : > { %v6465_v3 = vor.u32 %v6464_v57, %v6460_v40  ;;  %v6475_v29 = vrot.slane %v6473_v41, 4  ;;  %v11744_v13 = vcombine.low %v6437_v36, %v6447_v44  ;;  %v6461_v4 = vsel %vm14127_vm13, %v6456_v59, %v6460_v40  ;;  %v16223_v41 = vld [vmem:[#allocation3 + $0xa4] sm:$0x1] }
 0x3c8   : > { %v6478_v56 = vrot.slane %v6476_v34, 5  ;;  %v6486_v9 = vshrl.u32 %v16184_v11, 16  ;;  %v6484_v32 = vrot.slane %v6482_v35, 5  ;;  %v6492_v5 = vshll.u32 %v16192_v37, 16 }
 0x3c9   : > { %v6466_v14 = vrot.slane %v6465_v3, 4  ;;  %v6497_v15 = vshrl.u32 %v16187_v6, 16  ;;  %12853 = vmatmul.mubr.msk.bf16.vlgmr.msra.gmra.mrb[0].mxu1 %vm6641_vm9, %v11744_v13  ;;  %v6500_v42 = vshll.u32 %v16187_v6, 16  ;;  %v6506_v51 = vshll.u32 %v16198_v18, 16 }
 0x3ca   : > { %v6479_v54 = vor.u32 %v6478_v56, %v6475_v29  ;;  %v6488_v63 = vrot.slane %v6486_v9, 4  ;;  %12869 = vmatpush3.bf16.msra.mxu1 %v16145_v2  ;;  %v6494_v24 = vrot.slane %v6492_v5, 5  ;;  %v6510_v28 = vshrl.u32 %v16198_v18, 16 }
 0x3cb   : > { %v6471_v55 = vsel %vm14127_vm13, %v6466_v14, %v6470_v43  ;;  %v6499_v45 = vrot.slane %v6497_v15, 4  ;;  %v6502_v57 = vrot.slane %v6500_v42, 5  ;;  %13796 = vmatprep.subr.msk.bf16.mxu1 %vm6690_vm7, %v16203_v22  ;;  %v6508_v36 = vrot.slane %v6506_v51, 5  ;;  %v16229_v43 = vld [vmem:[#allocation3 + $0xa8] sm:$0xf] }
 0x3cc   : > { %v11745_v62 = vcombine.low %v6461_v4, %v6471_v55  ;;  %v6480_v60 = vrot.slane %v6479_v54, 4  ;;  %v6489_v40 = vor.u32 %v6488_v63, %v6484_v32  ;;  %v6512_v59 = vrot.slane %v6510_v28, 4  ;;  %v16239_v63 = vld [vmem:[#allocation3 + $0xac] sm:$0xf] }
 0x3cd   : > { %v6516_v2 = vshll.u32 %v16208_v0, 16  ;;  %v6521_v34 = vshrl.u32 %v16212_v53, 16  ;;  %v6503_v29 = vor.u32 %v6502_v57, %v6499_v45  ;;  %v6524_v35 = vshll.u32 %v16212_v53, 16  ;;  %v16242_v45 = vld [vmem:[#allocation3 + $0xb0] sm:$0x1] }
 0x3ce   : > { %12856 = vmatprep.mubr.msk.bf16.mxu1 %vm6641_vm9, %v11745_v62  ;;  %v6485_v44 = vsel %vm14127_vm13, %v6480_v60, %v6484_v32  ;;  %v6490_v3 = vrot.slane %v6489_v40, 4  ;;  %v6513_v13 = vor.u32 %v6512_v59, %v6508_v36  ;;  %v6530_v9 = vshll.u32 %v16217_v33, 16  ;;  %v16245_v40 = vld [vmem:[#allocation3 + $0xb4] sm:$0xf] }
 0x3cf   : > { %v6518_v4 = vrot.slane %v6516_v2, 5  ;;  %v6523_v56 = vrot.slane %v6521_v34, 4  ;;  %v6504_v5 = vrot.slane %v6503_v29, 4  ;;  %v6526_v15 = vrot.slane %v6524_v35, 5  ;;  %v16254_v34 = vld [vmem:[#allocation3 + $0xb8] sm:$0xf] }
 0x3d0   : > { %v6495_v14 = vsel %vm14127_vm13, %v6490_v3, %v6494_v24  ;;  %v6534_v54 = vshrl.u32 %v16217_v33, 16  ;;  %v6514_v32 = vrot.slane %v6513_v13, 4  ;;  %v6532_v51 = vrot.slane %v6530_v9, 5 }
 0x3d1   : > { %v11746_v42 = vcombine.low %v6485_v44, %v6495_v14  ;;  %v6540_v55 = vshll.u32 %v16223_v41, 16  ;;  %v6527_v28 = vor.u32 %v6526_v15, %v6523_v56  ;;  %v6545_v60 = vshrl.u32 %v16229_v43, 16 }
 0x3d2   : > { %v6536_v62 = vrot.slane %v6534_v54, 4  ;;  %v6509_v24 = vsel %vm14127_vm13, %v6504_v5, %v6508_v36  ;;  %v6519_v57 = vsel %vm14127_vm13, %v6514_v32, %v6518_v4  ;;  %v6548_v59 = vshll.u32 %v16229_v43, 16 }
 0x3d3   : > { %12857 = vmatmul.mubr.msk.bf16.gmra.mrb[4].mxu1 %vm6641_vm9, %v11746_v42  ;;  %v6554_v2 = vshll.u32 %v16239_v63, 16  ;;  %v11747_v44 = vcombine.low %v6509_v24, %v6519_v57  ;;  %v6528_v3 = vrot.slane %v6527_v28, 4  ;;  %v6547_v35 = vrot.slane %v6545_v60, 4  ;;  %v16263_v28 = vld [vmem:[#allocation3 + $0xbc] sm:$0x1] }
 0x3d4   : > { %v6537_v29 = vor.u32 %v6536_v62, %v6532_v51  ;;  %v6542_v13 = vrot.slane %v6540_v55, 5  ;;  %v6550_v56 = vrot.slane %v6548_v59, 5  ;;  %v6558_v14 = vshrl.u32 %v16239_v63, 16 }
 0x3d5   : > { %v6556_v9 = vrot.slane %v6554_v2, 5  ;;  %12860 = vmatprep.mubr.msk.bf16.mxu1 %vm6641_vm9, %v11747_v44  ;;  %v6564_v4 = vshll.u32 %v16242_v45, 16  ;;  %v6569_v5 = vshrl.u32 %v16245_v40, 16  ;;  %v6572_v15 = vshll.u32 %v16245_v40, 16 }
 0x3d6   : > { %v6538_v36 = vrot.slane %v6537_v29, 4  ;;  %v6533_v54 = vsel %vm14127_vm13, %v6528_v3, %v6532_v51  ;;  %v6551_v42 = vor.u32 %v6550_v56, %v6547_v35  ;;  %v6560_v32 = vrot.slane %v6558_v14, 4 }
 0x3d7   : > { %v6578_v55 = vshll.u32 %v16254_v34, 16  ;;  %v6571_v60 = vrot.slane %v6569_v5, 4  ;;  %v6574_v24 = vrot.slane %v6572_v15, 5  ;;  %v6582_v57 = vshrl.u32 %v16254_v34, 16  ;;  %v13936_v5 = vld [vmem:[#allocation3] sm:$0xf] }
 0x3d8   : > { %v6543_v62 = vsel %vm14127_vm13, %v6538_v36, %v6542_v13  ;;  %v6552_v2 = vrot.slane %v6551_v42, 4  ;;  %v6561_v44 = vor.u32 %v6560_v32, %v6556_v9  ;;  %v6588_v51 = vshll.u32 %v16263_v28, 16  ;;  %v16275_v15 = vld [vmem:[#allocation3 + $0x4] sm:$0xf] }
 0x3d9   : > { %v11748_v59 = vcombine.low %v6533_v54, %v6543_v62  ;;  %v6580_v29 = vrot.slane %v6578_v55, 5  ;;  %v6575_v58 = vor.u32 %v6574_v24, %v6571_v60  ;;  %v6584_v8 = vrot.slane %v6582_v57, 4 }
 0x3da   : > { %v6562_v3 = vrot.slane %v6561_v44, 4  ;;  %v6566_v35 = vrot.slane %v6564_v4, 5  ;;  %v6557_v13 = vsel %vm14127_vm13, %v6552_v2, %v6556_v9  ;;  %v11767_v54 = vcombine.low %v13936_v5, %v16275_v15  ;;  %v16314_v5 = vld [vmem:[%s17885_s2 + $0xc] sm:$0xf]  ;;  %v7158_v44 = vld [vmem:[#allocation3 + $0x84] sm:$0xe] }
 0x3db   : > { %12861 = vmatmul.mubr.msk.bf16.gmra.mrb[8].mxu1 %vm6641_vm9, %v11748_v59  ;;  %v6576_v56 = vrot.slane %v6575_v58, 4  ;;  %v6585_v14 = vor.u32 %v6584_v8, %v6580_v29  ;;  %v6590_v62 = vrot.slane %v6588_v51, 5  ;;  %v11774_v8 = vcombine.low %v16123_v30, %v16130_v20  ;;  %v13938_v51 = vld [vmem:[#allocation3 + $0xc] sm:$0xf]  ;;  %v7147_v30 = vld [vmem:[#allocation3] sm:$0xe] }
 0x3dc   : > { %v6567_v36 = vsel %vm14127_vm13, %v6562_v3, %v6566_v35  ;;  %v11775_v58 = vcombine.low %v16096_v16, %v16111_v19  ;;  %v11776_v9 = vcombine.low %v16139_v10, %v16150_v47  ;;  %v11777_v4 = vcombine.low %v16157_v1, %v16165_v61  ;;  %v16303_v3 = vld [vmem:[#allocation3 + $0x10] sm:$0xf] }
 0x3dd   : > { %v11749_v42 = vcombine.low %v6557_v13, %v6567_v36  ;;  %v6581_v32 = vsel %vm14127_vm13, %v6576_v56, %v6580_v29  ;;  %v6586_v55 = vrot.slane %v6585_v14, 4  ;;  %v11778_v24 = vcombine.low %v16177_v48, %v16184_v11  ;;  %v13940_v14 = vld [vmem:[#allocation3 + $0x18] sm:$0xf]  ;;  %v16308_v13 = vld [vmem:[#allocation3 + $0x1c] sm:$0xf] }
 0x3de   : > { %v11768_v35 = vcombine.low %v13938_v51, %v16303_v3  ;;  %v7405_v56 = vsel %vm6690_vm7, %v16203_v22, 0  ;;  %v11769_v36 = vcombine.low %v13940_v14, %v16308_v13  ;;  %v7155_v22 = vld [vmem:[#allocation3 + $0x60] sm:$0xe]  ;;  %v13942_v51 = vld [vmem:[#allocation3 + $0x24] sm:$0xf]  ;;  %v11772_v14 = vcombine.low %v16044_v12, %v16057_v26 }
 0x3df   : > { %12864 = vmatprep.mubr.msk.bf16.mxu1 %vm6641_vm9, %v11749_v42  ;;  %v6591_v60 = vsel %vm14127_vm13, %v6586_v55, %v6590_v62  ;;  %v7246_v42 = vrot.slane %v16130_v20, 5  ;;  %v7157_v29 = vld [vmem:[#allocation3 + $0x78] sm:$0xe]  ;;  %v7263_v12 = vrot.slane %v16152_v38, 5  ;;  %v7270_v38 = vrot.slane %v16173_v46, 5 }
 0x3e0   : > { %v11750_v2 = vcombine.low %v6581_v32, %v6591_v60  ;;  %v7256_v32 = vrot.slane %v16117_v21, 5  ;;  %v7249_v60 = vrot.slane %v16132_v23, 5  ;;  %v7291_v57 = vrot.slane %v16223_v41, 5 }
 0x3e1   : > { %v7248_v62 = vrot.slane %v7246_v42, 4  ;;  %v18095_v16 = vcombine.low %v16187_v6, %v16198_v18  ;;  %v11799_v20 = vrot.slane %v7147_v30, 9  ;;  %v18096_v1 = vcombine.low %v16212_v53, %v16217_v33  ;;  %v16496_v30 = vld [vmem:[%s17885_s2 + $0x10] sm:$0xf] }
 0x3e2   : > { %v7204_v6 = vrot.slane %v16303_v3, 5  ;;  %v18098_v53 = vcombine.low %v16245_v40, %v16254_v34 }
 0x3e3   : > { %12865 = vmatmul.mubr.msk.bf16.gmra.mrb[12].mxu1 %vm6641_vm9, %v11750_v2  ;;  %v7156_v2 = vld [vmem:[#allocation3 + $0x6c] sm:$0xe]  ;;  %v16335_v23 = vsel %vm14488_vm8, %v7248_v62, %v7249_v60  ;;  %v7267_v62 = vrot.slane %v16165_v61, 5  ;;  %v18097_v61 = vcombine.low %v16229_v43, %v16239_v63 }
 0x3e4   : > { %12870 = vmatprep.mubr.msk.bf16.mxu1 %vm6641_vm9, %v11767_v54  ;;  %v7154_v54 = vld [vmem:[#allocation3 + $0x54] sm:$0xe] }
 0x3e5   : > { %v11806_v55 = vrot.slane %v7154_v54, 9  ;;  %v11807_v54 = vrot.slane %v7155_v22, 9 }
 0x3e7   : > { %v16331_v21 = vsel %vm14488_vm8, %v11806_v55, %v7246_v42  ;;  %v11809_v55 = vrot.slane %v7157_v29, 9 }
 0x3e9   : > { %v16371_v29 = vsel %vm14488_vm8, %v11809_v55, %v7267_v62  ;;  %v7288_v55 = vrot.slane %v16217_v33, 5  ;;  %v7148_v33 = vld [vmem:[#allocation3 + $0xc] sm:$0xe] }
 0x3eb   : > { %12871 = vmatmul.mubr.msk.bf16.vlgmr.msra.gmra.mrb[16].mxu1 %vm6641_vm9, %v11768_v35  ;;  %v11770_v35 = vcombine.low %v13942_v51, %v16004_v50  ;;  %v7260_v50 = vrot.slane %v16150_v47, 5  ;;  %v11808_v51 = vrot.slane %v7156_v2, 9  ;;  %v7274_v2 = vrot.slane %v16184_v11, 5  ;;  %v13943_v47 = vld [vmem:[#allocation3 + $0x8] sm:$0x1] }
 0x3ec   : > { %12903 = vmatpush3.bf16.msra.mxu1 %v7405_v56  ;;  %12874 = vmatprep.mubr.msk.bf16.mxu1 %vm6641_vm9, %v11769_v36  ;;  %v11771_v56 = vcombine.low %v16014_v39, %v16020_v49  ;;  %v7253_v36 = vrot.slane %v16111_v19, 5  ;;  %v7197_v19 = vrot.slane %v16275_v15, 5 }
 0x3ed   : > { %13797 = vmatprep.subr.msk.bf16.mxu1 %vm6690_vm7, %v16314_v5  ;;  %v7262_v42 = vrot.slane %v7260_v50, 4  ;;  %v16353_v60 = vsel %vm14488_vm8, %v11808_v51, %v7260_v50  ;;  %v11773_v50 = vcombine.low %v16069_v17, %v16071_v31  ;;  %v7277_v51 = vrot.slane %v16192_v37, 5 }
 0x3ee   : > { %v7255_v49 = vrot.slane %v7253_v36, 4  ;;  %v16343_v59 = vsel %vm14488_vm8, %v11807_v54, %v7253_v36  ;;  %v7269_v36 = vrot.slane %v7267_v62, 4  ;;  %v7159_v54 = vld [vmem:[#allocation3 + $0x90] sm:$0xe]  ;;  %v7281_v17 = vrot.slane %v16198_v18, 5 }
 0x3ef   : > { %v11811_v46 = vrot.slane %v7159_v54, 9  ;;  %v7161_v62 = vld [vmem:[#allocation3 + $0xa8] sm:$0xe]  ;;  %v7162_v54 = vld [vmem:[#allocation3 + $0xb4] sm:$0xe]  ;;  %v7199_v10 = vrot.slane %v7197_v19, 4  ;;  %v7198_v48 = vsel %vm14488_vm8, %v11799_v20, %v7197_v19 }
 0x3f0   : > { %v16349_v22 = vsel %vm14488_vm8, %v7255_v49, %v7256_v32  ;;  %v11810_v32 = vrot.slane %v7158_v44, 9  ;;  %v7276_v49 = vrot.slane %v7274_v2, 4  ;;  %v7211_v18 = vrot.slane %v16308_v13, 5  ;;  %v13946_v13 = vld [vmem:[#allocation3 + $0x28] sm:$0xf] }
 0x3f1   : > { %v16394_v39 = vsel %vm14488_vm8, %v11811_v46, %v7281_v17  ;;  %v7150_v20 = vld [vmem:[#allocation3 + $0x24] sm:$0xe] }
 0x3f2   : > { %v16379_v44 = vsel %vm14488_vm8, %v11810_v32, %v7274_v2  ;;  %v16386_v37 = vsel %vm14488_vm8, %v7276_v49, %v7277_v51  ;;  %v7284_v2 = vrot.slane %v16208_v0, 5  ;;  %v7295_v49 = vrot.slane %v16239_v63, 5  ;;  %v13944_v63 = vld [vmem:[#allocation3 + $0x14] sm:$0x1] }
 0x3f3   : > { %12875 = vmatmul.mubr.msk.bf16.gmra.mrb[20].mxu1 %vm6641_vm9, %v11770_v35  ;;  %v16362_v35 = vsel %vm14488_vm8, %v7262_v42, %v7263_v12  ;;  %v16375_v12 = vsel %vm14488_vm8, %v7269_v36, %v7270_v38  ;;  %v7283_v36 = vrot.slane %v7281_v17, 4  ;;  %v7290_v42 = vrot.slane %v7288_v55, 4 }
 0x3f4   : > { %12878 = vmatprep.mubr.msk.bf16.mxu1 %vm6641_vm9, %v11771_v56  ;;  %v7160_v56 = vld [vmem:[#allocation3 + $0x9c] sm:$0xe]  ;;  %v11813_v0 = vrot.slane %v7161_v62, 9  ;;  %v7297_v17 = vrot.slane %v7295_v49, 4  ;;  %v11814_v62 = vrot.slane %v7162_v54, 9  ;;  %v7213_v43 = vrot.slane %v7211_v18, 4 }
 0x3f5   : > { %v11812_v32 = vrot.slane %v7160_v56, 9  ;;  %v16400_v51 = vsel %vm14488_vm8, %v7283_v36, %v7284_v2  ;;  %v7302_v56 = vrot.slane %v16254_v34, 5  ;;  %v16412_v41 = vsel %vm14488_vm8, %v7290_v42, %v7291_v57  ;;  %v13947_v34 = vld [vmem:[#allocation3 + $0x34] sm:$0xf] }
 0x3f6   : > { %v11827_v46 = vcombine.low %v16394_v39, %v16400_v51  ;;  %v7298_v36 = vrot.slane %v16242_v45, 5  ;;  %v11800_v54 = vrot.slane %v7148_v33, 9 }
 0x3f7   : > { %v16404_v38 = vsel %vm14488_vm8, %v11812_v32, %v7288_v55  ;;  %v7304_v2 = vrot.slane %v7302_v56, 4  ;;  %v7305_v32 = vrot.slane %v16263_v28, 5  ;;  %v18115_v28 = vcombine.low %v16379_v44, %v16386_v37  ;;  %v16683_v37 = vld [vmem:[#allocation3 + $0xac] sm:$0xf]  ;;  %v16703_v55 = vld [vmem:[#allocation3 + $0xb8] sm:$0xf] }
 0x3f8   : > { %v16425_v57 = vsel %vm14488_vm8, %v7297_v17, %v7298_v36  ;;  %v7225_v17 = vrot.slane %v13947_v34, 5  ;;  %v7205_v36 = vsel %vm14488_vm8, %v11800_v54, %v7204_v6 }
 0x3f9   : > { %v16435_v42 = vsel %vm14488_vm8, %v7304_v2, %v7305_v32  ;;  %v7762_v2 = vsel %vm6690_vm7, %v16314_v5, 0  ;;  %v7151_v5 = vld [vmem:[#allocation3 + $0x30] sm:$0xe] }
 0x3fb   : > { %12879 = vmatmul.mubr.msk.bf16.gmra.mrb[24].mxu1 %vm6641_vm9, %v11772_v14  ;;  %v16421_v14 = vsel %vm14488_vm8, %v11813_v0, %v7295_v49  ;;  %v7218_v0 = vrot.slane %v13946_v13, 5 }
 0x3fc   : > { %12882 = vmatprep.mubr.msk.bf16.mxu1 %vm6641_vm9, %v11773_v50  ;;  %v16431_v50 = vsel %vm14488_vm8, %v11814_v62, %v7302_v56 }
 0x3fd   : > { %v7220_v19 = vrot.slane %v7218_v0, 4 }
 0x403   : > { %12883 = vmatmul.mubr.msk.bf16.gmra.mrb[28].mxu1 %vm6641_vm9, %v11774_v8  ;;  %v7200_v8 = vrot.slane %v13943_v47, 5  ;;  %v13948_v47 = vld [vmem:[#allocation3 + $0x2c] sm:$0x1] }
 0x404   : > { %12886 = vmatprep.mubr.msk.bf16.mxu1 %vm6641_vm9, %v11775_v58  ;;  %v7206_v58 = vrot.slane %v7204_v6, 4  ;;  %v7232_v6 = vrot.slane %v16057_v26, 5  ;;  %v7235_v26 = vrot.slane %v16059_v7, 5  ;;  %v16526_v7 = vld [vmem:[#allocation3 + $0x28] sm:$0xf] }
 0x405   : > { %v7201_v11 = vsel %vm14488_vm8, %v7199_v10, %v7200_v8  ;;  %v7227_v10 = vrot.slane %v7225_v17, 4  ;;  %v7221_v8 = vrot.slane %v13948_v47, 5 }
 0x406   : > { %v11815_v15 = vcombine.low %v7198_v48, %v7201_v11  ;;  %v11802_v48 = vrot.slane %v7150_v20, 9  ;;  %v16542_v20 = vld [vmem:[#allocation3 + $0x40] sm:$0xf] }
 0x407   : > { %v7222_v11 = vsel %vm14488_vm8, %v7220_v19, %v7221_v8  ;;  %v8685_v19 = vld [vmem:[#allocation3 + $0x30] sm:$0xe]  ;;  %v16548_v8 = vld [vmem:[#allocation3 + $0x4c] sm:$0xf] }
 0x40b   : > { %12887 = vmatmul.mubr.msk.bf16.gmra.mrb[0].mxu1 %vm6641_vm9, %v11776_v9  ;;  %v7207_v9 = vrot.slane %v13944_v63, 5 }
 0x40c   : > { %12890 = vmatprep.mubr.msk.bf16.mxu1 %vm6641_vm9, %v11777_v4  ;;  %v7149_v4 = vld [vmem:[#allocation3 + $0x18] sm:$0xe] }
 0x40d   : > { %v7208_v3 = vsel %vm14488_vm8, %v7206_v58, %v7207_v9  ;;  %v11801_v56 = vrot.slane %v7149_v4, 9  ;;  %v7239_v58 = vrot.slane %v16071_v31, 5  ;;  %v7234_v9 = vrot.slane %v7232_v6, 4  ;;  %v7152_v4 = vld [vmem:[#allocation3 + $0x3c] sm:$0xe] }
 0x40e   : > { %v11816_v62 = vcombine.low %v7205_v36, %v7208_v3  ;;  %v7242_v31 = vrot.slane %v16073_v52, 5  ;;  %v11804_v54 = vrot.slane %v7152_v4, 9  ;;  %v16528_v52 = vld [vmem:[#allocation3 + $0x34] sm:$0xf]  ;;  %v18099_v36 = vcombine.low %v16331_v21, %v16335_v23  ;;  %v8686_v21 = vld [vmem:[#allocation3 + $0x3c] sm:$0xe] }
 0x40f   : > { %v7212_v32 = vsel %vm14488_vm8, %v11801_v56, %v7211_v18  ;;  %v11803_v18 = vrot.slane %v7151_v5, 9  ;;  %v7236_v3 = vsel %vm14488_vm8, %v7234_v9, %v7235_v26  ;;  %v8769_v47 = vrot.slane %v16528_v52, 5  ;;  %v16546_v23 = vld [vmem:[#allocation3 + $0x44] sm:$0x1]  ;;  %v8688_v4 = vld [vmem:[#allocation3 + $0x54] sm:$0xe] }
 0x410   : > { %v7233_v56 = vsel %vm14488_vm8, %v11804_v54, %v7232_v6  ;;  %v8783_v9 = vrot.slane %v16548_v8, 5  ;;  %v16573_v26 = vld [vmem:[#allocation3 + $0x64] sm:$0xf] }
 0x413   : > { %12891 = vmatmul.mubr.msk.bf16.gmra.mrb[4].mxu1 %vm6641_vm9, %v11778_v24  ;;  %v13945_v24 = vld [vmem:[#allocation3 + $0x20] sm:$0x1] }
 0x414   : > { %12894 = vmatprep.mubr.msk.bf16.mxu1 %vm6641_vm9, %v18095_v16  ;;  %v7214_v49 = vrot.slane %v13945_v24, 5  ;;  %v7241_v24 = vrot.slane %v7239_v58, 4 }
 0x416   : > { %v7215_v40 = vsel %vm14488_vm8, %v7213_v43, %v7214_v49  ;;  %v7226_v43 = vsel %vm14488_vm8, %v11803_v18, %v7225_v17  ;;  %v7153_v49 = vld [vmem:[#allocation3 + $0x48] sm:$0xe]  ;;  %v8771_v18 = vrot.slane %v8769_v47, 4 }
 0x417   : > { %v11817_v16 = vcombine.low %v7212_v32, %v7215_v40  ;;  %v11805_v13 = vrot.slane %v7153_v49, 9  ;;  %v11820_v40 = vcombine.low %v7233_v56, %v7236_v3  ;;  %v16538_v32 = vld [vmem:[#allocation3 + $0x2c] sm:$0x1]  ;;  %v8693_v49 = vld [vmem:[#allocation3 + $0x90] sm:$0xe] }
 0x419   : > { %v7240_v34 = vsel %vm14488_vm8, %v11805_v13, %v7239_v58  ;;  %v8776_v58 = vrot.slane %v16542_v20, 5  ;;  %v18105_v13 = vcombine.low %v16353_v60, %v16362_v35  ;;  %v16598_v60 = vld [vmem:[#allocation3 + $0x70] sm:$0xf] }
 0x41b   : > { %12895 = vmatmul.mubr.msk.bf16.gmra.mrb[8].mxu1 %vm6641_vm9, %v18096_v1  ;;  %v13949_v1 = vld [vmem:[#allocation3 + $0x38] sm:$0x1]  ;;  %v8778_v54 = vrot.slane %v8776_v58, 4 }
 0x41c   : > { %12898 = vmatprep.mubr.msk.bf16.mxu1 %vm6641_vm9, %v18097_v61  ;;  %v7228_v61 = vrot.slane %v13949_v1, 5  ;;  %v11914_v1 = vrot.slane %v8685_v19, 9  ;;  %v11917_v19 = vrot.slane %v8688_v4, 9 }
 0x423   : > { %12899 = vmatmul.mubr.msk.bf16.gmra.mrb[12].mxu1 %vm6641_vm9, %v18098_v53  ;;  %v7219_v53 = vsel %vm14488_vm8, %v11802_v48, %v7218_v0  ;;  %v7243_v0 = vsel %vm14488_vm8, %v7241_v24, %v7242_v31  ;;  %v8687_v48 = vld [vmem:[#allocation3 + $0x48] sm:$0xe]  ;;  %v16571_v24 = vld [vmem:[#allocation3 + $0x5c] sm:$0x1] }
 0x424   : > { %12904 = vmatprep.mubr.msk.bf16.mxu1 %vm6641_vm9, %v11815_v15  ;;  %v7229_v15 = vsel %vm14488_vm8, %v7227_v10, %v7228_v61  ;;  %v11818_v33 = vcombine.low %v7219_v53, %v7222_v11  ;;  %v11821_v17 = vcombine.low %v7240_v34, %v7243_v0  ;;  %v8762_v10 = vrot.slane %v16526_v7, 5  ;;  %v16552_v11 = vld [vmem:[#allocation3 + $0x50] sm:$0x1]  ;;  %v16559_v53 = vld [vmem:[#allocation3 + $0x58] sm:$0xf] }
 0x425   : > { %v11819_v63 = vcombine.low %v7226_v43, %v7229_v15  ;;  %v11915_v15 = vrot.slane %v8686_v21, 9  ;;  %v16567_v43 = vsel %vm14488_vm8, %v11914_v1, %v8769_v47  ;;  %v11916_v3 = vrot.slane %v8687_v48, 9  ;;  %v16585_v0 = vld [vmem:[#allocation3 + $0x68] sm:$0x1]  ;;  %v8690_v47 = vld [vmem:[#allocation3 + $0x6c] sm:$0xe] }
 0x426   : > { %18103 = vst [vmem:[#allocation19_spill] sm:$0xff] %v16567_v43  ;;  %v8785_v34 = vrot.slane %v8783_v9, 4  ;;  %v16609_v21 = vld [vmem:[#allocation3 + $0x74] sm:$0x1]  ;;  %v11919_v4 = vrot.slane %v8690_v47, 9  ;;  %v13867_v43 = vld [vmem:[#allocation3 + $0x6c] sm:$0xff]  }
 0x42b   : > { %12905 = vmatmul.mubr.msk.bf16.vlgmr.msra.gmra.mrb[16].mxu1 %vm6641_vm9, %v11816_v62  ;;  %v8684_v62 = vld [vmem:[#allocation3 + $0x24] sm:$0xe] }
 0x42c   : > { %12937 = vmatpush3.bf16.msra.mxu1 %v7762_v2  ;;  %12908 = vmatprep.mubr.msk.bf16.mxu1 %vm6641_vm9, %v11817_v16  ;;  %v18100_v2 = vcombine.low %v16343_v59, %v16349_v22  ;;  %v16540_v16 = vld [vmem:[#allocation3 + $0x38] sm:$0x1]  ;;  %v11913_v5 = vrot.slane %v8684_v62, 9  ;;  %v8764_v59 = vrot.slane %v8762_v10, 4  ;;  %v8765_v22 = vrot.slane %v16538_v32, 5 }
 0x42d   : > { %13798 = vmatprep.subr.msk.bf16.mxu1 %vm6690_vm7, %v16496_v30  ;;  %v8772_v61 = vrot.slane %v16540_v16, 5  ;;  %v18107_v62 = vcombine.low %v16371_v29, %v16375_v12  ;;  %v16653_v29 = vld [vmem:[#allocation3 + $0x98] sm:$0x1] }
 0x42e   : > { %v16556_v6 = vsel %vm14488_vm8, %v11913_v5, %v8762_v10  ;;  %v8790_v10 = vrot.slane %v16559_v53, 5  ;;  %v16611_v5 = vld [vmem:[#allocation3 + $0x7c] sm:$0xf] }
 0x42f   : > { %18101 = vst [vmem:[#allocation16_spill] sm:$0xff] %v16556_v6  ;;  %v16579_v31 = vsel %vm14488_vm8, %v8771_v18, %v8772_v61  ;;  %v8800_v18 = vrot.slane %v16585_v0, 5 }
 0x430   : > { %18104 = vst [vmem:[#allocation20_spill] sm:$0xff] %v16579_v31  ;;  %v8792_v61 = vrot.slane %v8790_v10, 4  ;;  %v16838_v31 = vld [vmem:[#allocation3 + $0x20] sm:$0x1] }
 0x431   : > { %18143 = vst [vmem:[#allocation42_spill] sm:$0xff] %v16838_v31 }
 0x433   : > { %12909 = vmatmul.mubr.msk.bf16.gmra.mrb[20].mxu1 %vm6641_vm9, %v11818_v33  ;;  %v16563_v33 = vsel %vm14488_vm8, %v8764_v59, %v8765_v22  ;;  %v8793_v59 = vrot.slane %v16571_v24, 5  ;;  %v8797_v22 = vrot.slane %v16573_v26, 5 }
 0x434   : > { %12912 = vmatprep.mubr.msk.bf16.mxu1 %vm6641_vm9, %v11819_v63  ;;  %18102 = vst [vmem:[#allocation17_spill] sm:$0xff] %v16563_v33  ;;  %v8779_v63 = vrot.slane %v16546_v23, 5 }
 0x436   : > { %v16602_v35 = vsel %vm14488_vm8, %v8778_v54, %v8779_v63  ;;  %v16628_v63 = vsel %vm14488_vm8, %v11917_v19, %v8790_v10  ;;  %v8804_v54 = vrot.slane %v16598_v60, 5  ;;  %v16645_v19 = vld [vmem:[#allocation3 + $0x94] sm:$0xf]  ;;  %v16662_v10 = vld [vmem:[#allocation3 + $0xa0] sm:$0xf] }
 0x437   : > { %18108 = vst [vmem:[#allocation21_spill] sm:$0xff] %v16602_v35  ;;  %18111 = vst [vmem:[#allocation7_spill] sm:$0xff] %v16628_v63  ;;  %v7966_v35 = vld [vmem:[#allocation3 + $0x30] sm:$0xf] }
 0x438   : > { %v8806_v1 = vrot.slane %v8804_v54, 4 }
 0x43b   : > { %12913 = vmatmul.mubr.msk.bf16.gmra.mrb[24].mxu1 %vm6641_vm9, %v11820_v40  ;;  %v16591_v40 = vsel %vm14488_vm8, %v11915_v15, %v8776_v58  ;;  %v8691_v15 = vld [vmem:[#allocation3 + $0x78] sm:$0xe]  ;;  %v16624_v58 = vld [vmem:[#allocation3 + $0x80] sm:$0x1] }
 0x43c   : > { %12916 = vmatprep.mubr.msk.bf16.mxu1 %vm6641_vm9, %v11821_v17  ;;  %18106 = vst [vmem:[#allocation4_spill] sm:$0xff] %v16591_v40  ;;  %v8786_v17 = vrot.slane %v16552_v11, 5  ;;  %v8814_v56 = vrot.slane %v16624_v58, 5 }
 0x43e   : > { %v16617_v12 = vsel %vm14488_vm8, %v8785_v34, %v8786_v17  ;;  %v16637_v34 = vsel %vm14488_vm8, %v8792_v61, %v8793_v59  ;;  %v11920_v59 = vrot.slane %v8691_v15, 9  ;;  %v8692_v61 = vld [vmem:[#allocation3 + $0x84] sm:$0xe]  ;;  %v16668_v15 = vsel %vm14488_vm8, %v11919_v4, %v8804_v54 }
 0x43f   : > { %18110 = vst [vmem:[#allocation6_spill] sm:$0xff] %v16617_v12  ;;  %18112 = vst [vmem:[#allocation8_spill] sm:$0xff] %v16637_v34  ;;  %v11921_v4 = vrot.slane %v8692_v61, 9  ;;  %v8825_v54 = vrot.slane %v16645_v19, 5  ;;  %v8832_v61 = vrot.slane %v16662_v10, 5 }
 0x440   : > { %18116 = vst [vmem:[#allocation11_spill] sm:$0xff] %v16668_v15  ;;  %v16728_v34 = vld [vmem:[#allocation3 + $0xc8] sm:$0x1] }
 0x441   : > { %v8827_v45 = vrot.slane %v8825_v54, 4 }
 0x443   : > { %12917 = vmatmul.mubr.msk.bf16.gmra.mrb[28].mxu1 %vm6641_vm9, %v18099_v36  ;;  %v8689_v36 = vld [vmem:[#allocation3 + $0x60] sm:$0xe] }
 0x444   : > { %12920 = vmatprep.mubr.msk.bf16.mxu1 %vm6641_vm9, %v18100_v2  ;;  %v16606_v2 = vsel %vm14488_vm8, %v11916_v3, %v8783_v9  ;;  %v11918_v48 = vrot.slane %v8689_v36, 9  ;;  %v8799_v9 = vrot.slane %v8797_v22, 4  ;;  %v16631_v3 = vld [vmem:[#allocation3 + $0x88] sm:$0xf]  ;;  %v8807_v36 = vrot.slane %v16609_v21, 5 }
 0x445   : > { %18109 = vst [vmem:[#allocation18_spill] sm:$0xff] %v16606_v2  ;;  %v8818_v44 = vrot.slane %v16631_v3, 5 }
 0x446   : > { %v16641_v17 = vsel %vm14488_vm8, %v11918_v48, %v8797_v22  ;;  %v16651_v47 = vsel %vm14488_vm8, %v8799_v9, %v8800_v18  ;;  %v16664_v18 = vld [vmem:[#allocation3 + $0xa4] sm:$0x1]  ;;  %v16672_v9 = vsel %vm14488_vm8, %v8806_v1, %v8807_v36  ;;  %v8694_v36 = vld [vmem:[#allocation3 + $0x9c] sm:$0xe] }
 0x447   : > { %18113 = vst [vmem:[#allocation9_spill] sm:$0xff] %v16641_v17  ;;  %18114 = vst [vmem:[#allocation10_spill] sm:$0xff] %v16651_v47  ;;  %v8820_v51 = vrot.slane %v8818_v44, 4  ;;  %v8696_v17 = vld [vmem:[#allocation3 + $0xb4] sm:$0xe] }
 0x448   : > { %18117 = vst [vmem:[#allocation12_spill] sm:$0xff] %v16672_v9 }
 0x44b   : > { %12921 = vmatmul.mubr.msk.bf16.gmra.mrb[0].mxu1 %vm6641_vm9, %v18105_v13  ;;  %v16633_v13 = vld [vmem:[#allocation3 + $0x8c] sm:$0x1] }
 0x44c   : > { %12924 = vmatprep.mubr.msk.bf16.mxu1 %vm6641_vm9, %v18107_v62  ;;  %v8811_v62 = vrot.slane %v16611_v5, 5 }
 0x44e   : > { %v8813_v48 = vrot.slane %v8811_v62, 4  ;;  %v16676_v22 = vsel %vm14488_vm8, %v11920_v59, %v8811_v62  ;;  %v16692_v62 = vld [vmem:[#allocation3 + $0xb0] sm:$0x1]  ;;  %v11922_v59 = vrot.slane %v8693_v49, 9  ;;  %v11923_v49 = vrot.slane %v8694_v36, 9 }
 0x44f   : > { %18118 = vst [vmem:[#allocation13_spill] sm:$0xff] %v16676_v22  ;;  %v8842_v47 = vrot.slane %v16692_v62, 5 }
 0x450   : > { %v16689_v1 = vsel %vm14488_vm8, %v8813_v48, %v8814_v56  ;;  %v8828_v56 = vrot.slane %v16653_v29, 5  ;;  %v8695_v48 = vld [vmem:[#allocation3 + $0xa8] sm:$0xe]  ;;  %v16711_v39 = vsel %vm14488_vm8, %v11922_v59, %v8825_v54  ;;  %v16732_v22 = vsel %vm14488_vm8, %v11923_v49, %v8832_v61 }
 0x451   : > { %18119 = vst [vmem:[#allocation5_spill] sm:$0xff] %v16689_v1  ;;  %18122 = vst [vmem:[#allocation24_spill] sm:$0xff] %v16711_v39  ;;  %v16716_v1 = vld [vmem:[#allocation3 + $0xc4] sm:$0xf]  ;;  %v11924_v36 = vrot.slane %v8695_v48, 9  ;;  %v18126_v48 = vcombine.low %v16404_v38, %v16412_v41  ;;  %v8856_v54 = vrot.slane %v16728_v34, 5 }
 0x452   : > { %v16722_v15 = vsel %vm14488_vm8, %v8827_v45, %v8828_v56  ;;  %18124 = vst [vmem:[#allocation26_spill] sm:$0xff] %v16732_v22  ;;  %v8846_v56 = vrot.slane %v16703_v55, 5  ;;  %v8853_v49 = vrot.slane %v16716_v1, 5 }
 0x453   : > { %12925 = vmatmul.mubr.msk.bf16.gmra.mrb[4].mxu1 %vm6641_vm9, %v18115_v28  ;;  %v16699_v28 = vsel %vm14488_vm8, %v11921_v4, %v8818_v44  ;;  %v8839_v44 = vrot.slane %v16683_v37, 5  ;;  %v16714_v4 = vld [vmem:[#allocation3 + $0xbc] sm:$0x1]  ;;  %18123 = vst [vmem:[#allocation25_spill] sm:$0xff] %v16722_v15 }
 0x454   : > { %12928 = vmatprep.mubr.msk.bf16.mxu1 %vm6641_vm9, %v11827_v46  ;;  %v8821_v46 = vrot.slane %v16633_v13, 5  ;;  %18120 = vst [vmem:[#allocation22_spill] sm:$0xff] %v16699_v28 }
 0x455   : > { %v8841_v59 = vrot.slane %v8839_v44, 4  ;;  %v16747_v15 = vsel %vm14488_vm8, %v11924_v36, %v8839_v44  ;;  %v8849_v44 = vrot.slane %v16714_v4, 5 }
 0x456   : > { %v16707_v9 = vsel %vm14488_vm8, %v8820_v51, %v8821_v46  ;;  %v8834_v51 = vrot.slane %v8832_v61, 4  ;;  %v8835_v46 = vrot.slane %v16664_v18, 5  ;;  %18127 = vst [vmem:[#allocation28_spill] sm:$0xff] %v16747_v15 }
 0x457   : > { %18121 = vst [vmem:[#allocation23_spill] sm:$0xff] %v16707_v9  ;;  %v8697_v9 = vld [vmem:[#allocation3 + $0xc0] sm:$0xe]  ;;  %v16751_v61 = vsel %vm14488_vm8, %v8841_v59, %v8842_v47  ;;  %v8855_v59 = vrot.slane %v8853_v49, 4 }
 0x458   : > { %v16736_v45 = vsel %vm14488_vm8, %v8834_v51, %v8835_v46  ;;  %18128 = vst [vmem:[#allocation29_spill] sm:$0xff] %v16751_v61  ;;  %v18129_v51 = vcombine.low %v16421_v14, %v16425_v57  ;;  %v11925_v46 = vrot.slane %v8696_v17, 9  ;;  %v11926_v47 = vrot.slane %v8697_v9, 9 }
 0x459   : > { %18125 = vst [vmem:[#allocation27_spill] sm:$0xff] %v16736_v45  ;;  %v16786_v41 = vsel %vm14488_vm8, %v8855_v59, %v8856_v54  ;;  %v16800_v54 = vld [vmem:[%s17885_s2 + $0x14] sm:$0xf]  ;;  %v8067_v61 = vshrl.u32 %v16526_v7, 16 }
 0x45a   : > { %v16770_v14 = vsel %vm14488_vm8, %v11925_v46, %v8846_v56  ;;  %v16782_v9 = vsel %vm14488_vm8, %v11926_v47, %v8853_v49  ;;  %18137 = vst [vmem:[#allocation37_spill] sm:$0xff] %v16786_v41  ;;  %v13859_v46 = vld [vmem:[#allocation3 + $0xc] sm:$0xff]   ;;  %v8487_v49 = vsel %vm6690_vm7, %v16496_v30, 0  ;;  %v13861_v47 = vld [vmem:[#allocation3 + $0x24] sm:$0xff]   ;;  %v13865_v41 = vld [vmem:[#allocation3 + $0x54] sm:$0xff]  }
 0x45b   : > { %12929 = vmatmul.mubr.msk.bf16.gmra.mrb[8].mxu1 %vm6641_vm9, %v18126_v48  ;;  %v16758_v38 = vpop.f32.mrb[32].mxu0  ;;  %v8848_v48 = vrot.slane %v8846_v56, 4  ;;  %18133 = vst [vmem:[#allocation33_spill] sm:$0xff] %v16770_v14  ;;  %18136 = vst [vmem:[#allocation36_spill] sm:$0xff] %v16782_v9  ;;  %v13862_v30 = vld [vmem:[#allocation3 + $0x30] sm:$0xff]   ;;  %v8063_v14 = vshll.u32 %v16526_v7, 16 }
 0x45c   : > { %12932 = vmatprep.mubr.msk.bf16.mxu1 %vm6641_vm9, %v18129_v51  ;;  %18130 = vst [vmem:[#allocation30_spill] sm:$0xff] %v16758_v38  ;;  %v16763_v36 = vpop.f32.mrb[33].mxu0  ;;  %v16814_v56 = vld [vmem:[#allocation3 + $0x10] sm:$0xf]  ;;  %v7960_v51 = vld [vmem:[#allocation3 + $0x18] sm:$0xf] }
 0x45d   : > { %18131 = vst [vmem:[#allocation31_spill] sm:$0xff] %v16763_v36  ;;  %v16766_v45 = vpop.f32.mrb[34].mxu0  ;;  %v16774_v57 = vsel %vm14488_vm8, %v8848_v48, %v8849_v44  ;;  %v18138_v48 = vcombine.low %v16431_v50, %v16435_v42  ;;  %v13860_v44 = vld [vmem:[#allocation3 + $0x18] sm:$0xff]   ;;  %v16836_v12 = vrot.slane %v8063_v14, 5  ;;  %v8069_v2 = vrot.slane %v8067_v61, 4  ;;  %v13866_v7 = vld [vmem:[#allocation3 + $0x60] sm:$0xff]  }
 0x45e   : > { %18132 = vst [vmem:[#allocation32_spill] sm:$0xff] %v16766_v45  ;;  %18134 = vst [vmem:[#allocation34_spill] sm:$0xff] %v16774_v57  ;;  %v16776_v17 = vpop.f32.mrb[35].mxu0  ;;  %v8030_v45 = vshrl.u32 %v7960_v51, 16  ;;  %v7963_v57 = vld [vmem:[#allocation3 + $0x24] sm:$0xf] }
 0x45f   : > { %18135 = vst [vmem:[#allocation35_spill] sm:$0xff] %v16776_v17  ;;  %v8054_v63 = vshrl.u32 %v7963_v57, 16  ;;  %v8070_v61 = vor.u32 %v8069_v2, %v16836_v12  ;;  %v7969_v2 = vld [vmem:[#allocation3 + $0x3c] sm:$0xf] }
 0x460   : > { %v8032_v15 = vrot.slane %v8030_v45, 4  ;;  %v8102_v6 = vshrl.u32 %v7969_v2, 16 }
 0x463   : > { %12933 = vmatmul.mubr.msk.bf16.gmra.mrb[12].mxu1 %vm6641_vm9, %v18138_v48  ;;  %v13863_v48 = vld [vmem:[#allocation3 + $0x3c] sm:$0xff]  }
 0x464   : > { %12938 = vmatprep.mubr.msk.bf16.mxu1 %vm6641_vm9, %v13859_v46 }
 0x46b   : > { %12939 = vmatmul.mubr.msk.bf16.vlgmr.msra.gmra.mrb[16].mxu1 %vm6641_vm9, %v13860_v44  ;;  %v7957_v44 = vld [vmem:[#allocation3 + $0xc] sm:$0xf] }
 0x46c   : > { %12971 = vmatpush3.bf16.msra.mxu1 %v8487_v49  ;;  %12942 = vmatprep.mubr.msk.bf16.mxu1 %vm6641_vm9, %v13861_v47  ;;  %v8015_v49 = vshll.u32 %v16814_v56, 16  ;;  %v8019_v47 = vshrl.u32 %v16814_v56, 16  ;;  %v8009_v36 = vshll.u32 %v7957_v44, 16 }
 0x46d   : > { %13799 = vmatprep.subr.msk.bf16.mxu1 %vm6690_vm7, %v16800_v54  ;;  %v16806_v50 = vpop.f32.mrb[36].mxu0 }
 0x46e   : > { %18139 = vst [vmem:[#allocation38_spill] sm:$0xff] %v16806_v50  ;;  %v16808_v42 = vpop.f32.mrb[37].mxu0  ;;  %v16820_v50 = vld [vmem:[#allocation3 + $0x1c] sm:$0xf]  ;;  %v16824_v38 = vrot.slane %v8015_v49, 5  ;;  %v8021_v17 = vrot.slane %v8019_v47, 4 }
 0x46f   : > { %18140 = vst [vmem:[#allocation39_spill] sm:$0xff] %v16808_v42  ;;  %v16810_v59 = vpop.f32.mrb[38].mxu0  ;;  %v16822_v42 = vld [vmem:[#allocation3 + $0x14] sm:$0x1]  ;;  %v8043_v9 = vshrl.u32 %v16820_v50, 16  ;;  %v8011_v47 = vrot.slane %v8009_v36, 5 }
 0x470   : > { %18141 = vst [vmem:[#allocation40_spill] sm:$0xff] %v16810_v59  ;;  %v16812_v46 = vpop.f32.mrb[39].mxu0  ;;  %v8006_v59 = vshrl.u32 %v7957_v44, 16  ;;  %v8025_v49 = vshll.u32 %v16822_v42, 16 }
 0x471   : > { %18142 = vst [vmem:[#allocation41_spill] sm:$0xff] %v16812_v46  ;;  %v13864_v46 = vld [vmem:[#allocation3 + $0x48] sm:$0xff]   ;;  %v8045_v28 = vrot.slane %v8043_v9, 4 }
 0x472   : > { %v8008_v44 = vrot.slane %v8006_v59, 4  ;;  %v8027_v59 = vrot.slane %v8025_v49, 5  ;;  %v8091_v49 = vshrl.u32 %v16528_v52, 16 }
 0x473   : > { %12943 = vmatmul.mubr.msk.bf16.gmra.mrb[20].mxu1 %vm6641_vm9, %v13862_v30  ;;  %v8033_v30 = vshll.u32 %v7960_v51, 16  ;;  %v8022_v51 = vor.u32 %v8021_v17, %v16824_v38 }
 0x474   : > { %12946 = vmatprep.mubr.msk.bf16.mxu1 %vm6641_vm9, %v13863_v48  ;;  %v8039_v48 = vshll.u32 %v16820_v50, 16  ;;  %v8012_v40 = vor.u32 %v8011_v47, %v8008_v44  ;;  %v8087_v44 = vshll.u32 %v16528_v52, 16  ;;  %v8071_v52 = vrot.slane %v8070_v61, 4 }
 0x475   : > { %v8035_v22 = vrot.slane %v8033_v30, 5  ;;  %v8056_v30 = vrot.slane %v8054_v63, 4 }
 0x476   : > { %v16834_v39 = vrot.slane %v8039_v48, 5  ;;  %v8078_v48 = vshrl.u32 %v7966_v35, 16 }
 0x477   : > { %v8036_v36 = vor.u32 %v8035_v22, %v8032_v15  ;;  %v8049_v15 = vshll.u32 %v16838_v31, 16  ;;  %v8105_v31 = vshll.u32 %v7969_v2, 16 }
 0x478   : > { %v8046_v45 = vor.u32 %v8045_v28, %v16834_v39  ;;  %v8013_v28 = vrot.slane %v8012_v40, 4 }
 0x479   : > { %v8051_v33 = vrot.slane %v8049_v15, 5  ;;  %v8107_v15 = vrot.slane %v8105_v31, 5 }
 0x47a   : > { %v8018_v40 = vsel %vm14127_vm13, %v8013_v28, %v16824_v38 }
 0x47b   : > { %12947 = vmatmul.mubr.msk.bf16.gmra.mrb[24].mxu1 %vm6641_vm9, %v13864_v46  ;;  %v8057_v46 = vshll.u32 %v7963_v57, 16  ;;  %v8081_v57 = vshll.u32 %v7966_v35, 16  ;;  %v8037_v35 = vrot.slane %v8036_v36, 4  ;;  %v7972_v36 = vld [vmem:[#allocation3 + $0x48] sm:$0xf] }
 0x47c   : > { %12950 = vmatprep.mubr.msk.bf16.mxu1 %vm6641_vm9, %v13865_v41  ;;  %v8023_v41 = vrot.slane %v8022_v51, 4  ;;  %v8073_v51 = vshll.u32 %v16538_v32, 16  ;;  %v8111_v32 = vshll.u32 %v16542_v20, 16  ;;  %v8126_v28 = vshrl.u32 %v7972_v36, 16 }
 0x47d   : > { %v8059_v9 = vrot.slane %v8057_v46, 5  ;;  %v8047_v46 = vrot.slane %v8046_v45, 4  ;;  %v13869_v45 = vld [vmem:[#allocation3 + $0x84] sm:$0xff]  }
 0x47e   : > { %v8028_v47 = vsel %vm14127_vm13, %v8023_v41, %v8027_v59  ;;  %v8075_v41 = vrot.slane %v8073_v51, 5  ;;  %v8115_v59 = vshrl.u32 %v16542_v20, 16  ;;  %v8135_v51 = vshll.u32 %v16548_v8, 16 }
 0x480   : > { %v8076_v38 = vsel %vm14127_vm13, %v8071_v52, %v8075_v41 }
 0x481   : > { %v16840_v17 = vpop.f32.mrb[40].mxu0 }
 0x482   : > { %18144 = vst [vmem:[#allocation43_spill] sm:$0xff] %v16840_v17  ;;  %v16844_v14 = vpop.f32.mrb[41].mxu0  ;;  %v8083_v17 = vrot.slane %v8081_v57, 5 }
 0x483   : > { %12951 = vmatmul.mubr.msk.bf16.gmra.mrb[28].mxu1 %vm6641_vm9, %v13866_v7  ;;  %18145 = vst [vmem:[#allocation44_spill] sm:$0xff] %v16844_v14  ;;  %v16850_v22 = vpop.f32.mrb[42].mxu0  ;;  %v8060_v7 = vor.u32 %v8059_v9, %v8056_v30  ;;  %v8080_v14 = vrot.slane %v8078_v48, 4  ;;  %v16865_v30 = vcombine.low %v8018_v40, %v8028_v47  ;;  %v8042_v9 = vsel %vm14127_vm13, %v8037_v35, %v16834_v39 }
 0x484   : > { %12954 = vmatprep.mubr.msk.bf16.mxu1 %vm6641_vm9, %v13867_v43  ;;  %18146 = vst [vmem:[#allocation45_spill] sm:$0xff] %v16850_v22  ;;  %v16853_v63 = vpop.f32.mrb[43].mxu0  ;;  %v16858_v43 = vrot.slane %v8087_v44, 5  ;;  %v8093_v22 = vrot.slane %v8091_v49, 4  ;;  %v8052_v48 = vsel %vm14127_vm13, %v8047_v46, %v8051_v33  ;;  %v8097_v44 = vshll.u32 %v16540_v16, 16 }
 0x485   : > { %18147 = vst [vmem:[#allocation46_spill] sm:$0xff] %v16853_v63  ;;  %v13868_v63 = vld [vmem:[#allocation3 + $0x78] sm:$0xff]   ;;  %v8061_v61 = vrot.slane %v8060_v7, 4  ;;  %v8084_v57 = vor.u32 %v8083_v17, %v8080_v14  ;;  %v8104_v49 = vrot.slane %v8102_v6, 4  ;;  %v8129_v39 = vshll.u32 %v7972_v36, 16 }
 0x486   : > { %v8094_v20 = vor.u32 %v8093_v22, %v16858_v43  ;;  %v16878_v47 = vrot.slane %v8111_v32, 5  ;;  %v8117_v33 = vrot.slane %v8115_v59, 4  ;;  %v16882_v2 = vcombine.low %v8042_v9, %v8052_v48  ;;  %v7975_v16 = vld [vmem:[#allocation3 + $0x54] sm:$0xf]  ;;  %v7978_v7 = vld [vmem:[#allocation3 + $0x60] sm:$0xf] }
 0x487   : > { %v8066_v17 = vsel %vm14127_vm13, %v8061_v61, %v16836_v12  ;;  %v8159_v14 = vshll.u32 %v16559_v53, 16  ;;  %v8163_v6 = vshrl.u32 %v16559_v53, 16  ;;  %v8085_v22 = vrot.slane %v8084_v57, 4  ;;  %v13870_v32 = vld [vmem:[#allocation3 + $0x90] sm:$0xff]   ;;  %v7981_v9 = vld [vmem:[#allocation3 + $0x6c] sm:$0xf] }
 0x488   : > { %v16889_v31 = vcombine.low %v8066_v17, %v8076_v38  ;;  %v8099_v35 = vrot.slane %v8097_v44, 5  ;;  %v8121_v46 = vshll.u32 %v16546_v23, 16  ;;  %v8095_v52 = vrot.slane %v8094_v20, 4  ;;  %v13871_v53 = vld [vmem:[#allocation3 + $0x9c] sm:$0xff]  }
 0x489   : > { %v8128_v40 = vrot.slane %v8126_v28, 4  ;;  %v8131_v41 = vrot.slane %v8129_v39, 5  ;;  %v8118_v59 = vor.u32 %v8117_v33, %v16878_v47  ;;  %v16893_v12 = vrot.slane %v8135_v51, 5 }
 0x48a   : > { %v8153_v48 = vshll.u32 %v7975_v16, 16  ;;  %v16895_v61 = vrot.slane %v8159_v14, 5  ;;  %v8165_v38 = vrot.slane %v8163_v6, 4  ;;  %v8174_v57 = vshrl.u32 %v7978_v7, 16 }
 0x48b   : > { %12955 = vmatmul.mubr.msk.bf16.gmra.mrb[0].mxu1 %vm6641_vm9, %v13868_v63  ;;  %v8139_v63 = vshrl.u32 %v16548_v8, 16  ;;  %v8108_v8 = vor.u32 %v8107_v15, %v8104_v49  ;;  %v8090_v23 = vsel %vm14127_vm13, %v8085_v22, %v16858_v43  ;;  %v8177_v20 = vshll.u32 %v7978_v7, 16 }
 0x48c   : > { %12958 = vmatprep.mubr.msk.bf16.mxu1 %vm6641_vm9, %v13869_v45  ;;  %v8150_v45 = vshrl.u32 %v7975_v16, 16  ;;  %v8183_v44 = vshll.u32 %v16573_v26, 16  ;;  %v8187_v49 = vshrl.u32 %v16573_v26, 16  ;;  %v8100_v15 = vsel %vm14127_vm13, %v8095_v52, %v8099_v35 }
 0x48d   : > { %v8141_v36 = vrot.slane %v8139_v63, 4  ;;  %v8109_v28 = vrot.slane %v8108_v8, 4  ;;  %v8198_v39 = vshrl.u32 %v7981_v9, 16  ;;  %v8201_v33 = vshll.u32 %v7981_v9, 16 }
 0x48e   : > { %v8119_v51 = vrot.slane %v8118_v59, 4  ;;  %v8132_v63 = vor.u32 %v8131_v41, %v8128_v40  ;;  %v8145_v17 = vshll.u32 %v16552_v11, 16  ;;  %v8152_v16 = vrot.slane %v8150_v45, 4  ;;  %v13872_v11 = vld [vmem:[#allocation3 + $0xa8] sm:$0xff]  }
 0x48f   : > { %v8142_v43 = vor.u32 %v8141_v36, %v16893_v12  ;;  %v8155_v14 = vrot.slane %v8153_v48, 5  ;;  %v8166_v6 = vor.u32 %v8165_v38, %v16895_v61  ;;  %v8176_v22 = vrot.slane %v8174_v57, 4  ;;  %v7984_v48 = vld [vmem:[#allocation3 + $0x78] sm:$0xf] }
 0x490   : > { %v8179_v26 = vrot.slane %v8177_v20, 5  ;;  %v16909_v7 = vrot.slane %v8183_v44, 5  ;;  %v8207_v35 = vshll.u32 %v16598_v60, 16  ;;  %v8123_v52 = vrot.slane %v8121_v46, 5  ;;  %v13873_v46 = vld [vmem:[#allocation3 + $0xb4] sm:$0xff]  }
 0x491   : > { %v8200_v8 = vrot.slane %v8198_v39, 4  ;;  %v8203_v9 = vrot.slane %v8201_v33, 5  ;;  %v8211_v40 = vshrl.u32 %v16598_v60, 16  ;;  %v16915_v59 = vcombine.low %v8090_v23, %v8100_v15 }
 0x492   : > { %v8114_v36 = vsel %vm14127_vm13, %v8109_v28, %v16878_v47  ;;  %v8133_v45 = vrot.slane %v8132_v63, 4  ;;  %v8124_v57 = vsel %vm14127_vm13, %v8119_v51, %v8123_v52  ;;  %v8143_v60 = vrot.slane %v8142_v43, 4 }
 0x493   : > { %12959 = vmatmul.mubr.msk.bf16.gmra.mrb[4].mxu1 %vm6641_vm9, %v13870_v32  ;;  %v8189_v32 = vrot.slane %v8187_v49, 4  ;;  %v8147_v20 = vrot.slane %v8145_v17, 5  ;;  %v8156_v44 = vor.u32 %v8155_v14, %v8152_v16  ;;  %v8167_v23 = vrot.slane %v8166_v6, 4 }
 0x494   : > { %12962 = vmatprep.mubr.msk.bf16.mxu1 %vm6641_vm9, %v13871_v53  ;;  %v8169_v53 = vshll.u32 %v16571_v24, 16  ;;  %v8180_v15 = vor.u32 %v8179_v26, %v8176_v22  ;;  %v16929_v28 = vrot.slane %v8207_v35, 5  ;;  %v8204_v39 = vor.u32 %v8203_v9, %v8200_v8  ;;  %v7987_v35 = vld [vmem:[#allocation3 + $0x84] sm:$0xf] }
 0x495   : > { %v8190_v47 = vor.u32 %v8189_v32, %v16909_v7  ;;  %v8213_v33 = vrot.slane %v8211_v40, 4  ;;  %v8222_v51 = vshrl.u32 %v7984_v48, 16  ;;  %v8225_v63 = vshll.u32 %v7984_v48, 16 }
 0x496   : > { %v16934_v17 = vcombine.low %v8114_v36, %v8124_v57  ;;  %v8138_v16 = vsel %vm14127_vm13, %v8133_v45, %v16893_v12  ;;  %v8171_v43 = vrot.slane %v8169_v53, 5  ;;  %v8193_v14 = vshll.u32 %v16585_v0, 16  ;;  %v16958_v45 = vld [vmem:[#allocation3 + $0x34] sm:$0xf] }
 0x497   : > { %v8148_v6 = vsel %vm14127_vm13, %v8143_v60, %v8147_v20  ;;  %v8157_v22 = vrot.slane %v8156_v44, 4  ;;  %v8231_v26 = vshll.u32 %v16611_v5, 16  ;;  %v8235_v32 = vshrl.u32 %v16611_v5, 16  ;;  %v13874_v5 = vld [vmem:[#allocation3 + $0xc0] sm:$0xff]   ;;  %v16965_v60 = vld [vmem:[#allocation3 + $0x38] sm:$0x1] }
 0x498   : > { %v8172_v52 = vsel %vm14127_vm13, %v8167_v23, %v8171_v43  ;;  %v16946_v8 = vrot.slane %v8180_v15, 4  ;;  %v16948_v9 = vrot.slane %v8190_v47, 4  ;;  %v8217_v12 = vshll.u32 %v16609_v21, 16  ;;  %18152 = vst [vmem:[#allocation51_spill] sm:$0xff] %v16965_v60  ;;  %v10236_v15 = vld [vmem:[#allocation3 + $0x30] sm:$0xe] }
 0x499   : > { %v16913_v41 = vpop.f32.mrb[44].mxu0  ;;  %v16951_v40 = vrot.slane %v8204_v39, 4  ;;  %v8214_v0 = vor.u32 %v8213_v33, %v16929_v28  ;;  %v16956_v36 = vrot.slane %v8225_v63, 5  ;;  %v16960_v53 = vcombine.low %v8138_v16, %v8148_v6  ;;  %v16987_v33 = vld [vmem:[#allocation3 + $0x40] sm:$0xf] }
 0x49a   : > { %18148 = vst [vmem:[#allocation47_spill] sm:$0xff] %v16913_v41  ;;  %v16921_v38 = vpop.f32.mrb[45].mxu0  ;;  %v16962_v48 = vrot.slane %v8193_v14, 5  ;;  %v8246_v57 = vshrl.u32 %v7987_v35, 16  ;;  %v8162_v21 = vsel %vm14127_vm13, %v8157_v22, %v16895_v61  ;;  %v16970_v20 = vrot.slane %v8231_v26, 5  ;;  %18153 = vst [vmem:[#allocation52_spill] sm:$0xff] %v16987_v33 }
 0x49b   : > { %18149 = vst [vmem:[#allocation48_spill] sm:$0xff] %v16921_v38  ;;  %v16925_v49 = vpop.f32.mrb[46].mxu0  ;;  %12963 = vmatmul.mubr.msk.bf16.gmra.mrb[8].mxu1 %vm6641_vm9, %v13872_v11  ;;  %v16954_v11 = vrot.slane %v8222_v51, 4  ;;  %v16972_v44 = vrot.slane %v8235_v32, 4  ;;  %v8249_v23 = vshll.u32 %v7987_v35, 16  ;;  %v16975_v47 = vcombine.low %v8162_v21, %v8172_v52 }
 0x49c   : > { %18150 = vst [vmem:[#allocation49_spill] sm:$0xff] %v16925_v49  ;;  %v16931_v24 = vpop.f32.mrb[47].mxu0  ;;  %12966 = vmatprep.mubr.msk.bf16.mxu1 %vm6641_vm9, %v13873_v46  ;;  %v8241_v46 = vshll.u32 %v16624_v58, 16  ;;  %v16985_v39 = vrot.slane %v8217_v12, 5  ;;  %v16989_v51 = vld [vmem:[#allocation3 + $0x44] sm:$0x1] }
 0x49d   : > { %18151 = vst [vmem:[#allocation50_spill] sm:$0xff] %v16931_v24  ;;  %18154 = vst [vmem:[#allocation53_spill] sm:$0xff] %v16989_v51  ;;  %v16991_v63 = vld [vmem:[#allocation3 + $0x4c] sm:$0xf]  ;;  %v16999_v43 = vrot.slane %v8214_v0, 4  ;;  %v10314_v26 = vrot.slane %v16958_v45, 5 }
 0x49e   : > { %v17003_v6 = vld [vmem:[#allocation3 + $0x50] sm:$0x1]  ;;  %v17005_v22 = vld [vmem:[#allocation3 + $0x58] sm:$0xf]  ;;  %v10237_v32 = vld [vmem:[#allocation3 + $0x3c] sm:$0xe] }
 0x49f   : > { %18155 = vst [vmem:[#allocation54_spill] sm:$0xff] %v17003_v6  ;;  %18156 = vst [vmem:[#allocation55_spill] sm:$0xff] %v17005_v22  ;;  %v17008_v35 = vrot.slane %v8241_v46, 5  ;;  %v12025_v12 = vrot.slane %v10236_v15, 9  ;;  %v17015_v21 = vrot.slane %v8249_v23, 5  ;;  %v10316_v16 = vrot.slane %v10314_v26, 4 }
 0x4a0   : > { %v17017_v14 = vld [vmem:[#allocation3 + $0x5c] sm:$0x1]  ;;  %v10317_v58 = vrot.slane %v16965_v60, 5  ;;  %v8956_v46 = vsel %vm6690_vm7, %v16800_v54, 0  ;;  %v17022_v61 = vld [vmem:[#allocation3 + $0x64] sm:$0xf] }
 0x4a1   : > { %18157 = vst [vmem:[#allocation56_spill] sm:$0xff] %v17017_v14  ;;  %18158 = vst [vmem:[#allocation57_spill] sm:$0xff] %v17022_v61  ;;  %v12026_v15 = vrot.slane %v10237_v32, 9  ;;  %v10321_v52 = vrot.slane %v16987_v33, 5  ;;  %v10239_v0 = vld [vmem:[#allocation3 + $0x54] sm:$0xe] }
 0x4a2   : > { %v17031_v23 = vsel %vm14488_vm8, %v10316_v16, %v10317_v58  ;;  %v10324_v24 = vrot.slane %v16989_v51, 5  ;;  %v10328_v38 = vrot.slane %v16991_v63, 5  ;;  %v10240_v54 = vld [vmem:[#allocation3 + $0x60] sm:$0xe]  ;;  %v17035_v41 = vld [vmem:[#allocation3 + $0x68] sm:$0x1] }
 0x4a3   : > { %12967 = vmatmul.mubr.msk.bf16.gmra.mrb[12].mxu1 %vm6641_vm9, %v13874_v5  ;;  %v10238_v5 = vld [vmem:[#allocation3 + $0x48] sm:$0xe]  ;;  %18160 = vst [vmem:[#allocation59_spill] sm:$0xff] %v17031_v23  ;;  %18161 = vst [vmem:[#allocation60_spill] sm:$0xff] %v17035_v41  ;;  %v17037_v60 = vld [vmem:[#allocation3 + $0x70] sm:$0xf]  ;;  %v17050_v16 = vsel %vm14488_vm8, %v12026_v15, %v10321_v52 }
 0x4a4   : > { %12972 = vmatprep.mubr.msk.bf16.mxu1 %vm6641_vm9, %v16865_v30  ;;  %v17010_v30 = vrot.slane %v8246_v57, 4  ;;  %v17026_v57 = vsel %vm14488_vm8, %v12025_v12, %v10314_v26  ;;  %v12027_v49 = vrot.slane %v10238_v5, 9  ;;  %18162 = vst [vmem:[#allocation61_spill] sm:$0xff] %v17037_v60  ;;  %v10323_v32 = vrot.slane %v10321_v52, 4  ;;  %v17046_v58 = vld [vmem:[%s17885_s2 + $0x18] sm:$0xf] }
 0x4a5   : > { %18159 = vst [vmem:[#allocation58_spill] sm:$0xff] %v17026_v57  ;;  %v10331_v12 = vrot.slane %v17003_v6, 5  ;;  %v10335_v33 = vrot.slane %v17005_v22, 5  ;;  %18163 = vst [vmem:[#allocation62_spill] sm:$0xff] %v17050_v16  ;;  %v10330_v51 = vrot.slane %v10328_v38, 4  ;;  %v12028_v26 = vrot.slane %v10239_v0, 9 }
 0x4a6   : > { %v17054_v5 = vsel %vm14488_vm8, %v12027_v49, %v10328_v38  ;;  %v10241_v23 = vld [vmem:[#allocation3 + $0x6c] sm:$0xe]  ;;  %v17058_v57 = vld [vmem:[#allocation3 + $0x7c] sm:$0xf]  ;;  %v17062_v6 = vsel %vm14488_vm8, %v10323_v32, %v10324_v24  ;;  %v10338_v52 = vrot.slane %v17017_v14, 5  ;;  %v12029_v15 = vrot.slane %v10240_v54, 9 }
 0x4a7   : > { %18164 = vst [vmem:[#allocation63_spill] sm:$0xff] %v17054_v5  ;;  %18165 = vst [vmem:[#allocation64_spill] sm:$0xff] %v17058_v57  ;;  %v10337_v22 = vrot.slane %v10335_v33, 4  ;;  %v17067_v38 = vld [vmem:[#allocation3 + $0x74] sm:$0x1]  ;;  %v17075_v0 = vsel %vm14488_vm8, %v10330_v51, %v10331_v12  ;;  %v17079_v24 = vsel %vm14488_vm8, %v12028_v26, %v10335_v33  ;;  %v12030_v51 = vrot.slane %v10241_v23, 9 }
 0x4a8   : > { %18166 = vst [vmem:[#allocation65_spill] sm:$0xff] %v17062_v6  ;;  %18167 = vst [vmem:[#allocation66_spill] sm:$0xff] %v17067_v38  ;;  %v17069_v49 = vld [vmem:[#allocation3 + $0x80] sm:$0x1]  ;;  %v10349_v12 = vrot.slane %v17037_v60, 5  ;;  %v10345_v54 = vrot.slane %v17035_v41, 5 }
 0x4a9   : > { %18168 = vst [vmem:[#allocation67_spill] sm:$0xff] %v17069_v49  ;;  %18169 = vst [vmem:[#allocation68_spill] sm:$0xff] %v17075_v0  ;;  %v17090_v32 = vsel %vm14488_vm8, %v10337_v22, %v10338_v52  ;;  %v17093_v33 = vld [vmem:[#allocation3 + $0x94] sm:$0xf]  ;;  %v10243_v0 = vld [vmem:[#allocation3 + $0x84] sm:$0xe] }
 0x4aa   : > { %18170 = vst [vmem:[#allocation69_spill] sm:$0xff] %v17079_v24  ;;  %18172 = vst [vmem:[#allocation71_spill] sm:$0xff] %v17090_v32  ;;  %v17102_v5 = vld [vmem:[#allocation3 + $0x8c] sm:$0x1]  ;;  %v17106_v22 = vsel %vm14488_vm8, %v12030_v51, %v10349_v12  ;;  %v10351_v23 = vrot.slane %v10349_v12, 4  ;;  %v10352_v52 = vrot.slane %v17067_v38, 5 }
 0x4ab   : > { %12973 = vmatmul.mubr.msk.bf16.vlgmr.msra.gmra.mrb[16].mxu1 %vm6641_vm9, %v16882_v2  ;;  %v10242_v2 = vld [vmem:[#allocation3 + $0x78] sm:$0xe]  ;;  %18174 = vst [vmem:[#allocation73_spill] sm:$0xff] %v17102_v5  ;;  %18175 = vst [vmem:[#allocation74_spill] sm:$0xff] %v17106_v22  ;;  %v10356_v60 = vrot.slane %v17058_v57, 5  ;;  %v10359_v32 = vrot.slane %v17069_v49, 5 }
 0x4ac   : > { %13005 = vmatpush3.bf16.msra.mxu1 %v8956_v46  ;;  %12976 = vmatprep.mubr.msk.bf16.mxu1 %vm6641_vm9, %v16889_v31  ;;  %v10342_v46 = vrot.slane %v17022_v61, 5  ;;  %v17084_v31 = vld [vmem:[#allocation3 + $0x88] sm:$0xf]  ;;  %v17110_v26 = vld [vmem:[#allocation3 + $0x98] sm:$0x1]  ;;  %v17126_v38 = vsel %vm14488_vm8, %v10351_v23, %v10352_v52  ;;  %v12032_v14 = vrot.slane %v10243_v0, 9 }
 0x4ad   : > { %13800 = vmatprep.subr.msk.bf16.mxu1 %vm6690_vm7, %v17046_v58  ;;  %18171 = vst [vmem:[#allocation70_spill] sm:$0xff] %v17084_v31  ;;  %18176 = vst [vmem:[#allocation75_spill] sm:$0xff] %v17110_v26  ;;  %v10363_v24 = vrot.slane %v17084_v31, 5  ;;  %v17118_v41 = vld [vmem:[#allocation3 + $0xa0] sm:$0xf]  ;;  %v10358_v57 = vrot.slane %v10356_v60, 4 }
 0x4ae   : > { %v17099_v6 = vsel %vm14488_vm8, %v12029_v15, %v10342_v46  ;;  %v10344_v16 = vrot.slane %v10342_v46, 4  ;;  %v12031_v46 = vrot.slane %v10242_v2, 9  ;;  %18178 = vst [vmem:[#allocation77_spill] sm:$0xff] %v17118_v41  ;;  %v17120_v51 = vld [vmem:[#allocation3 + $0xac] sm:$0xf]  ;;  %18180 = vst [vmem:[#allocation79_spill] sm:$0xff] %v17126_v38 }
 0x4af   : > { %18173 = vst [vmem:[#allocation72_spill] sm:$0xff] %v17099_v6  ;;  %18179 = vst [vmem:[#allocation78_spill] sm:$0xff] %v17120_v51  ;;  %v8259_v2 = vshrl.u32 %v16631_v3, 16  ;;  %v10365_v49 = vrot.slane %v10363_v24, 4  ;;  %v10366_v31 = vrot.slane %v17102_v5, 5  ;;  %v17144_v23 = vsel %vm14488_vm8, %v10358_v57, %v10359_v32  ;;  %v18263_v25 = vld [vmem:[#allocation63_spill] sm:$0xff] }
 0x4b0   : > { %v17114_v15 = vsel %vm14488_vm8, %v10344_v16, %v10345_v54  ;;  %v10244_v16 = vld [vmem:[#allocation3 + $0x90] sm:$0xe]  ;;  %v10245_v61 = vld [vmem:[#allocation3 + $0x9c] sm:$0xe]  ;;  %v17134_v12 = vld [vmem:[#allocation3 + $0xa4] sm:$0x1]  ;;  %v17140_v0 = vsel %vm14488_vm8, %v12031_v46, %v10356_v60  ;;  %v17148_v52 = vsel %vm14488_vm8, %v12032_v14, %v10363_v24 }
 0x4b1   : > { %18177 = vst [vmem:[#allocation76_spill] sm:$0xff] %v17114_v15  ;;  %18181 = vst [vmem:[#allocation80_spill] sm:$0xff] %v17134_v12  ;;  %v17136_v15 = vld [vmem:[#allocation3 + $0xb0] sm:$0x1]  ;;  %v10370_v54 = vrot.slane %v17093_v33, 5  ;;  %v17159_v60 = vsel %vm14488_vm8, %v10365_v49, %v10366_v31  ;;  %v12033_v57 = vrot.slane %v10244_v16, 9 }
 0x4b2   : > { %18182 = vst [vmem:[#allocation81_spill] sm:$0xff] %v17140_v0  ;;  %18183 = vst [vmem:[#allocation82_spill] sm:$0xff] %v17144_v23  ;;  %v10377_v32 = vrot.slane %v17118_v41, 5  ;;  %v10246_v46 = vld [vmem:[#allocation3 + $0xa8] sm:$0xe]  ;;  %v12034_v6 = vrot.slane %v10245_v61, 9 }
 0x4b3   : > { %12977 = vmatmul.mubr.msk.bf16.gmra.mrb[20].mxu1 %vm6641_vm9, %v16915_v59  ;;  %18184 = vst [vmem:[#allocation83_spill] sm:$0xff] %v17148_v52  ;;  %v17153_v59 = vld [vmem:[#allocation3 + $0xb8] sm:$0xf]  ;;  %18186 = vst [vmem:[#allocation85_spill] sm:$0xff] %v17159_v60  ;;  %v9550_v14 = vld [vmem:[#allocation3 + $0xbc] sm:$0x1]  ;;  %v17167_v5 = vsel %vm14488_vm8, %v12033_v57, %v10370_v54 }
 0x4b4   : > { %12980 = vmatprep.mubr.msk.bf16.mxu1 %vm6641_vm9, %v16934_v17  ;;  %18185 = vst [vmem:[#allocation84_spill] sm:$0xff] %v17153_v59  ;;  %v10372_v22 = vrot.slane %v10370_v54, 4  ;;  %v10373_v17 = vrot.slane %v17110_v26, 5  ;;  %v10379_v38 = vrot.slane %v10377_v32, 4  ;;  %v10380_v49 = vrot.slane %v17134_v12, 5 }
 0x4b5   : > { %v10384_v31 = vrot.slane %v17120_v51, 5  ;;  %v10247_v16 = vld [vmem:[#allocation3 + $0xb4] sm:$0xe]  ;;  %v17171_v23 = vld [vmem:[#allocation3 + $0xc4] sm:$0xf]  ;;  %v17179_v24 = vsel %vm14488_vm8, %v12034_v6, %v10377_v32  ;;  %v12035_v61 = vrot.slane %v10246_v46, 9 }
 0x4b6   : > { %v17175_v0 = vsel %vm14488_vm8, %v10372_v22, %v10373_v17  ;;  %v10391_v54 = vrot.slane %v17153_v59, 5  ;;  %v9553_v57 = vld [vmem:[#allocation3 + $0xc8] sm:$0x1]  ;;  %v17186_v52 = vsel %vm14488_vm8, %v10379_v38, %v10380_v49  ;;  %v10387_v51 = vrot.slane %v17136_v15, 5  ;;  %v10248_v46 = vld [vmem:[#allocation3 + $0xc0] sm:$0xe] }
 0x4b7   : > { %v10386_v12 = vrot.slane %v10384_v31, 4  ;;  %v12050_v22 = vcombine.low %v17179_v24, %v17186_v52  ;;  %v12036_v17 = vrot.slane %v10247_v16, 9  ;;  %v10394_v32 = vrot.slane %v9550_v14, 5  ;;  %v7990_v41 = vld [vmem:[#allocation3 + $0x90] sm:$0xf]  ;;  %v13894_v24 = vld [vmem:[%s14067_s11 + $0x18] sm:$0xff]  }
 0x4b8   : > { %v10393_v6 = vrot.slane %v10391_v54, 4  ;;  %v18187_v59 = vshll.u32 %v16631_v3, 16  ;;  %v17197_v60 = vsel %vm14488_vm8, %v12035_v61, %v10384_v31  ;;  %v10398_v49 = vrot.slane %v17171_v23, 5  ;;  %v7993_v3 = vld [vmem:[#allocation3 + $0x9c] sm:$0xf]  ;;  %v13892_v52 = vld [vmem:[%s14067_s11 + $0x8] sm:$0xff]  }
 0x4b9   : > { %v17201_v38 = vsel %vm14488_vm8, %v10386_v12, %v10387_v51  ;;  %v8261_v14 = vrot.slane %v8259_v2, 4  ;;  %v12037_v12 = vrot.slane %v10248_v46, 9  ;;  %v10401_v2 = vrot.slane %v9553_v57, 5 }
 0x4ba   : > { %v17193_v26 = vrot.slane %v18187_v59, 5  ;;  %v17210_v59 = vsel %vm14488_vm8, %v12036_v17, %v10391_v54  ;;  %v17214_v31 = vsel %vm14488_vm8, %v10393_v6, %v10394_v32  ;;  %v8220_v16 = vsel %vm14127_vm13, %v16999_v43, %v16985_v39 }
 0x4bb   : > { %12981 = vmatmul.mubr.msk.bf16.gmra.mrb[24].mxu1 %vm6641_vm9, %v16960_v53  ;;  %v12052_v51 = vcombine.low %v17210_v59, %v17214_v31  ;;  %v10400_v53 = vrot.slane %v10398_v49, 4  ;;  %v18188_v61 = vor.u32 %v16972_v44, %v16970_v20  ;;  %v8270_v17 = vshrl.u32 %v7990_v41, 16  ;;  %v13897_v59 = vld [vmem:[%s14067_s11 + $0x30] sm:$0xff]   ;;  %v13898_v31 = vld [vmem:[%s14067_s11 + $0x38] sm:$0xff]  }
 0x4bc   : > { %12984 = vmatprep.mubr.msk.bf16.mxu1 %vm6641_vm9, %v16975_v47  ;;  %v8273_v6 = vshll.u32 %v7990_v41, 16  ;;  %v8279_v32 = vshll.u32 %v16645_v19, 16  ;;  %v8283_v47 = vshrl.u32 %v16645_v19, 16  ;;  %v17231_v46 = vsel %vm14488_vm8, %v12037_v12, %v10398_v49 }
 0x4bd   : > { %v8239_v54 = vrot.slane %v18188_v61, 4  ;;  %v17235_v57 = vsel %vm14488_vm8, %v10400_v53, %v10401_v2  ;;  %v8262_v39 = vor.u32 %v8261_v14, %v17193_v26  ;;  %v8303_v44 = vshll.u32 %v16662_v10, 16 }
 0x4be   : > { %v8307_v43 = vshrl.u32 %v16662_v10, 16  ;;  %v18189_v19 = vsel %vm14127_vm13, %v16948_v9, %v16962_v48  ;;  %v18190_v49 = vsel %vm14127_vm13, %v16946_v8, %v16909_v7  ;;  %v18191_v14 = vsel %vm14127_vm13, %v16951_v40, %v16929_v28 }
 0x4bf   : > { %v11886_v12 = vcombine.low %v18190_v49, %v18189_v19  ;;  %v11887_v10 = vcombine.low %v18191_v14, %v8220_v16  ;;  %v18192_v53 = vor.u32 %v16956_v36, %v16954_v11  ;;  %v8252_v61 = vor.u32 %v17015_v21, %v17010_v30 }
 0x4c0   : > { %v8244_v9 = vsel %vm14127_vm13, %v8239_v54, %v17008_v35  ;;  %v8265_v7 = vshll.u32 %v16633_v13, 16  ;;  %v8294_v8 = vshrl.u32 %v7993_v3, 16  ;;  %v8297_v48 = vshll.u32 %v7993_v3, 16  ;;  %v7996_v54 = vld [vmem:[#allocation3 + $0xa8] sm:$0xf] }
 0x4c1   : > { %v8229_v2 = vrot.slane %v18192_v53, 4  ;;  %v8272_v19 = vrot.slane %v8270_v17, 4  ;;  %v8275_v49 = vrot.slane %v8273_v6, 5  ;;  %v8281_v41 = vrot.slane %v8279_v32, 5 }
 0x4c2   : > { %v8285_v28 = vrot.slane %v8283_v47, 4  ;;  %v8263_v40 = vrot.slane %v8262_v39, 4  ;;  %v8305_v11 = vrot.slane %v8303_v44, 5  ;;  %v8309_v36 = vrot.slane %v8307_v43, 4  ;;  %v7999_v39 = vld [vmem:[#allocation3 + $0xb4] sm:$0xf] }
 0x4c3   : > { %12985 = vmatmul.mubr.msk.bf16.gmra.mrb[28].mxu1 %vm6641_vm9, %v11886_v12  ;;  %v8234_v30 = vsel %vm14127_vm13, %v8229_v2, %v16970_v20  ;;  %v8253_v35 = vrot.slane %v8252_v61, 4  ;;  %v8267_v13 = vrot.slane %v8265_v7, 5  ;;  %v8296_v16 = vrot.slane %v8294_v8, 4 }
 0x4c4   : > { %12988 = vmatprep.mubr.msk.bf16.mxu1 %vm6641_vm9, %v11887_v10  ;;  %v11888_v21 = vcombine.low %v8234_v30, %v8244_v9  ;;  %v8299_v3 = vrot.slane %v8297_v48, 5  ;;  %v8276_v17 = vor.u32 %v8275_v49, %v8272_v19  ;;  %v8286_v6 = vor.u32 %v8285_v28, %v8281_v41 }
 0x4c5   : > { %v8327_v32 = vshll.u32 %v16683_v37, 16  ;;  %v8331_v47 = vshrl.u32 %v16683_v37, 16  ;;  %v8268_v44 = vsel %vm14127_vm13, %v8263_v40, %v8267_v13  ;;  %v8310_v43 = vor.u32 %v8309_v36, %v8305_v11 }
 0x4c6   : > { %v8351_v12 = vshll.u32 %v16703_v55, 16  ;;  %v8355_v20 = vshrl.u32 %v16703_v55, 16  ;;  %v8258_v14 = vsel %vm14127_vm13, %v8253_v35, %v17193_v26  ;;  %v8289_v10 = vshll.u32 %v16653_v29, 16 }
 0x4c7   : > { %v8318_v53 = vshrl.u32 %v7996_v54, 16  ;;  %v8321_v2 = vshll.u32 %v7996_v54, 16  ;;  %v8300_v61 = vor.u32 %v8299_v3, %v8296_v16  ;;  %v8313_v37 = vshll.u32 %v16664_v18, 16  ;;  %v8002_v3 = vld [vmem:[#allocation3 + $0xc0] sm:$0xf] }
 0x4c8   : > { %v8342_v9 = vshrl.u32 %v7999_v39, 16  ;;  %v8345_v7 = vshll.u32 %v7999_v39, 16  ;;  %v11889_v8 = vcombine.low %v8258_v14, %v8268_v44  ;;  %v8287_v48 = vrot.slane %v8286_v6, 4 }
 0x4c9   : > { %v8329_v19 = vrot.slane %v8327_v32, 5  ;;  %v8333_v49 = vrot.slane %v8331_v47, 4  ;;  %v8277_v55 = vrot.slane %v8276_v17, 4  ;;  %v8311_v28 = vrot.slane %v8310_v43, 4 }
 0x4ca   : > { %v8353_v40 = vrot.slane %v8351_v12, 5  ;;  %v8357_v36 = vrot.slane %v8355_v20, 4  ;;  %v8291_v29 = vrot.slane %v8289_v10, 5  ;;  %v8320_v26 = vrot.slane %v8318_v53, 4 }
 0x4cb   : > { %12989 = vmatmul.mubr.msk.bf16.gmra.mrb[0].mxu1 %vm6641_vm9, %v11888_v21  ;;  %v8323_v30 = vrot.slane %v8321_v2, 5  ;;  %v8301_v35 = vrot.slane %v8300_v61, 4  ;;  %v8315_v13 = vrot.slane %v8313_v37, 5  ;;  %v8344_v18 = vrot.slane %v8342_v9, 4 }
 0x4cc   : > { %12992 = vmatprep.mubr.msk.bf16.mxu1 %vm6641_vm9, %v11889_v8  ;;  %v8347_v16 = vrot.slane %v8345_v7, 5  ;;  %v8292_v54 = vsel %vm14127_vm13, %v8287_v48, %v8291_v29  ;;  %v8334_v6 = vor.u32 %v8333_v49, %v8329_v19  ;;  %v8375_v21 = vshll.u32 %v16716_v1, 16 }
 0x4cd   : > { %v8379_v17 = vshrl.u32 %v16716_v1, 16  ;;  %v8282_v32 = vsel %vm14127_vm13, %v8277_v55, %v8281_v41  ;;  %v8316_v47 = vsel %vm14127_vm13, %v8311_v28, %v8315_v13  ;;  %v8358_v39 = vor.u32 %v8357_v36, %v8353_v40 }
 0x4ce   : > { %v8324_v44 = vor.u32 %v8323_v30, %v8320_v26  ;;  %v8337_v43 = vshll.u32 %v16692_v62, 16  ;;  %v8366_v12 = vshrl.u32 %v8002_v3, 16  ;;  %v8369_v20 = vshll.u32 %v8002_v3, 16 }
 0x4cf   : > { %v11890_v14 = vcombine.low %v8282_v32, %v8292_v54  ;;  %v8306_v10 = vsel %vm14127_vm13, %v8301_v35, %v8305_v11  ;;  %v8348_v53 = vor.u32 %v8347_v16, %v8344_v18  ;;  %v8361_v2 = vshll.u32 %v16714_v4, 16 }
 0x4d0   : > { %v11891_v1 = vcombine.low %v8306_v10, %v8316_v47  ;;  %v8335_v61 = vrot.slane %v8334_v6, 4  ;;  %v8377_v37 = vrot.slane %v8375_v21, 5  ;;  %v8381_v41 = vrot.slane %v8379_v17, 4  ;;  %v464_v21 = vld [vmem:[#allocation3 + $0xcc] sm:$0x1]  ;;  %v18220_v17 = vld [vmem:[#allocation23_spill] sm:$0xff] }
 0x4d1   : > { %v8359_v9 = vrot.slane %v8358_v39, 4  ;;  %v8325_v7 = vrot.slane %v8324_v44, 4  ;;  %v8339_v62 = vrot.slane %v8337_v43, 5  ;;  %v8368_v8 = vrot.slane %v8366_v12, 4 }
 0x4d2   : > { %v8371_v48 = vrot.slane %v8369_v20, 5  ;;  %v8349_v49 = vrot.slane %v8348_v53, 4  ;;  %v8363_v55 = vrot.slane %v8361_v2, 5  ;;  %v8382_v28 = vor.u32 %v8381_v41, %v8377_v37  ;;  %v9941_v41 = vld [vmem:[%s17885_s2 + $0x1c] sm:$0xf] }
 0x4d3   : > { %12993 = vmatmul.mubr.msk.bf16.gmra.mrb[4].mxu1 %vm6641_vm9, %v11890_v14  ;;  %v8340_v11 = vsel %vm14127_vm13, %v8335_v61, %v8339_v62  ;;  %v8748_v36 = vrot.slane %v16814_v56, 5  ;;  %v8330_v29 = vsel %vm14127_vm13, %v8325_v7, %v8329_v19  ;;  %v8385_v30 = vshll.u32 %v16728_v34, 16  ;;  %v8682_v56 = vld [vmem:[#allocation3 + $0xc] sm:$0xe]  ;;  %v8683_v14 = vld [vmem:[#allocation3 + $0x18] sm:$0xe] }
 0x4d4   : > { %12996 = vmatprep.mubr.msk.bf16.mxu1 %vm6641_vm9, %v11891_v1  ;;  %v8364_v4 = vsel %vm14127_vm13, %v8359_v9, %v8363_v55  ;;  %v8372_v26 = vor.u32 %v8371_v48, %v8368_v8  ;;  %v11892_v35 = vcombine.low %v8330_v29, %v8340_v11  ;;  %v8354_v13 = vsel %vm14127_vm13, %v8349_v49, %v8353_v40  ;;  %v18195_v9 = vld [vmem:[#allocation16_spill] sm:$0xff]  ;;  %v18196_v7 = vld [vmem:[#allocation17_spill] sm:$0xff]  ;;  %v18198_v8 = vld [vmem:[#allocation19_spill] sm:$0xff] }
 0x4d5   : > { %v11893_v18 = vcombine.low %v8354_v13, %v8364_v4  ;;  %v8383_v16 = vrot.slane %v8382_v28, 4  ;;  %v8750_v3 = vrot.slane %v8748_v36, 4  ;;  %v8387_v6 = vrot.slane %v8385_v30, 5  ;;  %v18199_v48 = vld [vmem:[#allocation20_spill] sm:$0xff]  ;;  %v18202_v55 = vld [vmem:[#allocation21_spill] sm:$0xff]  ;;  %v18204_v28 = vld [vmem:[#allocation18_spill] sm:$0xff] }
 0x4d6   : > { %v8373_v54 = vrot.slane %v8372_v26, 4  ;;  %v8751_v19 = vrot.slane %v16822_v42, 5  ;;  %v465_v34 = vsel %vm15530_vm4, 0, %v464_v21  ;;  %v8755_v40 = vrot.slane %v16820_v50, 5  ;;  %v18194_v50 = vld [vmem:[#allocation42_spill] sm:$0xff]  ;;  %v18207_v29 = vld [vmem:[#allocation7_spill] sm:$0xff] }
 0x4d7   : > { %v8388_v32 = vsel %vm14127_vm13, %v8383_v16, %v8387_v6  ;;  %466 = vst [vmem:[#allocation3 + $0xcc] sm:$0x1] %v465_v34  ;;  %v11911_v47 = vrot.slane %v8682_v56, 9  ;;  %v8758_v10 = vrot.slane %v18194_v50, 5  ;;  %v11912_v53 = vrot.slane %v8683_v14, 9  ;;  %v18205_v4 = vld [vmem:[#allocation6_spill] sm:$0xff] }
 0x4d8   : > { %v8752_v39 = vsel %vm14488_vm8, %v8750_v3, %v8751_v19  ;;  %v8378_v44 = vsel %vm14127_vm13, %v8373_v54, %v8377_v37  ;;  %v8757_v20 = vrot.slane %v8755_v40, 4  ;;  %v9314_v37 = vsel %vm6690_vm7, %v17046_v58, 0  ;;  %v18201_v58 = vld [vmem:[#allocation4_spill] sm:$0xff]  ;;  %v18211_v13 = vld [vmem:[#allocation10_spill] sm:$0xff]  ;;  %v18213_v16 = vld [vmem:[#allocation11_spill] sm:$0xff] }
 0x4d9   : > { %v11894_v43 = vcombine.low %v8378_v44, %v8388_v32  ;;  %v8749_v42 = vsel %vm14488_vm8, %v11911_v47, %v8748_v36  ;;  %v8756_v1 = vsel %vm14488_vm8, %v11912_v53, %v8755_v40  ;;  %v18197_v62 = vcombine.low %v18195_v9, %v18196_v7  ;;  %v18208_v26 = vld [vmem:[#allocation8_spill] sm:$0xff]  ;;  %v18216_v6 = vld [vmem:[#allocation13_spill] sm:$0xff]  ;;  %v18219_v19 = vld [vmem:[#allocation22_spill] sm:$0xff] }
 0x4da   : > { %v11927_v12 = vcombine.low %v8749_v42, %v8752_v39  ;;  %v8759_v2 = vsel %vm14488_vm8, %v8757_v20, %v8758_v10  ;;  %v18200_v49 = vcombine.low %v18198_v8, %v18199_v48  ;;  %v18203_v11 = vcombine.low %v18201_v58, %v18202_v55  ;;  %v18214_v3 = vld [vmem:[#allocation12_spill] sm:$0xff]  ;;  %v18217_v56 = vld [vmem:[#allocation5_spill] sm:$0xff]  ;;  %v18225_v39 = vld [vmem:[#allocation26_spill] sm:$0xff] }
 0x4db   : > { %12997 = vmatmul.mubr.msk.bf16.gmra.mrb[8].mxu1 %vm6641_vm9, %v11892_v35  ;;  %v11928_v61 = vcombine.low %v8756_v1, %v8759_v2  ;;  %v18206_v36 = vcombine.low %v18204_v28, %v18205_v4  ;;  %v18209_v30 = vcombine.low %v18207_v29, %v18208_v26  ;;  %v18210_v35 = vld [vmem:[#allocation9_spill] sm:$0xff]  ;;  %v18215_v54 = vcombine.low %v18213_v16, %v18214_v3  ;;  %v18222_v32 = vld [vmem:[#allocation24_spill] sm:$0xff]  ;;  %v18226_v44 = vld [vmem:[#allocation27_spill] sm:$0xff] }
 0x4dc   : > { %13000 = vmatprep.mubr.msk.bf16.mxu1 %vm6641_vm9, %v11893_v18  ;;  %v18212_v18 = vcombine.low %v18210_v35, %v18211_v13  ;;  %v18218_v21 = vcombine.low %v18216_v6, %v18217_v56  ;;  %v18221_v34 = vcombine.low %v18219_v19, %v18220_v17  ;;  %v18223_v40 = vld [vmem:[#allocation25_spill] sm:$0xff]  ;;  %v18228_v42 = vld [vmem:[#allocation28_spill] sm:$0xff]  ;;  %v18232_v50 = vld [vmem:[#allocation34_spill] sm:$0xff]  ;;  %v10039_v8 = vsel %vm6690_vm7, %v9941_v41, 0 }
 0x4dd   : > { %v18224_v47 = vcombine.low %v18222_v32, %v18223_v40  ;;  %v18231_v14 = vld [vmem:[#allocation33_spill] sm:$0xff]  ;;  %v519_v53 = vld [vmem:[#allocation3 + $0xd4] sm:$0x1]  ;;  %v13879_v55 = vld [vmem:[#allocation3 + $0x48] sm:$0xff]  }
 0x4de   : > { %v18233_v10 = vcombine.low %v18231_v14, %v18232_v50  ;;  %v520_v1 = vsel %vm15772_vm3, 0, %v519_v53  ;;  %v18236_v9 = vld [vmem:[#allocation37_spill] sm:$0xff]  ;;  %v13877_v48 = vld [vmem:[#allocation3 + $0x30] sm:$0xff]   ;;  %v13883_v4 = vld [vmem:[#allocation3 + $0x78] sm:$0xff]  }
 0x4df   : > { %521 = vst [vmem:[#allocation3 + $0xd4] sm:$0x1] %v520_v1  ;;  %v13878_v58 = vld [vmem:[#allocation3 + $0x3c] sm:$0xff]   ;;  %v13882_v28 = vld [vmem:[#allocation3 + $0x6c] sm:$0xff]   ;;  %v9509_v29 = vld [vmem:[#allocation3 + $0x18] sm:$0xf] }
 0x4e0   : > { %v13884_v35 = vld [vmem:[#allocation3 + $0x84] sm:$0xff]   ;;  %v9558_v13 = vshrl.u32 %v9509_v29, 16  ;;  %v13885_v16 = vld [vmem:[#allocation3 + $0x90] sm:$0xff]   ;;  %v17426_v2 = vld [vmem:[#allocation3 + $0x2c] sm:$0x1] }
 0x4e1   : > { %v9512_v3 = vld [vmem:[#allocation3 + $0x24] sm:$0xf]  ;;  %v10310_v27 = vrot.slane %v17426_v2, 5 }
 0x4e2   : > { %v9582_v17 = vshrl.u32 %v9512_v3, 16 }
 0x4e3   : > { %13001 = vmatmul.mubr.msk.bf16.gmra.mrb[12].mxu1 %vm6641_vm9, %v11894_v43  ;;  %v18227_v43 = vcombine.low %v18225_v39, %v18226_v44  ;;  %v9515_v44 = vld [vmem:[#allocation3 + $0x30] sm:$0xf] }
 0x4e4   : > { %13006 = vmatprep.mubr.msk.bf16.mxu1 %vm6641_vm9, %v11927_v12  ;;  %v18229_v12 = vld [vmem:[#allocation29_spill] sm:$0xff]  ;;  %v9584_v14 = vrot.slane %v9582_v17, 4  ;;  %v18238_v17 = vld [vmem:[#allocation51_spill] sm:$0xff] }
 0x4e5   : > { %v18230_v20 = vcombine.low %v18228_v42, %v18229_v12  ;;  %v9619_v42 = vshrl.u32 %v16958_v45, 16  ;;  %v13886_v12 = vld [vmem:[#allocation3 + $0x9c] sm:$0xff]  }
 0x4eb   : > { %13007 = vmatmul.mubr.msk.bf16.vlgmr.msra.gmra.mrb[16].mxu1 %vm6641_vm9, %v11928_v61  ;;  %v13875_v61 = vld [vmem:[#allocation3 + $0x18] sm:$0xff]  }
 0x4ec   : > { %13039 = vmatpush3.bf16.msra.mxu1 %v9314_v37  ;;  %13010 = vmatprep.mubr.msk.bf16.mxu1 %vm6641_vm9, %v18197_v62  ;;  %v18235_v37 = vld [vmem:[#allocation36_spill] sm:$0xff]  ;;  %v13876_v62 = vld [vmem:[#allocation3 + $0x24] sm:$0xff]  }
 0x4ed   : > { %13801 = vmatprep.subr.msk.bf16.mxu1 %vm6690_vm7, %v9941_v41  ;;  %v18237_v7 = vcombine.low %v18235_v37, %v18236_v9  ;;  %v13880_v41 = vld [vmem:[#allocation3 + $0x54] sm:$0xff]   ;;  %v9606_v37 = vshrl.u32 %v9515_v44, 16  ;;  %v9609_v9 = vshll.u32 %v9515_v44, 16 }
 0x4f3   : > { %13011 = vmatmul.mubr.msk.bf16.gmra.mrb[20].mxu1 %vm6641_vm9, %v18200_v49  ;;  %v17399_v49 = vld [vmem:[%s17885_s2 + $0x20] sm:$0xf] }
 0x4f4   : > { %13014 = vmatprep.mubr.msk.bf16.mxu1 %vm6641_vm9, %v18203_v11  ;;  %v13881_v11 = vld [vmem:[#allocation3 + $0x60] sm:$0xff]  }
 0x4fb   : > { %13015 = vmatmul.mubr.msk.bf16.gmra.mrb[24].mxu1 %vm6641_vm9, %v18206_v36  ;;  %v17411_v36 = vld [vmem:[#allocation3 + $0x1c] sm:$0xf] }
 0x4fc   : > { %13018 = vmatprep.mubr.msk.bf16.mxu1 %vm6641_vm9, %v18209_v30  ;;  %v9567_v26 = vshll.u32 %v17411_v36, 16  ;;  %v9571_v30 = vshrl.u32 %v17411_v36, 16 }
 0x4fe   : > { %v9569_v6 = vrot.slane %v9567_v26, 5  ;;  %v9573_v56 = vrot.slane %v9571_v30, 4 }
 0x500   : > { %v9574_v39 = vor.u32 %v9573_v56, %v9569_v6  ;;  %v9521_v56 = vld [vmem:[#allocation3 + $0x48] sm:$0xf] }
 0x503   : > { %13019 = vmatmul.mubr.msk.bf16.gmra.mrb[28].mxu1 %vm6641_vm9, %v18212_v18  ;;  %v9561_v18 = vshll.u32 %v9509_v29, 16 }
 0x504   : > { %13022 = vmatprep.mubr.msk.bf16.mxu1 %vm6641_vm9, %v18215_v54  ;;  %v17416_v54 = vld [vmem:[#allocation3 + $0x28] sm:$0xf] }
 0x505   : > { %v9563_v19 = vrot.slane %v9561_v18, 5  ;;  %v9591_v32 = vshll.u32 %v17416_v54, 16  ;;  %v9595_v40 = vshrl.u32 %v17416_v54, 16 }
 0x507   : > { %v17428_v1 = vrot.slane %v9591_v32, 5  ;;  %v18239_v32 = vld [vmem:[#allocation52_spill] sm:$0xff] }
 0x50b   : > { %13023 = vmatmul.mubr.msk.bf16.gmra.mrb[0].mxu1 %vm6641_vm9, %v18218_v21  ;;  %v9560_v21 = vrot.slane %v9558_v13, 4 }
 0x50c   : > { %13026 = vmatprep.mubr.msk.bf16.mxu1 %vm6641_vm9, %v18221_v34  ;;  %v9585_v34 = vshll.u32 %v9512_v3, 16 }
 0x50e   : > { %v9587_v50 = vrot.slane %v9585_v34, 5  ;;  %v9625_v34 = vshll.u32 %v18238_v17, 16 }
 0x513   : > { %13027 = vmatmul.mubr.msk.bf16.gmra.mrb[4].mxu1 %vm6641_vm9, %v18224_v47  ;;  %v17421_v47 = vld [vmem:[#allocation3 + $0x20] sm:$0x1] }
 0x514   : > { %13030 = vmatprep.mubr.msk.bf16.mxu1 %vm6641_vm9, %v18227_v43  ;;  %v9615_v43 = vshll.u32 %v16958_v45, 16  ;;  %v9577_v53 = vshll.u32 %v17421_v47, 16 }
 0x516   : > { %v17432_v45 = vrot.slane %v9615_v43, 5 }
 0x51b   : > { %13031 = vmatmul.mubr.msk.bf16.gmra.mrb[8].mxu1 %vm6641_vm9, %v18230_v20  ;;  %v9564_v20 = vor.u32 %v9563_v19, %v9560_v21  ;;  %v13889_v21 = vld [vmem:[#allocation3 + $0xc0] sm:$0xff]  }
 0x51c   : > { %13034 = vmatprep.mubr.msk.bf16.mxu1 %vm6641_vm9, %v18233_v10  ;;  %v13887_v10 = vld [vmem:[#allocation3 + $0xa8] sm:$0xff]  }
 0x523   : > { %13035 = vmatmul.mubr.msk.bf16.gmra.mrb[12].mxu1 %vm6641_vm9, %v18237_v7  ;;  %v9575_v7 = vrot.slane %v9574_v39, 4  ;;  %v9643_v39 = vshrl.u32 %v18239_v32, 16 }
 0x524   : > { %13040 = vmatprep.mubr.msk.bf16.mxu1 %vm6641_vm9, %v13875_v61  ;;  %v9597_v61 = vrot.slane %v9595_v40, 4  ;;  %v9639_v40 = vshll.u32 %v18239_v32, 16 }
 0x52b   : > { %13041 = vmatmul.mubr.msk.bf16.vlgmr.msra.gmra.mrb[16].mxu1 %vm6641_vm9, %v13876_v62  ;;  %v9621_v62 = vrot.slane %v9619_v42, 4  ;;  %v9667_v42 = vshrl.u32 %v16991_v63, 16 }
 0x52c   : > { %13073 = vmatpush3.bf16.msra.mxu1 %v10039_v8  ;;  %13044 = vmatprep.mubr.msk.bf16.mxu1 %vm6641_vm9, %v13877_v48  ;;  %v9565_v8 = vrot.slane %v9564_v20, 4  ;;  %v9588_v48 = vor.u32 %v9587_v50, %v9584_v14  ;;  %v17453_v20 = vld [vmem:[#allocation3 + $0xd4] sm:$0x1] }
 0x52d   : > { %13802 = vmatprep.subr.msk.bf16.mxu1 %vm6690_vm7, %v17399_v49  ;;  %v9622_v26 = vor.u32 %v9621_v62, %v17432_v45 }
 0x52e   : > { %v9570_v13 = vsel %vm14127_vm13, %v9565_v8, %v9569_v6  ;;  %v17441_v18 = vrot.slane %v9588_v48, 4  ;;  %v9663_v6 = vshll.u32 %v16991_v63, 16  ;;  %v17460_v48 = vrot.slane %v9639_v40, 5  ;;  %v9527_v40 = vld [vmem:[#allocation3 + $0x60] sm:$0xf] }
 0x52f   : > { %v9623_v14 = vrot.slane %v9622_v26, 4 }
 0x533   : > { %13045 = vmatmul.mubr.msk.bf16.gmra.mrb[20].mxu1 %vm6641_vm9, %v13878_v58  ;;  %v9601_v58 = vshll.u32 %v17426_v2, 16  ;;  %v18260_v2 = vld [vmem:[#allocation62_spill] sm:$0xff] }
 0x534   : > { %13048 = vmatprep.mubr.msk.bf16.mxu1 %vm6641_vm9, %v13879_v55  ;;  %v9518_v55 = vld [vmem:[#allocation3 + $0x3c] sm:$0xf] }
 0x535   : > { %v9630_v30 = vshrl.u32 %v9518_v55, 16  ;;  %v9633_v3 = vshll.u32 %v9518_v55, 16  ;;  %v9654_v55 = vshrl.u32 %v9521_v56, 16 }
 0x537   : > { %v9632_v50 = vrot.slane %v9630_v30, 4  ;;  %v9627_v30 = vrot.slane %v9625_v34, 5 }
 0x53b   : > { %13049 = vmatmul.mubr.msk.bf16.gmra.mrb[24].mxu1 %vm6641_vm9, %v13880_v41  ;;  %v9579_v41 = vrot.slane %v9577_v53, 5 }
 0x53c   : > { %13052 = vmatprep.mubr.msk.bf16.mxu1 %vm6641_vm9, %v13881_v11  ;;  %v9598_v11 = vor.u32 %v9597_v61, %v17428_v1  ;;  %v10408_v61 = vrot.slane %v17453_v20, 5 }
 0x53d   : > { %v9580_v29 = vsel %vm14127_vm13, %v9575_v7, %v9579_v41  ;;  %v18240_v7 = vld [vmem:[#allocation55_spill] sm:$0xff] }
 0x53e   : > { %v9599_v19 = vrot.slane %v9598_v11, 4  ;;  %v11991_v44 = vcombine.low %v9570_v13, %v9580_v29  ;;  %v9687_v62 = vshll.u32 %v18240_v7, 16  ;;  %v9691_v8 = vshrl.u32 %v18240_v7, 16  ;;  %v13890_v11 = vld [vmem:[#allocation3 + $0xcc] sm:$0xff]  }
 0x53f   : > { %v9669_v29 = vrot.slane %v9667_v42, 4  ;;  %v9705_v7 = vshll.u32 %v9527_v40, 16 }
 0x540   : > { %v17472_v17 = vrot.slane %v9687_v62, 5  ;;  %v9693_v32 = vrot.slane %v9691_v8, 4 }
 0x543   : > { %13053 = vmatmul.mubr.msk.bf16.gmra.mrb[28].mxu1 %vm6641_vm9, %v13882_v28  ;;  %v9608_v28 = vrot.slane %v9606_v37, 4  ;;  %v9635_v37 = vrot.slane %v9633_v3, 5 }
 0x544   : > { %13056 = vmatprep.mubr.msk.bf16.mxu1 %vm6641_vm9, %v13883_v4  ;;  %v9611_v4 = vrot.slane %v9609_v9, 5  ;;  %v9524_v9 = vld [vmem:[#allocation3 + $0x54] sm:$0xf] }
 0x545   : > { %v9681_v13 = vshll.u32 %v9524_v9, 16 }
 0x546   : > { %v9612_v43 = vor.u32 %v9611_v4, %v9608_v28  ;;  %v9657_v28 = vshll.u32 %v9521_v56, 16  ;;  %v17462_v4 = vrot.slane %v9663_v6, 5  ;;  %v9628_v6 = vsel %vm14127_vm13, %v9623_v14, %v9627_v30  ;;  %v18241_v14 = vld [vmem:[#allocation57_spill] sm:$0xff] }
 0x54b   : > { %13057 = vmatmul.mubr.msk.bf16.gmra.mrb[0].mxu1 %vm6641_vm9, %v13884_v35  ;;  %v13888_v35 = vld [vmem:[#allocation3 + $0xb4] sm:$0xff]  }
 0x54c   : > { %13060 = vmatprep.mubr.msk.bf16.mxu1 %vm6641_vm9, %v13885_v16  ;;  %v17443_v16 = vrot.slane %v9601_v58, 5  ;;  %v9645_v58 = vrot.slane %v9643_v39, 4  ;;  %v9594_v39 = vsel %vm14127_vm13, %v17441_v18, %v17428_v1  ;;  %v9683_v1 = vrot.slane %v9681_v13, 5 }
 0x54d   : > { %v9702_v18 = vshrl.u32 %v9527_v40, 16  ;;  %v10508_v40 = vsel %vm6690_vm7, %v17399_v49, 0 }
 0x54e   : > { %v9604_v34 = vsel %vm14127_vm13, %v9599_v19, %v17443_v16  ;;  %v9646_v42 = vor.u32 %v9645_v58, %v17460_v48  ;;  %v9694_v19 = vor.u32 %v9693_v32, %v17472_v17  ;;  %v9707_v32 = vrot.slane %v9705_v7, 5 }
 0x54f   : > { %v11992_v62 = vcombine.low %v9594_v39, %v9604_v34 }
 0x553   : > { %13061 = vmatmul.mubr.msk.bf16.gmra.mrb[4].mxu1 %vm6641_vm9, %v13886_v12  ;;  %v17451_v12 = vld [vmem:[#allocation3 + $0xd0] sm:$0xf] }
 0x554   : > { %13064 = vmatprep.mubr.msk.bf16.mxu1 %vm6641_vm9, %v13887_v10  ;;  %v10249_v10 = vld [vmem:[#allocation3 + $0xcc] sm:$0xe]  ;;  %v10405_v53 = vrot.slane %v17451_v12, 5 }
 0x555   : > { %v12038_v63 = vrot.slane %v10249_v10, 9  ;;  %v9656_v10 = vrot.slane %v9654_v55, 4  ;;  %v18243_v55 = vld [vmem:[#allocation54_spill] sm:$0xff] }
 0x556   : > { %v10407_v41 = vrot.slane %v10405_v53, 4 }
 0x557   : > { %v17466_v26 = vsel %vm14488_vm8, %v12038_v63, %v10405_v53  ;;  %v9659_v53 = vrot.slane %v9657_v28, 5  ;;  %v18242_v63 = vld [vmem:[#allocation53_spill] sm:$0xff] }
 0x558   : > { %v17470_v3 = vsel %vm14488_vm8, %v10407_v41, %v10408_v61  ;;  %v9670_v61 = vor.u32 %v9669_v29, %v17462_v4  ;;  %v9649_v58 = vshll.u32 %v18242_v63, 16  ;;  %v18244_v29 = vld [vmem:[#allocation56_spill] sm:$0xff] }
 0x559   : > { %v12054_v56 = vcombine.low %v17466_v26, %v17470_v3  ;;  %v9660_v28 = vor.u32 %v9659_v53, %v9656_v10  ;;  %v9697_v30 = vshll.u32 %v18244_v29, 16  ;;  %v18245_v53 = vld [vmem:[#allocation61_spill] sm:$0xff]  ;;  %v13903_v3 = vld [vmem:[%s14067_s11 + $0x60] sm:$0xff]  }
 0x55a   : > { %v9671_v13 = vrot.slane %v9670_v61, 4  ;;  %v9735_v61 = vshll.u32 %v18245_v53, 16  ;;  %v13902_v26 = vld [vmem:[%s14067_s11 + $0x58] sm:$0xff]  }
 0x55b   : > { %13065 = vmatmul.mubr.msk.bf16.gmra.mrb[8].mxu1 %vm6641_vm9, %v13888_v35  ;;  %v9678_v35 = vshrl.u32 %v9524_v9, 16  ;;  %v9699_v49 = vrot.slane %v9697_v30, 5  ;;  %v9661_v7 = vrot.slane %v9660_v28, 4  ;;  %v18247_v30 = vld [vmem:[#allocation64_spill] sm:$0xff] }
 0x55c   : > { %13068 = vmatprep.mubr.msk.bf16.mxu1 %vm6641_vm9, %v13889_v21  ;;  %v9613_v21 = vrot.slane %v9612_v43, 4  ;;  %v9636_v43 = vor.u32 %v9635_v37, %v9632_v50  ;;  %v9711_v50 = vshll.u32 %v18241_v14, 16  ;;  %v9715_v37 = vshrl.u32 %v18241_v14, 16 }
 0x55d   : > { %v9680_v9 = vrot.slane %v9678_v35, 4  ;;  %v9530_v35 = vld [vmem:[#allocation3 + $0x6c] sm:$0xf]  ;;  %v9695_v14 = vrot.slane %v9694_v19, 4  ;;  %v17524_v28 = vrot.slane %v9735_v61, 5 }
 0x55e   : > { %v9618_v16 = vsel %vm14127_vm13, %v9613_v21, %v17432_v45  ;;  %v9637_v41 = vrot.slane %v9636_v43, 4  ;;  %v9704_v21 = vrot.slane %v9702_v18, 4  ;;  %v17500_v39 = vrot.slane %v9711_v50, 5 }
 0x55f   : > { %v11993_v8 = vcombine.low %v9618_v16, %v9628_v6  ;;  %v9684_v45 = vor.u32 %v9683_v1, %v9680_v9  ;;  %v9717_v34 = vrot.slane %v9715_v37, 4  ;;  %v9651_v6 = vrot.slane %v9649_v58, 5  ;;  %v9533_v1 = vld [vmem:[#allocation3 + $0x78] sm:$0xf] }
 0x560   : > { %v9726_v63 = vshrl.u32 %v9530_v35, 16  ;;  %v9729_v43 = vshll.u32 %v9530_v35, 16  ;;  %v9642_v10 = vsel %vm14127_vm13, %v9637_v41, %v17460_v48  ;;  %v9739_v9 = vshrl.u32 %v18245_v53, 16  ;;  %v18246_v58 = vld [vmem:[#allocation60_spill] sm:$0xff] }
 0x561   : > { %v9685_v50 = vrot.slane %v9684_v45, 4  ;;  %v9700_v48 = vsel %vm14127_vm13, %v9695_v14, %v9699_v49  ;;  %v9708_v37 = vor.u32 %v9707_v32, %v9704_v21  ;;  %v9750_v41 = vshrl.u32 %v9533_v1, 16 }
 0x562   : > { %v9741_v29 = vrot.slane %v9739_v9, 4  ;;  %v9759_v35 = vshll.u32 %v18247_v30, 16  ;;  %v9666_v21 = vsel %vm14127_vm13, %v9661_v7, %v17462_v4  ;;  %v9539_v9 = vld [vmem:[#allocation3 + $0x90] sm:$0xf] }
 0x563   : > { %13069 = vmatmul.mubr.msk.bf16.gmra.mrb[12].mxu1 %vm6641_vm9, %v13890_v11  ;;  %v9647_v11 = vrot.slane %v9646_v42, 4  ;;  %v17505_v42 = vld [vmem:[%s17886_s3] sm:$0x3]  ;;  %v9690_v32 = vsel %vm14127_vm13, %v9685_v50, %v17472_v17  ;;  %v9752_v53 = vrot.slane %v9750_v41, 4 }
 0x564   : > { %13074 = vmatprep.mubr.msk.bf16.mxu1 %vm6641_vm9, %v11991_v44  ;;  %v9673_v44 = vshll.u32 %v18243_v55, 16  ;;  %v9721_v55 = vshll.u32 %v18246_v58, 16  ;;  %v11996_v14 = vcombine.low %v9690_v32, %v9700_v48  ;;  %v9742_v4 = vor.u32 %v9741_v29, %v17524_v28 }
 0x565   : > { %v9652_v18 = vsel %vm14127_vm13, %v9647_v11, %v9651_v6  ;;  %v9753_v11 = vshll.u32 %v9533_v1, 16  ;;  %v9761_v1 = vrot.slane %v9759_v35, 5  ;;  %v9807_v58 = vshll.u32 %v17093_v33, 16 }
 0x566   : > { %v9675_v16 = vrot.slane %v9673_v44, 5  ;;  %v9731_v44 = vrot.slane %v9729_v43, 5  ;;  %v11994_v45 = vcombine.low %v9642_v10, %v9652_v18  ;;  %v9723_v6 = vrot.slane %v9721_v55, 5  ;;  %v18248_v43 = vld [vmem:[#allocation66_spill] sm:$0xff] }
 0x567   : > { %v9745_v49 = vshll.u32 %v18248_v43, 16  ;;  %v9755_v61 = vrot.slane %v9753_v11, 5  ;;  %v9811_v55 = vshrl.u32 %v17093_v33, 16 }
 0x568   : > { %v9676_v19 = vsel %vm14127_vm13, %v9671_v13, %v9675_v16  ;;  %v9763_v13 = vshrl.u32 %v18247_v30, 16  ;;  %v9536_v16 = vld [vmem:[#allocation3 + $0x84] sm:$0xf]  ;;  %v9743_v30 = vrot.slane %v9742_v4, 4 }
 0x569   : > { %v9774_v17 = vshrl.u32 %v9536_v16, 16  ;;  %v9777_v7 = vshll.u32 %v9536_v16, 16  ;;  %v9747_v41 = vrot.slane %v9745_v49, 5  ;;  %v9756_v11 = vor.u32 %v9755_v61, %v9752_v53 }
 0x56a   : > { %v9765_v18 = vrot.slane %v9763_v13, 4  ;;  %v18250_v13 = vld [vmem:[#allocation67_spill] sm:$0xff] }
 0x56b   : > { %13075 = vmatmul.mubr.msk.bf16.vlgmr.msra.gmra.mrb[16].mxu1 %vm6641_vm9, %v11992_v62  ;;  %v9718_v62 = vor.u32 %v9717_v34, %v17500_v39  ;;  %v9709_v34 = vrot.slane %v9708_v37, 4  ;;  %v9798_v37 = vshrl.u32 %v9539_v9, 16  ;;  %v9779_v32 = vrot.slane %v9777_v7, 5  ;;  %v18251_v7 = vld [vmem:[#allocation73_spill] sm:$0xff] }
 0x56c   : > { %13107 = vmatpush3.bf16.msra.mxu1 %v10508_v40  ;;  %13078 = vmatprep.mubr.msk.bf16.mxu1 %vm6641_vm9, %v11993_v8  ;;  %v9728_v8 = vrot.slane %v9726_v63, 4  ;;  %v11995_v40 = vcombine.low %v9666_v21, %v9676_v19  ;;  %v18249_v19 = vld [vmem:[#allocation70_spill] sm:$0xff]  ;;  %v9766_v35 = vor.u32 %v9765_v18, %v9761_v1  ;;  %v9776_v21 = vrot.slane %v9774_v17, 4 }
 0x56d   : > { %13803 = vmatprep.subr.msk.bf16.mxu1 %vm1529_vm0, %v17505_v42  ;;  %v9719_v63 = vrot.slane %v9718_v62, 4  ;;  %v9783_v50 = vshll.u32 %v18249_v19, 16  ;;  %v9787_v48 = vshrl.u32 %v18249_v19, 16  ;;  %v9801_v62 = vshll.u32 %v9539_v9, 16 }
 0x56e   : > { %v9732_v10 = vor.u32 %v9731_v44, %v9728_v8  ;;  %v9714_v8 = vsel %vm14127_vm13, %v9709_v34, %v17500_v39  ;;  %v9800_v33 = vrot.slane %v9798_v37, 4  ;;  %v17550_v9 = vrot.slane %v9807_v58, 5  ;;  %v9542_v34 = vld [vmem:[#allocation3 + $0x9c] sm:$0xf] }
 0x56f   : > { %v9724_v44 = vsel %vm14127_vm13, %v9719_v63, %v9723_v6  ;;  %v9789_v16 = vrot.slane %v9787_v48, 4  ;;  %v9803_v43 = vrot.slane %v9801_v62, 5  ;;  %v9813_v39 = vrot.slane %v9811_v55, 4  ;;  %v18252_v62 = vld [vmem:[#allocation77_spill] sm:$0xff] }
 0x570   : > { %v9733_v29 = vrot.slane %v9732_v10, 4  ;;  %v11997_v19 = vcombine.low %v9714_v8, %v9724_v44  ;;  %v9757_v6 = vrot.slane %v9756_v11, 4  ;;  %v9748_v49 = vsel %vm14127_vm13, %v9743_v30, %v9747_v41  ;;  %v9545_v8 = vld [vmem:[#allocation3 + $0xa8] sm:$0xf]  ;;  %v18253_v41 = vld [vmem:[#allocation75_spill] sm:$0xff] }
 0x571   : > { %v9767_v53 = vrot.slane %v9766_v35, 4  ;;  %v9780_v61 = vor.u32 %v9779_v32, %v9776_v21  ;;  %v9822_v4 = vshrl.u32 %v9542_v34, 16  ;;  %v9825_v18 = vshll.u32 %v9542_v34, 16 }
 0x572   : > { %v9738_v63 = vsel %vm14127_vm13, %v9733_v29, %v17524_v28  ;;  %v9804_v48 = vor.u32 %v9803_v43, %v9800_v33  ;;  %v9762_v28 = vsel %vm14127_vm13, %v9757_v6, %v9761_v1  ;;  %v9831_v58 = vshll.u32 %v18252_v62, 16  ;;  %v18254_v29 = vld [vmem:[#allocation78_spill] sm:$0xff] }
 0x573   : > { %13079 = vmatmul.mubr.msk.bf16.gmra.mrb[20].mxu1 %vm6641_vm9, %v11994_v45  ;;  %v9769_v45 = vshll.u32 %v18250_v13, 16  ;;  %v11998_v37 = vcombine.low %v9738_v63, %v9748_v49  ;;  %v9835_v55 = vshrl.u32 %v18252_v62, 16  ;;  %v9817_v11 = vshll.u32 %v18253_v41, 16 }
 0x574   : > { %13082 = vmatprep.mubr.msk.bf16.mxu1 %vm6641_vm9, %v11995_v40  ;;  %v17548_v40 = vrot.slane %v9783_v50, 5  ;;  %v9793_v50 = vshll.u32 %v18251_v7, 16  ;;  %v9855_v30 = vshll.u32 %v18254_v29, 16  ;;  %v9859_v35 = vshrl.u32 %v18254_v29, 16 }
 0x575   : > { %v9771_v17 = vrot.slane %v9769_v45, 5  ;;  %v9781_v13 = vrot.slane %v9780_v61, 4  ;;  %v9824_v21 = vrot.slane %v9822_v4, 4  ;;  %v9827_v32 = vrot.slane %v9825_v18, 5  ;;  %v18255_v18 = vld [vmem:[#allocation80_spill] sm:$0xff] }
 0x576   : > { %v9790_v10 = vor.u32 %v9789_v16, %v17548_v40  ;;  %v9805_v16 = vrot.slane %v9804_v48, 4  ;;  %v9846_v33 = vshrl.u32 %v9545_v8, 16  ;;  %v9849_v43 = vshll.u32 %v9545_v8, 16  ;;  %v9551_v8 = vld [vmem:[#allocation3 + $0xc0] sm:$0xf] }
 0x577   : > { %v9772_v44 = vsel %vm14127_vm13, %v9767_v53, %v9771_v17  ;;  %v9795_v34 = vrot.slane %v9793_v50, 5  ;;  %v9837_v6 = vrot.slane %v9835_v55, 4  ;;  %v9819_v63 = vrot.slane %v9817_v11, 5  ;;  %v9548_v17 = vld [vmem:[#allocation3 + $0xb4] sm:$0xf] }
 0x578   : > { %v9791_v45 = vrot.slane %v9790_v10, 4  ;;  %v17574_v49 = vrot.slane %v9855_v30, 5  ;;  %v9861_v53 = vrot.slane %v9859_v35, 4  ;;  %v9786_v61 = vsel %vm14127_vm13, %v9781_v13, %v17548_v40 }
 0x579   : > { %v9828_v4 = vor.u32 %v9827_v32, %v9824_v21  ;;  %v9841_v7 = vshll.u32 %v18255_v18, 16  ;;  %v9810_v50 = vsel %vm14127_vm13, %v9805_v16, %v17550_v9  ;;  %v9870_v62 = vshrl.u32 %v9548_v17, 16 }
 0x57a   : > { %v9796_v10 = vsel %vm14127_vm13, %v9791_v45, %v9795_v34  ;;  %v9873_v41 = vshll.u32 %v9548_v17, 16  ;;  %v9903_v11 = vshll.u32 %v17171_v23, 16  ;;  %v9865_v21 = vshll.u32 %v17136_v15, 16 }
 0x57b   : > { %13083 = vmatmul.mubr.msk.bf16.gmra.mrb[24].mxu1 %vm6641_vm9, %v11996_v14  ;;  %v9814_v14 = vor.u32 %v9813_v39, %v17550_v9  ;;  %v11999_v39 = vcombine.low %v9762_v28, %v9772_v44  ;;  %v9862_v44 = vor.u32 %v9861_v53, %v17574_v49  ;;  %v9907_v9 = vshrl.u32 %v17171_v23, 16 }
 0x57c   : > { %13086 = vmatprep.mubr.msk.bf16.mxu1 %vm6641_vm9, %v11997_v19  ;;  %v17571_v19 = vrot.slane %v9831_v58, 5  ;;  %v18256_v58 = vld [vmem:[#allocation84_spill] sm:$0xff]  ;;  %v12000_v29 = vcombine.low %v9786_v61, %v9796_v10  ;;  %v9829_v35 = vrot.slane %v9828_v4, 4  ;;  %v9843_v13 = vrot.slane %v9841_v7, 5 }
 0x57d   : > { %v9815_v1 = vrot.slane %v9814_v14, 4  ;;  %v9848_v14 = vrot.slane %v9846_v33, 4  ;;  %v9879_v40 = vshll.u32 %v18256_v58, 16  ;;  %v9883_v55 = vshrl.u32 %v18256_v58, 16  ;;  %v13950_v58 = vld [vmem:[#allocation3 + $0xbc] sm:$0x1] }
 0x57e   : > { %v9838_v28 = vor.u32 %v9837_v6, %v17571_v19  ;;  %v9894_v32 = vshrl.u32 %v9551_v8, 16  ;;  %v9897_v16 = vshll.u32 %v9551_v8, 16  ;;  %v9863_v6 = vrot.slane %v9862_v44, 4 }
 0x57f   : > { %v9820_v48 = vsel %vm14127_vm13, %v9815_v1, %v9819_v63  ;;  %v9554_v1 = vld [vmem:[#allocation3 + $0xcc] sm:$0xf]  ;;  %v9885_v34 = vrot.slane %v9883_v55, 4  ;;  %v9875_v63 = vrot.slane %v9873_v41, 5  ;;  %v9905_v53 = vrot.slane %v9903_v11, 5 }
 0x580   : > { %v12001_v30 = vcombine.low %v9810_v50, %v9820_v48  ;;  %v9839_v33 = vrot.slane %v9838_v28, 4  ;;  %v9909_v23 = vrot.slane %v9907_v9, 4  ;;  %v9918_v17 = vshrl.u32 %v9554_v1, 16 }
 0x581   : > { %v9921_v61 = vshll.u32 %v9554_v1, 16  ;;  %v9927_v10 = vshll.u32 %v17451_v12, 16  ;;  %v9931_v15 = vshrl.u32 %v17451_v12, 16  ;;  %v9867_v18 = vrot.slane %v9865_v21, 5 }
 0x582   : > { %v9896_v7 = vrot.slane %v9894_v32, 4  ;;  %v9899_v50 = vrot.slane %v9897_v16, 5  ;;  %v9834_v48 = vsel %vm14127_vm13, %v9829_v35, %v17571_v19  ;;  %v9910_v55 = vor.u32 %v9909_v23, %v9905_v53 }
 0x583   : > { %13087 = vmatmul.mubr.msk.bf16.gmra.mrb[28].mxu1 %vm6641_vm9, %v11998_v37  ;;  %v9851_v37 = vrot.slane %v9849_v43, 5  ;;  %v9872_v43 = vrot.slane %v9870_v62, 4  ;;  %v9868_v28 = vsel %vm14127_vm13, %v9863_v6, %v9867_v18  ;;  %v9920_v12 = vrot.slane %v9918_v17, 4 }
 0x584   : > { %13090 = vmatprep.mubr.msk.bf16.mxu1 %vm6641_vm9, %v11999_v39  ;;  %v9881_v39 = vrot.slane %v9879_v40, 5  ;;  %v9889_v40 = vshll.u32 %v13950_v58, 16  ;;  %v9923_v8 = vrot.slane %v9921_v61, 5  ;;  %v9929_v44 = vrot.slane %v9927_v10, 5 }
 0x585   : > { %v9852_v45 = vor.u32 %v9851_v37, %v9848_v14  ;;  %v9844_v14 = vsel %vm14127_vm13, %v9839_v33, %v9843_v13  ;;  %v9876_v62 = vor.u32 %v9875_v63, %v9872_v43  ;;  %v9933_v41 = vrot.slane %v9931_v15, 4 }
 0x586   : > { %v9886_v37 = vor.u32 %v9885_v34, %v9881_v39  ;;  %v12002_v11 = vcombine.low %v9834_v48, %v9844_v14  ;;  %v9900_v9 = vor.u32 %v9899_v50, %v9896_v7  ;;  %v9911_v21 = vrot.slane %v9910_v55, 4 }
 0x587   : > { %v9853_v4 = vrot.slane %v9852_v45, 4  ;;  %v9891_v45 = vrot.slane %v9889_v40, 5  ;;  %v9877_v32 = vrot.slane %v9876_v62, 4  ;;  %v9924_v16 = vor.u32 %v9923_v8, %v9920_v12  ;;  %v10235_v40 = vld [vmem:[#allocation3 + $0x24] sm:$0xe] }
 0x588   : > { %v9887_v13 = vrot.slane %v9886_v37, 4  ;;  %v9934_v1 = vor.u32 %v9933_v41, %v9929_v44  ;;  %v9937_v33 = vshll.u32 %v17453_v20, 16  ;;  %v9901_v43 = vrot.slane %v9900_v9, 4  ;;  %v18258_v41 = vld [vmem:[#allocation59_spill] sm:$0xff] }
 0x589   : > { %v9858_v19 = vsel %vm14127_vm13, %v9853_v4, %v17574_v49  ;;  %v10300_v63 = vrot.slane %v17411_v36, 5  ;;  %v9882_v23 = vsel %vm14127_vm13, %v9877_v32, %v9881_v39  ;;  %v9925_v17 = vrot.slane %v9924_v16, 4  ;;  %v10234_v39 = vld [vmem:[#allocation3 + $0x18] sm:$0xe]  ;;  %v18272_v16 = vld [vmem:[#allocation74_spill] sm:$0xff] }
 0x58a   : > { %v12003_v35 = vcombine.low %v9858_v19, %v9868_v28  ;;  %v9892_v49 = vsel %vm14127_vm13, %v9887_v13, %v9891_v45  ;;  %v9935_v61 = vrot.slane %v9934_v1, 4  ;;  %v9939_v10 = vrot.slane %v9937_v33, 5  ;;  %v18261_v19 = vld [vmem:[#allocation65_spill] sm:$0xff]  ;;  %v18269_v45 = vld [vmem:[#allocation72_spill] sm:$0xff]  ;;  %v18273_v1 = vld [vmem:[#allocation79_spill] sm:$0xff] }
 0x58b   : > { %13091 = vmatmul.mubr.msk.bf16.gmra.mrb[0].mxu1 %vm6641_vm9, %v12000_v29  ;;  %v13951_v29 = vld [vmem:[#allocation3 + $0xc8] sm:$0x1]  ;;  %v12004_v15 = vcombine.low %v9882_v23, %v9892_v49  ;;  %v9906_v20 = vsel %vm14127_vm13, %v9901_v43, %v9905_v53  ;;  %v10302_v18 = vrot.slane %v10300_v63, 4  ;;  %v9930_v7 = vsel %vm14127_vm13, %v9925_v17, %v9929_v44  ;;  %v18275_v43 = vld [vmem:[#allocation81_spill] sm:$0xff] }
 0x58c   : > { %13094 = vmatprep.mubr.msk.bf16.mxu1 %vm6641_vm9, %v12001_v30  ;;  %v9913_v30 = vshll.u32 %v13951_v29, 16  ;;  %v9940_v36 = vsel %vm14127_vm13, %v9935_v61, %v9939_v10  ;;  %v10303_v50 = vrot.slane %v17421_v47, 5  ;;  %v10307_v48 = vrot.slane %v17416_v54, 5  ;;  %v18257_v44 = vld [vmem:[#allocation58_spill] sm:$0xff]  ;;  %v18264_v29 = vld [vmem:[#allocation68_spill] sm:$0xff] }
 0x58d   : > { %v12006_v14 = vcombine.low %v9930_v7, %v9940_v36  ;;  %v12023_v37 = vrot.slane %v10234_v39, 9  ;;  %v12024_v47 = vrot.slane %v10235_v40, 9  ;;  %v10911_v8 = vsel %vm1529_vm0, %v17505_v42, 0  ;;  %v18266_v42 = vld [vmem:[#allocation69_spill] sm:$0xff]  ;;  %v13905_v10 = vld [vmem:[%s14067_s11 + $0x70] sm:$0xff]   ;;  %v18285_v7 = vld [vmem:[#allocation35_spill] sm:$0xff] }
 0x58e   : > { %v9915_v34 = vrot.slane %v9913_v30, 5  ;;  %v10304_v53 = vsel %vm14488_vm8, %v10302_v18, %v10303_v50  ;;  %v10309_v58 = vrot.slane %v10307_v48, 4  ;;  %v18262_v9 = vcombine.low %v18260_v2, %v18261_v19  ;;  %v17743_v39 = vld [vmem:[%s17889_s6] ss:$0 sm:$0xff] }
 0x58f   : > { %v10301_v28 = vsel %vm14488_vm8, %v12023_v37, %v10300_v63  ;;  %v10308_v55 = vsel %vm14488_vm8, %v12024_v47, %v10307_v48  ;;  %v18265_v30 = vcombine.low %v18263_v25, %v18264_v29  ;;  %v18274_v33 = vcombine.low %v18272_v16, %v18273_v1  ;;  %v18279_v63 = vld [vmem:[#allocation85_spill] sm:$0xff]  ;;  %v18286_v50 = vld [vmem:[#allocation30_spill] sm:$0xff] }
 0x590   : > { %v9916_v6 = vsel %vm14127_vm13, %v9911_v21, %v9915_v34  ;;  %v12039_v62 = vcombine.low %v10301_v28, %v10304_v53  ;;  %v10311_v54 = vsel %vm14488_vm8, %v10309_v58, %v10310_v27  ;;  %v18270_v21 = vld [vmem:[#allocation76_spill] sm:$0xff]  ;;  %v18276_v34 = vld [vmem:[#allocation82_spill] sm:$0xff]  ;;  %v18281_v17 = vcombine.low %v17167_v5, %v17175_v0 }
 0x591   : > { %v12005_v4 = vcombine.low %v9906_v20, %v9916_v6  ;;  %v12040_v12 = vcombine.low %v10308_v55, %v10311_v54  ;;  %v18271_v32 = vcombine.low %v18269_v45, %v18270_v21  ;;  %v18277_v49 = vcombine.low %v18275_v43, %v18276_v34  ;;  %v18278_v6 = vld [vmem:[#allocation83_spill] sm:$0xff]  ;;  %v13891_v0 = vld [vmem:[%s14067_s11] sm:$0xff]  }
 0x592   : > { %v18280_v23 = vcombine.low %v18278_v6, %v18279_v63  ;;  %v18282_v61 = vcombine.low %v17197_v60, %v17201_v38  ;;  %v18283_v5 = vcombine.low %v17231_v46, %v17235_v57  ;;  %v13893_v60 = vld [vmem:[%s14067_s11 + $0x10] sm:$0xff]   ;;  %v13896_v38 = vld [vmem:[%s14067_s11 + $0x28] sm:$0xff]   ;;  %v17734_v20 = vld [vmem:[%s17888_s5] ss:$0 sm:$0xff] }
 0x593   : > { %13095 = vmatmul.mubr.msk.bf16.gmra.mrb[4].mxu1 %vm6641_vm9, %v12002_v11  ;;  %v18259_v11 = vcombine.low %v18257_v44, %v18258_v41  ;;  %v13900_v46 = vld [vmem:[%s14067_s11 + $0x48] sm:$0xff]   ;;  %v13901_v57 = vld [vmem:[%s14067_s11 + $0x50] sm:$0xff]   ;;  %v13185_v36 = vadd.f32 %v17734_v20, %v18285_v7  ;;  %v13176_v48 = vadd.f32 %v18286_v50, %v17734_v20  ;;  %v18288_v54 = vld [vmem:[#allocation38_spill] sm:$0xff] }
 0x594   : > { %13098 = vmatprep.mubr.msk.bf16.mxu1 %vm6641_vm9, %v12003_v35  ;;  %v18267_v35 = vld [vmem:[#allocation71_spill] sm:$0xff]  ;;  %v13188_v55 = vadd.f32 %v18288_v54, %v17734_v20 }
 0x595   : > { %v18268_v13 = vcombine.low %v18266_v42, %v18267_v35  ;;  %v13186_v47 = vadd.f32 %v13185_v36, %v17743_v39  ;;  %v18289_v41 = vld [vmem:[#allocation39_spill] sm:$0xff]  ;;  %v18291_v42 = vld [vmem:[#allocation41_spill] sm:$0xff] }
 0x596   : > { %v13197_v35 = vadd.f32 %v17734_v20, %v18291_v42  ;;  %v13189_v16 = vadd.f32 %v13188_v55, %v17743_v39  ;;  %v18297_v55 = vld [vmem:[#allocation48_spill] sm:$0xff] }
 0x59b   : > { %13099 = vmatmul.mubr.msk.bf16.gmra.mrb[8].mxu1 %vm6641_vm9, %v12004_v15  ;;  %v13906_v15 = vld [vmem:[%s14067_s11 + $0x78] sm:$0xff]  }
 0x59c   : > { %13102 = vmatprep.mubr.msk.bf16.mxu1 %vm6641_vm9, %v12005_v4  ;;  %v18284_v4 = vld [vmem:[#allocation32_spill] sm:$0xff] }
 0x59d   : > { %v13182_v18 = vadd.f32 %v18284_v4, %v17734_v20 }
 0x59f   : > { %v13183_v58 = vadd.f32 %v13182_v18, %v17743_v39 }
 0x5a3   : > { %13103 = vmatmul.mubr.msk.bf16.gmra.mrb[12].mxu1 %vm6641_vm9, %v12006_v14  ;;  %v18287_v14 = vld [vmem:[#allocation31_spill] sm:$0xff] }
 0x5a4   : > { %13108 = vmatprep.mubr.msk.bf16.mxu1 %vm6641_vm9, %v12039_v62  ;;  %v13179_v37 = vadd.f32 %v17734_v20, %v18287_v14 }
 0x5ab   : > { %13109 = vmatmul.mubr.msk.bf16.vlgmr.msra.gmra.mrb[16].mxu1 %vm6641_vm9, %v12040_v12 }
 0x5ac   : > { %13141 = vmatpush3.bf16.msra.mxu1 %v10911_v8  ;;  %13112 = vmatprep.mubr.msk.bf16.mxu1 %vm6641_vm9, %v18259_v11  ;;  %v13191_v11 = vadd.f32 %v17734_v20, %v18289_v41  ;;  %v18298_v41 = vld [vmem:[#allocation49_spill] sm:$0xff] }
 0x5ae   : > { %v13192_v34 = vadd.f32 %v13191_v11, %v17743_v39  ;;  %v13218_v11 = vadd.f32 %v18298_v41, %v17734_v20 }
 0x5b3   : > { %13113 = vmatmul.mubr.msk.bf16.gmra.mrb[20].mxu1 %vm6641_vm9, %v18262_v9  ;;  %v18290_v9 = vld [vmem:[#allocation40_spill] sm:$0xff] }
 0x5b4   : > { %13116 = vmatprep.mubr.msk.bf16.mxu1 %vm6641_vm9, %v18265_v30  ;;  %v13194_v25 = vadd.f32 %v18290_v9, %v17734_v20  ;;  %v18299_v9 = vld [vmem:[#allocation50_spill] sm:$0xff] }
 0x5b6   : > { %v13195_v63 = vadd.f32 %v13194_v25, %v17743_v39  ;;  %v13221_v25 = vadd.f32 %v17734_v20, %v18299_v9 }
 0x5bb   : > { %13117 = vmatmul.mubr.msk.bf16.gmra.mrb[24].mxu1 %vm6641_vm9, %v18268_v13 }
 0x5bc   : > { %13120 = vmatprep.mubr.msk.bf16.mxu1 %vm6641_vm9, %v18271_v32 }
 0x5c3   : > { %13121 = vmatmul.mubr.msk.bf16.gmra.mrb[28].mxu1 %vm6641_vm9, %v18274_v33 }
 0x5c4   : > { %13124 = vmatprep.mubr.msk.bf16.mxu1 %vm6641_vm9, %v18277_v49 }
 0x5cb   : > { %13125 = vmatmul.mubr.msk.bf16.gmra.mrb[0].mxu1 %vm6641_vm9, %v18280_v23 }
 0x5cc   : > { %13128 = vmatprep.mubr.msk.bf16.mxu1 %vm6641_vm9, %v18281_v17 }
 0x5d3   : > { %13129 = vmatmul.mubr.msk.bf16.gmra.mrb[4].mxu1 %vm6641_vm9, %v12050_v22  ;;  %v13895_v22 = vld [vmem:[%s14067_s11 + $0x20] sm:$0xff]  }
 0x5d4   : > { %13132 = vmatprep.mubr.msk.bf16.mxu1 %vm6641_vm9, %v18282_v61  ;;  %v13198_v61 = vadd.f32 %v13197_v35, %v17743_v39 }
 0x5db   : > { %13133 = vmatmul.mubr.msk.bf16.gmra.mrb[8].mxu1 %vm6641_vm9, %v12052_v51  ;;  %v13899_v51 = vld [vmem:[%s14067_s11 + $0x40] sm:$0xff]  }
 0x5dc   : > { %13136 = vmatprep.mubr.msk.bf16.mxu1 %vm6641_vm9, %v18283_v5  ;;  %v18292_v5 = vld [vmem:[#allocation43_spill] sm:$0xff] }
 0x5e3   : > { %13137 = vmatmul.mubr.msk.bf16.gmra.mrb[12].mxu1 %vm6641_vm9, %v12054_v56  ;;  %v13904_v56 = vld [vmem:[%s14067_s11 + $0x68] sm:$0xff]  }
 0x5e4   : > { %13142 = vmatprep.mubr.msk.bf16.mxu1 %vm1480_vm14, %v13891_v0  ;;  %v13200_v0 = vadd.f32 %v18292_v5, %v17734_v20 }
 0x5e6   : > { %v13201_v18 = vadd.f32 %v13200_v0, %v17743_v39  ;;  %v17822_v0 = vadd.f32 %v17743_v39, %v17734_v20 }
 0x5eb   : > { %13143 = vmatmul.mubr.msk.bf16.vlgmr.msra.gmra.mrb[16].mxu1 %vm1480_vm14, %v13892_v52 }
 0x5ec   : > { %13146 = vmatprep.mubr.msk.bf16.mxu1 %vm1480_vm14, %v13893_v60 }
 0x5f3   : > { %13147 = vmatmul.mubr.msk.bf16.gmra.mrb[20].mxu1 %vm1480_vm14, %v13894_v24 }
 0x5f4   : > { %13150 = vmatprep.mubr.msk.bf16.mxu1 %vm1480_vm14, %v13895_v22  ;;  %v18293_v22 = vld [vmem:[#allocation44_spill] sm:$0xff] }
 0x5fb   : > { %13151 = vmatmul.mubr.msk.bf16.gmra.mrb[24].mxu1 %vm1480_vm14, %v13896_v38  ;;  %v13203_v38 = vadd.f32 %v17734_v20, %v18293_v22 }
 0x5fc   : > { %13154 = vmatprep.mubr.msk.bf16.mxu1 %vm1480_vm14, %v13897_v59 }
 0x5fd   : > { %v13204_v50 = vadd.f32 %v13203_v38, %v17743_v39 }
 0x603   : > { %13155 = vmatmul.mubr.msk.bf16.gmra.mrb[28].mxu1 %vm1480_vm14, %v13898_v31 }
 0x604   : > { %13158 = vmatprep.mubr.msk.bf16.mxu1 %vm1480_vm14, %v13899_v51  ;;  %v18294_v51 = vld [vmem:[#allocation45_spill] sm:$0xff] }
 0x60b   : > { %13159 = vmatmul.mubr.msk.bf16.gmra.mrb[0].mxu1 %vm1480_vm14, %v13900_v46  ;;  %v13206_v46 = vadd.f32 %v18294_v51, %v17734_v20 }
 0x60c   : > { %13162 = vmatprep.mubr.msk.bf16.mxu1 %vm1480_vm14, %v13901_v57 }
 0x613   : > { %13163 = vmatmul.mubr.msk.bf16.gmra.mrb[4].mxu1 %vm1480_vm14, %v13902_v26 }
 0x614   : > { %13166 = vmatprep.mubr.msk.bf16.mxu1 %vm1480_vm14, %v13903_v3  ;;  %v18295_v3 = vld [vmem:[#allocation46_spill] sm:$0xff] }
 0x61b   : > { %13167 = vmatmul.mubr.msk.bf16.gmra.mrb[8].mxu1 %vm1480_vm14, %v13904_v56  ;;  %v13209_v56 = vadd.f32 %v17734_v20, %v18295_v3 }
 0x61c   : > { %13170 = vmatprep.mubr.msk.bf16.mxu1 %vm1480_vm14, %v13905_v10 }
 0x623   : > { %13171 = vmatmul.mubr.msk.bf16.gmra.mrb[12].mxu1 %vm1480_vm14, %v13906_v15 }
 0x6be   : > { %v13144_v53 = vpop.f32.mrb[16].mxu1 }
 0x6bf   : > { %v13177_v28 = vadd.f32 %v13176_v48, %v13144_v53  ;;  %v10947_v62 = vpop.f32.mrb[17].mxu1 }
 0x6c0   : > { %v13180_v40 = vadd.f32 %v13179_v37, %v10947_v62  ;;  %v13145_v27 = vpop.f32.mrb[18].mxu1  ;;  %v13207_v37 = vadd.f32 %v13206_v46, %v17743_v39  ;;  %v13210_v62 = vadd.f32 %v13209_v56, %v17743_v39 }
 0x6c1   : > { %v13178_v12 = vadd.f32 %v13177_v28, %v17743_v39  ;;  %v13184_v8 = vadd.f32 %v13183_v58, %v13145_v27  ;;  %v10950_v44 = vpop.f32.mrb[19].mxu1  ;;  %v18296_v58 = vld [vmem:[#allocation47_spill] sm:$0xff] }
 0x6c2   : > { %v13181_v2 = vadd.f32 %v13180_v40, %v17743_v39  ;;  %v13187_v19 = vadd.f32 %v13186_v47, %v10950_v44  ;;  %v13212_v40 = vadd.f32 %v18296_v58, %v17734_v20 }
 0x6c3   : > { %v11108_v29 = vmax.f32 %v13178_v12, 0.0  ;;  %v11109_v30 = vmax.f32 %v13184_v8, 0.0  ;;  %v13215_v12 = vadd.f32 %v17734_v20, %v18297_v55 }
 0x6c4   : > { %v11106_v13 = vmax.f32 %v13181_v2, 0.0  ;;  %v11107_v45 = vmax.f32 %v13187_v19, 0.0  ;;  %v13213_v35 = vadd.f32 %v13212_v40, %v17743_v39 }
 0x6c5   : > { %v12175_v21 = vpack.c.bf16 %v11108_v29, %v11108_v29  ;;  %v12176_v32 = vpack.c.bf16 %v11109_v30, %v11109_v30 }
 0x6c6   : > { %v12173_v1 = vpack.c.bf16 %v11106_v13, %v11106_v13  ;;  %v12174_v33 = vpack.c.bf16 %v11107_v45, %v11107_v45  ;;  %v13148_v43 = vpop.f32.mrb[20].mxu1 }
 0x6c7   : > { %11268 = vst.msk [vmem:[%s17766_s19 + $0x8] sm:$0xf] %vm402_vm6, %v12175_v21  ;;  %11269 = vst.msk [vmem:[%s17766_s19 + $0xc] sm:$0xf] %vm402_vm6, %v12176_v32  ;;  %v13190_v49 = vadd.f32 %v13189_v16, %v13148_v43  ;;  %v10963_v6 = vpop.f32.mrb[21].mxu1  ;;  %v13216_v21 = vadd.f32 %v13215_v12, %v17743_v39 }
 0x6c8   : > { %11266 = vst.msk [vmem:[%s17766_s19] sm:$0xf] %vm402_vm6, %v12173_v1  ;;  %11267 = vst.msk [vmem:[%s17766_s19 + $0x4] sm:$0xf] %vm402_vm6, %v12174_v33  ;;  %v13193_v23 = vadd.f32 %v13192_v34, %v10963_v6  ;;  %v13149_v17 = vpop.f32.mrb[22].mxu1  ;;  %v13219_v1 = vadd.f32 %v13218_v11, %v17743_v39  ;;  %v13222_v34 = vadd.f32 %v13221_v25, %v17743_v39 }
 0x6c9   : > { %v11112_v52 = vmax.f32 %v13190_v49, 0.0  ;;  %v13196_v60 = vadd.f32 %v13195_v63, %v13149_v17  ;;  %v10966_v24 = vpop.f32.mrb[23].mxu1 }
 0x6ca   : > { %v11110_v59 = vmax.f32 %v13193_v23, 0.0  ;;  %v13199_v31 = vadd.f32 %v13198_v61, %v10966_v24 }
 0x6cb   : > { %v12179_v57 = vpack.c.bf16 %v11112_v52, %v11112_v52  ;;  %v11113_v26 = vmax.f32 %v13196_v60, 0.0 }
 0x6cc   : > { %v12177_v10 = vpack.c.bf16 %v11110_v59, %v11110_v59  ;;  %v11111_v15 = vmax.f32 %v13199_v31, 0.0 }
 0x6cd   : > { %11272 = vst.msk [vmem:[%s17766_s19 + $0x18] sm:$0xf] %vm402_vm6, %v12179_v57  ;;  %v12180_v4 = vpack.c.bf16 %v11113_v26, %v11113_v26 }
 0x6ce   : > { %11270 = vst.msk [vmem:[%s17766_s19 + $0x10] sm:$0xf] %vm402_vm6, %v12177_v10  ;;  %v12178_v7 = vpack.c.bf16 %v11111_v15, %v11111_v15  ;;  %v13152_v36 = vpop.f32.mrb[24].mxu1 }
 0x6cf   : > { %11273 = vst.msk [vmem:[%s17766_s19 + $0x1c] sm:$0xf] %vm402_vm6, %v12180_v4  ;;  %v13202_v48 = vadd.f32 %v13201_v18, %v13152_v36  ;;  %v10979_v14 = vpop.f32.mrb[25].mxu1 }
 0x6d0   : > { %11271 = vst.msk [vmem:[%s17766_s19 + $0x14] sm:$0xf] %vm402_vm6, %v12178_v7  ;;  %v13205_v53 = vadd.f32 %v13204_v50, %v10979_v14  ;;  %v13153_v28 = vpop.f32.mrb[26].mxu1 }
 0x6d1   : > { %v11116_v27 = vmax.f32 %v13202_v48, 0.0  ;;  %v13208_v47 = vadd.f32 %v13207_v37, %v13153_v28  ;;  %v10982_v54 = vpop.f32.mrb[27].mxu1 }
 0x6d2   : > { %v11114_v8 = vmax.f32 %v13205_v53, 0.0  ;;  %v13211_v44 = vadd.f32 %v13210_v62, %v10982_v54 }
 0x6d3   : > { %v12183_v2 = vpack.c.bf16 %v11116_v27, %v11116_v27  ;;  %v11117_v19 = vmax.f32 %v13208_v47, 0.0 }
 0x6d4   : > { %v12181_v29 = vpack.c.bf16 %v11114_v8, %v11114_v8  ;;  %v11115_v30 = vmax.f32 %v13211_v44, 0.0 }
 0x6d5   : > { %11276 = vst.msk [vmem:[%s17766_s19 + $0x28] sm:$0xf] %vm402_vm6, %v12183_v2  ;;  %v12184_v42 = vpack.c.bf16 %v11117_v19, %v11117_v19 }
 0x6d6   : > { %11274 = vst.msk [vmem:[%s17766_s19 + $0x20] sm:$0xf] %vm402_vm6, %v12181_v29  ;;  %v12182_v13 = vpack.c.bf16 %v11115_v30, %v11115_v30  ;;  %v13156_v45 = vpop.f32.mrb[28].mxu1 }
 0x6d7   : > { %11277 = vst.msk [vmem:[%s17766_s19 + $0x2c] sm:$0xf] %vm402_vm6, %v12184_v42  ;;  %v13214_v32 = vadd.f32 %v13213_v35, %v13156_v45  ;;  %v10995_v16 = vpop.f32.mrb[29].mxu1 }
 0x6d8   : > { %11275 = vst.msk [vmem:[%s17766_s19 + $0x24] sm:$0xf] %vm402_vm6, %v12182_v13  ;;  %v13217_v33 = vadd.f32 %v13216_v21, %v10995_v16  ;;  %v13157_v43 = vpop.f32.mrb[30].mxu1 }
 0x6d9   : > { %v11120_v49 = vmax.f32 %v13214_v32, 0.0  ;;  %v13220_v6 = vadd.f32 %v13219_v1, %v13157_v43  ;;  %v10998_v63 = vpop.f32.mrb[31].mxu1 }
 0x6da   : > { %v11118_v23 = vmax.f32 %v13217_v33, 0.0  ;;  %v13223_v17 = vadd.f32 %v13222_v34, %v10998_v63 }
 0x6db   : > { %v12187_v61 = vpack.c.bf16 %v11120_v49, %v11120_v49  ;;  %v11121_v5 = vmax.f32 %v13220_v6, 0.0 }
 0x6dc   : > { %v12185_v52 = vpack.c.bf16 %v11118_v23, %v11118_v23  ;;  %v11119_v60 = vmax.f32 %v13223_v17, 0.0 }
 0x6dd   : > { %11280 = vst.msk [vmem:[%s17766_s19 + $0x38] sm:$0xf] %vm402_vm6, %v12187_v61  ;;  %v12188_v24 = vpack.c.bf16 %v11121_v5, %v11121_v5 }
 0x6de   : > { %11278 = vst.msk [vmem:[%s17766_s19 + $0x30] sm:$0xf] %vm402_vm6, %v12185_v52  ;;  %v12186_v22 = vpack.c.bf16 %v11119_v60, %v11119_v60  ;;  %v13160_v38 = vpop.f32.mrb[0].mxu1 }
 0x6df   : > { %11281 = vst.msk [vmem:[%s17766_s19 + $0x3c] sm:$0xf] %vm402_vm6, %v12188_v24  ;;  %v13225_v59 = vadd.f32 %v17822_v0, %v13160_v38  ;;  %v11011_v31 = vpop.f32.mrb[1].mxu1 }
 0x6e0   : > { %11279 = vst.msk [vmem:[%s17766_s19 + $0x34] sm:$0xf] %vm402_vm6, %v12186_v22  ;;  %v13227_v20 = vadd.f32 %v17822_v0, %v11011_v31  ;;  %v13161_v39 = vpop.f32.mrb[2].mxu1 }
 0x6e1   : > { %v11124_v51 = vmax.f32 %v13225_v59, 0.0  ;;  %v13229_v46 = vadd.f32 %v17822_v0, %v13161_v39  ;;  %v11014_v57 = vpop.f32.mrb[3].mxu1 }
 0x6e2   : > { %v11122_v26 = vmax.f32 %v13227_v20, 0.0  ;;  %v13231_v3 = vadd.f32 %v17822_v0, %v11014_v57 }
 0x6e3   : > { %v12191_v56 = vpack.c.bf16 %v11124_v51, %v11124_v51  ;;  %v11125_v10 = vmax.f32 %v13229_v46, 0.0 }
 0x6e4   : > { %v12189_v15 = vpack.c.bf16 %v11122_v26, %v11122_v26  ;;  %v11123_v4 = vmax.f32 %v13231_v3, 0.0 }
 0x6e5   : > { %11284 = vst.msk [vmem:[%s17766_s19 + $0x48] sm:$0xf] %vm402_vm6, %v12191_v56  ;;  %v12192_v18 = vpack.c.bf16 %v11125_v10, %v11125_v10 }
 0x6e6   : > { %11282 = vst.msk [vmem:[%s17766_s19 + $0x40] sm:$0xf] %vm402_vm6, %v12189_v15  ;;  %v12190_v7 = vpack.c.bf16 %v11123_v4, %v11123_v4  ;;  %v13164_v36 = vpop.f32.mrb[4].mxu1 }
 0x6e7   : > { %11285 = vst.msk [vmem:[%s17766_s19 + $0x4c] sm:$0xf] %vm402_vm6, %v12192_v18  ;;  %v13233_v50 = vadd.f32 %v17822_v0, %v13164_v36  ;;  %v11027_v48 = vpop.f32.mrb[5].mxu1 }
 0x6e8   : > { %11283 = vst.msk [vmem:[%s17766_s19 + $0x44] sm:$0xf] %vm402_vm6, %v12190_v7  ;;  %v13235_v14 = vadd.f32 %v17822_v0, %v11027_v48  ;;  %v13165_v37 = vpop.f32.mrb[6].mxu1 }
 0x6e9   : > { %v11128_v53 = vmax.f32 %v13233_v50, 0.0  ;;  %v13237_v28 = vadd.f32 %v17822_v0, %v13165_v37  ;;  %v11030_v62 = vpop.f32.mrb[7].mxu1 }
 0x6ea   : > { %v11126_v58 = vmax.f32 %v13235_v14, 0.0  ;;  %v13239_v40 = vadd.f32 %v17822_v0, %v11030_v62 }
 0x6eb   : > { %v12195_v27 = vpack.c.bf16 %v11128_v53, %v11128_v53  ;;  %v11129_v47 = vmax.f32 %v13237_v28, 0.0 }
 0x6ec   : > { %v12193_v54 = vpack.c.bf16 %v11126_v58, %v11126_v58  ;;  %v11127_v55 = vmax.f32 %v13239_v40, 0.0 }
 0x6ed   : > { %11288 = vst.msk [vmem:[%s17766_s19 + $0x58] sm:$0xf] %vm402_vm6, %v12195_v27  ;;  %v12196_v12 = vpack.c.bf16 %v11129_v47, %v11129_v47 }
 0x6ee   : > { %11286 = vst.msk [vmem:[%s17766_s19 + $0x50] sm:$0xf] %vm402_vm6, %v12193_v54  ;;  %v12194_v8 = vpack.c.bf16 %v11127_v55, %v11127_v55  ;;  %v13168_v44 = vpop.f32.mrb[8].mxu1 }
 0x6ef   : > { %11289 = vst.msk [vmem:[%s17766_s19 + $0x5c] sm:$0xf] %vm402_vm6, %v12196_v12  ;;  %v13241_v41 = vadd.f32 %v17822_v0, %v13168_v44  ;;  %v11043_v11 = vpop.f32.mrb[9].mxu1 }
 0x6f0   : > { %11287 = vst.msk [vmem:[%s17766_s19 + $0x54] sm:$0xf] %vm402_vm6, %v12194_v8  ;;  %v13243_v2 = vadd.f32 %v17822_v0, %v11043_v11  ;;  %v13169_v19 = vpop.f32.mrb[10].mxu1 }
 0x6f1   : > { %v11132_v9 = vmax.f32 %v13241_v41, 0.0  ;;  %v13245_v25 = vadd.f32 %v17822_v0, %v13169_v19  ;;  %v11046_v29 = vpop.f32.mrb[11].mxu1 }
 0x6f2   : > { %v11130_v30 = vmax.f32 %v13243_v2, 0.0  ;;  %v13247_v42 = vadd.f32 %v17822_v0, %v11046_v29 }
 0x6f3   : > { %v12199_v35 = vpack.c.bf16 %v11132_v9, %v11132_v9  ;;  %v11133_v13 = vmax.f32 %v13245_v25, 0.0 }
 0x6f4   : > { %v12197_v45 = vpack.c.bf16 %v11130_v30, %v11130_v30  ;;  %v11131_v21 = vmax.f32 %v13247_v42, 0.0 }
 0x6f5   : > { %11292 = vst.msk [vmem:[%s17766_s19 + $0x68] sm:$0xf] %vm402_vm6, %v12199_v35  ;;  %v12200_v32 = vpack.c.bf16 %v11133_v13, %v11133_v13 }
 0x6f6   : > { %11290 = vst.msk [vmem:[%s17766_s19 + $0x60] sm:$0xf] %vm402_vm6, %v12197_v45  ;;  %v12198_v16 = vpack.c.bf16 %v11131_v21, %v11131_v21  ;;  %v13172_v1 = vpop.f32.mrb[12].mxu1 }
 0x6f7   : > { %11293 = vst.msk [vmem:[%s17766_s19 + $0x6c] sm:$0xf] %vm402_vm6, %v12200_v32  ;;  %v13249_v33 = vadd.f32 %v17822_v0, %v13172_v1  ;;  %v11059_v43 = vpop.f32.mrb[13].mxu1 }
 0x6f8   : > { %11291 = vst.msk [vmem:[%s17766_s19 + $0x64] sm:$0xf] %vm402_vm6, %v12198_v16  ;;  %v13251_v34 = vadd.f32 %v17822_v0, %v11059_v43  ;;  %v13173_v49 = vpop.f32.mrb[14].mxu1 }
 0x6f9   : > { %v11136_v6 = vmax.f32 %v13249_v33, 0.0  ;;  %v13253_v63 = vadd.f32 %v17822_v0, %v13173_v49  ;;  %v11062_v23 = vpop.f32.mrb[15].mxu1 }
 0x6fa   : > { %v11134_v17 = vmax.f32 %v13251_v34, 0.0  ;;  %v13255_v61 = vadd.f32 %v17822_v0, %v11062_v23 }
 0x6fb   : > { %v12203_v5 = vpack.c.bf16 %v11136_v6, %v11136_v6  ;;  %v11137_v52 = vmax.f32 %v13253_v63, 0.0 }
 0x6fc   : > { %v12201_v60 = vpack.c.bf16 %v11134_v17, %v11134_v17  ;;  %v11135_v24 = vmax.f32 %v13255_v61, 0.0 }
 0x6fd   : > { %11296 = vst.msk [vmem:[%s17766_s19 + $0x78] sm:$0xf] %vm402_vm6, %v12203_v5  ;;  %v12204_v22 = vpack.c.bf16 %v11137_v52, %v11137_v52 }
 0x6fe   : > { %11294 = vst.msk [vmem:[%s17766_s19 + $0x70] sm:$0xf] %vm402_vm6, %v12201_v60  ;;  %v12202_v38 = vpack.c.bf16 %v11135_v24, %v11135_v24 }
 0x6ff   : > { %11297 = vst.msk [vmem:[%s17766_s19 + $0x7c] sm:$0xf] %vm402_vm6, %v12204_v22 }
 0x700   : > { %11295 = vst.msk [vmem:[%s17766_s19 + $0x74] sm:$0xf] %vm402_vm6, %v12202_v38 }
 0x701 PF: > { %s17_s24 = sadd.s32 1, %s13958_s24  }
 0x702   : > { %p14_p4 = scmp.ge.s32.totalorder %s17_s24, 4  }
 0x704   :  { %16 = sbr.rel (!%p14_p4) target bundleno = 1 (0x1), region = 84 }

</bundles_post_ra>
